<compile_context>
chip_gen: v5e
topology: v5e:2x2
jax: 0.10.0
libtpu: 0.0.40
codegen_flags: <defaults>
</compile_context>

<pallas_src>
import jax
import jax.numpy as jnp
from jax.experimental import pallas as pl
from jax.experimental.pallas import tpu as pltpu

EPS = 1e-5
EXPANSION = 1                    # BasicBlock.expansion
MXU_DTYPE = jnp.bfloat16         # MXU operand dtype (f32 accumulation)
ACT_DTYPE = jnp.bfloat16         # inter-kernel activation storage dtype
_VMEM_LIMIT = 32 * 1024 * 1024   # scoped-VMEM limit passed to every call
_TILE_VMEM_BUDGET = 12 * 1024 * 1024   # per-call tile working-set budget


def _pick_row_tile(rows, bytes_per_row=1):
    """Largest row tile (power-of-two ladder) dividing `rows` whose
    double-buffered working set fits the VMEM budget.  No artificial >=2-step
    minimum: on single-TC v5e/v6e the biggest resident tile wins, and the
    stats-carrying axes must stay 'arbitrary' regardless."""
    fallback = rows
    for t in (4096, 2048, 1024, 512, 256, 128, 64, 32, 16, 8):
        if rows % t == 0:
            fallback = t
            if t * bytes_per_row <= _TILE_VMEM_BUDGET:
                return t
    return fallback


def _lane_dense_ok(m, c):
    return (c <= 128) and (128 % c == 0) and ((m * c) % 128 == 0)


# --------------------------------------------------------------------------
# Pallas kernels
# --------------------------------------------------------------------------

def _mm_stats_body(a, w_ref, o_ref, sum_ref, sq_ref, shf_ref):
    """MXU matmul + shifted per-channel sum / sum-of-squares of the product.

    Grid = (branch 'parallel', row-tile 'arbitrary').  The stats outputs map
    to a fixed block along the row axis, so they stay resident and accumulate.
    The shift (first tile's column means) makes the downstream variance
    E[(y-shift)^2] - E[y-shift]^2 well conditioned."""
    y = jnp.dot(a, w_ref[...], preferred_element_type=jnp.float32)
    o_ref[...] = y.astype(o_ref.dtype)
    # NOTE: for real ResNet channel counts (C >= 128) this store is already
    # lane-dense; for the toy C < 128 it is a masked vst.msk on a small tile.
    # TODO(synk): repack (tm, C) -> (tm*C/128, 128) in-kernel for small C.

    @pl.when(pl.program_id(1) == 0)
    def _():
        shf_ref[...] = jnp.sum(y, axis=0, keepdims=True) * (1.0 / y.shape[0])
        sum_ref[...] = jnp.zeros_like(sum_ref)
        sq_ref[...] = jnp.zeros_like(sq_ref)

    d = y - shf_ref[...]
    # TODO(synk): defer the cross-sublane collapse to the last grid step via an
    #             (8, C) VPU-accumulated scratch if the XLU ever binds here.
    sum_ref[...] += jnp.sum(d, axis=0, keepdims=True)
    sq_ref[...] += jnp.sum(d * d, axis=0, keepdims=True)


def _make_mm_stats_kernel(with_prologue):
    """Conv-as-matmul kernel factory.  With `with_prologue`, a per-K-column
    affine + ReLU (the previous layer's BN1+ReLU, tiled 9x along K) is applied
    to the activation tile before the dot — pure VPU filler under the MXU."""
    if with_prologue:
        def kernel(a_ref, p_ref, w_ref, o_ref, sum_ref, sq_ref, shf_ref):
            p = p_ref[...]                                   # (2, K) f32
            a = a_ref[...].astype(jnp.float32)
            a = jnp.maximum(a * p[0:1] + p[1:2], 0.0)        # fused BN1+ReLU
            _mm_stats_body(a.astype(MXU_DTYPE), w_ref, o_ref,
                           sum_ref, sq_ref, shf_ref)
    else:
        def kernel(a_ref, w_ref, o_ref, sum_ref, sq_ref, shf_ref):
            _mm_stats_body(a_ref[...], w_ref, o_ref, sum_ref, sq_ref, shf_ref)
    return kernel


def _affine2_stats_kernel(x1_ref, x2_ref, p_ref, o_ref, sum_ref, sq_ref):
    """y = x1*s1+b1 + x2*s2+b2 (fused BN2(conv2)+shortcut), ReLU where flag>0,
    plus shifted per-lane sum / sum-of-squares of the FINAL value (these feed
    the out_bn1/2/3 combine, so no re-read of the slab is needed).
    Lane-dense tiles.  p rows: [s1, b1, s2, b2, flag, shift]."""
    p = p_ref[...]
    y = (x1_ref[...].astype(jnp.float32) * p[0:1] + p[1:2]
         + x2_ref[...].astype(jnp.float32) * p[2:3] + p[3:4])
    y = jnp.where(p[4:5] > 0.0, jnp.maximum(y, 0.0), y)
    o_ref[...] = y.astype(o_ref.dtype)

    @pl.when(pl.program_id(1) == 0)
    def _():
        sum_ref[...] = jnp.zeros_like(sum_ref)
        sq_ref[...] = jnp.zeros_like(sq_ref)

    d = y - p[5:6]                 # same shift for every lane group of a chan
    sum_ref[...] += jnp.sum(d, axis=0, keepdims=True)
    sq_ref[...] += jnp.sum(d * d, axis=0, keepdims=True)


def _combine3_kernel(x1_ref, x2_ref, x3_ref, p_ref, o_ref):
    """out = x1*s1+b1 + x2*s2+b2 + x3*s3+b3.  Lane-dense.  p rows: [s,b]x3."""
    p = p_ref[...]
    o_ref[...] = (x1_ref[...].astype(jnp.float32) * p[0:1] + p[1:2]
                  + x2_ref[...].astype(jnp.float32) * p[2:3] + p[3:4]
                  + x3_ref[...].astype(jnp.float32) * p[4:5] + p[5:6])


# --------------------------------------------------------------------------
# Pallas wrappers
# --------------------------------------------------------------------------

def conv_matmul_stats(a, w, prologue=None):
    """Batched (B,M,K)@(B,K,C) conv-as-matmul with fused shifted per-channel
    stats of the product.  `prologue=(scale,bias)` (each (B,K)) applies
    ReLU(a*scale+bias) to the activation before the dot (fused BN1+ReLU).
    Returns (conv (B,M,C) bf16, sum (B,C), sumsq (B,C), shift (B,C))."""
    B, M, K = a.shape
    C = w.shape[-1]
    tm = _pick_row_tile(M, bytes_per_row=4 * (K + C) + 4 * C)

    kernel = _make_mm_stats_kernel(prologue is not None)
    in_specs = [pl.BlockSpec((None, tm, K), lambda b, i: (b, i, 0))]
    args = [a if a.dtype == MXU_DTYPE else a.astype(MXU_DTYPE)]
    if prologue is not None:
        in_specs.append(pl.BlockSpec((None, 2, K), lambda b, i: (b, 0, 0)))
        args.append(jnp.stack(prologue, axis=1).astype(jnp.float32))
    in_specs.append(pl.BlockSpec((None, K, C), lambda b, i: (b, 0, 0)))
    args.append(w.astype(MXU_DTYPE))

    stat_spec = pl.BlockSpec((None, 1, C), lambda b, i: (b, 0, 0))
    conv, s, q, sh = pl.pallas_call(
        kernel,
        out_shape=(jax.ShapeDtypeStruct((B, M, C), ACT_DTYPE),
                   jax.ShapeDtypeStruct((B, 1, C), jnp.float32),
                   jax.ShapeDtypeStruct((B, 1, C), jnp.float32),
                   jax.ShapeDtypeStruct((B, 1, C), jnp.float32)),
        grid=(B, M // tm),
        in_specs=in_specs,
        out_specs=(pl.BlockSpec((None, tm, C), lambda b, i: (b, i, 0)),
                   stat_spec, stat_spec, stat_spec),
        compiler_params=pltpu.CompilerParams(
            dimension_semantics=("parallel", "arbitrary"),
            vmem_limit_bytes=_VMEM_LIMIT),
    )(*args)
    return conv, s[:, 0], q[:, 0], sh[:, 0]


def _dense3(x):
    """(B, M, C) -> lane-dense (B, R, 128) view (free row-major reshape)."""
    B, M, C = x.shape
    if _lane_dense_ok(M, C):
        return x.reshape(B, (M * C) // 128, 128), 128
    return x, C


def _dense2(x):
    M, C = x.shape
    if _lane_dense_ok(M, C):
        return x.reshape((M * C) // 128, 128), 128
    return x, C


def _pack_rows3(rows, C, L):
    """rows: list of (B, C) -> (B, k, L) lane-replicated parameter block."""
    p = jnp.stack(rows, axis=1).astype(jnp.float32)
    if L != C:
        p = jnp.tile(p, (1, 1, L // C))
    return p


def _pack_rows2(rows, C, L):
    p = jnp.stack(rows, axis=0).astype(jnp.float32)
    if L != C:
        p = jnp.tile(p, (1, L // C))
    return p


def affine2_stats(x1, x2, s1, b1, s2, b2, relu_flag, shift):
    """(B,M,C): y = x1*s1+b1 + x2*s2+b2, optional ReLU, with fused shifted
    per-channel stats of y.  Returns (y (B,M,C) bf16, sum (B,C), sumsq (B,C))."""
    B, M, C = x1.shape
    x1d, L = _dense3(x1)
    x2d, _ = _dense3(x2)
    R = x1d.shape[1]
    tr = _pick_row_tile(R, bytes_per_row=16 * L)
    params = _pack_rows3(
        [s1, b1, s2, b2, jnp.broadcast_to(relu_flag[:, None], (B, C)), shift],
        C, L)
    tile = pl.BlockSpec((None, tr, L), lambda b, i: (b, i, 0))
    stat_spec = pl.BlockSpec((None, 1, L), lambda b, i: (b, 0, 0))
    out, s, q = pl.pallas_call(
        _affine2_stats_kernel,
        out_shape=(jax.ShapeDtypeStruct((B, R, L), ACT_DTYPE),
                   jax.ShapeDtypeStruct((B, 1, L), jnp.float32),
                   jax.ShapeDtypeStruct((B, 1, L), jnp.float32)),
        grid=(B, R // tr),
        in_specs=[tile, tile,
                  pl.BlockSpec((None, 6, L), lambda b, i: (b, 0, 0))],
        out_specs=(tile, stat_spec, stat_spec),
        compiler_params=pltpu.CompilerParams(
            dimension_semantics=("parallel", "arbitrary"),
            vmem_limit_bytes=_VMEM_LIMIT),
    )(x1d, x2d, params)
    s, q = s[:, 0], q[:, 0]
    if L != C:                       # fold lane groups (same shift) to channels
        g = L // C
        s = s.reshape(B, g, C).sum(axis=1)
        q = q.reshape(B, g, C).sum(axis=1)
    return out.reshape(B, M, C), s, q


def combine3(x1, x2, x3, scales, biases):
    """out = x1*s0+b0 + x2*s1+b1 + x3*s2+b2 on (M, C) slabs.  Lane-dense, f32."""
    M, C = x1.shape
    x1d, L = _dense2(x1)
    x2d, _ = _dense2(x2)
    x3d, _ = _dense2(x3)
    R = x1d.shape[0]
    tr = _pick_row_tile(R, bytes_per_row=20 * L)
    params = _pack_rows2(
        [scales[0], biases[0], scales[1], biases[1], scales[2], biases[2]],
        C, L)
    tile = pl.BlockSpec((tr, L), lambda i: (i, 0))
    out = pl.pallas_call(
        _combine3_kernel,
        out_shape=jax.ShapeDtypeStruct((R, L), jnp.float32),
        grid=(R // tr,),
        in_specs=[tile, tile, tile, pl.BlockSpec((6, L), lambda i: (0, 0))],
        out_specs=tile,
        compiler_params=pltpu.CompilerParams(
            dimension_semantics=("parallel",),
            vmem_limit_bytes=_VMEM_LIMIT),
    )(x1d, x2d, x3d, params)
    return out.reshape(M, C)


# --------------------------------------------------------------------------
# JAX glue: im2col, BN affine params, batched BasicBlock group, TaylorBlockV2
# --------------------------------------------------------------------------

def im2col(x_nhwc, k, stride, pad):
    """Patch extraction in plain JAX (channels-last, bf16 so the 9x slab is
    half the bytes of the previous f32 version).
    # TODO(synk): replace with an in-kernel 9-tap accumulating matmul."""
    N, H, W, C = x_nhwc.shape
    xp = jnp.pad(x_nhwc, ((0, 0), (pad, pad), (pad, pad), (0, 0)))
    Ho = (H + 2 * pad - k) // stride + 1
    Wo = (W + 2 * pad - k) // stride + 1
    cols = []
    for ky in range(k):
        for kx in range(k):
            cols.append(
                xp[:, ky:ky + stride * Ho:stride, kx:kx + stride * Wo:stride, :])
    patches = jnp.concatenate(cols, axis=-1)          # (N, Ho, Wo, k*k*C)
    return patches.reshape(N * Ho * Wo, k * k * C), Ho, Wo


def _moments_from_shifted(s, q, shift, m):
    """Mean / biased variance from shifted sums (well-conditioned)."""
    mean_d = s / m
    mean = shift + mean_d
    var = jnp.maximum(q / m - mean_d * mean_d, 0.0)
    return mean, var


def bn_affine_from_moments(mean, var, gamma, beta, pre_scale=1.0, eps=EPS):
    """(scale, bias) s.t. y = x*scale + bias == BN_train(pre_scale * x)."""
    mean_t = pre_scale * mean
    var_t = (pre_scale ** 2) * var
    inv = gamma * jax.lax.rsqrt(var_t + eps)
    return pre_scale * inv, beta - mean_t * inv


def init_block_group(key, num_branches, cin, planes, stride):
    """Parameters for `num_branches` independent BasicBlocks, stacked so the
    whole group runs through single batched pallas_calls."""
    B = num_branches
    ks = jax.random.split(key, 8)
    p = {
        'w1': (0.1 * jax.random.normal(ks[0], (B, 3, 3, cin, planes),
                                       jnp.float32)).reshape(B, 9 * cin, planes),
        'g1': 1.0 + 0.1 * jax.random.normal(ks[1], (B, planes), jnp.float32),
        'b1': 0.1 * jax.random.normal(ks[2], (B, planes), jnp.float32),
        'w2': (0.1 * jax.random.normal(ks[3], (B, 3, 3, planes, planes),
                                       jnp.float32)).reshape(B, 9 * planes, planes),
        'g2': 1.0 + 0.1 * jax.random.normal(ks[4], (B, planes), jnp.float32),
        'b2': 0.1 * jax.random.normal(ks[5], (B, planes), jnp.float32),
        'stride': stride,
        'has_shortcut': (stride != 1) or (cin != planes * EXPANSION),
    }
    if p['has_shortcut']:
        p['wsc'] = 0.1 * jax.random.normal(ks[6], (B, cin, planes), jnp.float32)
        p['gsc'] = 1.0 + 0.1 * jax.random.normal(ks[7], (B, planes), jnp.float32)
        p['bsc'] = jnp.zeros((B, planes), jnp.float32)
    return p


def block_group_forward(x, p, relu_flags, in_mean=None):
    """x: (B, N, H, W, Cin) bf16 NHWC activations for B independent BasicBlocks.
    relu_flags: (B,) {0,1} gating the final ReLU per branch.
    Returns (out (B,N,Ho,Wo,planes) bf16, out_mean (B,planes), out_var (B,planes))."""
    B, N, H, W, Cin = x.shape
    stride = p['stride']
    planes = p['g1'].shape[1]

    # conv1 (3x3, stride, pad=1): bf16 im2col + fused matmul / shifted stats
    a1, Ho, Wo = im2col(x.reshape(B * N, H, W, Cin), 3, stride, 1)
    M = N * Ho * Wo
    c1, s1, q1, sh1 = conv_matmul_stats(a1.reshape(B, M, 9 * Cin), p['w1'])
    mean1, var1 = _moments_from_shifted(s1, q1, sh1, M)
    sc1, bi1 = bn_affine_from_moments(mean1, var1, p['g1'], p['b1'])

    # conv2 (3x3, s=1, pad=1): BN1+ReLU fused into the matmul prologue
    a2, _, _ = im2col(c1.reshape(B * N, Ho, Wo, planes), 3, 1, 1)
    c2, s2, q2, sh2 = conv_matmul_stats(
        a2.reshape(B, M, 9 * planes), p['w2'],
        prologue=(jnp.tile(sc1, (1, 9)), jnp.tile(bi1, (1, 9))))
    mean2, var2 = _moments_from_shifted(s2, q2, sh2, M)
    sc2, bi2 = bn_affine_from_moments(mean2, var2, p['g2'], p['b2'])

    # shortcut: 1x1 conv + BN(train) when the shape changes, identity otherwise
    if p['has_shortcut']:
        xs = x[:, :, ::stride, ::stride, :].reshape(B, M, Cin)
        res, ss, qs, shs = conv_matmul_stats(xs, p['wsc'])
        means, varss = _moments_from_shifted(ss, qs, shs, M)
        scs, bis = bn_affine_from_moments(means, varss, p['gsc'], p['bsc'])
        out_shift = bi2 + bis        # E[BN2(conv2) + BN_sc(sc)] per channel
    else:
        res = x.reshape(B, M, Cin)   # Cin == planes here
        scs = jnp.ones((B, planes), jnp.float32)
        bis = jnp.zeros((B, planes), jnp.float32)
        out_shift = bi2 + (in_mean if in_mean is not None else 0.0)

    # out = relu?( bn2(conv2) + shortcut ) with fused output stats
    out, so, qo = affine2_stats(c2, res, sc2, bi2, scs, bis, relu_flags,
                                out_shift)
    out_mean, out_var = _moments_from_shifted(so, qo, out_shift, M)
    return out.reshape(B, N, Ho, Wo, planes), out_mean, out_var


class TaylorBlockV2Pallas:
    """TaylorBlockV2 with BasicBlock (expansion=1) sub-blocks."""

    def __init__(self, key, in_planes, planes, stride=2, is_bootblock=False):
        self.is_bootblock = is_bootblock
        self.is_need_four = in_planes != planes * EXPANSION
        self.planes = planes
        ks = jax.random.split(key, 8)
        if is_bootblock:
            ip = in_planes
            if self.is_need_four:
                self.euler_v0 = init_block_group(ks[0], 1, ip, planes, 1)
                ip = planes * EXPANSION
            self.euler_v1 = init_block_group(ks[1], 1, ip, planes, 1)
            ip = planes * EXPANSION
            self.euler_v2 = init_block_group(ks[2], 1, ip, planes, 1)
            self.euler_v3 = init_block_group(ks[3], 1, ip, planes, 1)
        else:
            # three independent, identically-shaped BasicBlocks -> one batched group
            self.euler_h = init_block_group(ks[0], 3, in_planes, planes, stride)
        # out_bn1 / out_bn2 / out_bn3 affine parameters
        self.out_gamma = 1.0 + 0.1 * jax.random.normal(ks[4], (3, planes),
                                                       jnp.float32)
        self.out_beta = 0.1 * jax.random.normal(ks[5], (3, planes), jnp.float32)

    def _combine(self, slab1, m1, v1, slab2, m2, v2, slab3, m3, v3):
        """out = out_bn1(-w_k_1) + out_bn2(0.5*w_k_2) + out_bn3(grad).
        Per-channel moments come fused from the producing kernels — no slab
        re-read for statistics."""
        pre = jnp.array([-1.0, 0.5, 1.0], jnp.float32)[:, None]
        means = jnp.stack([m1, m2, m3])
        varss = jnp.stack([v1, v2, v3])
        scales, biases = bn_affine_from_moments(means, varss, self.out_gamma,
                                                self.out_beta, pre_scale=pre)
        return combine3(slab1, slab2, slab3, scales, biases)

    def __call__(self, x0_nchw, x1_nchw=None, x2_nchw=None):
        # NCHW <-> NHWC only at the module boundary; bf16 channels-last inside.
        to_nhwc = lambda t: jnp.transpose(t, (0, 2, 3, 1)).astype(ACT_DTYPE)
        to_nchw = lambda t: jnp.transpose(t.astype(jnp.float32), (0, 3, 1, 2))
        if self.is_bootblock:
            x0 = to_nhwc(x0_nchw)[None]               # (1, N, H, W, C)
            on = jnp.ones((1,), jnp.float32)
            off = jnp.zeros((1,), jnp.float32)
            if self.is_need_four:
                w_k_2, m2, v2 = block_group_forward(x0, self.euler_v0, on)
            else:
                w_k_2 = x0
                # channel stats of the raw module input (tiny XLA reduction)
                xf = x0_nchw.astype(jnp.float32)
                m2 = jnp.mean(xf, axis=(0, 2, 3))[None]
                v2 = jnp.var(xf, axis=(0, 2, 3))[None]
            w_k_1, m1, v1 = block_group_forward(w_k_2, self.euler_v1, on,
                                                in_mean=m2)
            w_k, mk, vk = block_group_forward(w_k_1, self.euler_v2, on,
                                              in_mean=m1)
            grad, mg, vg = block_group_forward(w_k, self.euler_v3, off,
                                               in_mean=mk)
            N, Ho, Wo, C = w_k_1.shape[1:]
            out = self._combine(
                w_k_1[0].reshape(-1, C), m1[0], v1[0],
                w_k_2[0].reshape(-1, C), m2[0], v2[0],
                grad[0].reshape(-1, C), mg[0], vg[0]).reshape(N, Ho, Wo, C)
            return to_nchw(w_k_1[0]), to_nchw(w_k[0]), to_nchw(out)
        else:
            x = jnp.stack([to_nhwc(x0_nchw), to_nhwc(x1_nchw), to_nhwc(x2_nchw)])
            flags = jnp.array([1.0, 1.0, 0.0], jnp.float32)  # euler_h3: no ReLU
            y, m, v = block_group_forward(x, self.euler_h, flags)
            _, N, Ho, Wo, C = y.shape
            w_k_2, w_k_1, grad = y[0], y[1], y[2]
            out = self._combine(
                w_k_1.reshape(-1, C), m[1], v[1],
                w_k_2.reshape(-1, C), m[0], v[0],
                grad.reshape(-1, C), m[2], v[2]).reshape(N, Ho, Wo, C)
            return to_nchw(w_k_2), to_nchw(w_k_1), to_nchw(out)


# --------------------------------------------------------------------------

if __name__ == "__main__":
    key = jax.random.PRNGKey(0)
    kx, kp1, kp2 = jax.random.split(key, 3)

    # --- bootblock path (stride=1, is_need_four=True): x0 = (2, 4, 16, 16) ---
    x0 = jax.random.normal(kx, (2, 4, 16, 16), jnp.float32)
    boot = TaylorBlockV2Pallas(kp1, in_planes=4, planes=8, is_bootblock=True)
    boot_fn = jax.jit(lambda t: boot(t))
    w_k_1, w_k, out_b = boot_fn(x0)
    jax.block_until_ready((w_k_1, w_k, out_b))
    assert w_k_1.shape == (2, 8, 16, 16)
    assert w_k.shape == (2, 8, 16, 16)
    assert out_b.shape == (2, 8, 16, 16)

    # --- non-boot path (stride=2): x0, x1, x2 = (2, 8, 16, 16) each ---
    k0, k1, k2 = jax.random.split(kx, 3)
    y0 = jax.random.normal(k0, (2, 8, 16, 16), jnp.float32)
    y1 = jax.random.normal(k1, (2, 8, 16, 16), jnp.float32)
    y2 = jax.random.normal(k2, (2, 8, 16, 16), jnp.float32)
    blk = TaylorBlockV2Pallas(kp2, in_planes=8, planes=16, stride=2,
                              is_bootblock=False)
    blk_fn = jax.jit(lambda a, b, c: blk(a, b, c))
    a, b, c = blk_fn(y0, y1, y2)
    jax.block_until_ready((a, b, c))
    assert a.shape == (2, 16, 8, 8)
    assert b.shape == (2, 16, 8, 8)
    assert c.shape == (2, 16, 8, 8)

    for t in (w_k_1, w_k, out_b, a, b, c):
        assert bool(jnp.all(jnp.isfinite(t)))

    print("KERNEL_OK")
</pallas_src>

<mosaic_0001>
module attributes {stable_mosaic.version = 11 : i64} {
  func.func @kernel(%arg0: i32, %arg1: i32, %arg2: memref<1x512x4xbf16, #tpu.memory_space<vmem>>, %arg3: memref<1x4x8xbf16, #tpu.memory_space<vmem>>, %arg4: memref<1x512x8xbf16, #tpu.memory_space<vmem>>, %arg5: memref<1x1x8xf32, #tpu.memory_space<vmem>>, %arg6: memref<1x1x8xf32, #tpu.memory_space<vmem>>, %arg7: memref<1x1x8xf32, #tpu.memory_space<vmem>>) attributes {dimension_semantics = [#tpu.dimension_semantics<parallel>, #tpu.dimension_semantics<arbitrary>], iteration_bounds = array<i64: 1, 1>, scalar_prefetch = 0 : i64, scratch_operands = 0 : i64, tpu.core_type = #tpu.core_type<tc>, window_params = [{transform_indices = @transform_0, window_bounds = array<i64: 1, 512, 4>}, {transform_indices = @transform_1, window_bounds = array<i64: 1, 4, 8>}, {transform_indices = @transform_2, window_bounds = array<i64: 1, 512, 8>}, {transform_indices = @transform_3, window_bounds = array<i64: 1, 1, 8>}, {transform_indices = @transform_4, window_bounds = array<i64: 1, 1, 8>}, {transform_indices = @transform_5, window_bounds = array<i64: 1, 1, 8>}]} {
    %c0 = arith.constant 0 : index
    %c0_0 = arith.constant 0 : index
    %c0_1 = arith.constant 0 : index
    %0 = vector.load %arg2[%c0, %c0_0, %c0_1] : memref<1x512x4xbf16, #tpu.memory_space<vmem>>, vector<1x512x4xbf16>
    %1 = vector.shape_cast %0 : vector<1x512x4xbf16> to vector<512x4xbf16>
    %c0_2 = arith.constant 0 : index
    %c0_3 = arith.constant 0 : index
    %c0_4 = arith.constant 0 : index
    %2 = vector.load %arg3[%c0_2, %c0_3, %c0_4] : memref<1x4x8xbf16, #tpu.memory_space<vmem>>, vector<1x4x8xbf16>
    %3 = vector.shape_cast %2 : vector<1x4x8xbf16> to vector<4x8xbf16>
    %cst = arith.constant dense<0.000000e+00> : vector<512x8xf32>
    %4 = tpu.matmul %1, %3, %cst {dimension_numbers = #tpu.dot_dimension_numbers<[1], [0], [0], [1], [0, 0, 1, 1], [], []>} : vector<512x4xbf16>, vector<4x8xbf16>, vector<512x8xf32> -> vector<512x8xf32>
    %5 = arith.truncf %4 : vector<512x8xf32> to vector<512x8xbf16>
    %c0_5 = arith.constant 0 : index
    %c0_6 = arith.constant 0 : index
    %c0_7 = arith.constant 0 : index
    %6 = vector.load %arg4[%c0_5, %c0_6, %c0_7] : memref<1x512x8xbf16, #tpu.memory_space<vmem>>, vector<1x512x8xbf16>
    %7 = vector.shape_cast %6 : vector<1x512x8xbf16> to vector<512x8xbf16>
    %8 = vector.shape_cast %5 : vector<512x8xbf16> to vector<1x512x8xbf16>
    tpu.vector_store %arg4[%c0_5, %c0_6, %c0_7], %8 {strides = array<i32>} : memref<1x512x8xbf16, #tpu.memory_space<vmem>>, vector<1x512x8xbf16>,
    %c0_i32 = arith.constant 0 : i32
    %9 = arith.cmpi eq, %arg1, %c0_i32 : i32
    %10 = arith.extui %9 : i1 to i32
    %c0_i32_8 = arith.constant 0 : i32
    %11 = arith.cmpi ne, %10, %c0_i32_8 : i32
    scf.if %11 {
      %cst_26 = arith.constant dense<0.000000e+00> : vector<8xf32>
      %33 = vector.multi_reduction <add>, %4, %cst_26 [0] : vector<512x8xf32> to vector<8xf32>
      %34 = vector.shape_cast %33 : vector<8xf32> to vector<1x8xf32>
      %cst_27 = arith.constant 0.001953125 : f32
      %35 = vector.broadcast %cst_27 : f32 to vector<1x8xf32>
      %36 = arith.mulf %34, %35 : vector<1x8xf32>
      %c0_28 = arith.constant 0 : index
      %c0_29 = arith.constant 0 : index
      %c0_30 = arith.constant 0 : index
      %37 = vector.load %arg7[%c0_28, %c0_29, %c0_30] : memref<1x1x8xf32, #tpu.memory_space<vmem>>, vector<1x1x8xf32>
      %38 = vector.shape_cast %37 : vector<1x1x8xf32> to vector<1x8xf32>
      %39 = vector.shape_cast %36 : vector<1x8xf32> to vector<1x1x8xf32>
      tpu.vector_store %arg7[%c0_28, %c0_29, %c0_30], %39 {strides = array<i32>} : memref<1x1x8xf32, #tpu.memory_space<vmem>>, vector<1x1x8xf32>,
      %cst_31 = arith.constant 0.000000e+00 : f32
      %40 = vector.broadcast %cst_31 : f32 to vector<1x8xf32>
      %c0_32 = arith.constant 0 : index
      %c0_33 = arith.constant 0 : index
      %c0_34 = arith.constant 0 : index
      %41 = vector.load %arg5[%c0_32, %c0_33, %c0_34] : memref<1x1x8xf32, #tpu.memory_space<vmem>>, vector<1x1x8xf32>
      %42 = vector.shape_cast %41 : vector<1x1x8xf32> to vector<1x8xf32>
      %43 = vector.shape_cast %40 : vector<1x8xf32> to vector<1x1x8xf32>
      tpu.vector_store %arg5[%c0_32, %c0_33, %c0_34], %43 {strides = array<i32>} : memref<1x1x8xf32, #tpu.memory_space<vmem>>, vector<1x1x8xf32>,
      %cst_35 = arith.constant 0.000000e+00 : f32
      %44 = vector.broadcast %cst_35 : f32 to vector<1x8xf32>
      %c0_36 = arith.constant 0 : index
      %c0_37 = arith.constant 0 : index
      %c0_38 = arith.constant 0 : index
      %45 = vector.load %arg6[%c0_36, %c0_37, %c0_38] : memref<1x1x8xf32, #tpu.memory_space<vmem>>, vector<1x1x8xf32>
      %46 = vector.shape_cast %45 : vector<1x1x8xf32> to vector<1x8xf32>
      %47 = vector.shape_cast %44 : vector<1x8xf32> to vector<1x1x8xf32>
      tpu.vector_store %arg6[%c0_36, %c0_37, %c0_38], %47 {strides = array<i32>} : memref<1x1x8xf32, #tpu.memory_space<vmem>>, vector<1x1x8xf32>,
    } else {
    }
    %c0_9 = arith.constant 0 : index
    %c0_10 = arith.constant 0 : index
    %c0_11 = arith.constant 0 : index
    %12 = vector.load %arg7[%c0_9, %c0_10, %c0_11] : memref<1x1x8xf32, #tpu.memory_space<vmem>>, vector<1x1x8xf32>
    %13 = vector.shape_cast %12 : vector<1x1x8xf32> to vector<1x8xf32>
    %14 = vector.broadcast %13 : vector<1x8xf32> to vector<512x8xf32>
    %15 = arith.subf %4, %14 : vector<512x8xf32>
    %c0_12 = arith.constant 0 : index
    %c0_13 = arith.constant 0 : index
    %c0_14 = arith.constant 0 : index
    %16 = vector.load %arg5[%c0_12, %c0_13, %c0_14] : memref<1x1x8xf32, #tpu.memory_space<vmem>>, vector<1x1x8xf32>
    %17 = vector.shape_cast %16 : vector<1x1x8xf32> to vector<1x8xf32>
    %cst_15 = arith.constant dense<0.000000e+00> : vector<8xf32>
    %18 = vector.multi_reduction <add>, %15, %cst_15 [0] : vector<512x8xf32> to vector<8xf32>
    %19 = vector.shape_cast %18 : vector<8xf32> to vector<1x8xf32>
    %20 = arith.addf %17, %19 : vector<1x8xf32>
    %c0_16 = arith.constant 0 : index
    %c0_17 = arith.constant 0 : index
    %c0_18 = arith.constant 0 : index
    %21 = vector.load %arg5[%c0_16, %c0_17, %c0_18] : memref<1x1x8xf32, #tpu.memory_space<vmem>>, vector<1x1x8xf32>
    %22 = vector.shape_cast %21 : vector<1x1x8xf32> to vector<1x8xf32>
    %23 = vector.shape_cast %20 : vector<1x8xf32> to vector<1x1x8xf32>
    tpu.vector_store %arg5[%c0_16, %c0_17, %c0_18], %23 {strides = array<i32>} : memref<1x1x8xf32, #tpu.memory_space<vmem>>, vector<1x1x8xf32>,
    %c0_19 = arith.constant 0 : index
    %c0_20 = arith.constant 0 : index
    %c0_21 = arith.constant 0 : index
    %24 = vector.load %arg6[%c0_19, %c0_20, %c0_21] : memref<1x1x8xf32, #tpu.memory_space<vmem>>, vector<1x1x8xf32>
    %25 = vector.shape_cast %24 : vector<1x1x8xf32> to vector<1x8xf32>
    %26 = arith.mulf %15, %15 : vector<512x8xf32>
    %cst_22 = arith.constant dense<0.000000e+00> : vector<8xf32>
    %27 = vector.multi_reduction <add>, %26, %cst_22 [0] : vector<512x8xf32> to vector<8xf32>
    %28 = vector.shape_cast %27 : vector<8xf32> to vector<1x8xf32>
    %29 = arith.addf %25, %28 : vector<1x8xf32>
    %c0_23 = arith.constant 0 : index
    %c0_24 = arith.constant 0 : index
    %c0_25 = arith.constant 0 : index
    %30 = vector.load %arg6[%c0_23, %c0_24, %c0_25] : memref<1x1x8xf32, #tpu.memory_space<vmem>>, vector<1x1x8xf32>
    %31 = vector.shape_cast %30 : vector<1x1x8xf32> to vector<1x8xf32>
    %32 = vector.shape_cast %29 : vector<1x8xf32> to vector<1x1x8xf32>
    tpu.vector_store %arg6[%c0_23, %c0_24, %c0_25], %32 {strides = array<i32>} : memref<1x1x8xf32, #tpu.memory_space<vmem>>, vector<1x1x8xf32>,
    return
  }
  func.func @transform_0(%arg0: i32, %arg1: i32) -> (i32, i32, i32) {
    %c0_i32 = arith.constant 0 : i32
    %c0_i32_0 = arith.constant 0 : i32
    return %arg0, %arg1, %c0_i32 : i32, i32, i32
  }
  func.func @transform_1(%arg0: i32, %arg1: i32) -> (i32, i32, i32) {
    %c0_i32 = arith.constant 0 : i32
    %c0_i32_0 = arith.constant 0 : i32
    %c0_i32_1 = arith.constant 0 : i32
    return %arg0, %c0_i32, %c0_i32_0 : i32, i32, i32
  }
  func.func @transform_2(%arg0: i32, %arg1: i32) -> (i32, i32, i32) {
    %c0_i32 = arith.constant 0 : i32
    %c0_i32_0 = arith.constant 0 : i32
    return %arg0, %arg1, %c0_i32 : i32, i32, i32
  }
  func.func @transform_3(%arg0: i32, %arg1: i32) -> (i32, i32, i32) {
    %c0_i32 = arith.constant 0 : i32
    %c0_i32_0 = arith.constant 0 : i32
    %c0_i32_1 = arith.constant 0 : i32
    return %arg0, %c0_i32, %c0_i32_0 : i32, i32, i32
  }
  func.func @transform_4(%arg0: i32, %arg1: i32) -> (i32, i32, i32) {
    %c0_i32 = arith.constant 0 : i32
    %c0_i32_0 = arith.constant 0 : i32
    %c0_i32_1 = arith.constant 0 : i32
    return %arg0, %c0_i32, %c0_i32_0 : i32, i32, i32
  }
  func.func @transform_5(%arg0: i32, %arg1: i32) -> (i32, i32, i32) {
    %c0_i32 = arith.constant 0 : i32
    %c0_i32_0 = arith.constant 0 : i32
    %c0_i32_1 = arith.constant 0 : i32
    return %arg0, %c0_i32, %c0_i32_0 : i32, i32, i32
  }
}

module attributes {stable_mosaic.version = 11 : i64} {
  func.func @kernel(%arg0: i32, %arg1: i32, %arg2: memref<1x512x36xbf16, #tpu.memory_space<vmem>>, %arg3: memref<1x36x8xbf16, #tpu.memory_space<vmem>>, %arg4: memref<1x512x8xbf16, #tpu.memory_space<vmem>>, %arg5: memref<1x1x8xf32, #tpu.memory_space<vmem>>, %arg6: memref<1x1x8xf32, #tpu.memory_space<vmem>>, %arg7: memref<1x1x8xf32, #tpu.memory_space<vmem>>) attributes {dimension_semantics = [#tpu.dimension_semantics<parallel>, #tpu.dimension_semantics<arbitrary>], iteration_bounds = array<i64: 1, 1>, scalar_prefetch = 0 : i64, scratch_operands = 0 : i64, tpu.core_type = #tpu.core_type<tc>, window_params = [{transform_indices = @transform_0, window_bounds = array<i64: 1, 512, 36>}, {transform_indices = @transform_1, window_bounds = array<i64: 1, 36, 8>}, {transform_indices = @transform_2, window_bounds = array<i64: 1, 512, 8>}, {transform_indices = @transform_3, window_bounds = array<i64: 1, 1, 8>}, {transform_indices = @transform_4, window_bounds = array<i64: 1, 1, 8>}, {transform_indices = @transform_5, window_bounds = array<i64: 1, 1, 8>}]} {
    %c0 = arith.constant 0 : index
    %c0_0 = arith.constant 0 : index
    %c0_1 = arith.constant 0 : index
    %0 = vector.load %arg2[%c0, %c0_0, %c0_1] : memref<1x512x36xbf16, #tpu.memory_space<vmem>>, vector<1x512x36xbf16>
    %1 = vector.shape_cast %0 : vector<1x512x36xbf16> to vector<512x36xbf16>
    %c0_2 = arith.constant 0 : index
    %c0_3 = arith.constant 0 : index
    %c0_4 = arith.constant 0 : index
    %2 = vector.load %arg3[%c0_2, %c0_3, %c0_4] : memref<1x36x8xbf16, #tpu.memory_space<vmem>>, vector<1x36x8xbf16>
    %3 = vector.shape_cast %2 : vector<1x36x8xbf16> to vector<36x8xbf16>
    %cst = arith.constant dense<0.000000e+00> : vector<512x8xf32>
    %4 = tpu.matmul %1, %3, %cst {dimension_numbers = #tpu.dot_dimension_numbers<[1], [0], [0], [1], [0, 0, 1, 1], [], []>} : vector<512x36xbf16>, vector<36x8xbf16>, vector<512x8xf32> -> vector<512x8xf32>
    %5 = arith.truncf %4 : vector<512x8xf32> to vector<512x8xbf16>
    %c0_5 = arith.constant 0 : index
    %c0_6 = arith.constant 0 : index
    %c0_7 = arith.constant 0 : index
    %6 = vector.load %arg4[%c0_5, %c0_6, %c0_7] : memref<1x512x8xbf16, #tpu.memory_space<vmem>>, vector<1x512x8xbf16>
    %7 = vector.shape_cast %6 : vector<1x512x8xbf16> to vector<512x8xbf16>
    %8 = vector.shape_cast %5 : vector<512x8xbf16> to vector<1x512x8xbf16>
    tpu.vector_store %arg4[%c0_5, %c0_6, %c0_7], %8 {strides = array<i32>} : memref<1x512x8xbf16, #tpu.memory_space<vmem>>, vector<1x512x8xbf16>,
    %c0_i32 = arith.constant 0 : i32
    %9 = arith.cmpi eq, %arg1, %c0_i32 : i32
    %10 = arith.extui %9 : i1 to i32
    %c0_i32_8 = arith.constant 0 : i32
    %11 = arith.cmpi ne, %10, %c0_i32_8 : i32
    scf.if %11 {
      %cst_26 = arith.constant dense<0.000000e+00> : vector<8xf32>
      %33 = vector.multi_reduction <add>, %4, %cst_26 [0] : vector<512x8xf32> to vector<8xf32>
      %34 = vector.shape_cast %33 : vector<8xf32> to vector<1x8xf32>
      %cst_27 = arith.constant 0.001953125 : f32
      %35 = vector.broadcast %cst_27 : f32 to vector<1x8xf32>
      %36 = arith.mulf %34, %35 : vector<1x8xf32>
      %c0_28 = arith.constant 0 : index
      %c0_29 = arith.constant 0 : index
      %c0_30 = arith.constant 0 : index
      %37 = vector.load %arg7[%c0_28, %c0_29, %c0_30] : memref<1x1x8xf32, #tpu.memory_space<vmem>>, vector<1x1x8xf32>
      %38 = vector.shape_cast %37 : vector<1x1x8xf32> to vector<1x8xf32>
      %39 = vector.shape_cast %36 : vector<1x8xf32> to vector<1x1x8xf32>
      tpu.vector_store %arg7[%c0_28, %c0_29, %c0_30], %39 {strides = array<i32>} : memref<1x1x8xf32, #tpu.memory_space<vmem>>, vector<1x1x8xf32>,
      %cst_31 = arith.constant 0.000000e+00 : f32
      %40 = vector.broadcast %cst_31 : f32 to vector<1x8xf32>
      %c0_32 = arith.constant 0 : index
      %c0_33 = arith.constant 0 : index
      %c0_34 = arith.constant 0 : index
      %41 = vector.load %arg5[%c0_32, %c0_33, %c0_34] : memref<1x1x8xf32, #tpu.memory_space<vmem>>, vector<1x1x8xf32>
      %42 = vector.shape_cast %41 : vector<1x1x8xf32> to vector<1x8xf32>
      %43 = vector.shape_cast %40 : vector<1x8xf32> to vector<1x1x8xf32>
      tpu.vector_store %arg5[%c0_32, %c0_33, %c0_34], %43 {strides = array<i32>} : memref<1x1x8xf32, #tpu.memory_space<vmem>>, vector<1x1x8xf32>,
      %cst_35 = arith.constant 0.000000e+00 : f32
      %44 = vector.broadcast %cst_35 : f32 to vector<1x8xf32>
      %c0_36 = arith.constant 0 : index
      %c0_37 = arith.constant 0 : index
      %c0_38 = arith.constant 0 : index
      %45 = vector.load %arg6[%c0_36, %c0_37, %c0_38] : memref<1x1x8xf32, #tpu.memory_space<vmem>>, vector<1x1x8xf32>
      %46 = vector.shape_cast %45 : vector<1x1x8xf32> to vector<1x8xf32>
      %47 = vector.shape_cast %44 : vector<1x8xf32> to vector<1x1x8xf32>
      tpu.vector_store %arg6[%c0_36, %c0_37, %c0_38], %47 {strides = array<i32>} : memref<1x1x8xf32, #tpu.memory_space<vmem>>, vector<1x1x8xf32>,
    } else {
    }
    %c0_9 = arith.constant 0 : index
    %c0_10 = arith.constant 0 : index
    %c0_11 = arith.constant 0 : index
    %12 = vector.load %arg7[%c0_9, %c0_10, %c0_11] : memref<1x1x8xf32, #tpu.memory_space<vmem>>, vector<1x1x8xf32>
    %13 = vector.shape_cast %12 : vector<1x1x8xf32> to vector<1x8xf32>
    %14 = vector.broadcast %13 : vector<1x8xf32> to vector<512x8xf32>
    %15 = arith.subf %4, %14 : vector<512x8xf32>
    %c0_12 = arith.constant 0 : index
    %c0_13 = arith.constant 0 : index
    %c0_14 = arith.constant 0 : index
    %16 = vector.load %arg5[%c0_12, %c0_13, %c0_14] : memref<1x1x8xf32, #tpu.memory_space<vmem>>, vector<1x1x8xf32>
    %17 = vector.shape_cast %16 : vector<1x1x8xf32> to vector<1x8xf32>
    %cst_15 = arith.constant dense<0.000000e+00> : vector<8xf32>
    %18 = vector.multi_reduction <add>, %15, %cst_15 [0] : vector<512x8xf32> to vector<8xf32>
    %19 = vector.shape_cast %18 : vector<8xf32> to vector<1x8xf32>
    %20 = arith.addf %17, %19 : vector<1x8xf32>
    %c0_16 = arith.constant 0 : index
    %c0_17 = arith.constant 0 : index
    %c0_18 = arith.constant 0 : index
    %21 = vector.load %arg5[%c0_16, %c0_17, %c0_18] : memref<1x1x8xf32, #tpu.memory_space<vmem>>, vector<1x1x8xf32>
    %22 = vector.shape_cast %21 : vector<1x1x8xf32> to vector<1x8xf32>
    %23 = vector.shape_cast %20 : vector<1x8xf32> to vector<1x1x8xf32>
    tpu.vector_store %arg5[%c0_16, %c0_17, %c0_18], %23 {strides = array<i32>} : memref<1x1x8xf32, #tpu.memory_space<vmem>>, vector<1x1x8xf32>,
    %c0_19 = arith.constant 0 : index
    %c0_20 = arith.constant 0 : index
    %c0_21 = arith.constant 0 : index
    %24 = vector.load %arg6[%c0_19, %c0_20, %c0_21] : memref<1x1x8xf32, #tpu.memory_space<vmem>>, vector<1x1x8xf32>
    %25 = vector.shape_cast %24 : vector<1x1x8xf32> to vector<1x8xf32>
    %26 = arith.mulf %15, %15 : vector<512x8xf32>
    %cst_22 = arith.constant dense<0.000000e+00> : vector<8xf32>
    %27 = vector.multi_reduction <add>, %26, %cst_22 [0] : vector<512x8xf32> to vector<8xf32>
    %28 = vector.shape_cast %27 : vector<8xf32> to vector<1x8xf32>
    %29 = arith.addf %25, %28 : vector<1x8xf32>
    %c0_23 = arith.constant 0 : index
    %c0_24 = arith.constant 0 : index
    %c0_25 = arith.constant 0 : index
    %30 = vector.load %arg6[%c0_23, %c0_24, %c0_25] : memref<1x1x8xf32, #tpu.memory_space<vmem>>, vector<1x1x8xf32>
    %31 = vector.shape_cast %30 : vector<1x1x8xf32> to vector<1x8xf32>
    %32 = vector.shape_cast %29 : vector<1x8xf32> to vector<1x1x8xf32>
    tpu.vector_store %arg6[%c0_23, %c0_24, %c0_25], %32 {strides = array<i32>} : memref<1x1x8xf32, #tpu.memory_space<vmem>>, vector<1x1x8xf32>,
    return
  }
  func.func @transform_0(%arg0: i32, %arg1: i32) -> (i32, i32, i32) {
    %c0_i32 = arith.constant 0 : i32
    %c0_i32_0 = arith.constant 0 : i32
    return %arg0, %arg1, %c0_i32 : i32, i32, i32
  }
  func.func @transform_1(%arg0: i32, %arg1: i32) -> (i32, i32, i32) {
    %c0_i32 = arith.constant 0 : i32
    %c0_i32_0 = arith.constant 0 : i32
    %c0_i32_1 = arith.constant 0 : i32
    return %arg0, %c0_i32, %c0_i32_0 : i32, i32, i32
  }
  func.func @transform_2(%arg0: i32, %arg1: i32) -> (i32, i32, i32) {
    %c0_i32 = arith.constant 0 : i32
    %c0_i32_0 = arith.constant 0 : i32
    return %arg0, %arg1, %c0_i32 : i32, i32, i32
  }
  func.func @transform_3(%arg0: i32, %arg1: i32) -> (i32, i32, i32) {
    %c0_i32 = arith.constant 0 : i32
    %c0_i32_0 = arith.constant 0 : i32
    %c0_i32_1 = arith.constant 0 : i32
    return %arg0, %c0_i32, %c0_i32_0 : i32, i32, i32
  }
  func.func @transform_4(%arg0: i32, %arg1: i32) -> (i32, i32, i32) {
    %c0_i32 = arith.constant 0 : i32
    %c0_i32_0 = arith.constant 0 : i32
    %c0_i32_1 = arith.constant 0 : i32
    return %arg0, %c0_i32, %c0_i32_0 : i32, i32, i32
  }
  func.func @transform_5(%arg0: i32, %arg1: i32) -> (i32, i32, i32) {
    %c0_i32 = arith.constant 0 : i32
    %c0_i32_0 = arith.constant 0 : i32
    %c0_i32_1 = arith.constant 0 : i32
    return %arg0, %c0_i32, %c0_i32_0 : i32, i32, i32
  }
}

module attributes {stable_mosaic.version = 11 : i64} {
  func.func @kernel(%arg0: i32, %arg1: i32, %arg2: memref<1x512x72xbf16, #tpu.memory_space<vmem>>, %arg3: memref<1x2x72xf32, #tpu.memory_space<vmem>>, %arg4: memref<1x72x8xbf16, #tpu.memory_space<vmem>>, %arg5: memref<1x512x8xbf16, #tpu.memory_space<vmem>>, %arg6: memref<1x1x8xf32, #tpu.memory_space<vmem>>, %arg7: memref<1x1x8xf32, #tpu.memory_space<vmem>>, %arg8: memref<1x1x8xf32, #tpu.memory_space<vmem>>) attributes {dimension_semantics = [#tpu.dimension_semantics<parallel>, #tpu.dimension_semantics<arbitrary>], iteration_bounds = array<i64: 1, 1>, scalar_prefetch = 0 : i64, scratch_operands = 0 : i64, tpu.core_type = #tpu.core_type<tc>, window_params = [{transform_indices = @transform_0, window_bounds = array<i64: 1, 512, 72>}, {transform_indices = @transform_1, window_bounds = array<i64: 1, 2, 72>}, {transform_indices = @transform_2, window_bounds = array<i64: 1, 72, 8>}, {transform_indices = @transform_3, window_bounds = array<i64: 1, 512, 8>}, {transform_indices = @transform_4, window_bounds = array<i64: 1, 1, 8>}, {transform_indices = @transform_5, window_bounds = array<i64: 1, 1, 8>}, {transform_indices = @transform_6, window_bounds = array<i64: 1, 1, 8>}]} {
    %c0 = arith.constant 0 : index
    %c0_0 = arith.constant 0 : index
    %c0_1 = arith.constant 0 : index
    %0 = vector.load %arg3[%c0, %c0_0, %c0_1] : memref<1x2x72xf32, #tpu.memory_space<vmem>>, vector<1x2x72xf32>
    %1 = vector.shape_cast %0 : vector<1x2x72xf32> to vector<2x72xf32>
    %c0_2 = arith.constant 0 : index
    %c0_3 = arith.constant 0 : index
    %c0_4 = arith.constant 0 : index
    %2 = vector.load %arg2[%c0_2, %c0_3, %c0_4] : memref<1x512x72xbf16, #tpu.memory_space<vmem>>, vector<1x512x72xbf16>
    %3 = vector.shape_cast %2 : vector<1x512x72xbf16> to vector<512x72xbf16>
    %4 = arith.extf %3 : vector<512x72xbf16> to vector<512x72xf32>
    %5 = vector.extract_strided_slice %1 {offsets = [0, 0], sizes = [1, 72], strides = [1, 1]} : vector<2x72xf32> to vector<1x72xf32>
    %6 = vector.broadcast %5 : vector<1x72xf32> to vector<512x72xf32>
    %7 = arith.mulf %4, %6 : vector<512x72xf32>
    %8 = vector.extract_strided_slice %1 {offsets = [1, 0], sizes = [1, 72], strides = [1, 1]} : vector<2x72xf32> to vector<1x72xf32>
    %9 = vector.broadcast %8 : vector<1x72xf32> to vector<512x72xf32>
    %10 = arith.addf %7, %9 : vector<512x72xf32>
    %cst = arith.constant 0.000000e+00 : f32
    %11 = vector.broadcast %cst : f32 to vector<512x72xf32>
    %12 = arith.maximumf %10, %11 : vector<512x72xf32>
    %13 = arith.truncf %12 : vector<512x72xf32> to vector<512x72xbf16>
    %c0_5 = arith.constant 0 : index
    %c0_6 = arith.constant 0 : index
    %c0_7 = arith.constant 0 : index
    %14 = vector.load %arg4[%c0_5, %c0_6, %c0_7] : memref<1x72x8xbf16, #tpu.memory_space<vmem>>, vector<1x72x8xbf16>
    %15 = vector.shape_cast %14 : vector<1x72x8xbf16> to vector<72x8xbf16>
    %cst_8 = arith.constant dense<0.000000e+00> : vector<512x8xf32>
    %16 = tpu.matmul %13, %15, %cst_8 {dimension_numbers = #tpu.dot_dimension_numbers<[1], [0], [0], [1], [0, 0, 1, 1], [], []>} : vector<512x72xbf16>, vector<72x8xbf16>, vector<512x8xf32> -> vector<512x8xf32>
    %17 = arith.truncf %16 : vector<512x8xf32> to vector<512x8xbf16>
    %c0_9 = arith.constant 0 : index
    %c0_10 = arith.constant 0 : index
    %c0_11 = arith.constant 0 : index
    %18 = vector.load %arg5[%c0_9, %c0_10, %c0_11] : memref<1x512x8xbf16, #tpu.memory_space<vmem>>, vector<1x512x8xbf16>
    %19 = vector.shape_cast %18 : vector<1x512x8xbf16> to vector<512x8xbf16>
    %20 = vector.shape_cast %17 : vector<512x8xbf16> to vector<1x512x8xbf16>
    tpu.vector_store %arg5[%c0_9, %c0_10, %c0_11], %20 {strides = array<i32>} : memref<1x512x8xbf16, #tpu.memory_space<vmem>>, vector<1x512x8xbf16>,
    %c0_i32 = arith.constant 0 : i32
    %21 = arith.cmpi eq, %arg1, %c0_i32 : i32
    %22 = arith.extui %21 : i1 to i32
    %c0_i32_12 = arith.constant 0 : i32
    %23 = arith.cmpi ne, %22, %c0_i32_12 : i32
    scf.if %23 {
      %cst_30 = arith.constant dense<0.000000e+00> : vector<8xf32>
      %45 = vector.multi_reduction <add>, %16, %cst_30 [0] : vector<512x8xf32> to vector<8xf32>
      %46 = vector.shape_cast %45 : vector<8xf32> to vector<1x8xf32>
      %cst_31 = arith.constant 0.001953125 : f32
      %47 = vector.broadcast %cst_31 : f32 to vector<1x8xf32>
      %48 = arith.mulf %46, %47 : vector<1x8xf32>
      %c0_32 = arith.constant 0 : index
      %c0_33 = arith.constant 0 : index
      %c0_34 = arith.constant 0 : index
      %49 = vector.load %arg8[%c0_32, %c0_33, %c0_34] : memref<1x1x8xf32, #tpu.memory_space<vmem>>, vector<1x1x8xf32>
      %50 = vector.shape_cast %49 : vector<1x1x8xf32> to vector<1x8xf32>
      %51 = vector.shape_cast %48 : vector<1x8xf32> to vector<1x1x8xf32>
      tpu.vector_store %arg8[%c0_32, %c0_33, %c0_34], %51 {strides = array<i32>} : memref<1x1x8xf32, #tpu.memory_space<vmem>>, vector<1x1x8xf32>,
      %cst_35 = arith.constant 0.000000e+00 : f32
      %52 = vector.broadcast %cst_35 : f32 to vector<1x8xf32>
      %c0_36 = arith.constant 0 : index
      %c0_37 = arith.constant 0 : index
      %c0_38 = arith.constant 0 : index
      %53 = vector.load %arg6[%c0_36, %c0_37, %c0_38] : memref<1x1x8xf32, #tpu.memory_space<vmem>>, vector<1x1x8xf32>
      %54 = vector.shape_cast %53 : vector<1x1x8xf32> to vector<1x8xf32>
      %55 = vector.shape_cast %52 : vector<1x8xf32> to vector<1x1x8xf32>
      tpu.vector_store %arg6[%c0_36, %c0_37, %c0_38], %55 {strides = array<i32>} : memref<1x1x8xf32, #tpu.memory_space<vmem>>, vector<1x1x8xf32>,
      %cst_39 = arith.constant 0.000000e+00 : f32
      %56 = vector.broadcast %cst_39 : f32 to vector<1x8xf32>
      %c0_40 = arith.constant 0 : index
      %c0_41 = arith.constant 0 : index
      %c0_42 = arith.constant 0 : index
      %57 = vector.load %arg7[%c0_40, %c0_41, %c0_42] : memref<1x1x8xf32, #tpu.memory_space<vmem>>, vector<1x1x8xf32>
      %58 = vector.shape_cast %57 : vector<1x1x8xf32> to vector<1x8xf32>
      %59 = vector.shape_cast %56 : vector<1x8xf32> to vector<1x1x8xf32>
      tpu.vector_store %arg7[%c0_40, %c0_41, %c0_42], %59 {strides = array<i32>} : memref<1x1x8xf32, #tpu.memory_space<vmem>>, vector<1x1x8xf32>,
    } else {
    }
    %c0_13 = arith.constant 0 : index
    %c0_14 = arith.constant 0 : index
    %c0_15 = arith.constant 0 : index
    %24 = vector.load %arg8[%c0_13, %c0_14, %c0_15] : memref<1x1x8xf32, #tpu.memory_space<vmem>>, vector<1x1x8xf32>
    %25 = vector.shape_cast %24 : vector<1x1x8xf32> to vector<1x8xf32>
    %26 = vector.broadcast %25 : vector<1x8xf32> to vector<512x8xf32>
    %27 = arith.subf %16, %26 : vector<512x8xf32>
    %c0_16 = arith.constant 0 : index
    %c0_17 = arith.constant 0 : index
    %c0_18 = arith.constant 0 : index
    %28 = vector.load %arg6[%c0_16, %c0_17, %c0_18] : memref<1x1x8xf32, #tpu.memory_space<vmem>>, vector<1x1x8xf32>
    %29 = vector.shape_cast %28 : vector<1x1x8xf32> to vector<1x8xf32>
    %cst_19 = arith.constant dense<0.000000e+00> : vector<8xf32>
    %30 = vector.multi_reduction <add>, %27, %cst_19 [0] : vector<512x8xf32> to vector<8xf32>
    %31 = vector.shape_cast %30 : vector<8xf32> to vector<1x8xf32>
    %32 = arith.addf %29, %31 : vector<1x8xf32>
    %c0_20 = arith.constant 0 : index
    %c0_21 = arith.constant 0 : index
    %c0_22 = arith.constant 0 : index
    %33 = vector.load %arg6[%c0_20, %c0_21, %c0_22] : memref<1x1x8xf32, #tpu.memory_space<vmem>>, vector<1x1x8xf32>
    %34 = vector.shape_cast %33 : vector<1x1x8xf32> to vector<1x8xf32>
    %35 = vector.shape_cast %32 : vector<1x8xf32> to vector<1x1x8xf32>
    tpu.vector_store %arg6[%c0_20, %c0_21, %c0_22], %35 {strides = array<i32>} : memref<1x1x8xf32, #tpu.memory_space<vmem>>, vector<1x1x8xf32>,
    %c0_23 = arith.constant 0 : index
    %c0_24 = arith.constant 0 : index
    %c0_25 = arith.constant 0 : index
    %36 = vector.load %arg7[%c0_23, %c0_24, %c0_25] : memref<1x1x8xf32, #tpu.memory_space<vmem>>, vector<1x1x8xf32>
    %37 = vector.shape_cast %36 : vector<1x1x8xf32> to vector<1x8xf32>
    %38 = arith.mulf %27, %27 : vector<512x8xf32>
    %cst_26 = arith.constant dense<0.000000e+00> : vector<8xf32>
    %39 = vector.multi_reduction <add>, %38, %cst_26 [0] : vector<512x8xf32> to vector<8xf32>
    %40 = vector.shape_cast %39 : vector<8xf32> to vector<1x8xf32>
    %41 = arith.addf %37, %40 : vector<1x8xf32>
    %c0_27 = arith.constant 0 : index
    %c0_28 = arith.constant 0 : index
    %c0_29 = arith.constant 0 : index
    %42 = vector.load %arg7[%c0_27, %c0_28, %c0_29] : memref<1x1x8xf32, #tpu.memory_space<vmem>>, vector<1x1x8xf32>
    %43 = vector.shape_cast %42 : vector<1x1x8xf32> to vector<1x8xf32>
    %44 = vector.shape_cast %41 : vector<1x8xf32> to vector<1x1x8xf32>
    tpu.vector_store %arg7[%c0_27, %c0_28, %c0_29], %44 {strides = array<i32>} : memref<1x1x8xf32, #tpu.memory_space<vmem>>, vector<1x1x8xf32>,
    return
  }
  func.func @transform_0(%arg0: i32, %arg1: i32) -> (i32, i32, i32) {
    %c0_i32 = arith.constant 0 : i32
    %c0_i32_0 = arith.constant 0 : i32
    return %arg0, %arg1, %c0_i32 : i32, i32, i32
  }
  func.func @transform_1(%arg0: i32, %arg1: i32) -> (i32, i32, i32) {
    %c0_i32 = arith.constant 0 : i32
    %c0_i32_0 = arith.constant 0 : i32
    %c0_i32_1 = arith.constant 0 : i32
    return %arg0, %c0_i32, %c0_i32_0 : i32, i32, i32
  }
  func.func @transform_2(%arg0: i32, %arg1: i32) -> (i32, i32, i32) {
    %c0_i32 = arith.constant 0 : i32
    %c0_i32_0 = arith.constant 0 : i32
    %c0_i32_1 = arith.constant 0 : i32
    return %arg0, %c0_i32, %c0_i32_0 : i32, i32, i32
  }
  func.func @transform_3(%arg0: i32, %arg1: i32) -> (i32, i32, i32) {
    %c0_i32 = arith.constant 0 : i32
    %c0_i32_0 = arith.constant 0 : i32
    return %arg0, %arg1, %c0_i32 : i32, i32, i32
  }
  func.func @transform_4(%arg0: i32, %arg1: i32) -> (i32, i32, i32) {
    %c0_i32 = arith.constant 0 : i32
    %c0_i32_0 = arith.constant 0 : i32
    %c0_i32_1 = arith.constant 0 : i32
    return %arg0, %c0_i32, %c0_i32_0 : i32, i32, i32
  }
  func.func @transform_5(%arg0: i32, %arg1: i32) -> (i32, i32, i32) {
    %c0_i32 = arith.constant 0 : i32
    %c0_i32_0 = arith.constant 0 : i32
    %c0_i32_1 = arith.constant 0 : i32
    return %arg0, %c0_i32, %c0_i32_0 : i32, i32, i32
  }
  func.func @transform_6(%arg0: i32, %arg1: i32) -> (i32, i32, i32) {
    %c0_i32 = arith.constant 0 : i32
    %c0_i32_0 = arith.constant 0 : i32
    %c0_i32_1 = arith.constant 0 : i32
    return %arg0, %c0_i32, %c0_i32_0 : i32, i32, i32
  }
}

module attributes {stable_mosaic.version = 11 : i64} {
  func.func @_affine2_stats_kernel(%arg0: i32, %arg1: i32, %arg2: memref<1x32x128xbf16, #tpu.memory_space<vmem>>, %arg3: memref<1x32x128xbf16, #tpu.memory_space<vmem>>, %arg4: memref<1x6x128xf32, #tpu.memory_space<vmem>>, %arg5: memref<1x32x128xbf16, #tpu.memory_space<vmem>>, %arg6: memref<1x1x128xf32, #tpu.memory_space<vmem>>, %arg7: memref<1x1x128xf32, #tpu.memory_space<vmem>>) attributes {dimension_semantics = [#tpu.dimension_semantics<parallel>, #tpu.dimension_semantics<arbitrary>], iteration_bounds = array<i64: 1, 1>, scalar_prefetch = 0 : i64, scratch_operands = 0 : i64, tpu.core_type = #tpu.core_type<tc>, window_params = [{transform_indices = @transform_0, window_bounds = array<i64: 1, 32, 128>}, {transform_indices = @transform_1, window_bounds = array<i64: 1, 32, 128>}, {transform_indices = @transform_2, window_bounds = array<i64: 1, 6, 128>}, {transform_indices = @transform_3, window_bounds = array<i64: 1, 32, 128>}, {transform_indices = @transform_4, window_bounds = array<i64: 1, 1, 128>}, {transform_indices = @transform_5, window_bounds = array<i64: 1, 1, 128>}]} {
    %c0 = arith.constant 0 : index
    %c0_0 = arith.constant 0 : index
    %c0_1 = arith.constant 0 : index
    %0 = vector.load %arg4[%c0, %c0_0, %c0_1] : memref<1x6x128xf32, #tpu.memory_space<vmem>>, vector<1x6x128xf32>
    %1 = vector.shape_cast %0 : vector<1x6x128xf32> to vector<6x128xf32>
    %c0_2 = arith.constant 0 : index
    %c0_3 = arith.constant 0 : index
    %c0_4 = arith.constant 0 : index
    %2 = vector.load %arg2[%c0_2, %c0_3, %c0_4] : memref<1x32x128xbf16, #tpu.memory_space<vmem>>, vector<1x32x128xbf16>
    %3 = vector.shape_cast %2 : vector<1x32x128xbf16> to vector<32x128xbf16>
    %4 = arith.extf %3 : vector<32x128xbf16> to vector<32x128xf32>
    %5 = vector.extract_strided_slice %1 {offsets = [0, 0], sizes = [1, 128], strides = [1, 1]} : vector<6x128xf32> to vector<1x128xf32>
    %6 = vector.broadcast %5 : vector<1x128xf32> to vector<32x128xf32>
    %7 = arith.mulf %4, %6 : vector<32x128xf32>
    %8 = vector.extract_strided_slice %1 {offsets = [1, 0], sizes = [1, 128], strides = [1, 1]} : vector<6x128xf32> to vector<1x128xf32>
    %9 = vector.broadcast %8 : vector<1x128xf32> to vector<32x128xf32>
    %10 = arith.addf %7, %9 : vector<32x128xf32>
    %c0_5 = arith.constant 0 : index
    %c0_6 = arith.constant 0 : index
    %c0_7 = arith.constant 0 : index
    %11 = vector.load %arg3[%c0_5, %c0_6, %c0_7] : memref<1x32x128xbf16, #tpu.memory_space<vmem>>, vector<1x32x128xbf16>
    %12 = vector.shape_cast %11 : vector<1x32x128xbf16> to vector<32x128xbf16>
    %13 = arith.extf %12 : vector<32x128xbf16> to vector<32x128xf32>
    %14 = vector.extract_strided_slice %1 {offsets = [2, 0], sizes = [1, 128], strides = [1, 1]} : vector<6x128xf32> to vector<1x128xf32>
    %15 = vector.broadcast %14 : vector<1x128xf32> to vector<32x128xf32>
    %16 = arith.mulf %13, %15 : vector<32x128xf32>
    %17 = arith.addf %10, %16 : vector<32x128xf32>
    %18 = vector.extract_strided_slice %1 {offsets = [3, 0], sizes = [1, 128], strides = [1, 1]} : vector<6x128xf32> to vector<1x128xf32>
    %19 = vector.broadcast %18 : vector<1x128xf32> to vector<32x128xf32>
    %20 = arith.addf %17, %19 : vector<32x128xf32>
    %21 = vector.extract_strided_slice %1 {offsets = [4, 0], sizes = [1, 128], strides = [1, 1]} : vector<6x128xf32> to vector<1x128xf32>
    %cst = arith.constant 0.000000e+00 : f32
    %22 = vector.broadcast %cst : f32 to vector<1x128xf32>
    %23 = arith.cmpf ogt, %21, %22 : vector<1x128xf32>
    %cst_8 = arith.constant 0.000000e+00 : f32
    %24 = vector.broadcast %cst_8 : f32 to vector<32x128xf32>
    %25 = arith.maximumf %20, %24 : vector<32x128xf32>
    %26 = vector.shape_cast %23 : vector<1x128xi1> to vector<1x128xi1>
    %27 = vector.broadcast %26 : vector<1x128xi1> to vector<32x128xi1>
    %28 = arith.select %27, %25, %20 : vector<32x128xi1>, vector<32x128xf32>
    %29 = arith.truncf %28 : vector<32x128xf32> to vector<32x128xbf16>
    %c0_9 = arith.constant 0 : index
    %c0_10 = arith.constant 0 : index
    %c0_11 = arith.constant 0 : index
    %30 = vector.load %arg5[%c0_9, %c0_10, %c0_11] : memref<1x32x128xbf16, #tpu.memory_space<vmem>>, vector<1x32x128xbf16>
    %31 = vector.shape_cast %30 : vector<1x32x128xbf16> to vector<32x128xbf16>
    %32 = vector.shape_cast %29 : vector<32x128xbf16> to vector<1x32x128xbf16>
    tpu.vector_store %arg5[%c0_9, %c0_10, %c0_11], %32 {strides = array<i32>} : memref<1x32x128xbf16, #tpu.memory_space<vmem>>, vector<1x32x128xbf16>,
    %c0_i32 = arith.constant 0 : i32
    %33 = arith.cmpi eq, %arg1, %c0_i32 : i32
    %34 = arith.extui %33 : i1 to i32
    %c0_i32_12 = arith.constant 0 : i32
    %35 = arith.cmpi ne, %34, %c0_i32_12 : i32
    scf.if %35 {
      %cst_27 = arith.constant 0.000000e+00 : f32
      %56 = vector.broadcast %cst_27 : f32 to vector<1x128xf32>
      %c0_28 = arith.constant 0 : index
      %c0_29 = arith.constant 0 : index
      %c0_30 = arith.constant 0 : index
      %57 = vector.load %arg6[%c0_28, %c0_29, %c0_30] : memref<1x1x128xf32, #tpu.memory_space<vmem>>, vector<1x1x128xf32>
      %58 = vector.shape_cast %57 : vector<1x1x128xf32> to vector<1x128xf32>
      %59 = vector.shape_cast %56 : vector<1x128xf32> to vector<1x1x128xf32>
      tpu.vector_store %arg6[%c0_28, %c0_29, %c0_30], %59 {strides = array<i32>} : memref<1x1x128xf32, #tpu.memory_space<vmem>>, vector<1x1x128xf32>,
      %cst_31 = arith.constant 0.000000e+00 : f32
      %60 = vector.broadcast %cst_31 : f32 to vector<1x128xf32>
      %c0_32 = arith.constant 0 : index
      %c0_33 = arith.constant 0 : index
      %c0_34 = arith.constant 0 : index
      %61 = vector.load %arg7[%c0_32, %c0_33, %c0_34] : memref<1x1x128xf32, #tpu.memory_space<vmem>>, vector<1x1x128xf32>
      %62 = vector.shape_cast %61 : vector<1x1x128xf32> to vector<1x128xf32>
      %63 = vector.shape_cast %60 : vector<1x128xf32> to vector<1x1x128xf32>
      tpu.vector_store %arg7[%c0_32, %c0_33, %c0_34], %63 {strides = array<i32>} : memref<1x1x128xf32, #tpu.memory_space<vmem>>, vector<1x1x128xf32>,
    } else {
    }
    %36 = vector.extract_strided_slice %1 {offsets = [5, 0], sizes = [1, 128], strides = [1, 1]} : vector<6x128xf32> to vector<1x128xf32>
    %37 = vector.broadcast %36 : vector<1x128xf32> to vector<32x128xf32>
    %38 = arith.subf %28, %37 : vector<32x128xf32>
    %c0_13 = arith.constant 0 : index
    %c0_14 = arith.constant 0 : index
    %c0_15 = arith.constant 0 : index
    %39 = vector.load %arg6[%c0_13, %c0_14, %c0_15] : memref<1x1x128xf32, #tpu.memory_space<vmem>>, vector<1x1x128xf32>
    %40 = vector.shape_cast %39 : vector<1x1x128xf32> to vector<1x128xf32>
    %cst_16 = arith.constant dense<0.000000e+00> : vector<128xf32>
    %41 = vector.multi_reduction <add>, %38, %cst_16 [0] : vector<32x128xf32> to vector<128xf32>
    %42 = vector.shape_cast %41 : vector<128xf32> to vector<1x128xf32>
    %43 = arith.addf %40, %42 : vector<1x128xf32>
    %c0_17 = arith.constant 0 : index
    %c0_18 = arith.constant 0 : index
    %c0_19 = arith.constant 0 : index
    %44 = vector.load %arg6[%c0_17, %c0_18, %c0_19] : memref<1x1x128xf32, #tpu.memory_space<vmem>>, vector<1x1x128xf32>
    %45 = vector.shape_cast %44 : vector<1x1x128xf32> to vector<1x128xf32>
    %46 = vector.shape_cast %43 : vector<1x128xf32> to vector<1x1x128xf32>
    tpu.vector_store %arg6[%c0_17, %c0_18, %c0_19], %46 {strides = array<i32>} : memref<1x1x128xf32, #tpu.memory_space<vmem>>, vector<1x1x128xf32>,
    %c0_20 = arith.constant 0 : index
    %c0_21 = arith.constant 0 : index
    %c0_22 = arith.constant 0 : index
    %47 = vector.load %arg7[%c0_20, %c0_21, %c0_22] : memref<1x1x128xf32, #tpu.memory_space<vmem>>, vector<1x1x128xf32>
    %48 = vector.shape_cast %47 : vector<1x1x128xf32> to vector<1x128xf32>
    %49 = arith.mulf %38, %38 : vector<32x128xf32>
    %cst_23 = arith.constant dense<0.000000e+00> : vector<128xf32>
    %50 = vector.multi_reduction <add>, %49, %cst_23 [0] : vector<32x128xf32> to vector<128xf32>
    %51 = vector.shape_cast %50 : vector<128xf32> to vector<1x128xf32>
    %52 = arith.addf %48, %51 : vector<1x128xf32>
    %c0_24 = arith.constant 0 : index
    %c0_25 = arith.constant 0 : index
    %c0_26 = arith.constant 0 : index
    %53 = vector.load %arg7[%c0_24, %c0_25, %c0_26] : memref<1x1x128xf32, #tpu.memory_space<vmem>>, vector<1x1x128xf32>
    %54 = vector.shape_cast %53 : vector<1x1x128xf32> to vector<1x128xf32>
    %55 = vector.shape_cast %52 : vector<1x128xf32> to vector<1x1x128xf32>
    tpu.vector_store %arg7[%c0_24, %c0_25, %c0_26], %55 {strides = array<i32>} : memref<1x1x128xf32, #tpu.memory_space<vmem>>, vector<1x1x128xf32>,
    return
  }
  func.func @transform_0(%arg0: i32, %arg1: i32) -> (i32, i32, i32) {
    %c0_i32 = arith.constant 0 : i32
    %c0_i32_0 = arith.constant 0 : i32
    return %arg0, %arg1, %c0_i32 : i32, i32, i32
  }
  func.func @transform_1(%arg0: i32, %arg1: i32) -> (i32, i32, i32) {
    %c0_i32 = arith.constant 0 : i32
    %c0_i32_0 = arith.constant 0 : i32
    return %arg0, %arg1, %c0_i32 : i32, i32, i32
  }
  func.func @transform_2(%arg0: i32, %arg1: i32) -> (i32, i32, i32) {
    %c0_i32 = arith.constant 0 : i32
    %c0_i32_0 = arith.constant 0 : i32
    %c0_i32_1 = arith.constant 0 : i32
    return %arg0, %c0_i32, %c0_i32_0 : i32, i32, i32
  }
  func.func @transform_3(%arg0: i32, %arg1: i32) -> (i32, i32, i32) {
    %c0_i32 = arith.constant 0 : i32
    %c0_i32_0 = arith.constant 0 : i32
    return %arg0, %arg1, %c0_i32 : i32, i32, i32
  }
  func.func @transform_4(%arg0: i32, %arg1: i32) -> (i32, i32, i32) {
    %c0_i32 = arith.constant 0 : i32
    %c0_i32_0 = arith.constant 0 : i32
    %c0_i32_1 = arith.constant 0 : i32
    return %arg0, %c0_i32, %c0_i32_0 : i32, i32, i32
  }
  func.func @transform_5(%arg0: i32, %arg1: i32) -> (i32, i32, i32) {
    %c0_i32 = arith.constant 0 : i32
    %c0_i32_0 = arith.constant 0 : i32
    %c0_i32_1 = arith.constant 0 : i32
    return %arg0, %c0_i32, %c0_i32_0 : i32, i32, i32
  }
}

module attributes {stable_mosaic.version = 11 : i64} {
  func.func @kernel(%arg0: i32, %arg1: i32, %arg2: memref<1x512x72xbf16, #tpu.memory_space<vmem>>, %arg3: memref<1x72x8xbf16, #tpu.memory_space<vmem>>, %arg4: memref<1x512x8xbf16, #tpu.memory_space<vmem>>, %arg5: memref<1x1x8xf32, #tpu.memory_space<vmem>>, %arg6: memref<1x1x8xf32, #tpu.memory_space<vmem>>, %arg7: memref<1x1x8xf32, #tpu.memory_space<vmem>>) attributes {dimension_semantics = [#tpu.dimension_semantics<parallel>, #tpu.dimension_semantics<arbitrary>], iteration_bounds = array<i64: 1, 1>, scalar_prefetch = 0 : i64, scratch_operands = 0 : i64, tpu.core_type = #tpu.core_type<tc>, window_params = [{transform_indices = @transform_0, window_bounds = array<i64: 1, 512, 72>}, {transform_indices = @transform_1, window_bounds = array<i64: 1, 72, 8>}, {transform_indices = @transform_2, window_bounds = array<i64: 1, 512, 8>}, {transform_indices = @transform_3, window_bounds = array<i64: 1, 1, 8>}, {transform_indices = @transform_4, window_bounds = array<i64: 1, 1, 8>}, {transform_indices = @transform_5, window_bounds = array<i64: 1, 1, 8>}]} {
    %c0 = arith.constant 0 : index
    %c0_0 = arith.constant 0 : index
    %c0_1 = arith.constant 0 : index
    %0 = vector.load %arg2[%c0, %c0_0, %c0_1] : memref<1x512x72xbf16, #tpu.memory_space<vmem>>, vector<1x512x72xbf16>
    %1 = vector.shape_cast %0 : vector<1x512x72xbf16> to vector<512x72xbf16>
    %c0_2 = arith.constant 0 : index
    %c0_3 = arith.constant 0 : index
    %c0_4 = arith.constant 0 : index
    %2 = vector.load %arg3[%c0_2, %c0_3, %c0_4] : memref<1x72x8xbf16, #tpu.memory_space<vmem>>, vector<1x72x8xbf16>
    %3 = vector.shape_cast %2 : vector<1x72x8xbf16> to vector<72x8xbf16>
    %cst = arith.constant dense<0.000000e+00> : vector<512x8xf32>
    %4 = tpu.matmul %1, %3, %cst {dimension_numbers = #tpu.dot_dimension_numbers<[1], [0], [0], [1], [0, 0, 1, 1], [], []>} : vector<512x72xbf16>, vector<72x8xbf16>, vector<512x8xf32> -> vector<512x8xf32>
    %5 = arith.truncf %4 : vector<512x8xf32> to vector<512x8xbf16>
    %c0_5 = arith.constant 0 : index
    %c0_6 = arith.constant 0 : index
    %c0_7 = arith.constant 0 : index
    %6 = vector.load %arg4[%c0_5, %c0_6, %c0_7] : memref<1x512x8xbf16, #tpu.memory_space<vmem>>, vector<1x512x8xbf16>
    %7 = vector.shape_cast %6 : vector<1x512x8xbf16> to vector<512x8xbf16>
    %8 = vector.shape_cast %5 : vector<512x8xbf16> to vector<1x512x8xbf16>
    tpu.vector_store %arg4[%c0_5, %c0_6, %c0_7], %8 {strides = array<i32>} : memref<1x512x8xbf16, #tpu.memory_space<vmem>>, vector<1x512x8xbf16>,
    %c0_i32 = arith.constant 0 : i32
    %9 = arith.cmpi eq, %arg1, %c0_i32 : i32
    %10 = arith.extui %9 : i1 to i32
    %c0_i32_8 = arith.constant 0 : i32
    %11 = arith.cmpi ne, %10, %c0_i32_8 : i32
    scf.if %11 {
      %cst_26 = arith.constant dense<0.000000e+00> : vector<8xf32>
      %33 = vector.multi_reduction <add>, %4, %cst_26 [0] : vector<512x8xf32> to vector<8xf32>
      %34 = vector.shape_cast %33 : vector<8xf32> to vector<1x8xf32>
      %cst_27 = arith.constant 0.001953125 : f32
      %35 = vector.broadcast %cst_27 : f32 to vector<1x8xf32>
      %36 = arith.mulf %34, %35 : vector<1x8xf32>
      %c0_28 = arith.constant 0 : index
      %c0_29 = arith.constant 0 : index
      %c0_30 = arith.constant 0 : index
      %37 = vector.load %arg7[%c0_28, %c0_29, %c0_30] : memref<1x1x8xf32, #tpu.memory_space<vmem>>, vector<1x1x8xf32>
      %38 = vector.shape_cast %37 : vector<1x1x8xf32> to vector<1x8xf32>
      %39 = vector.shape_cast %36 : vector<1x8xf32> to vector<1x1x8xf32>
      tpu.vector_store %arg7[%c0_28, %c0_29, %c0_30], %39 {strides = array<i32>} : memref<1x1x8xf32, #tpu.memory_space<vmem>>, vector<1x1x8xf32>,
      %cst_31 = arith.constant 0.000000e+00 : f32
      %40 = vector.broadcast %cst_31 : f32 to vector<1x8xf32>
      %c0_32 = arith.constant 0 : index
      %c0_33 = arith.constant 0 : index
      %c0_34 = arith.constant 0 : index
      %41 = vector.load %arg5[%c0_32, %c0_33, %c0_34] : memref<1x1x8xf32, #tpu.memory_space<vmem>>, vector<1x1x8xf32>
      %42 = vector.shape_cast %41 : vector<1x1x8xf32> to vector<1x8xf32>
      %43 = vector.shape_cast %40 : vector<1x8xf32> to vector<1x1x8xf32>
      tpu.vector_store %arg5[%c0_32, %c0_33, %c0_34], %43 {strides = array<i32>} : memref<1x1x8xf32, #tpu.memory_space<vmem>>, vector<1x1x8xf32>,
      %cst_35 = arith.constant 0.000000e+00 : f32
      %44 = vector.broadcast %cst_35 : f32 to vector<1x8xf32>
      %c0_36 = arith.constant 0 : index
      %c0_37 = arith.constant 0 : index
      %c0_38 = arith.constant 0 : index
      %45 = vector.load %arg6[%c0_36, %c0_37, %c0_38] : memref<1x1x8xf32, #tpu.memory_space<vmem>>, vector<1x1x8xf32>
      %46 = vector.shape_cast %45 : vector<1x1x8xf32> to vector<1x8xf32>
      %47 = vector.shape_cast %44 : vector<1x8xf32> to vector<1x1x8xf32>
      tpu.vector_store %arg6[%c0_36, %c0_37, %c0_38], %47 {strides = array<i32>} : memref<1x1x8xf32, #tpu.memory_space<vmem>>, vector<1x1x8xf32>,
    } else {
    }
    %c0_9 = arith.constant 0 : index
    %c0_10 = arith.constant 0 : index
    %c0_11 = arith.constant 0 : index
    %12 = vector.load %arg7[%c0_9, %c0_10, %c0_11] : memref<1x1x8xf32, #tpu.memory_space<vmem>>, vector<1x1x8xf32>
    %13 = vector.shape_cast %12 : vector<1x1x8xf32> to vector<1x8xf32>
    %14 = vector.broadcast %13 : vector<1x8xf32> to vector<512x8xf32>
    %15 = arith.subf %4, %14 : vector<512x8xf32>
    %c0_12 = arith.constant 0 : index
    %c0_13 = arith.constant 0 : index
    %c0_14 = arith.constant 0 : index
    %16 = vector.load %arg5[%c0_12, %c0_13, %c0_14] : memref<1x1x8xf32, #tpu.memory_space<vmem>>, vector<1x1x8xf32>
    %17 = vector.shape_cast %16 : vector<1x1x8xf32> to vector<1x8xf32>
    %cst_15 = arith.constant dense<0.000000e+00> : vector<8xf32>
    %18 = vector.multi_reduction <add>, %15, %cst_15 [0] : vector<512x8xf32> to vector<8xf32>
    %19 = vector.shape_cast %18 : vector<8xf32> to vector<1x8xf32>
    %20 = arith.addf %17, %19 : vector<1x8xf32>
    %c0_16 = arith.constant 0 : index
    %c0_17 = arith.constant 0 : index
    %c0_18 = arith.constant 0 : index
    %21 = vector.load %arg5[%c0_16, %c0_17, %c0_18] : memref<1x1x8xf32, #tpu.memory_space<vmem>>, vector<1x1x8xf32>
    %22 = vector.shape_cast %21 : vector<1x1x8xf32> to vector<1x8xf32>
    %23 = vector.shape_cast %20 : vector<1x8xf32> to vector<1x1x8xf32>
    tpu.vector_store %arg5[%c0_16, %c0_17, %c0_18], %23 {strides = array<i32>} : memref<1x1x8xf32, #tpu.memory_space<vmem>>, vector<1x1x8xf32>,
    %c0_19 = arith.constant 0 : index
    %c0_20 = arith.constant 0 : index
    %c0_21 = arith.constant 0 : index
    %24 = vector.load %arg6[%c0_19, %c0_20, %c0_21] : memref<1x1x8xf32, #tpu.memory_space<vmem>>, vector<1x1x8xf32>
    %25 = vector.shape_cast %24 : vector<1x1x8xf32> to vector<1x8xf32>
    %26 = arith.mulf %15, %15 : vector<512x8xf32>
    %cst_22 = arith.constant dense<0.000000e+00> : vector<8xf32>
    %27 = vector.multi_reduction <add>, %26, %cst_22 [0] : vector<512x8xf32> to vector<8xf32>
    %28 = vector.shape_cast %27 : vector<8xf32> to vector<1x8xf32>
    %29 = arith.addf %25, %28 : vector<1x8xf32>
    %c0_23 = arith.constant 0 : index
    %c0_24 = arith.constant 0 : index
    %c0_25 = arith.constant 0 : index
    %30 = vector.load %arg6[%c0_23, %c0_24, %c0_25] : memref<1x1x8xf32, #tpu.memory_space<vmem>>, vector<1x1x8xf32>
    %31 = vector.shape_cast %30 : vector<1x1x8xf32> to vector<1x8xf32>
    %32 = vector.shape_cast %29 : vector<1x8xf32> to vector<1x1x8xf32>
    tpu.vector_store %arg6[%c0_23, %c0_24, %c0_25], %32 {strides = array<i32>} : memref<1x1x8xf32, #tpu.memory_space<vmem>>, vector<1x1x8xf32>,
    return
  }
  func.func @transform_0(%arg0: i32, %arg1: i32) -> (i32, i32, i32) {
    %c0_i32 = arith.constant 0 : i32
    %c0_i32_0 = arith.constant 0 : i32
    return %arg0, %arg1, %c0_i32 : i32, i32, i32
  }
  func.func @transform_1(%arg0: i32, %arg1: i32) -> (i32, i32, i32) {
    %c0_i32 = arith.constant 0 : i32
    %c0_i32_0 = arith.constant 0 : i32
    %c0_i32_1 = arith.constant 0 : i32
    return %arg0, %c0_i32, %c0_i32_0 : i32, i32, i32
  }
  func.func @transform_2(%arg0: i32, %arg1: i32) -> (i32, i32, i32) {
    %c0_i32 = arith.constant 0 : i32
    %c0_i32_0 = arith.constant 0 : i32
    return %arg0, %arg1, %c0_i32 : i32, i32, i32
  }
  func.func @transform_3(%arg0: i32, %arg1: i32) -> (i32, i32, i32) {
    %c0_i32 = arith.constant 0 : i32
    %c0_i32_0 = arith.constant 0 : i32
    %c0_i32_1 = arith.constant 0 : i32
    return %arg0, %c0_i32, %c0_i32_0 : i32, i32, i32
  }
  func.func @transform_4(%arg0: i32, %arg1: i32) -> (i32, i32, i32) {
    %c0_i32 = arith.constant 0 : i32
    %c0_i32_0 = arith.constant 0 : i32
    %c0_i32_1 = arith.constant 0 : i32
    return %arg0, %c0_i32, %c0_i32_0 : i32, i32, i32
  }
  func.func @transform_5(%arg0: i32, %arg1: i32) -> (i32, i32, i32) {
    %c0_i32 = arith.constant 0 : i32
    %c0_i32_0 = arith.constant 0 : i32
    %c0_i32_1 = arith.constant 0 : i32
    return %arg0, %c0_i32, %c0_i32_0 : i32, i32, i32
  }
}

module attributes {stable_mosaic.version = 11 : i64} {
  func.func @_affine2_stats_kernel(%arg0: i32, %arg1: i32, %arg2: memref<1x32x128xbf16, #tpu.memory_space<vmem>>, %arg3: memref<1x32x128xbf16, #tpu.memory_space<vmem>>, %arg4: memref<1x6x128xf32, #tpu.memory_space<vmem>>, %arg5: memref<1x32x128xbf16, #tpu.memory_space<vmem>>, %arg6: memref<1x1x128xf32, #tpu.memory_space<vmem>>, %arg7: memref<1x1x128xf32, #tpu.memory_space<vmem>>) attributes {dimension_semantics = [#tpu.dimension_semantics<parallel>, #tpu.dimension_semantics<arbitrary>], iteration_bounds = array<i64: 1, 1>, scalar_prefetch = 0 : i64, scratch_operands = 0 : i64, tpu.core_type = #tpu.core_type<tc>, window_params = [{transform_indices = @transform_0, window_bounds = array<i64: 1, 32, 128>}, {transform_indices = @transform_1, window_bounds = array<i64: 1, 32, 128>}, {transform_indices = @transform_2, window_bounds = array<i64: 1, 6, 128>}, {transform_indices = @transform_3, window_bounds = array<i64: 1, 32, 128>}, {transform_indices = @transform_4, window_bounds = array<i64: 1, 1, 128>}, {transform_indices = @transform_5, window_bounds = array<i64: 1, 1, 128>}]} {
    %c0 = arith.constant 0 : index
    %c0_0 = arith.constant 0 : index
    %c0_1 = arith.constant 0 : index
    %0 = vector.load %arg4[%c0, %c0_0, %c0_1] : memref<1x6x128xf32, #tpu.memory_space<vmem>>, vector<1x6x128xf32>
    %1 = vector.shape_cast %0 : vector<1x6x128xf32> to vector<6x128xf32>
    %c0_2 = arith.constant 0 : index
    %c0_3 = arith.constant 0 : index
    %c0_4 = arith.constant 0 : index
    %2 = vector.load %arg2[%c0_2, %c0_3, %c0_4] : memref<1x32x128xbf16, #tpu.memory_space<vmem>>, vector<1x32x128xbf16>
    %3 = vector.shape_cast %2 : vector<1x32x128xbf16> to vector<32x128xbf16>
    %4 = arith.extf %3 : vector<32x128xbf16> to vector<32x128xf32>
    %5 = vector.extract_strided_slice %1 {offsets = [0, 0], sizes = [1, 128], strides = [1, 1]} : vector<6x128xf32> to vector<1x128xf32>
    %6 = vector.broadcast %5 : vector<1x128xf32> to vector<32x128xf32>
    %7 = arith.mulf %4, %6 : vector<32x128xf32>
    %8 = vector.extract_strided_slice %1 {offsets = [1, 0], sizes = [1, 128], strides = [1, 1]} : vector<6x128xf32> to vector<1x128xf32>
    %9 = vector.broadcast %8 : vector<1x128xf32> to vector<32x128xf32>
    %10 = arith.addf %7, %9 : vector<32x128xf32>
    %c0_5 = arith.constant 0 : index
    %c0_6 = arith.constant 0 : index
    %c0_7 = arith.constant 0 : index
    %11 = vector.load %arg3[%c0_5, %c0_6, %c0_7] : memref<1x32x128xbf16, #tpu.memory_space<vmem>>, vector<1x32x128xbf16>
    %12 = vector.shape_cast %11 : vector<1x32x128xbf16> to vector<32x128xbf16>
    %13 = arith.extf %12 : vector<32x128xbf16> to vector<32x128xf32>
    %14 = vector.extract_strided_slice %1 {offsets = [2, 0], sizes = [1, 128], strides = [1, 1]} : vector<6x128xf32> to vector<1x128xf32>
    %15 = vector.broadcast %14 : vector<1x128xf32> to vector<32x128xf32>
    %16 = arith.mulf %13, %15 : vector<32x128xf32>
    %17 = arith.addf %10, %16 : vector<32x128xf32>
    %18 = vector.extract_strided_slice %1 {offsets = [3, 0], sizes = [1, 128], strides = [1, 1]} : vector<6x128xf32> to vector<1x128xf32>
    %19 = vector.broadcast %18 : vector<1x128xf32> to vector<32x128xf32>
    %20 = arith.addf %17, %19 : vector<32x128xf32>
    %21 = vector.extract_strided_slice %1 {offsets = [4, 0], sizes = [1, 128], strides = [1, 1]} : vector<6x128xf32> to vector<1x128xf32>
    %cst = arith.constant 0.000000e+00 : f32
    %22 = vector.broadcast %cst : f32 to vector<1x128xf32>
    %23 = arith.cmpf ogt, %21, %22 : vector<1x128xf32>
    %cst_8 = arith.constant 0.000000e+00 : f32
    %24 = vector.broadcast %cst_8 : f32 to vector<32x128xf32>
    %25 = arith.maximumf %20, %24 : vector<32x128xf32>
    %26 = vector.shape_cast %23 : vector<1x128xi1> to vector<1x128xi1>
    %27 = vector.broadcast %26 : vector<1x128xi1> to vector<32x128xi1>
    %28 = arith.select %27, %25, %20 : vector<32x128xi1>, vector<32x128xf32>
    %29 = arith.truncf %28 : vector<32x128xf32> to vector<32x128xbf16>
    %c0_9 = arith.constant 0 : index
    %c0_10 = arith.constant 0 : index
    %c0_11 = arith.constant 0 : index
    %30 = vector.load %arg5[%c0_9, %c0_10, %c0_11] : memref<1x32x128xbf16, #tpu.memory_space<vmem>>, vector<1x32x128xbf16>
    %31 = vector.shape_cast %30 : vector<1x32x128xbf16> to vector<32x128xbf16>
    %32 = vector.shape_cast %29 : vector<32x128xbf16> to vector<1x32x128xbf16>
    tpu.vector_store %arg5[%c0_9, %c0_10, %c0_11], %32 {strides = array<i32>} : memref<1x32x128xbf16, #tpu.memory_space<vmem>>, vector<1x32x128xbf16>,
    %c0_i32 = arith.constant 0 : i32
    %33 = arith.cmpi eq, %arg1, %c0_i32 : i32
    %34 = arith.extui %33 : i1 to i32
    %c0_i32_12 = arith.constant 0 : i32
    %35 = arith.cmpi ne, %34, %c0_i32_12 : i32
    scf.if %35 {
      %cst_27 = arith.constant 0.000000e+00 : f32
      %56 = vector.broadcast %cst_27 : f32 to vector<1x128xf32>
      %c0_28 = arith.constant 0 : index
      %c0_29 = arith.constant 0 : index
      %c0_30 = arith.constant 0 : index
      %57 = vector.load %arg6[%c0_28, %c0_29, %c0_30] : memref<1x1x128xf32, #tpu.memory_space<vmem>>, vector<1x1x128xf32>
      %58 = vector.shape_cast %57 : vector<1x1x128xf32> to vector<1x128xf32>
      %59 = vector.shape_cast %56 : vector<1x128xf32> to vector<1x1x128xf32>
      tpu.vector_store %arg6[%c0_28, %c0_29, %c0_30], %59 {strides = array<i32>} : memref<1x1x128xf32, #tpu.memory_space<vmem>>, vector<1x1x128xf32>,
      %cst_31 = arith.constant 0.000000e+00 : f32
      %60 = vector.broadcast %cst_31 : f32 to vector<1x128xf32>
      %c0_32 = arith.constant 0 : index
      %c0_33 = arith.constant 0 : index
      %c0_34 = arith.constant 0 : index
      %61 = vector.load %arg7[%c0_32, %c0_33, %c0_34] : memref<1x1x128xf32, #tpu.memory_space<vmem>>, vector<1x1x128xf32>
      %62 = vector.shape_cast %61 : vector<1x1x128xf32> to vector<1x128xf32>
      %63 = vector.shape_cast %60 : vector<1x128xf32> to vector<1x1x128xf32>
      tpu.vector_store %arg7[%c0_32, %c0_33, %c0_34], %63 {strides = array<i32>} : memref<1x1x128xf32, #tpu.memory_space<vmem>>, vector<1x1x128xf32>,
    } else {
    }
    %36 = vector.extract_strided_slice %1 {offsets = [5, 0], sizes = [1, 128], strides = [1, 1]} : vector<6x128xf32> to vector<1x128xf32>
    %37 = vector.broadcast %36 : vector<1x128xf32> to vector<32x128xf32>
    %38 = arith.subf %28, %37 : vector<32x128xf32>
    %c0_13 = arith.constant 0 : index
    %c0_14 = arith.constant 0 : index
    %c0_15 = arith.constant 0 : index
    %39 = vector.load %arg6[%c0_13, %c0_14, %c0_15] : memref<1x1x128xf32, #tpu.memory_space<vmem>>, vector<1x1x128xf32>
    %40 = vector.shape_cast %39 : vector<1x1x128xf32> to vector<1x128xf32>
    %cst_16 = arith.constant dense<0.000000e+00> : vector<128xf32>
    %41 = vector.multi_reduction <add>, %38, %cst_16 [0] : vector<32x128xf32> to vector<128xf32>
    %42 = vector.shape_cast %41 : vector<128xf32> to vector<1x128xf32>
    %43 = arith.addf %40, %42 : vector<1x128xf32>
    %c0_17 = arith.constant 0 : index
    %c0_18 = arith.constant 0 : index
    %c0_19 = arith.constant 0 : index
    %44 = vector.load %arg6[%c0_17, %c0_18, %c0_19] : memref<1x1x128xf32, #tpu.memory_space<vmem>>, vector<1x1x128xf32>
    %45 = vector.shape_cast %44 : vector<1x1x128xf32> to vector<1x128xf32>
    %46 = vector.shape_cast %43 : vector<1x128xf32> to vector<1x1x128xf32>
    tpu.vector_store %arg6[%c0_17, %c0_18, %c0_19], %46 {strides = array<i32>} : memref<1x1x128xf32, #tpu.memory_space<vmem>>, vector<1x1x128xf32>,
    %c0_20 = arith.constant 0 : index
    %c0_21 = arith.constant 0 : index
    %c0_22 = arith.constant 0 : index
    %47 = vector.load %arg7[%c0_20, %c0_21, %c0_22] : memref<1x1x128xf32, #tpu.memory_space<vmem>>, vector<1x1x128xf32>
    %48 = vector.shape_cast %47 : vector<1x1x128xf32> to vector<1x128xf32>
    %49 = arith.mulf %38, %38 : vector<32x128xf32>
    %cst_23 = arith.constant dense<0.000000e+00> : vector<128xf32>
    %50 = vector.multi_reduction <add>, %49, %cst_23 [0] : vector<32x128xf32> to vector<128xf32>
    %51 = vector.shape_cast %50 : vector<128xf32> to vector<1x128xf32>
    %52 = arith.addf %48, %51 : vector<1x128xf32>
    %c0_24 = arith.constant 0 : index
    %c0_25 = arith.constant 0 : index
    %c0_26 = arith.constant 0 : index
    %53 = vector.load %arg7[%c0_24, %c0_25, %c0_26] : memref<1x1x128xf32, #tpu.memory_space<vmem>>, vector<1x1x128xf32>
    %54 = vector.shape_cast %53 : vector<1x1x128xf32> to vector<1x128xf32>
    %55 = vector.shape_cast %52 : vector<1x128xf32> to vector<1x1x128xf32>
    tpu.vector_store %arg7[%c0_24, %c0_25, %c0_26], %55 {strides = array<i32>} : memref<1x1x128xf32, #tpu.memory_space<vmem>>, vector<1x1x128xf32>,
    return
  }
  func.func @transform_0(%arg0: i32, %arg1: i32) -> (i32, i32, i32) {
    %c0_i32 = arith.constant 0 : i32
    %c0_i32_0 = arith.constant 0 : i32
    return %arg0, %arg1, %c0_i32 : i32, i32, i32
  }
  func.func @transform_1(%arg0: i32, %arg1: i32) -> (i32, i32, i32) {
    %c0_i32 = arith.constant 0 : i32
    %c0_i32_0 = arith.constant 0 : i32
    return %arg0, %arg1, %c0_i32 : i32, i32, i32
  }
  func.func @transform_2(%arg0: i32, %arg1: i32) -> (i32, i32, i32) {
    %c0_i32 = arith.constant 0 : i32
    %c0_i32_0 = arith.constant 0 : i32
    %c0_i32_1 = arith.constant 0 : i32
    return %arg0, %c0_i32, %c0_i32_0 : i32, i32, i32
  }
  func.func @transform_3(%arg0: i32, %arg1: i32) -> (i32, i32, i32) {
    %c0_i32 = arith.constant 0 : i32
    %c0_i32_0 = arith.constant 0 : i32
    return %arg0, %arg1, %c0_i32 : i32, i32, i32
  }
  func.func @transform_4(%arg0: i32, %arg1: i32) -> (i32, i32, i32) {
    %c0_i32 = arith.constant 0 : i32
    %c0_i32_0 = arith.constant 0 : i32
    %c0_i32_1 = arith.constant 0 : i32
    return %arg0, %c0_i32, %c0_i32_0 : i32, i32, i32
  }
  func.func @transform_5(%arg0: i32, %arg1: i32) -> (i32, i32, i32) {
    %c0_i32 = arith.constant 0 : i32
    %c0_i32_0 = arith.constant 0 : i32
    %c0_i32_1 = arith.constant 0 : i32
    return %arg0, %c0_i32, %c0_i32_0 : i32, i32, i32
  }
}

module attributes {stable_mosaic.version = 11 : i64} {
  func.func @_combine3_kernel(%arg0: i32, %arg1: memref<32x128xbf16, #tpu.memory_space<vmem>>, %arg2: memref<32x128xbf16, #tpu.memory_space<vmem>>, %arg3: memref<32x128xbf16, #tpu.memory_space<vmem>>, %arg4: memref<6x128xf32, #tpu.memory_space<vmem>>, %arg5: memref<32x128xf32, #tpu.memory_space<vmem>>) attributes {dimension_semantics = [#tpu.dimension_semantics<parallel>], iteration_bounds = array<i64: 1>, scalar_prefetch = 0 : i64, scratch_operands = 0 : i64, tpu.core_type = #tpu.core_type<tc>, window_params = [{transform_indices = @transform_0, window_bounds = array<i64: 32, 128>}, {transform_indices = @transform_1, window_bounds = array<i64: 32, 128>}, {transform_indices = @transform_2, window_bounds = array<i64: 32, 128>}, {pipeline_mode = #tpu.pipeline_mode<synchronous>, transform_indices = @transform_3, window_bounds = array<i64: 6, 128>}, {transform_indices = @transform_4, window_bounds = array<i64: 32, 128>}]} {
    %c0 = arith.constant 0 : index
    %c0_0 = arith.constant 0 : index
    %0 = vector.load %arg4[%c0, %c0_0] : memref<6x128xf32, #tpu.memory_space<vmem>>, vector<6x128xf32>
    %c0_1 = arith.constant 0 : index
    %c0_2 = arith.constant 0 : index
    %1 = vector.load %arg1[%c0_1, %c0_2] : memref<32x128xbf16, #tpu.memory_space<vmem>>, vector<32x128xbf16>
    %2 = arith.extf %1 : vector<32x128xbf16> to vector<32x128xf32>
    %3 = vector.extract_strided_slice %0 {offsets = [0, 0], sizes = [1, 128], strides = [1, 1]} : vector<6x128xf32> to vector<1x128xf32>
    %4 = vector.broadcast %3 : vector<1x128xf32> to vector<32x128xf32>
    %5 = arith.mulf %2, %4 : vector<32x128xf32>
    %6 = vector.extract_strided_slice %0 {offsets = [1, 0], sizes = [1, 128], strides = [1, 1]} : vector<6x128xf32> to vector<1x128xf32>
    %7 = vector.broadcast %6 : vector<1x128xf32> to vector<32x128xf32>
    %8 = arith.addf %5, %7 : vector<32x128xf32>
    %c0_3 = arith.constant 0 : index
    %c0_4 = arith.constant 0 : index
    %9 = vector.load %arg2[%c0_3, %c0_4] : memref<32x128xbf16, #tpu.memory_space<vmem>>, vector<32x128xbf16>
    %10 = arith.extf %9 : vector<32x128xbf16> to vector<32x128xf32>
    %11 = vector.extract_strided_slice %0 {offsets = [2, 0], sizes = [1, 128], strides = [1, 1]} : vector<6x128xf32> to vector<1x128xf32>
    %12 = vector.broadcast %11 : vector<1x128xf32> to vector<32x128xf32>
    %13 = arith.mulf %10, %12 : vector<32x128xf32>
    %14 = arith.addf %8, %13 : vector<32x128xf32>
    %15 = vector.extract_strided_slice %0 {offsets = [3, 0], sizes = [1, 128], strides = [1, 1]} : vector<6x128xf32> to vector<1x128xf32>
    %16 = vector.broadcast %15 : vector<1x128xf32> to vector<32x128xf32>
    %17 = arith.addf %14, %16 : vector<32x128xf32>
    %c0_5 = arith.constant 0 : index
    %c0_6 = arith.constant 0 : index
    %18 = vector.load %arg3[%c0_5, %c0_6] : memref<32x128xbf16, #tpu.memory_space<vmem>>, vector<32x128xbf16>
    %19 = arith.extf %18 : vector<32x128xbf16> to vector<32x128xf32>
    %20 = vector.extract_strided_slice %0 {offsets = [4, 0], sizes = [1, 128], strides = [1, 1]} : vector<6x128xf32> to vector<1x128xf32>
    %21 = vector.broadcast %20 : vector<1x128xf32> to vector<32x128xf32>
    %22 = arith.mulf %19, %21 : vector<32x128xf32>
    %23 = arith.addf %17, %22 : vector<32x128xf32>
    %24 = vector.extract_strided_slice %0 {offsets = [5, 0], sizes = [1, 128], strides = [1, 1]} : vector<6x128xf32> to vector<1x128xf32>
    %25 = vector.broadcast %24 : vector<1x128xf32> to vector<32x128xf32>
    %26 = arith.addf %23, %25 : vector<32x128xf32>
    %c0_7 = arith.constant 0 : index
    %c0_8 = arith.constant 0 : index
    %27 = vector.load %arg5[%c0_7, %c0_8] : memref<32x128xf32, #tpu.memory_space<vmem>>, vector<32x128xf32>
    tpu.vector_store %arg5[%c0_7, %c0_8], %26 {strides = array<i32>} : memref<32x128xf32, #tpu.memory_space<vmem>>, vector<32x128xf32>,
    return
  }
  func.func @transform_0(%arg0: i32) -> (i32, i32) {
    %c0_i32 = arith.constant 0 : i32
    %c0_i32_0 = arith.constant 0 : i32
    return %arg0, %c0_i32 : i32, i32
  }
  func.func @transform_1(%arg0: i32) -> (i32, i32) {
    %c0_i32 = arith.constant 0 : i32
    %c0_i32_0 = arith.constant 0 : i32
    return %arg0, %c0_i32 : i32, i32
  }
  func.func @transform_2(%arg0: i32) -> (i32, i32) {
    %c0_i32 = arith.constant 0 : i32
    %c0_i32_0 = arith.constant 0 : i32
    return %arg0, %c0_i32 : i32, i32
  }
  func.func @transform_3(%arg0: i32) -> (i32, i32) {
    %c0_i32 = arith.constant 0 : i32
    %c0_i32_0 = arith.constant 0 : i32
    %c0_i32_1 = arith.constant 0 : i32
    return %c0_i32, %c0_i32_0 : i32, i32
  }
  func.func @transform_4(%arg0: i32) -> (i32, i32) {
    %c0_i32 = arith.constant 0 : i32
    %c0_i32_0 = arith.constant 0 : i32
    return %arg0, %c0_i32 : i32, i32
  }
}

</mosaic_0001>

<bundles_post_ra>
// kernel: _lambda_.16
= control target key start
LH: loop header
LB: loop body
LE: loop exit
PB: predicated region body
PF: predicated region fallthrough
CT: control target
= control target key end

     0   :  { %vm338_vm0 = vcmask 1041408   ;;  %vm241_vm1 = vcmask 31744   ;;  %vm575_vm2 = vcmask 60416   ;;  %vm644_vm3 = vcmask 64512   ;;  %s2791_s1 = inlined_call_operand.vmem [shape: bf16[1,4,8], index: 1, kind: input, shape index: {}]   ;;  %s2792_s0 = inlined_call_operand.vmem [shape: bf16[1,512,4], index: 0, kind: input, shape index: {}]   ;;  %s2793_s2 = inlined_call_operand.vmem [shape: bf16[1,512,8], index: 2, kind: output, shape index: {0}]   ;;  %s2794_s3 = inlined_call_operand.vmem [shape: f32[1,1,8], index: 3, kind: output, shape index: {1}]   ;;  %s2795_s4 = inlined_call_operand.vmem [shape: f32[1,1,8], index: 4, kind: output, shape index: {2}]   ;;  %s2796_s5 = inlined_call_operand.vmem [shape: f32[1,1,8], index: 5, kind: output, shape index: {3}]  }
   0x1   :  { %v80_v0 = vld [vmem:[%s2791_s1] sm:$0x3]  ;;  %v1366_v4 = vld [vmem:[%s2792_s0 + $0x8] sm:$0xff]  ;;  %v1367_v7 = vld [vmem:[%s2792_s0 + $0x10] sm:$0xff]  ;;  %vm779_vm4 = vcmask 57344  }
   0x2   :  { %v340_v1 = vsel %vm338_vm0, %v80_v0, 0  ;;  %v1365_v2 = vld [vmem:[%s2792_s0] sm:$0xff]  ;;  %v1374_v5 = vld [vmem:[%s2792_s0 + $0x48] sm:$0xff]  ;;  %v1375_v8 = vld [vmem:[%s2792_s0 + $0x50] sm:$0xff] }
   0x3   :  { %v1373_v3 = vld [vmem:[%s2792_s0 + $0x40] sm:$0xff]  ;;  %349 = vmatpush.bf16.msra.mxu0 %v340_v1  ;;  %1397 = vmatpush.bf16.msra.mxu1 %v340_v1  ;;  %v1382_v9 = vld [vmem:[%s2792_s0 + $0x88] sm:$0xff]  ;;  %v1368_v10 = vld [vmem:[%s2792_s0 + $0x18] sm:$0xff] }
   0x4   :  { %1398 = vmatpush.bf16.msra.mxu2 %v340_v1  ;;  %1399 = vmatpush.bf16.msra.mxu3 %v340_v1  ;;  %v1381_v6 = vld [vmem:[%s2792_s0 + $0x80] sm:$0xff]  ;;  %v1376_v11 = vld [vmem:[%s2792_s0 + $0x58] sm:$0xff]  ;;  %v1383_v12 = vld [vmem:[%s2792_s0 + $0x90] sm:$0xff] }
   0x5   :  { %v1389_v13 = vld [vmem:[%s2792_s0 + $0xc0] sm:$0xff]  ;;  %v1384_v16 = vld [vmem:[%s2792_s0 + $0x98] sm:$0xff]  ;;  %v1390_v17 = vld [vmem:[%s2792_s0 + $0xc8] sm:$0xff] }
   0x6   :  { %1333 = vmatmul.msk.bf16.vlgmr.msra.gmra.mxu0 %vm241_vm1, %v1365_v2  ;;  %1341 = vmatmul.msk.bf16.vlgmr.msra.gmra.mxu1 %vm241_vm1, %v1373_v3  ;;  %v1369_v14 = vld [vmem:[%s2792_s0 + $0x20] sm:$0xff]  ;;  %v1370_v18 = vld [vmem:[%s2792_s0 + $0x28] sm:$0xff]  ;;  %v1391_v21 = vld [vmem:[%s2792_s0 + $0xd0] sm:$0xff] }
   0x7   :  { %1349 = vmatmul.msk.bf16.vlgmr.msra.gmra.mxu2 %vm241_vm1, %v1381_v6  ;;  %1357 = vmatmul.msk.bf16.vlgmr.msra.gmra.mxu3 %vm241_vm1, %v1389_v13  ;;  %v1377_v15 = vld [vmem:[%s2792_s0 + $0x60] sm:$0xff]  ;;  %v1378_v19 = vld [vmem:[%s2792_s0 + $0x68] sm:$0xff]  ;;  %v1371_v22 = vld [vmem:[%s2792_s0 + $0x30] sm:$0xff] }
   0x8   :  { %v1385_v20 = vld [vmem:[%s2792_s0 + $0xa0] sm:$0xff]  ;;  %v1379_v23 = vld [vmem:[%s2792_s0 + $0x70] sm:$0xff]  ;;  %v1386_v24 = vld [vmem:[%s2792_s0 + $0xa8] sm:$0xff] }
   0x9   :  { %v1392_v25 = vld [vmem:[%s2792_s0 + $0xd8] sm:$0xff]  ;;  %v1387_v28 = vld [vmem:[%s2792_s0 + $0xb0] sm:$0xff]  ;;  %v1393_v29 = vld [vmem:[%s2792_s0 + $0xe0] sm:$0xff] }
   0xa   :  { %v1372_v26 = vld [vmem:[%s2792_s0 + $0x38] sm:$0xff]  ;;  %v1394_v35 = vld [vmem:[%s2792_s0 + $0xe8] sm:$0xff]  ;;  %v1395_v44 = vld [vmem:[%s2792_s0 + $0xf0] sm:$0xff] }
   0xb   :  { %v1380_v27 = vld [vmem:[%s2792_s0 + $0x78] sm:$0xff] }
   0xc   :  { %v1388_v34 = vld [vmem:[%s2792_s0 + $0xb8] sm:$0xff] }
   0xd   :  { %v1396_v57 = vld [vmem:[%s2792_s0 + $0xf8] sm:$0xff] }
  0x16   :  { %1334 = vmatmul.msk.bf16.gmra.mxu0 %vm241_vm1, %v1366_v4  ;;  %1342 = vmatmul.msk.bf16.gmra.mxu1 %vm241_vm1, %v1374_v5 }
  0x17   :  { %1350 = vmatmul.msk.bf16.gmra.mxu2 %vm241_vm1, %v1382_v9  ;;  %1358 = vmatmul.msk.bf16.gmra.mxu3 %vm241_vm1, %v1390_v17 }
  0x26   :  { %1335 = vmatmul.msk.bf16.gmra.mxu0 %vm241_vm1, %v1367_v7  ;;  %1343 = vmatmul.msk.bf16.gmra.mxu1 %vm241_vm1, %v1375_v8 }
  0x27   :  { %1351 = vmatmul.msk.bf16.gmra.mxu2 %vm241_vm1, %v1383_v12  ;;  %1359 = vmatmul.msk.bf16.gmra.mxu3 %vm241_vm1, %v1391_v21 }
  0x36   :  { %1336 = vmatmul.msk.bf16.gmra.mxu0 %vm241_vm1, %v1368_v10  ;;  %1344 = vmatmul.msk.bf16.gmra.mxu1 %vm241_vm1, %v1376_v11 }
  0x37   :  { %1352 = vmatmul.msk.bf16.gmra.mxu2 %vm241_vm1, %v1384_v16  ;;  %1360 = vmatmul.msk.bf16.gmra.mxu3 %vm241_vm1, %v1392_v25 }
  0x46   :  { %1337 = vmatmul.msk.bf16.gmra.mxu0 %vm241_vm1, %v1369_v14  ;;  %1345 = vmatmul.msk.bf16.gmra.mxu1 %vm241_vm1, %v1377_v15 }
  0x47   :  { %1353 = vmatmul.msk.bf16.gmra.mxu2 %vm241_vm1, %v1385_v20  ;;  %1361 = vmatmul.msk.bf16.gmra.mxu3 %vm241_vm1, %v1393_v29 }
  0x56   :  { %1338 = vmatmul.msk.bf16.gmra.mxu0 %vm241_vm1, %v1370_v18  ;;  %1346 = vmatmul.msk.bf16.gmra.mxu1 %vm241_vm1, %v1378_v19 }
  0x57   :  { %1354 = vmatmul.msk.bf16.gmra.mxu2 %vm241_vm1, %v1386_v24  ;;  %1362 = vmatmul.msk.bf16.gmra.mxu3 %vm241_vm1, %v1394_v35 }
  0x66   :  { %1339 = vmatmul.msk.bf16.gmra.mxu0 %vm241_vm1, %v1371_v22  ;;  %1347 = vmatmul.msk.bf16.gmra.mxu1 %vm241_vm1, %v1379_v23 }
  0x67   :  { %1355 = vmatmul.msk.bf16.gmra.mxu2 %vm241_vm1, %v1387_v28  ;;  %1363 = vmatmul.msk.bf16.gmra.mxu3 %vm241_vm1, %v1395_v44 }
  0x76   :  { %1340 = vmatmul.msk.bf16.gmra.mxu0 %vm241_vm1, %v1372_v26  ;;  %1348 = vmatmul.msk.bf16.gmra.mxu1 %vm241_vm1, %v1380_v27 }
  0x77   :  { %1356 = vmatmul.msk.bf16.gmra.mxu2 %vm241_vm1, %v1388_v34  ;;  %1364 = vmatmul.msk.bf16.gmra.mxu3 %vm241_vm1, %v1396_v57 }
  0x83   :  { %v1548_v30 = vpop.f32.mrf.mxu0  ;;  %v1550_v31 = vpop.f32.mrf.mxu1 }
  0x84   :  { %2815 = vst [vmem:[#allocation2_spill] sm:$0xff] %v1550_v31  ;;  %v511_v32 = vpack.c.bf16 %v1548_v30, %v1548_v30  ;;  %v527_v33 = vpack.c.bf16 %v1550_v31, %v1550_v31  ;;  %v645_v57 = vsel %vm644_vm3, %v1548_v30, 0.0 }
  0x86   :  { %576 = vst.msk [vmem:[%s2793_s2] sm:$0xf] %vm575_vm2, %v511_v32 }
  0x87   :  { %592 = vst.msk [vmem:[%s2793_s2 + $0x40] sm:$0xf] %vm575_vm2, %v527_v33 }
  0x8a   :  { %v1616_v49 = vpop.f32.mrf.mxu2  ;;  %v1718_v11 = vpop.f32.mrf.mxu3 }
  0x8b   :  { %v1572_v36 = vpop.f32.mrf.mxu0  ;;  %v1574_v37 = vpop.f32.mrf.mxu1  ;;  %v543_v50 = vpack.c.bf16 %v1616_v49, %v1616_v49  ;;  %v559_v13 = vpack.c.bf16 %v1718_v11, %v1718_v11 }
  0x8c   :  { %v512_v38 = vpack.c.bf16 %v1572_v36, %v1572_v36  ;;  %v528_v39 = vpack.c.bf16 %v1574_v37, %v1574_v37 }
  0x8d   :  { %608 = vst.msk [vmem:[%s2793_s2 + $0x80] sm:$0xf] %vm575_vm2, %v543_v50 }
  0x8e   :  { %577 = vst.msk [vmem:[%s2793_s2 + $0x4] sm:$0xf] %vm575_vm2, %v512_v38 }
  0x8f   :  { %593 = vst.msk [vmem:[%s2793_s2 + $0x44] sm:$0xf] %vm575_vm2, %v528_v39 }
  0x90   :  { %624 = vst.msk [vmem:[%s2793_s2 + $0xc0] sm:$0xf] %vm575_vm2, %v559_v13 }
  0x92   :  { %v1640_v55 = vpop.f32.mrf.mxu2  ;;  %v1750_v19 = vpop.f32.mrf.mxu3 }
  0x93   :  { %v1588_v40 = vpop.f32.mrf.mxu0  ;;  %v1590_v41 = vpop.f32.mrf.mxu1  ;;  %v544_v56 = vpack.c.bf16 %v1640_v55, %v1640_v55  ;;  %v560_v21 = vpack.c.bf16 %v1750_v19, %v1750_v19 }
  0x94   :  { %v513_v42 = vpack.c.bf16 %v1588_v40, %v1588_v40  ;;  %v529_v43 = vpack.c.bf16 %v1590_v41, %v1590_v41 }
  0x95   :  { %609 = vst.msk [vmem:[%s2793_s2 + $0x84] sm:$0xf] %vm575_vm2, %v544_v56  ;;  %v646_v56 = vsel %vm644_vm3, %v1572_v36, 0.0 }
  0x96   :  { %578 = vst.msk [vmem:[%s2793_s2 + $0x8] sm:$0xf] %vm575_vm2, %v513_v42 }
  0x97   :  { %594 = vst.msk [vmem:[%s2793_s2 + $0x48] sm:$0xf] %vm575_vm2, %v529_v43 }
  0x98   :  { %625 = vst.msk [vmem:[%s2793_s2 + $0xc4] sm:$0xf] %vm575_vm2, %v560_v21 }
  0x9a   :  { %v1668_v62 = vpop.f32.mrf.mxu2  ;;  %v1782_v27 = vpop.f32.mrf.mxu3 }
  0x9b   :  { %v1608_v45 = vpop.f32.mrf.mxu0  ;;  %v1610_v46 = vpop.f32.mrf.mxu1  ;;  %v545_v63 = vpack.c.bf16 %v1668_v62, %v1668_v62  ;;  %v561_v29 = vpack.c.bf16 %v1782_v27, %v1782_v27 }
  0x9c   :  { %v514_v47 = vpack.c.bf16 %v1608_v45, %v1608_v45  ;;  %v530_v48 = vpack.c.bf16 %v1610_v46, %v1610_v46 }
  0x9d   :  { %610 = vst.msk [vmem:[%s2793_s2 + $0x88] sm:$0xf] %vm575_vm2, %v545_v63  ;;  %v650_v63 = vsel %vm644_vm3, %v1608_v45, 0.0 }
  0x9e   :  { %579 = vst.msk [vmem:[%s2793_s2 + $0xc] sm:$0xf] %vm575_vm2, %v514_v47 }
  0x9f   :  { %595 = vst.msk [vmem:[%s2793_s2 + $0x4c] sm:$0xf] %vm575_vm2, %v530_v48 }
  0xa0   :  { %626 = vst.msk [vmem:[%s2793_s2 + $0xc8] sm:$0xf] %vm575_vm2, %v561_v29 }
  0xa2   :  { %v1692_v4 = vpop.f32.mrf.mxu2  ;;  %v1814_v39 = vpop.f32.mrf.mxu3 }
  0xa3   :  { %v1632_v51 = vpop.f32.mrf.mxu0  ;;  %v1634_v52 = vpop.f32.mrf.mxu1  ;;  %v546_v5 = vpack.c.bf16 %v1692_v4, %v1692_v4  ;;  %v562_v43 = vpack.c.bf16 %v1814_v39, %v1814_v39 }
  0xa4   :  { %2816 = vst [vmem:[#allocation3_spill] sm:$0xff] %v1634_v52  ;;  %v515_v53 = vpack.c.bf16 %v1632_v51, %v1632_v51  ;;  %v531_v54 = vpack.c.bf16 %v1634_v52, %v1634_v52 }
  0xa5   :  { %611 = vst.msk [vmem:[%s2793_s2 + $0x8c] sm:$0xf] %vm575_vm2, %v546_v5 }
  0xa6   :  { %580 = vst.msk [vmem:[%s2793_s2 + $0x10] sm:$0xf] %vm575_vm2, %v515_v53 }
  0xa7   :  { %596 = vst.msk [vmem:[%s2793_s2 + $0x50] sm:$0xf] %vm575_vm2, %v531_v54 }
  0xa8   :  { %627 = vst.msk [vmem:[%s2793_s2 + $0xcc] sm:$0xf] %vm575_vm2, %v562_v43 }
  0xaa   :  { %v1716_v10 = vpop.f32.mrf.mxu2  ;;  %v1846_v54 = vpop.f32.mrf.mxu3 }
  0xab   :  { %v1660_v58 = vpop.f32.mrf.mxu0  ;;  %v1662_v59 = vpop.f32.mrf.mxu1  ;;  %2820 = vst [vmem:[#allocation7_spill] sm:$0xff] %v1716_v10  ;;  %v547_v12 = vpack.c.bf16 %v1716_v10, %v1716_v10  ;;  %v563_v21 = vpack.c.bf16 %v1846_v54, %v1846_v54 }
  0xac   :  { %2817 = vst [vmem:[#allocation4_spill] sm:$0xff] %v1662_v59  ;;  %v516_v60 = vpack.c.bf16 %v1660_v58, %v1660_v58  ;;  %v532_v61 = vpack.c.bf16 %v1662_v59, %v1662_v59 }
  0xad   :  { %612 = vst.msk [vmem:[%s2793_s2 + $0x90] sm:$0xf] %vm575_vm2, %v547_v12 }
  0xae   :  { %581 = vst.msk [vmem:[%s2793_s2 + $0x14] sm:$0xf] %vm575_vm2, %v516_v60  ;;  %v648_v60 = vsel %vm644_vm3, %v1588_v40, 0.0 }
  0xaf   :  { %597 = vst.msk [vmem:[%s2793_s2 + $0x54] sm:$0xf] %vm575_vm2, %v532_v61  ;;  %v647_v61 = vadd.f32 %v646_v56, %v645_v57 }
  0xb0   :  { %628 = vst.msk [vmem:[%s2793_s2 + $0xd0] sm:$0xf] %vm575_vm2, %v563_v21 }
  0xb2   :  { %v1748_v18 = vpop.f32.mrf.mxu2 }
  0xb3   :  { %v1684_v0 = vpop.f32.mrf.mxu0  ;;  %v1686_v1 = vpop.f32.mrf.mxu1  ;;  %v548_v20 = vpack.c.bf16 %v1748_v18, %v1748_v18 }
  0xb4   :  { %2818 = vst [vmem:[#allocation5_spill] sm:$0xff] %v1686_v1  ;;  %v517_v2 = vpack.c.bf16 %v1684_v0, %v1684_v0  ;;  %v533_v3 = vpack.c.bf16 %v1686_v1, %v1686_v1 }
  0xb5   :  { %613 = vst.msk [vmem:[%s2793_s2 + $0x94] sm:$0xf] %vm575_vm2, %v548_v20 }
  0xb6   :  { %582 = vst.msk [vmem:[%s2793_s2 + $0x18] sm:$0xf] %vm575_vm2, %v517_v2  ;;  %v649_v2 = vadd.f32 %v648_v60, %v647_v61 }
  0xb7   :  { %598 = vst.msk [vmem:[%s2793_s2 + $0x58] sm:$0xf] %vm575_vm2, %v533_v3 }
  0xba   :  { %v1780_v26 = vpop.f32.mrf.mxu2 }
  0xbb   :  { %v1708_v6 = vpop.f32.mrf.mxu0  ;;  %v1710_v7 = vpop.f32.mrf.mxu1  ;;  %v549_v28 = vpack.c.bf16 %v1780_v26, %v1780_v26 }
  0xbc   :  { %2819 = vst [vmem:[#allocation6_spill] sm:$0xff] %v1710_v7  ;;  %v518_v8 = vpack.c.bf16 %v1708_v6, %v1708_v6  ;;  %v534_v9 = vpack.c.bf16 %v1710_v7, %v1710_v7 }
  0xbd   :  { %614 = vst.msk [vmem:[%s2793_s2 + $0x98] sm:$0xf] %vm575_vm2, %v549_v28 }
  0xbe   :  { %583 = vst.msk [vmem:[%s2793_s2 + $0x1c] sm:$0xf] %vm575_vm2, %v518_v8  ;;  %v652_v8 = vsel %vm644_vm3, %v1632_v51, 0.0 }
  0xbf   :  { %599 = vst.msk [vmem:[%s2793_s2 + $0x5c] sm:$0xf] %vm575_vm2, %v534_v9 }
  0xc2   :  { %v1812_v38 = vpop.f32.mrf.mxu2 }
  0xc3   :  { %v1740_v14 = vpop.f32.mrf.mxu0  ;;  %v1742_v15 = vpop.f32.mrf.mxu1  ;;  %2821 = vst [vmem:[#allocation8_spill] sm:$0xff] %v1812_v38  ;;  %v550_v42 = vpack.c.bf16 %v1812_v38, %v1812_v38 }
  0xc4   :  { %v519_v16 = vpack.c.bf16 %v1740_v14, %v1740_v14  ;;  %v535_v17 = vpack.c.bf16 %v1742_v15, %v1742_v15  ;;  %v660_v56 = vsel %vm644_vm3, %v1740_v14, 0.0 }
  0xc5   :  { %615 = vst.msk [vmem:[%s2793_s2 + $0x9c] sm:$0xf] %vm575_vm2, %v550_v42  ;;  %v658_v42 = vsel %vm644_vm3, %v1708_v6, 0.0 }
  0xc6   :  { %584 = vst.msk [vmem:[%s2793_s2 + $0x20] sm:$0xf] %vm575_vm2, %v519_v16  ;;  %v1876_v16 = vpop.f32.mrf.mxu3 }
  0xc7   :  { %600 = vst.msk [vmem:[%s2793_s2 + $0x60] sm:$0xf] %vm575_vm2, %v535_v17  ;;  %v651_v17 = vadd.f32 %v650_v63, %v649_v2  ;;  %v564_v29 = vpack.c.bf16 %v1876_v16, %v1876_v16 }
  0xc9   :  { %v653_v28 = vadd.f32 %v652_v8, %v651_v17  ;;  %629 = vst.msk [vmem:[%s2793_s2 + $0xd4] sm:$0xf] %vm575_vm2, %v564_v29 }
  0xca   :  { %v1844_v53 = vpop.f32.mrf.mxu2 }
  0xcb   :  { %v1772_v22 = vpop.f32.mrf.mxu0  ;;  %v1774_v23 = vpop.f32.mrf.mxu1  ;;  %v551_v20 = vpack.c.bf16 %v1844_v53, %v1844_v53 }
  0xcc   :  { %v520_v24 = vpack.c.bf16 %v1772_v22, %v1772_v22  ;;  %v536_v25 = vpack.c.bf16 %v1774_v23, %v1774_v23  ;;  %v662_v8 = vsel %vm644_vm3, %v1772_v22, 0.0 }
  0xcd   :  { %616 = vst.msk [vmem:[%s2793_s2 + $0xa0] sm:$0xf] %vm575_vm2, %v551_v20 }
  0xce   :  { %585 = vst.msk [vmem:[%s2793_s2 + $0x24] sm:$0xf] %vm575_vm2, %v520_v24  ;;  %v654_v24 = vsel %vm644_vm3, %v1660_v58, 0.0  ;;  %v1928_v63 = vpop.f32.mrf.mxu3 }
  0xcf   :  { %601 = vst.msk [vmem:[%s2793_s2 + $0x64] sm:$0xf] %vm575_vm2, %v536_v25 }
  0xd2   :  { %v1874_v13 = vpop.f32.mrf.mxu2 }
  0xd3   :  { %v1804_v32 = vpop.f32.mrf.mxu0  ;;  %v1806_v33 = vpop.f32.mrf.mxu1  ;;  %v552_v25 = vpack.c.bf16 %v1874_v13, %v1874_v13 }
  0xd4   :  { %v521_v34 = vpack.c.bf16 %v1804_v32, %v1804_v32  ;;  %v537_v35 = vpack.c.bf16 %v1806_v33, %v1806_v33 }
  0xd5   :  { %617 = vst.msk [vmem:[%s2793_s2 + $0xa4] sm:$0xf] %vm575_vm2, %v552_v25 }
  0xd6   :  { %586 = vst.msk [vmem:[%s2793_s2 + $0x28] sm:$0xf] %vm575_vm2, %v521_v34  ;;  %v656_v34 = vsel %vm644_vm3, %v1684_v0, 0.0 }
  0xd7   :  { %602 = vst.msk [vmem:[%s2793_s2 + $0x68] sm:$0xf] %vm575_vm2, %v537_v35  ;;  %v655_v35 = vadd.f32 %v654_v24, %v653_v28 }
  0xd9   :  { %v657_v43 = vadd.f32 %v656_v34, %v655_v35 }
  0xda   :  { %v1926_v61 = vpop.f32.mrf.mxu2 }
  0xdb   :  { %v1836_v44 = vpop.f32.mrf.mxu0  ;;  %v1838_v47 = vpop.f32.mrf.mxu1  ;;  %v659_v2 = vadd.f32 %v658_v42, %v657_v43 }
  0xdc   :  { %2822 = vst [vmem:[#allocation9_spill] sm:$0xff] %v1838_v47  ;;  %v522_v48 = vpack.c.bf16 %v1836_v44, %v1836_v44  ;;  %v538_v50 = vpack.c.bf16 %v1838_v47, %v1838_v47  ;;  %v666_v20 = vsel %vm644_vm3, %v1836_v44, 0.0  ;;  %v1956_v42 = vpop.f32.mrf.mxu3 }
  0xde   :  { %587 = vst.msk [vmem:[%s2793_s2 + $0x2c] sm:$0xf] %vm575_vm2, %v522_v48 }
  0xdf   :  { %603 = vst.msk [vmem:[%s2793_s2 + $0x6c] sm:$0xf] %vm575_vm2, %v538_v50 }
  0xe2   :  { %v1954_v35 = vpop.f32.mrf.mxu2 }
  0xe3   :  { %v1864_v3 = vpop.f32.mrf.mxu0  ;;  %v1866_v5 = vpop.f32.mrf.mxu1 }
  0xe4   :  { %2823 = vst [vmem:[#allocation10_spill] sm:$0xff] %v1866_v5  ;;  %v523_v9 = vpack.c.bf16 %v1864_v3, %v1864_v3  ;;  %v539_v12 = vpack.c.bf16 %v1866_v5, %v1866_v5  ;;  %v668_v28 = vsel %vm644_vm3, %v1864_v3, 0.0 }
  0xe6   :  { %588 = vst.msk [vmem:[%s2793_s2 + $0x30] sm:$0xf] %vm575_vm2, %v523_v9  ;;  %v661_v9 = vadd.f32 %v660_v56, %v659_v2  ;;  %v553_v56 = vpack.c.bf16 %v1926_v61, %v1926_v61  ;;  %v554_v2 = vpack.c.bf16 %v1954_v35, %v1954_v35 }
  0xe7   :  { %604 = vst.msk [vmem:[%s2793_s2 + $0x70] sm:$0xf] %vm575_vm2, %v539_v12  ;;  %v664_v12 = vsel %vm644_vm3, %v1804_v32, 0.0 }
  0xe8   :  { %v663_v17 = vadd.f32 %v662_v8, %v661_v9  ;;  %v566_v9 = vpack.c.bf16 %v1956_v42, %v1956_v42  ;;  %618 = vst.msk [vmem:[%s2793_s2 + $0xa8] sm:$0xf] %vm575_vm2, %v553_v56 }
  0xe9   :  { %619 = vst.msk [vmem:[%s2793_s2 + $0xac] sm:$0xf] %vm575_vm2, %v554_v2  ;;  %v676_v2 = vsel %vm644_vm3, %v1550_v31, 0.0 }
  0xea   :  { %v665_v21 = vadd.f32 %v664_v12, %v663_v17  ;;  %631 = vst.msk [vmem:[%s2793_s2 + $0xdc] sm:$0xf] %vm575_vm2, %v566_v9  ;;  %v2004_v56 = vpop.f32.mrf.mxu2  ;;  %v678_v9 = vsel %vm644_vm3, %v1574_v37, 0.0 }
  0xeb   :  { %v1912_v48 = vpop.f32.mrf.mxu0  ;;  %v1914_v50 = vpop.f32.mrf.mxu1 }
  0xec   :  { %2824 = vst [vmem:[#allocation11_spill] sm:$0xff] %v1914_v50  ;;  %v524_v57 = vpack.c.bf16 %v1912_v48, %v1912_v48  ;;  %v540_v60 = vpack.c.bf16 %v1914_v50, %v1914_v50  ;;  %v667_v43 = vadd.f32 %v666_v20, %v665_v21 }
  0xee   :  { %589 = vst.msk [vmem:[%s2793_s2 + $0x34] sm:$0xf] %vm575_vm2, %v524_v57  ;;  %v565_v57 = vpack.c.bf16 %v1928_v63, %v1928_v63  ;;  %v669_v8 = vadd.f32 %v668_v28, %v667_v43 }
  0xef   :  { %605 = vst.msk [vmem:[%s2793_s2 + $0x74] sm:$0xf] %vm575_vm2, %v540_v60  ;;  %v670_v60 = vsel %vm644_vm3, %v1912_v48, 0.0 }
  0xf0   :  { %v671_v17 = vadd.f32 %v670_v60, %v669_v8  ;;  %630 = vst.msk [vmem:[%s2793_s2 + $0xd8] sm:$0xf] %vm575_vm2, %v565_v57  ;;  %v2006_v57 = vpop.f32.mrf.mxu3 }
  0xf3   :  { %v1944_v24 = vpop.f32.mrf.mxu0  ;;  %v1946_v25 = vpop.f32.mrf.mxu1 }
  0xf4   :  { %v525_v29 = vpack.c.bf16 %v1944_v24, %v1944_v24  ;;  %v541_v34 = vpack.c.bf16 %v1946_v25, %v1946_v25  ;;  %v672_v12 = vsel %vm644_vm3, %v1944_v24, 0.0 }
  0xf5   :  { %v673_v20 = vadd.f32 %v672_v12, %v671_v17  ;;  %v680_v17 = vsel %vm644_vm3, %v1590_v41, 0.0 }
  0xf6   :  { %590 = vst.msk [vmem:[%s2793_s2 + $0x38] sm:$0xf] %vm575_vm2, %v525_v29 }
  0xf7   :  { %606 = vst.msk [vmem:[%s2793_s2 + $0x78] sm:$0xf] %vm575_vm2, %v541_v34 }
  0xfb   :  { %v1990_v21 = vpop.f32.mrf.mxu0  ;;  %v1992_v28 = vpop.f32.mrf.mxu1 }
  0xfc   :  { %2825 = vst [vmem:[#allocation12_spill] sm:$0xff] %v1992_v28  ;;  %v526_v29 = vpack.c.bf16 %v1990_v21, %v1990_v21  ;;  %v674_v34 = vsel %vm644_vm3, %v1990_v21, 0.0  ;;  %v542_v43 = vpack.c.bf16 %v1992_v28, %v1992_v28 }
  0xfd   :  { %v675_v60 = vadd.f32 %v674_v34, %v673_v20  ;;  %v682_v34 = vsel %vm644_vm3, %v1610_v46, 0.0 }
  0xfe   :  { %591 = vst.msk [vmem:[%s2793_s2 + $0x3c] sm:$0xf] %vm575_vm2, %v526_v29  ;;  %v555_v29 = vpack.c.bf16 %v2004_v56, %v2004_v56 }
  0xff   :  { %v677_v8 = vadd.f32 %v676_v2, %v675_v60  ;;  %607 = vst.msk [vmem:[%s2793_s2 + $0x7c] sm:$0xf] %vm575_vm2, %v542_v43  ;;  %v567_v60 = vpack.c.bf16 %v2006_v57, %v2006_v57  ;;  %v2028_v2 = vpop.f32.mrf.mxu2  ;;  %v2030_v43 = vpop.f32.mrf.mxu3 }
 0x100   :  { %2826 = vst [vmem:[#allocation13_spill] sm:$0xff] %v2028_v2 }
 0x101   :  { %v679_v12 = vadd.f32 %v678_v9, %v677_v8  ;;  %2827 = vst [vmem:[#allocation14_spill] sm:$0xff] %v2030_v43  ;;  %v556_v8 = vpack.c.bf16 %v2028_v2, %v2028_v2  ;;  %v568_v9 = vpack.c.bf16 %v2030_v43, %v2030_v43 }
 0x102   :  { %620 = vst.msk [vmem:[%s2793_s2 + $0xb0] sm:$0xf] %vm575_vm2, %v555_v29 }
 0x103   :  { %v681_v20 = vadd.f32 %v680_v17, %v679_v12  ;;  %v684_v12 = vsel %vm644_vm3, %v1634_v52, 0.0  ;;  %632 = vst.msk [vmem:[%s2793_s2 + $0xe0] sm:$0xf] %vm575_vm2, %v567_v60  ;;  %v690_v60 = vsel %vm644_vm3, %v1710_v7, 0.0 }
 0x104   :  { %621 = vst.msk [vmem:[%s2793_s2 + $0xb4] sm:$0xf] %vm575_vm2, %v556_v8  ;;  %v692_v8 = vsel %vm644_vm3, %v1742_v15, 0.0 }
 0x105   :  { %v683_v31 = vadd.f32 %v682_v34, %v681_v20  ;;  %v686_v20 = vsel %vm644_vm3, %v1662_v59, 0.0  ;;  %633 = vst.msk [vmem:[%s2793_s2 + $0xe4] sm:$0xf] %vm575_vm2, %v568_v9 }
 0x107   :  { %v685_v17 = vadd.f32 %v684_v12, %v683_v31  ;;  %v688_v31 = vsel %vm644_vm3, %v1686_v1, 0.0  ;;  %v2060_v12 = vpop.f32.mrf.mxu2  ;;  %v2062_v59 = vpop.f32.mrf.mxu3  ;;  %v696_v1 = vsel %vm644_vm3, %v1806_v33, 0.0 }
 0x108   :  { %2828 = vst [vmem:[#allocation15_spill] sm:$0xff] %v2062_v59  ;;  %v557_v7 = vpack.c.bf16 %v2060_v12, %v2060_v12 }
 0x109   :  { %v687_v34 = vadd.f32 %v686_v20, %v685_v17  ;;  %v694_v20 = vsel %vm644_vm3, %v1774_v23, 0.0 }
 0x10a   :  { %622 = vst.msk [vmem:[%s2793_s2 + $0xb8] sm:$0xf] %vm575_vm2, %v557_v7  ;;  %v704_v7 = vsel %vm644_vm3, %v1946_v25, 0.0 }
 0x10b   :  { %v689_v29 = vadd.f32 %v688_v31, %v687_v34  ;;  %v698_v31 = vsel %vm644_vm3, %v1838_v47, 0.0 }
 0x10d   :  { %v691_v52 = vadd.f32 %v690_v60, %v689_v29  ;;  %v569_v29 = vpack.c.bf16 %v2062_v59, %v2062_v59 }
 0x10f   :  { %v693_v17 = vadd.f32 %v692_v8, %v691_v52  ;;  %v2076_v60 = vpop.f32.mrf.mxu2  ;;  %v2078_v52 = vpop.f32.mrf.mxu3  ;;  %634 = vst.msk [vmem:[%s2793_s2 + $0xe8] sm:$0xf] %vm575_vm2, %v569_v29  ;;  %v706_v29 = vsel %vm644_vm3, %v1992_v28, 0.0 }
 0x110   :  { %2829 = vst [vmem:[#allocation16_spill] sm:$0xff] %v2078_v52 }
 0x111   :  { %v695_v9 = vadd.f32 %v694_v20, %v693_v17  ;;  %v558_v17 = vpack.c.bf16 %v2076_v60, %v2076_v60  ;;  %v700_v20 = vsel %vm644_vm3, %v1866_v5, 0.0  ;;  %v708_v5 = vsel %vm644_vm3, %v1616_v49, 0.0 }
 0x113   :  { %v697_v34 = vadd.f32 %v696_v1, %v695_v9  ;;  %v570_v1 = vpack.c.bf16 %v2078_v52, %v2078_v52  ;;  %623 = vst.msk [vmem:[%s2793_s2 + $0xbc] sm:$0xf] %vm575_vm2, %v558_v17 }
 0x115   :  { %v699_v8 = vadd.f32 %v698_v31, %v697_v34  ;;  %v702_v34 = vsel %vm644_vm3, %v1914_v50, 0.0  ;;  %635 = vst.msk [vmem:[%s2793_s2 + $0xec] sm:$0xf] %vm575_vm2, %v570_v1  ;;  %v712_v1 = vsel %vm644_vm3, %v1668_v62, 0.0 }
 0x117   :  { %v701_v9 = vadd.f32 %v700_v20, %v699_v8  ;;  %v2108_v20 = vpop.f32.mrf.mxu3 }
 0x118   :  { %2830 = vst [vmem:[#allocation17_spill] sm:$0xff] %v2108_v20 }
 0x119   :  { %v703_v31 = vadd.f32 %v702_v34, %v701_v9  ;;  %v710_v9 = vsel %vm644_vm3, %v1640_v55, 0.0 }
 0x11b   :  { %v705_v8 = vadd.f32 %v704_v7, %v703_v31  ;;  %v714_v31 = vsel %vm644_vm3, %v1692_v4, 0.0  ;;  %v571_v7 = vpack.c.bf16 %v2108_v20, %v2108_v20 }
 0x11d   :  { %v707_v50 = vadd.f32 %v706_v29, %v705_v8  ;;  %636 = vst.msk [vmem:[%s2793_s2 + $0xf0] sm:$0xf] %vm575_vm2, %v571_v7 }
 0x11f   :  { %v709_v17 = vadd.f32 %v708_v5, %v707_v50  ;;  %v2120_v28 = vpop.f32.mrf.mxu3  ;;  %v716_v50 = vsel %vm644_vm3, %v1716_v10, 0.0 }
 0x120   :  { %v572_v5 = vpack.c.bf16 %v2120_v28, %v2120_v28 }
 0x121   :  { %v711_v34 = vadd.f32 %v710_v9, %v709_v17  ;;  %v720_v9 = vsel %vm644_vm3, %v1780_v26, 0.0 }
 0x122   :  { %637 = vst.msk [vmem:[%s2793_s2 + $0xf4] sm:$0xf] %vm575_vm2, %v572_v5  ;;  %v726_v5 = vsel %vm644_vm3, %v1874_v13, 0.0 }
 0x123   :  { %v713_v47 = vadd.f32 %v712_v1, %v711_v34  ;;  %v722_v1 = vsel %vm644_vm3, %v1812_v38, 0.0 }
 0x125   :  { %v715_v8 = vadd.f32 %v714_v31, %v713_v47  ;;  %v718_v47 = vsel %vm644_vm3, %v1748_v18, 0.0 }
 0x127   :  { %v717_v29 = vadd.f32 %v716_v50, %v715_v8  ;;  %v2140_v31 = vpop.f32.mrf.mxu3  ;;  %v724_v8 = vsel %vm644_vm3, %v1844_v53, 0.0 }
 0x128   :  { %2831 = vst [vmem:[#allocation18_spill] sm:$0xff] %v2140_v31 }
 0x129   :  { %v719_v17 = vadd.f32 %v718_v47, %v717_v29  ;;  %v728_v29 = vsel %vm644_vm3, %v1926_v61, 0.0 }
 0x12b   :  { %v721_v34 = vadd.f32 %v720_v9, %v719_v17  ;;  %v730_v17 = vsel %vm644_vm3, %v1954_v35, 0.0  ;;  %v573_v9 = vpack.c.bf16 %v2140_v31, %v2140_v31 }
 0x12d   :  { %v723_v7 = vadd.f32 %v722_v1, %v721_v34  ;;  %638 = vst.msk [vmem:[%s2793_s2 + $0xf8] sm:$0xf] %vm575_vm2, %v573_v9  ;;  %v740_v9 = vsel %vm644_vm3, %v1718_v11, 0.0 }
 0x12f   :  { %v725_v50 = vadd.f32 %v724_v8, %v723_v7  ;;  %v2152_v38 = vpop.f32.mrf.mxu3  ;;  %v732_v7 = vsel %vm644_vm3, %v2004_v56, 0.0  ;;  %v734_v8 = vsel %vm644_vm3, %v2028_v2, 0.0  ;;  %v744_v2 = vsel %vm644_vm3, %v1782_v27, 0.0 }
 0x130   :  { %2832 = vst [vmem:[#allocation19_spill] sm:$0xff] %v2152_v38  ;;  %v574_v1 = vpack.c.bf16 %v2152_v38, %v2152_v38 }
 0x131   :  { %v727_v10 = vadd.f32 %v726_v5, %v725_v50  ;;  %v736_v5 = vsel %vm644_vm3, %v2060_v12, 0.0 }
 0x132   :  { %639 = vst.msk [vmem:[%s2793_s2 + $0xfc] sm:$0xf] %vm575_vm2, %v574_v1 }
 0x133   :  { %v729_v47 = vadd.f32 %v728_v29, %v727_v10 }
 0x135   :  { %v731_v34 = vadd.f32 %v730_v17, %v729_v47  ;;  %v738_v47 = vsel %vm644_vm3, %v2076_v60, 0.0 }
 0x137   :  { %v733_v10 = vadd.f32 %v732_v7, %v731_v34  ;;  %v742_v7 = vsel %vm644_vm3, %v1750_v19, 0.0 }
 0x139   :  { %v735_v50 = vadd.f32 %v734_v8, %v733_v10  ;;  %v746_v8 = vsel %vm644_vm3, %v1814_v39, 0.0 }
 0x13b   :  { %v737_v29 = vadd.f32 %v736_v5, %v735_v50  ;;  %v748_v5 = vsel %vm644_vm3, %v1846_v54, 0.0 }
 0x13d   :  { %v739_v17 = vadd.f32 %v738_v47, %v737_v29  ;;  %v750_v47 = vsel %vm644_vm3, %v1876_v16, 0.0 }
 0x13f   :  { %v741_v34 = vadd.f32 %v740_v9, %v739_v17  ;;  %v752_v9 = vsel %vm644_vm3, %v1928_v63, 0.0 }
 0x141   :  { %v743_v1 = vadd.f32 %v742_v7, %v741_v34  ;;  %v754_v7 = vsel %vm644_vm3, %v1956_v42, 0.0 }
 0x143   :  { %v745_v10 = vadd.f32 %v744_v2, %v743_v1  ;;  %v756_v1 = vsel %vm644_vm3, %v2006_v57, 0.0 }
 0x145   :  { %v747_v50 = vadd.f32 %v746_v8, %v745_v10  ;;  %v1402_v10 = vmov 0.0  }
 0x146   :  { %781 = vst.msk [vmem:[%s2794_s3] sm:$0x1] %vm779_vm4, %v1402_v10 }
 0x147   :  { %v749_v29 = vadd.f32 %v748_v5, %v747_v50  ;;  %782 = vst.msk [vmem:[%s2795_s4] sm:$0x1] %vm779_vm4, %v1402_v10  ;;  %v758_v50 = vsel %vm644_vm3, %v2030_v43, 0.0  ;;  %v768_v10 = vsel %vm644_vm3, %v2140_v31, 0.0 }
 0x149   :  { %v751_v17 = vadd.f32 %v750_v47, %v749_v29  ;;  %v760_v29 = vsel %vm644_vm3, %v2062_v59, 0.0 }
 0x14b   :  { %v753_v34 = vadd.f32 %v752_v9, %v751_v17  ;;  %v762_v17 = vsel %vm644_vm3, %v2078_v52, 0.0 }
 0x14d   :  { %v755_v2 = vadd.f32 %v754_v7, %v753_v34  ;;  %v764_v34 = vsel %vm644_vm3, %v2108_v20, 0.0 }
 0x14f   :  { %v757_v8 = vadd.f32 %v756_v1, %v755_v2  ;;  %v766_v2 = vsel %vm644_vm3, %v2120_v28, 0.0 }
 0x151   :  { %v759_v5 = vadd.f32 %v758_v50, %v757_v8  ;;  %v770_v50 = vsel %vm644_vm3, %v2152_v38, 0.0 }
 0x153   :  { %v761_v47 = vadd.f32 %v760_v29, %v759_v5 }
 0x155   :  { %v763_v9 = vadd.f32 %v762_v17, %v761_v47 }
 0x157   :  { %v765_v7 = vadd.f32 %v764_v34, %v763_v9 }
 0x159   :  { %v767_v1 = vadd.f32 %v766_v2, %v765_v7 }
 0x15b   :  { %v769_v8 = vadd.f32 %v768_v10, %v767_v1 }
 0x15d   :  { %v771_v5 = vadd.f32 %v770_v50, %v769_v8 }
 0x15f   :  { %v772_v29 = vrot.slane %v771_v5, 4 }
 0x161   :  { %v773_v59 = vadd.f32 %v772_v29, %v771_v5 }
 0x163   :  { %v774_v52 = vrot.slane %v773_v59, 2 }
 0x165   :  { %v775_v47 = vadd.f32 %v774_v52, %v773_v59 }
 0x167   :  { %v776_v17 = vrot.slane %v775_v47, 1 }
 0x169   :  { %v777_v43 = vadd.f32 %v776_v17, %v775_v47 }
 0x16b   :  { %v778_v20 = vmul.f32 0.001953125, %v777_v43 }
 0x16d   :  { %780 = vst.msk [vmem:[%s2796_s5] sm:$0x1] %vm779_vm4, %v778_v20 }
 0x174   :  { %v2219_v9 = vld [vmem:[%s2796_s5] ss:$0 sm:$0xff] }
 0x175   :  { %v787_v34 = vsub.f32 %v1548_v30, %v2219_v9  ;;  %v788_v7 = vsub.f32 %v1572_v36, %v2219_v9  ;;  %v789_v59 = vsub.f32 %v1588_v40, %v2219_v9  ;;  %v790_v43 = vsub.f32 %v1608_v45, %v2219_v9 }
 0x176   :  { %v2233_v1 = vsub.f32 %v1632_v51, %v2219_v9  ;;  %v2238_v36 = vsub.f32 %v1660_v58, %v2219_v9  ;;  %v2243_v45 = vsub.f32 %v1684_v0, %v2219_v9  ;;  %v2249_v51 = vsub.f32 %v1708_v6, %v2219_v9 }
 0x177   :  { %v853_v52 = vsel %vm644_vm3, %v787_v34, 0.0  ;;  %v854_v20 = vsel %vm644_vm3, %v788_v7, 0.0  ;;  %v856_v30 = vsel %vm644_vm3, %v789_v59, 0.0  ;;  %v858_v40 = vsel %vm644_vm3, %v790_v43, 0.0 }
 0x178   :  { %v855_v2 = vadd.f32 %v854_v20, %v853_v52  ;;  %v860_v50 = vsel %vm644_vm3, %v2233_v1, 0.0  ;;  %v862_v29 = vsel %vm644_vm3, %v2238_v36, 0.0  ;;  %v2255_v47 = vsub.f32 %v1740_v14, %v2219_v9 }
 0x179   :  { %v864_v0 = vsel %vm644_vm3, %v2243_v45, 0.0  ;;  %v2261_v52 = vsub.f32 %v1772_v22, %v2219_v9  ;;  %v866_v6 = vsel %vm644_vm3, %v2249_v51, 0.0 }
 0x17a   :  { %v857_v10 = vadd.f32 %v856_v30, %v855_v2  ;;  %v2267_v2 = vsub.f32 %v1804_v32, %v2219_v9  ;;  %v868_v14 = vsel %vm644_vm3, %v2255_v47, 0.0 }
 0x17b   :  { %v870_v22 = vsel %vm644_vm3, %v2261_v52, 0.0 }
 0x17c   :  { %v859_v8 = vadd.f32 %v858_v40, %v857_v10  ;;  %v2273_v10 = vsub.f32 %v1836_v44, %v2219_v9  ;;  %v872_v32 = vsel %vm644_vm3, %v2267_v2, 0.0 }
 0x17e   :  { %v861_v5 = vadd.f32 %v860_v50, %v859_v8  ;;  %v2279_v8 = vsub.f32 %v1864_v3, %v2219_v9  ;;  %v874_v44 = vsel %vm644_vm3, %v2273_v10, 0.0 }
 0x180   :  { %v863_v58 = vadd.f32 %v862_v29, %v861_v5  ;;  %v2285_v5 = vsub.f32 %v1912_v48, %v2219_v9  ;;  %v876_v3 = vsel %vm644_vm3, %v2279_v8, 0.0 }
 0x182   :  { %v865_v17 = vadd.f32 %v864_v0, %v863_v58  ;;  %v2291_v58 = vsub.f32 %v1944_v24, %v2219_v9  ;;  %v878_v48 = vsel %vm644_vm3, %v2285_v5, 0.0 }
 0x184   :  { %v867_v20 = vadd.f32 %v866_v6, %v865_v17  ;;  %v2297_v17 = vsub.f32 %v1990_v21, %v2219_v9  ;;  %v880_v24 = vsel %vm644_vm3, %v2291_v58, 0.0 }
 0x186   :  { %v869_v30 = vadd.f32 %v868_v14, %v867_v20  ;;  %v2833_v20 = vld [vmem:[#allocation2_spill] sm:$0xff]  ;;  %v882_v21 = vsel %vm644_vm3, %v2297_v17, 0.0 }
 0x187   :  { %v2303_v14 = vsub.f32 %v2833_v20, %v2219_v9 }
 0x188   :  { %v871_v40 = vadd.f32 %v870_v22, %v869_v30  ;;  %v2309_v22 = vsub.f32 %v1574_v37, %v2219_v9 }
 0x18a   :  { %v873_v50 = vadd.f32 %v872_v32, %v871_v40  ;;  %v2315_v32 = vsub.f32 %v1590_v41, %v2219_v9  ;;  %v886_v37 = vsel %vm644_vm3, %v2309_v22, 0.0 }
 0x18c   :  { %v875_v29 = vadd.f32 %v874_v44, %v873_v50  ;;  %v884_v50 = vsel %vm644_vm3, %v2303_v14, 0.0  ;;  %v888_v41 = vsel %vm644_vm3, %v2315_v32, 0.0 }
 0x18e   :  { %v877_v0 = vadd.f32 %v876_v3, %v875_v29  ;;  %v2321_v29 = vsub.f32 %v1610_v46, %v2219_v9  ;;  %v990_v3 = vmul.f32 %v787_v34, %v787_v34 }
 0x190   :  { %v879_v6 = vadd.f32 %v878_v48, %v877_v0  ;;  %v991_v0 = vmul.f32 %v788_v7, %v788_v7  ;;  %v1054_v34 = vsel %vm644_vm3, %v990_v3, 0.0  ;;  %v2837_v3 = vld [vmem:[#allocation6_spill] sm:$0xff] }
 0x191   :  { %v2350_v31 = vsub.f32 %v2837_v3, %v2219_v9 }
 0x192   :  { %v881_v30 = vadd.f32 %v880_v24, %v879_v6  ;;  %v2834_v6 = vld [vmem:[#allocation3_spill] sm:$0xff]  ;;  %v992_v24 = vmul.f32 %v789_v59, %v789_v59  ;;  %v1055_v7 = vsel %vm644_vm3, %v991_v0, 0.0 }
 0x193   :  { %v2327_v20 = vsub.f32 %v2834_v6, %v2219_v9  ;;  %v2836_v6 = vld [vmem:[#allocation5_spill] sm:$0xff] }
 0x194   :  { %v883_v40 = vadd.f32 %v882_v21, %v881_v30  ;;  %v2835_v30 = vld [vmem:[#allocation4_spill] sm:$0xff]  ;;  %v2341_v38 = vsub.f32 %v2836_v6, %v2219_v9 }
 0x195   :  { %v2333_v21 = vsub.f32 %v2835_v30, %v2219_v9  ;;  %v892_v59 = vsel %vm644_vm3, %v2327_v20, 0.0 }
 0x196   :  { %v885_v44 = vadd.f32 %v884_v50, %v883_v40  ;;  %v890_v40 = vsel %vm644_vm3, %v2321_v29, 0.0  ;;  %v993_v50 = vmul.f32 %v790_v43, %v790_v43 }
 0x197   :  { %v894_v0 = vsel %vm644_vm3, %v2333_v21, 0.0 }
 0x198   :  { %v887_v48 = vadd.f32 %v886_v37, %v885_v44  ;;  %v1056_v37 = vadd.f32 %v1055_v7, %v1054_v34 }
 0x19a   :  { %v889_v46 = vadd.f32 %v888_v41, %v887_v48  ;;  %v994_v48 = vmul.f32 %v2233_v1, %v2233_v1  ;;  %v1057_v41 = vsel %vm644_vm3, %v992_v24, 0.0  ;;  %v2359_v1 = vsub.f32 %v1742_v15, %v2219_v9 }
 0x19b   :  { %v1058_v43 = vadd.f32 %v1057_v41, %v1056_v37  ;;  %v896_v24 = vsel %vm644_vm3, %v2341_v38, 0.0  ;;  %v997_v15 = vmul.f32 %v2249_v51, %v2249_v51  ;;  %v2838_v51 = vld [vmem:[#allocation9_spill] sm:$0xff] }
 0x19c   :  { %v891_v44 = vadd.f32 %v890_v40, %v889_v46  ;;  %v995_v46 = vmul.f32 %v2238_v36, %v2238_v36  ;;  %v1059_v40 = vsel %vm644_vm3, %v993_v50, 0.0  ;;  %v1061_v37 = vsel %vm644_vm3, %v994_v48, 0.0 }
 0x19d   :  { %v1060_v7 = vadd.f32 %v1059_v40, %v1058_v43  ;;  %v2368_v36 = vsub.f32 %v1774_v23, %v2219_v9  ;;  %v898_v50 = vsel %vm644_vm3, %v2350_v31, 0.0  ;;  %v900_v48 = vsel %vm644_vm3, %v2359_v1, 0.0 }
 0x19e   :  { %v893_v30 = vadd.f32 %v892_v59, %v891_v44  ;;  %v996_v44 = vmul.f32 %v2243_v45, %v2243_v45  ;;  %v1063_v41 = vsel %vm644_vm3, %v995_v46, 0.0  ;;  %v2377_v45 = vsub.f32 %v1806_v33, %v2219_v9 }
 0x19f   :  { %v1062_v59 = vadd.f32 %v1061_v37, %v1060_v7  ;;  %v998_v23 = vmul.f32 %v2255_v47, %v2255_v47  ;;  %v902_v46 = vsel %vm644_vm3, %v2368_v36, 0.0  ;;  %v999_v33 = vmul.f32 %v2261_v52, %v2261_v52  ;;  %v2839_v47 = vld [vmem:[#allocation10_spill] sm:$0xff]  ;;  %v2840_v52 = vld [vmem:[#allocation11_spill] sm:$0xff] }
 0x1a0   :  { %v895_v34 = vadd.f32 %v894_v0, %v893_v30  ;;  %v1065_v3 = vsel %vm644_vm3, %v996_v44, 0.0  ;;  %v1067_v7 = vsel %vm644_vm3, %v997_v15, 0.0  ;;  %v904_v44 = vsel %vm644_vm3, %v2377_v45, 0.0 }
 0x1a1   :  { %v1064_v43 = vadd.f32 %v1063_v41, %v1062_v59  ;;  %v1000_v59 = vmul.f32 %v2267_v2, %v2267_v2  ;;  %v2413_v2 = vsub.f32 %v1946_v25, %v2219_v9  ;;  %v1003_v25 = vmul.f32 %v2285_v5, %v2285_v5 }
 0x1a2   :  { %v897_v6 = vadd.f32 %v896_v24, %v895_v34  ;;  %v2386_v34 = vsub.f32 %v2838_v51, %v2219_v9  ;;  %v1002_v51 = vmul.f32 %v2279_v8, %v2279_v8  ;;  %v2431_v8 = vsub.f32 %v1616_v49, %v2219_v9 }
 0x1a3   :  { %v1066_v40 = vadd.f32 %v1065_v3, %v1064_v43  ;;  %v2404_v43 = vsub.f32 %v2840_v52, %v2219_v9  ;;  %v1071_v3 = vsel %vm644_vm3, %v999_v33, 0.0  ;;  %v2440_v5 = vsub.f32 %v1640_v55, %v2219_v9 }
 0x1a4   :  { %v899_v30 = vadd.f32 %v898_v50, %v897_v6  ;;  %v2395_v6 = vsub.f32 %v2839_v47, %v2219_v9  ;;  %v1069_v50 = vsel %vm644_vm3, %v998_v23, 0.0  ;;  %v906_v15 = vsel %vm644_vm3, %v2386_v34, 0.0 }
 0x1a5   :  { %v1068_v37 = vadd.f32 %v1067_v7, %v1066_v40  ;;  %v910_v33 = vsel %vm644_vm3, %v2404_v43, 0.0  ;;  %v1005_v49 = vmul.f32 %v2297_v17, %v2297_v17  ;;  %v1006_v55 = vmul.f32 %v2303_v14, %v2303_v14  ;;  %v2842_v14 = vld [vmem:[#allocation7_spill] sm:$0xff] }
 0x1a6   :  { %v901_v0 = vadd.f32 %v900_v48, %v899_v30  ;;  %v1001_v48 = vmul.f32 %v2273_v10, %v2273_v10  ;;  %v908_v23 = vsel %vm644_vm3, %v2395_v6, 0.0  ;;  %v2841_v10 = vld [vmem:[#allocation12_spill] sm:$0xff]  ;;  %v2458_v17 = vsub.f32 %v1692_v4, %v2219_v9 }
 0x1a7   :  { %v1070_v30 = vadd.f32 %v1069_v50, %v1068_v37  ;;  %v2422_v37 = vsub.f32 %v2841_v10, %v2219_v9  ;;  %v1083_v10 = vsel %vm644_vm3, %v1005_v49, 0.0  ;;  %v1008_v4 = vmul.f32 %v2315_v32, %v2315_v32 }
 0x1a8   :  { %v903_v24 = vadd.f32 %v902_v46, %v901_v0  ;;  %v1073_v46 = vsel %vm644_vm3, %v1000_v59, 0.0  ;;  %v1075_v47 = vsel %vm644_vm3, %v1001_v48, 0.0  ;;  %v912_v59 = vsel %vm644_vm3, %v2413_v2, 0.0 }
 0x1a9   :  { %v1072_v40 = vadd.f32 %v1071_v3, %v1070_v30  ;;  %v1077_v30 = vsel %vm644_vm3, %v1002_v51, 0.0  ;;  %v914_v48 = vsel %vm644_vm3, %v2422_v37, 0.0  ;;  %v1079_v3 = vsel %vm644_vm3, %v1003_v25, 0.0 }
 0x1aa   :  { %v905_v41 = vadd.f32 %v904_v44, %v903_v24  ;;  %v2485_v32 = vsub.f32 %v1780_v26, %v2219_v9  ;;  %v1011_v26 = vmul.f32 %v2333_v21, %v2333_v21  ;;  %v2512_v21 = vsub.f32 %v1874_v13, %v2219_v9 }
 0x1ab   :  { %v1074_v24 = vadd.f32 %v1073_v46, %v1072_v40  ;;  %v1014_v13 = vmul.f32 %v2359_v1, %v2359_v1  ;;  %v2539_v1 = vsub.f32 %v2004_v56, %v2219_v9  ;;  %v1017_v56 = vmul.f32 %v2386_v34, %v2386_v34 }
 0x1ac   :  { %v907_v0 = vadd.f32 %v906_v15, %v905_v41  ;;  %v1004_v41 = vmul.f32 %v2291_v58, %v2291_v58  ;;  %v2449_v58 = vsub.f32 %v1668_v62, %v2219_v9  ;;  %v1007_v62 = vmul.f32 %v2309_v22, %v2309_v22 }
 0x1ad   :  { %v1076_v50 = vadd.f32 %v1075_v47, %v1074_v24  ;;  %v918_v24 = vsel %vm644_vm3, %v2440_v5, 0.0  ;;  %v2467_v47 = vsub.f32 %v2842_v14, %v2219_v9  ;;  %v2476_v22 = vsub.f32 %v1748_v18, %v2219_v9 }
 0x1ae   :  { %v909_v7 = vadd.f32 %v908_v23, %v907_v0  ;;  %v916_v23 = vsel %vm644_vm3, %v2431_v8, 0.0  ;;  %v1081_v51 = vsel %vm644_vm3, %v1004_v41, 0.0  ;;  %v1010_v18 = vmul.f32 %v2327_v20, %v2327_v20 }
 0x1af   :  { %v1078_v15 = vadd.f32 %v1077_v30, %v1076_v50  ;;  %v1085_v50 = vsel %vm644_vm3, %v1006_v55, 0.0  ;;  %v922_v30 = vsel %vm644_vm3, %v2458_v17, 0.0  ;;  %v2503_v20 = vsub.f32 %v1844_v53, %v2219_v9 }
 0x1b0   :  { %v911_v44 = vadd.f32 %v910_v33, %v909_v7  ;;  %v1013_v53 = vmul.f32 %v2350_v31, %v2350_v31  ;;  %v2530_v31 = vsub.f32 %v1954_v35, %v2219_v9  ;;  %v1016_v35 = vmul.f32 %v2377_v45, %v2377_v45 }
 0x1b1   :  { %v1080_v40 = vadd.f32 %v1079_v3, %v1078_v15  ;;  %v1087_v15 = vsel %vm644_vm3, %v1007_v62, 0.0  ;;  %v924_v3 = vsel %vm644_vm3, %v2467_v47, 0.0  ;;  %v928_v62 = vsel %vm644_vm3, %v2485_v32, 0.0 }
 0x1b2   :  { %v913_v52 = vadd.f32 %v912_v59, %v911_v44  ;;  %v920_v44 = vsel %vm644_vm3, %v2449_v58, 0.0  ;;  %v2557_v45 = vsub.f32 %v2060_v12, %v2219_v9  ;;  %v2566_v34 = vsub.f32 %v2076_v60, %v2219_v9 }
 0x1b3   :  { %v1082_v7 = vadd.f32 %v1081_v51, %v1080_v40  ;;  %v926_v51 = vsel %vm644_vm3, %v2476_v22, 0.0  ;;  %v1019_v12 = vmul.f32 %v2404_v43, %v2404_v43  ;;  %v1020_v60 = vmul.f32 %v2413_v2, %v2413_v2 }
 0x1b4   :  { %v915_v0 = vadd.f32 %v914_v48, %v913_v52  ;;  %v1009_v52 = vmul.f32 %v2321_v29, %v2321_v29  ;;  %v2843_v29 = vld [vmem:[#allocation8_spill] sm:$0xff]  ;;  %v2584_v43 = vsub.f32 %v1750_v19, %v2219_v9  ;;  %v2593_v2 = vsub.f32 %v1782_v27, %v2219_v9 }
 0x1b5   :  { %v1084_v25 = vadd.f32 %v1083_v10, %v1082_v7  ;;  %v2494_v55 = vsub.f32 %v2843_v29, %v2219_v9  ;;  %v1012_v10 = vmul.f32 %v2341_v38, %v2341_v38  ;;  %v2521_v38 = vsub.f32 %v1926_v61, %v2219_v9 }
 0x1b6   :  { %v917_v46 = vadd.f32 %v916_v23, %v915_v0  ;;  %v1089_v0 = vsel %vm644_vm3, %v1008_v4, 0.0  ;;  %v1095_v4 = vsel %vm644_vm3, %v1011_v26, 0.0  ;;  %v1015_v61 = vmul.f32 %v2368_v36, %v2368_v36  ;;  %v2844_v36 = vld [vmem:[#allocation13_spill] sm:$0xff] }
 0x1b7   :  { %v1086_v41 = vadd.f32 %v1085_v50, %v1084_v25  ;;  %v938_v26 = vsel %vm644_vm3, %v2530_v31, 0.0  ;;  %v1022_v19 = vmul.f32 %v2431_v8, %v2431_v8  ;;  %v1023_v27 = vmul.f32 %v2440_v5, %v2440_v5 }
 0x1b8   :  { %v919_v33 = vadd.f32 %v918_v24, %v917_v46  ;;  %v1091_v46 = vsel %vm644_vm3, %v1009_v52, 0.0  ;;  %v2611_v8 = vsub.f32 %v1846_v54, %v2219_v9  ;;  %v2620_v5 = vsub.f32 %v1876_v16, %v2219_v9 }
 0x1b9   :  { %v1088_v49 = vadd.f32 %v1087_v15, %v1086_v41  ;;  %v932_v41 = vsel %vm644_vm3, %v2503_v20, 0.0  ;;  %v1025_v54 = vmul.f32 %v2458_v17, %v2458_v17  ;;  %v1026_v16 = vmul.f32 %v2467_v47, %v2467_v47 }
 0x1ba   :  { %v921_v59 = vadd.f32 %v920_v44, %v919_v33  ;;  %v1093_v33 = vsel %vm644_vm3, %v1010_v18, 0.0  ;;  %v930_v44 = vsel %vm644_vm3, %v2494_v55, 0.0  ;;  %v2638_v17 = vsub.f32 %v1956_v42, %v2219_v9 }
 0x1bb   :  { %v1090_v23 = vadd.f32 %v1089_v0, %v1088_v49  ;;  %v1099_v49 = vsel %vm644_vm3, %v1013_v53, 0.0  ;;  %v936_v0 = vsel %vm644_vm3, %v2521_v38, 0.0  ;;  %v1107_v53 = vsel %vm644_vm3, %v1017_v56, 0.0 }
 0x1bc   :  { %v923_v48 = vadd.f32 %v922_v30, %v921_v59  ;;  %v1097_v30 = vsel %vm644_vm3, %v1012_v10, 0.0  ;;  %v1018_v10 = vmul.f32 %v2395_v6, %v2395_v6  ;;  %v2575_v6 = vsub.f32 %v1718_v11, %v2219_v9 }
 0x1bd   :  { %v1092_v24 = vadd.f32 %v1091_v46, %v1090_v23  ;;  %v1103_v46 = vsel %vm644_vm3, %v1015_v61, 0.0  ;;  %v1021_v11 = vmul.f32 %v2422_v37, %v2422_v37  ;;  %v2602_v37 = vsub.f32 %v1814_v39, %v2219_v9 }
 0x1be   :  { %v925_v40 = vadd.f32 %v924_v3, %v923_v48  ;;  %v934_v48 = vsel %vm644_vm3, %v2512_v21, 0.0  ;;  %v1024_v39 = vmul.f32 %v2449_v58, %v2449_v58  ;;  %v2629_v58 = vsub.f32 %v1928_v63, %v2219_v9 }
 0x1bf   :  { %v1094_v14 = vadd.f32 %v1093_v33, %v1092_v24  ;;  %v1105_v33 = vsel %vm644_vm3, %v1016_v35, 0.0  ;;  %v950_v35 = vsel %vm644_vm3, %v2584_v43, 0.0  ;;  %v1027_v63 = vmul.f32 %v2476_v22, %v2476_v22  ;;  %v2845_v22 = vld [vmem:[#allocation14_spill] sm:$0xff] }
 0x1c0   :  { %v927_v7 = vadd.f32 %v926_v51, %v925_v40  ;;  %v1101_v40 = vsel %vm644_vm3, %v1014_v13, 0.0  ;;  %v2548_v51 = vsub.f32 %v2844_v36, %v2219_v9  ;;  %v952_v36 = vsel %vm644_vm3, %v2593_v2, 0.0 }
 0x1c1   :  { %v1096_v59 = vadd.f32 %v1095_v4, %v1094_v14  ;;  %v2647_v47 = vsub.f32 %v2006_v57, %v2219_v9  ;;  %v1028_v42 = vmul.f32 %v2485_v32, %v2485_v32  ;;  %v1029_v57 = vmul.f32 %v2494_v55, %v2494_v55  ;;  %v2846_v32 = vld [vmem:[#allocation15_spill] sm:$0xff]  ;;  %v2847_v55 = vld [vmem:[#allocation16_spill] sm:$0xff] }
 0x1c2   :  { %v929_v25 = vadd.f32 %v928_v62, %v927_v7  ;;  %v940_v62 = vsel %vm644_vm3, %v2539_v1, 0.0 }
 0x1c3   :  { %v1098_v15 = vadd.f32 %v1097_v30, %v1096_v59  ;;  %v944_v59 = vsel %vm644_vm3, %v2557_v45, 0.0 }
 0x1c4   :  { %v931_v50 = vadd.f32 %v930_v44, %v929_v25  ;;  %v942_v44 = vsel %vm644_vm3, %v2548_v51, 0.0 }
 0x1c5   :  { %v1100_v18 = vadd.f32 %v1099_v49, %v1098_v15  ;;  %v1111_v15 = vsel %vm644_vm3, %v1019_v12, 0.0  ;;  %v948_v49 = vsel %vm644_vm3, %v2575_v6, 0.0  ;;  %v958_v12 = vsel %vm644_vm3, %v2620_v5, 0.0 }
 0x1c6   :  { %v933_v52 = vadd.f32 %v932_v41, %v931_v50  ;;  %v1109_v41 = vsel %vm644_vm3, %v1018_v10, 0.0 }
 0x1c7   :  { %v1102_v29 = vadd.f32 %v1101_v40, %v1100_v18  ;;  %v1115_v40 = vsel %vm644_vm3, %v1021_v11, 0.0  ;;  %v1127_v11 = vsel %vm644_vm3, %v1027_v63, 0.0 }
 0x1c8   :  { %v935_v3 = vadd.f32 %v934_v48, %v933_v52  ;;  %v946_v52 = vsel %vm644_vm3, %v2566_v34, 0.0 }
 0x1c9   :  { %v1104_v24 = vadd.f32 %v1103_v46, %v1102_v29 }
 0x1ca   :  { %v937_v23 = vadd.f32 %v936_v0, %v935_v3  ;;  %v1113_v3 = vsel %vm644_vm3, %v1020_v60, 0.0  ;;  %v1125_v60 = vsel %vm644_vm3, %v1026_v16, 0.0 }
 0x1cb   :  { %v1106_v14 = vadd.f32 %v1105_v33, %v1104_v24  ;;  %v1119_v24 = vsel %vm644_vm3, %v1023_v27, 0.0  ;;  %v956_v33 = vsel %vm644_vm3, %v2611_v8, 0.0 }
 0x1cc   :  { %v939_v7 = vadd.f32 %v938_v26, %v937_v23  ;;  %v1117_v26 = vsel %vm644_vm3, %v1022_v19, 0.0  ;;  %v1030_v19 = vmul.f32 %v2503_v20, %v2503_v20  ;;  %v2848_v20 = vld [vmem:[#allocation17_spill] sm:$0xff] }
 0x1cd   :  { %v1108_v50 = vadd.f32 %v1107_v53, %v1106_v14  ;;  %v1123_v53 = vsel %vm644_vm3, %v1025_v54, 0.0 }
 0x1ce   :  { %v941_v25 = vadd.f32 %v940_v62, %v939_v7  ;;  %v954_v7 = vsel %vm644_vm3, %v2602_v37, 0.0 }
 0x1cf   :  { %v1110_v30 = vadd.f32 %v1109_v41, %v1108_v50 }
 0x1d0   :  { %v943_v4 = vadd.f32 %v942_v44, %v941_v25  ;;  %v1121_v25 = vsel %vm644_vm3, %v1024_v39, 0.0  ;;  %v2683_v39 = vsub.f32 %v2848_v20, %v2219_v9 }
 0x1d1   :  { %v1112_v61 = vadd.f32 %v1111_v15, %v1110_v30  ;;  %v2656_v30 = vsub.f32 %v2845_v22, %v2219_v9 }
 0x1d2   :  { %v945_v13 = vadd.f32 %v944_v59, %v943_v4  ;;  %v960_v59 = vsel %vm644_vm3, %v2629_v58, 0.0 }
 0x1d3   :  { %v1114_v0 = vadd.f32 %v1113_v3, %v1112_v61  ;;  %v2665_v61 = vsub.f32 %v2846_v32, %v2219_v9  ;;  %v1129_v3 = vsel %vm644_vm3, %v1028_v42, 0.0  ;;  %v966_v27 = vsel %vm644_vm3, %v2656_v30, 0.0 }
 0x1d4   :  { %v947_v48 = vadd.f32 %v946_v52, %v945_v13  ;;  %v962_v52 = vsel %vm644_vm3, %v2638_v17, 0.0 }
 0x1d5   :  { %v1116_v29 = vadd.f32 %v1115_v40, %v1114_v0  ;;  %v1031_v40 = vmul.f32 %v2512_v21, %v2512_v21  ;;  %v2692_v21 = vsub.f32 %v2120_v28, %v2219_v9  ;;  %v1034_v28 = vmul.f32 %v2539_v1, %v2539_v1 }
 0x1d6   :  { %v949_v18 = vadd.f32 %v948_v49, %v947_v48  ;;  %v964_v49 = vsel %vm644_vm3, %v2647_v47, 0.0 }
 0x1d7   :  { %v1118_v46 = vadd.f32 %v1117_v26, %v1116_v29  ;;  %v968_v26 = vsel %vm644_vm3, %v2665_v61, 0.0 }
 0x1d8   :  { %v951_v23 = vadd.f32 %v950_v35, %v949_v18  ;;  %v2674_v35 = vsub.f32 %v2847_v55, %v2219_v9 }
 0x1d9   :  { %v1120_v10 = vadd.f32 %v1119_v24, %v1118_v46  ;;  %v1133_v46 = vsel %vm644_vm3, %v1030_v19, 0.0  ;;  %v1039_v19 = vmul.f32 %v2584_v43, %v2584_v43  ;;  %v1042_v43 = vmul.f32 %v2611_v8, %v2611_v8 }
 0x1da   :  { %v953_v56 = vadd.f32 %v952_v36, %v951_v23  ;;  %v1131_v23 = vsel %vm644_vm3, %v1029_v57, 0.0  ;;  %v970_v24 = vsel %vm644_vm3, %v2674_v35, 0.0 }
 0x1db   :  { %v1122_v44 = vadd.f32 %v1121_v25, %v1120_v10  ;;  %v1135_v10 = vsel %vm644_vm3, %v1031_v40, 0.0  ;;  %v1157_v8 = vsel %vm644_vm3, %v1042_v43, 0.0 }
 0x1dc   :  { %v955_v62 = vadd.f32 %v954_v7, %v953_v56  ;;  %v1032_v56 = vmul.f32 %v2521_v38, %v2521_v38  ;;  %v2849_v38 = vld [vmem:[#allocation18_spill] sm:$0xff] }
 0x1dd   :  { %v1124_v50 = vadd.f32 %v1123_v53, %v1122_v44  ;;  %v2701_v25 = vsub.f32 %v2849_v38, %v2219_v9  ;;  %v1046_v38 = vmul.f32 %v2647_v47, %v2647_v47 }
 0x1de   :  { %v957_v14 = vadd.f32 %v956_v33, %v955_v62  ;;  %v1033_v62 = vmul.f32 %v2530_v31, %v2530_v31  ;;  %v1137_v44 = vsel %vm644_vm3, %v1032_v56, 0.0  ;;  %v2850_v31 = vld [vmem:[#allocation19_spill] sm:$0xff] }
 0x1df   :  { %v1126_v13 = vadd.f32 %v1125_v60, %v1124_v50  ;;  %v2710_v53 = vsub.f32 %v2850_v31, %v2219_v9  ;;  %v1035_v50 = vmul.f32 %v2548_v51, %v2548_v51  ;;  %v976_v1 = vsel %vm644_vm3, %v2701_v25, 0.0 }
 0x1e0   :  { %v959_v4 = vadd.f32 %v958_v12, %v957_v14  ;;  %v972_v14 = vsel %vm644_vm3, %v2683_v39, 0.0  ;;  %v1037_v51 = vmul.f32 %v2566_v34, %v2566_v34  ;;  %v1040_v34 = vmul.f32 %v2593_v2, %v2593_v2  ;;  %v851_v2 = vld [vmem:[%s2794_s3] sm:$0x1] }
 0x1e1   :  { %v1128_v48 = vadd.f32 %v1127_v11, %v1126_v13  ;;  %v1141_v13 = vsel %vm644_vm3, %v1034_v28, 0.0  ;;  %v1143_v57 = vsel %vm644_vm3, %v1035_v50, 0.0  ;;  %v1047_v28 = vmul.f32 %v2656_v30, %v2656_v30 }
 0x1e2   :  { %v961_v41 = vadd.f32 %v960_v59, %v959_v4  ;;  %v974_v4 = vsel %vm644_vm3, %v2692_v21, 0.0  ;;  %v1139_v59 = vsel %vm644_vm3, %v1033_v62, 0.0  ;;  %v1153_v20 = vsel %vm644_vm3, %v1040_v34, 0.0 }
 0x1e3   :  { %v1130_v0 = vadd.f32 %v1129_v3, %v1128_v48  ;;  %v1038_v48 = vmul.f32 %v2575_v6, %v2575_v6  ;;  %v1147_v3 = vsel %vm644_vm3, %v1037_v51, 0.0  ;;  %v1041_v6 = vmul.f32 %v2602_v37, %v2602_v37 }
 0x1e4   :  { %v963_v15 = vadd.f32 %v962_v52, %v961_v41  ;;  %v1036_v41 = vmul.f32 %v2557_v45, %v2557_v45  ;;  %v978_v52 = vsel %vm644_vm3, %v2710_v53, 0.0  ;;  %v1167_v47 = vsel %vm644_vm3, %v1047_v28, 0.0 }
 0x1e5   :  { %v1132_v36 = vadd.f32 %v1131_v23, %v1130_v0  ;;  %v1149_v55 = vsel %vm644_vm3, %v1038_v48, 0.0  ;;  %v1151_v23 = vsel %vm644_vm3, %v1039_v19, 0.0  ;;  %v1155_v37 = vsel %vm644_vm3, %v1041_v6, 0.0 }
 0x1e6   :  { %v965_v18 = vadd.f32 %v964_v49, %v963_v15  ;;  %v1145_v32 = vsel %vm644_vm3, %v1036_v41, 0.0  ;;  %v1052_v41 = vmul.f32 %v2701_v25, %v2701_v25 }
 0x1e7   :  { %v1134_v54 = vadd.f32 %v1133_v46, %v1132_v36  ;;  %v1043_v46 = vmul.f32 %v2620_v5, %v2620_v5 }
 0x1e8   :  { %v967_v29 = vadd.f32 %v966_v27, %v965_v18 }
 0x1e9   :  { %v1136_v16 = vadd.f32 %v1135_v10, %v1134_v54 }
 0x1ea   :  { %v969_v7 = vadd.f32 %v968_v26, %v967_v29 }
 0x1eb   :  { %v1138_v63 = vadd.f32 %v1137_v44, %v1136_v16  ;;  %v1159_v16 = vsel %vm644_vm3, %v1043_v46, 0.0 }
 0x1ec   :  { %v971_v33 = vadd.f32 %v970_v24, %v969_v7  ;;  %v1044_v24 = vmul.f32 %v2629_v58, %v2629_v58 }
 0x1ed   :  { %v1140_v60 = vadd.f32 %v1139_v59, %v1138_v63  ;;  %v1165_v63 = vsel %vm644_vm3, %v1046_v38, 0.0  ;;  %v1050_v59 = vmul.f32 %v2683_v39, %v2683_v39 }
 0x1ee   :  { %v973_v12 = vadd.f32 %v972_v14, %v971_v33  ;;  %v1045_v33 = vmul.f32 %v2638_v17, %v2638_v17  ;;  %v1161_v58 = vsel %vm644_vm3, %v1044_v24, 0.0 }
 0x1ef   :  { %v1142_v22 = vadd.f32 %v1141_v13, %v1140_v60  ;;  %v1051_v60 = vmul.f32 %v2692_v21, %v2692_v21 }
 0x1f0   :  { %v975_v42 = vadd.f32 %v974_v4, %v973_v12  ;;  %v1163_v44 = vsel %vm644_vm3, %v1045_v33, 0.0  ;;  %v1048_v12 = vmul.f32 %v2665_v61, %v2665_v61  ;;  %v1049_v4 = vmul.f32 %v2674_v35, %v2674_v35 }
 0x1f1   :  { %v1144_v15 = vadd.f32 %v1143_v57, %v1142_v22  ;;  %v1173_v35 = vsel %vm644_vm3, %v1050_v59, 0.0  ;;  %v1175_v39 = vsel %vm644_vm3, %v1051_v60, 0.0 }
 0x1f2   :  { %v977_v9 = vadd.f32 %v976_v1, %v975_v42  ;;  %v1169_v30 = vsel %vm644_vm3, %v1048_v12, 0.0  ;;  %v1171_v61 = vsel %vm644_vm3, %v1049_v4, 0.0 }
 0x1f3   :  { %v1146_v49 = vadd.f32 %v1145_v32, %v1144_v15 }
 0x1f4   :  { %v979_v11 = vadd.f32 %v978_v52, %v977_v9  ;;  %v1053_v9 = vmul.f32 %v2710_v53, %v2710_v53  ;;  %v1177_v52 = vsel %vm644_vm3, %v1052_v41, 0.0 }
 0x1f5   :  { %v1148_v0 = vadd.f32 %v1147_v3, %v1146_v49 }
 0x1f6   :  { %v980_v45 = vrot.slane %v979_v11, 4  ;;  %v1179_v21 = vsel %vm644_vm3, %v1053_v9, 0.0 }
 0x1f7   :  { %v1150_v40 = vadd.f32 %v1149_v55, %v1148_v0 }
 0x1f8   :  { %v981_v18 = vadd.f32 %v980_v45, %v979_v11  ;;  %v989_v45 = vld [vmem:[%s2795_s4] sm:$0x1] }
 0x1f9   :  { %v1152_v36 = vadd.f32 %v1151_v23, %v1150_v40 }
 0x1fa   :  { %v982_v27 = vrot.slane %v981_v18, 2 }
 0x1fb   :  { %v1154_v56 = vadd.f32 %v1153_v20, %v1152_v36 }
 0x1fc   :  { %v983_v29 = vadd.f32 %v982_v27, %v981_v18 }
 0x1fd   :  { %v1156_v54 = vadd.f32 %v1155_v37, %v1154_v56 }
 0x1fe   :  { %v984_v26 = vrot.slane %v983_v29, 1 }
 0x1ff   :  { %v1158_v10 = vadd.f32 %v1157_v8, %v1156_v54 }
 0x200   :  { %v985_v7 = vadd.f32 %v984_v26, %v983_v29 }
 0x201   :  { %v1160_v5 = vadd.f32 %v1159_v16, %v1158_v10 }
 0x202   :  { %v986_v62 = vadd.f32 %v985_v7, %v851_v2 }
 0x203   :  { %v1162_v14 = vadd.f32 %v1161_v58, %v1160_v5 }
 0x204   :  { %988 = vst.msk [vmem:[%s2794_s3] sm:$0x1] %vm779_vm4, %v986_v62 }
 0x205   :  { %v1164_v17 = vadd.f32 %v1163_v44, %v1162_v14 }
 0x207   :  { %v1166_v31 = vadd.f32 %v1165_v63, %v1164_v17 }
 0x209   :  { %v1168_v50 = vadd.f32 %v1167_v47, %v1166_v31 }
 0x20b   :  { %v1170_v42 = vadd.f32 %v1169_v30, %v1168_v50 }
 0x20d   :  { %v1172_v1 = vadd.f32 %v1171_v61, %v1170_v42 }
 0x20f   :  { %v1174_v13 = vadd.f32 %v1173_v35, %v1172_v1 }
 0x211   :  { %v1176_v22 = vadd.f32 %v1175_v39, %v1174_v13 }
 0x213   :  { %v1178_v51 = vadd.f32 %v1177_v52, %v1176_v22 }
 0x215   :  { %v1180_v57 = vadd.f32 %v1179_v21, %v1178_v51 }
 0x217   :  { %v1181_v11 = vrot.slane %v1180_v57, 4 }
 0x219   :  { %v1182_v15 = vadd.f32 %v1181_v11, %v1180_v57 }
 0x21b   :  { %v1183_v48 = vrot.slane %v1182_v15, 2 }
 0x21d   :  { %v1184_v32 = vadd.f32 %v1183_v48, %v1182_v15 }
 0x21f   :  { %v1185_v25 = vrot.slane %v1184_v32, 1 }
 0x221   :  { %v1186_v49 = vadd.f32 %v1185_v25, %v1184_v32 }
 0x223   :  { %v1187_v53 = vadd.f32 %v1186_v49, %v989_v45 }
 0x225   :  { %1188 = vst.msk [vmem:[%s2795_s4] sm:$0x1] %vm779_vm4, %v1187_v53 }

// kernel: _lambda_.14
= control target key start
LH: loop header
LB: loop body
LE: loop exit
PB: predicated region body
PF: predicated region fallthrough
CT: control target
= control target key end

     0   :  { %vm357_vm0 = vcmask 1041408   ;;  %vm260_vm1 = vcmask 293888   ;;  %vm594_vm2 = vcmask 60416   ;;  %vm663_vm3 = vcmask 64512   ;;  %s2832_s1 = inlined_call_operand.vmem [shape: bf16[1,36,8], index: 1, kind: input, shape index: {}]   ;;  %s2833_s0 = inlined_call_operand.vmem [shape: bf16[1,512,36], index: 0, kind: input, shape index: {}]   ;;  %s2834_s2 = inlined_call_operand.vmem [shape: bf16[1,512,8], index: 2, kind: output, shape index: {0}]   ;;  %s2835_s3 = inlined_call_operand.vmem [shape: f32[1,1,8], index: 3, kind: output, shape index: {1}]   ;;  %s2836_s4 = inlined_call_operand.vmem [shape: f32[1,1,8], index: 4, kind: output, shape index: {2}]   ;;  %s2837_s5 = inlined_call_operand.vmem [shape: f32[1,1,8], index: 5, kind: output, shape index: {3}]  }
   0x1   :  { %v84_v0 = vld [vmem:[%s2832_s1 + $0x10] sm:$0x3]  ;;  %v1425_v4 = vld [vmem:[%s2832_s1 + $0x8] sm:$0xff]  ;;  %v1424_v5 = vld [vmem:[%s2832_s1] sm:$0xff]  ;;  %vm798_vm4 = vcmask 57344  }
   0x2   :  { %v254_v1 = vunpack.c.l.b16 %v84_v0  ;;  %v1392_v6 = vld [vmem:[%s2833_s0] sm:$0xff]  ;;  %v1393_v8 = vld [vmem:[%s2833_s0 + $0x8] sm:$0xff]  ;;  %v1394_v11 = vld [vmem:[%s2833_s0 + $0x10] sm:$0xff] }
   0x3   :  { %v1400_v7 = vld [vmem:[%s2833_s0 + $0x40] sm:$0xff]  ;;  %v1401_v9 = vld [vmem:[%s2833_s0 + $0x48] sm:$0xff]  ;;  %v1402_v12 = vld [vmem:[%s2833_s0 + $0x50] sm:$0xff] }
   0x4   :  { %v257_v2 = vpack.c.b16 %v254_v1, %v254_v1  ;;  %v1408_v10 = vld [vmem:[%s2833_s0 + $0x80] sm:$0xff]  ;;  %v1409_v13 = vld [vmem:[%s2833_s0 + $0x88] sm:$0xff]  ;;  %v1395_v14 = vld [vmem:[%s2833_s0 + $0x18] sm:$0xff] }
   0x5   :  { %v1403_v15 = vld [vmem:[%s2833_s0 + $0x58] sm:$0xff]  ;;  %v1410_v16 = vld [vmem:[%s2833_s0 + $0x90] sm:$0xff]  ;;  %v1416_v17 = vld [vmem:[%s2833_s0 + $0xc0] sm:$0xff] }
   0x6   :  { %v359_v3 = vsel %vm357_vm0, %v257_v2, 0  ;;  %v1396_v18 = vld [vmem:[%s2833_s0 + $0x20] sm:$0xff]  ;;  %v1411_v20 = vld [vmem:[%s2833_s0 + $0x98] sm:$0xff]  ;;  %v1417_v21 = vld [vmem:[%s2833_s0 + $0xc8] sm:$0xff] }
   0x7   :  { %366 = vmatpush.bf16.msra.mxu0 %v359_v3  ;;  %1426 = vmatpush.bf16.msra.mxu1 %v359_v3  ;;  %v1404_v19 = vld [vmem:[%s2833_s0 + $0x60] sm:$0xff]  ;;  %v1397_v22 = vld [vmem:[%s2833_s0 + $0x28] sm:$0xff]  ;;  %v1418_v25 = vld [vmem:[%s2833_s0 + $0xd0] sm:$0xff] }
   0x8   :  { %1427 = vmatpush.bf16.msra.mxu2 %v359_v3  ;;  %1428 = vmatpush.bf16.msra.mxu3 %v359_v3  ;;  %v1405_v23 = vld [vmem:[%s2833_s0 + $0x68] sm:$0xff]  ;;  %v1412_v24 = vld [vmem:[%s2833_s0 + $0xa0] sm:$0xff]  ;;  %v1398_v26 = vld [vmem:[%s2833_s0 + $0x30] sm:$0xff] }
   0x9   :  { %v1406_v27 = vld [vmem:[%s2833_s0 + $0x70] sm:$0xff]  ;;  %v1413_v28 = vld [vmem:[%s2833_s0 + $0xa8] sm:$0xff]  ;;  %v1419_v29 = vld [vmem:[%s2833_s0 + $0xd8] sm:$0xff] }
   0xa   :  { %v1399_v30 = vld [vmem:[%s2833_s0 + $0x38] sm:$0xff]  ;;  %v1414_v32 = vld [vmem:[%s2833_s0 + $0xb0] sm:$0xff]  ;;  %v1420_v33 = vld [vmem:[%s2833_s0 + $0xe0] sm:$0xff] }
   0xb   :  { %367 = vmatpush.bf16.msra.mxu0 %v1425_v4  ;;  %1429 = vmatpush.bf16.msra.mxu1 %v1425_v4  ;;  %v1407_v31 = vld [vmem:[%s2833_s0 + $0x78] sm:$0xff]  ;;  %v1421_v39 = vld [vmem:[%s2833_s0 + $0xe8] sm:$0xff]  ;;  %v1422_v48 = vld [vmem:[%s2833_s0 + $0xf0] sm:$0xff] }
   0xc   :  { %1430 = vmatpush.bf16.msra.mxu2 %v1425_v4  ;;  %1431 = vmatpush.bf16.msra.mxu3 %v1425_v4  ;;  %v1415_v38 = vld [vmem:[%s2833_s0 + $0xb8] sm:$0xff] }
   0xd   :  { %v1423_v61 = vld [vmem:[%s2833_s0 + $0xf8] sm:$0xff] }
   0xf   :  { %368 = vmatpush.bf16.msra.mxu0 %v1424_v5  ;;  %1432 = vmatpush.bf16.msra.mxu1 %v1424_v5 }
  0x10   :  { %1433 = vmatpush.bf16.msra.mxu2 %v1424_v5  ;;  %1434 = vmatpush.bf16.msra.mxu3 %v1424_v5 }
  0x12   :  { %1360 = vmatmul.msk.bf16.vlgmr.msra.gmra.mxu0 %vm260_vm1, %v1392_v6  ;;  %1368 = vmatmul.msk.bf16.vlgmr.msra.gmra.mxu1 %vm260_vm1, %v1400_v7 }
  0x13   :  { %1376 = vmatmul.msk.bf16.vlgmr.msra.gmra.mxu2 %vm260_vm1, %v1408_v10  ;;  %1384 = vmatmul.msk.bf16.vlgmr.msra.gmra.mxu3 %vm260_vm1, %v1416_v17 }
  0x22   :  { %1361 = vmatmul.msk.bf16.gmra.mxu0 %vm260_vm1, %v1393_v8  ;;  %1369 = vmatmul.msk.bf16.gmra.mxu1 %vm260_vm1, %v1401_v9 }
  0x23   :  { %1377 = vmatmul.msk.bf16.gmra.mxu2 %vm260_vm1, %v1409_v13  ;;  %1385 = vmatmul.msk.bf16.gmra.mxu3 %vm260_vm1, %v1417_v21 }
  0x32   :  { %1362 = vmatmul.msk.bf16.gmra.mxu0 %vm260_vm1, %v1394_v11  ;;  %1370 = vmatmul.msk.bf16.gmra.mxu1 %vm260_vm1, %v1402_v12 }
  0x33   :  { %1378 = vmatmul.msk.bf16.gmra.mxu2 %vm260_vm1, %v1410_v16  ;;  %1386 = vmatmul.msk.bf16.gmra.mxu3 %vm260_vm1, %v1418_v25 }
  0x42   :  { %1363 = vmatmul.msk.bf16.gmra.mxu0 %vm260_vm1, %v1395_v14  ;;  %1371 = vmatmul.msk.bf16.gmra.mxu1 %vm260_vm1, %v1403_v15 }
  0x43   :  { %1379 = vmatmul.msk.bf16.gmra.mxu2 %vm260_vm1, %v1411_v20  ;;  %1387 = vmatmul.msk.bf16.gmra.mxu3 %vm260_vm1, %v1419_v29 }
  0x52   :  { %1364 = vmatmul.msk.bf16.gmra.mxu0 %vm260_vm1, %v1396_v18  ;;  %1372 = vmatmul.msk.bf16.gmra.mxu1 %vm260_vm1, %v1404_v19 }
  0x53   :  { %1380 = vmatmul.msk.bf16.gmra.mxu2 %vm260_vm1, %v1412_v24  ;;  %1388 = vmatmul.msk.bf16.gmra.mxu3 %vm260_vm1, %v1420_v33 }
  0x62   :  { %1365 = vmatmul.msk.bf16.gmra.mxu0 %vm260_vm1, %v1397_v22  ;;  %1373 = vmatmul.msk.bf16.gmra.mxu1 %vm260_vm1, %v1405_v23 }
  0x63   :  { %1381 = vmatmul.msk.bf16.gmra.mxu2 %vm260_vm1, %v1413_v28  ;;  %1389 = vmatmul.msk.bf16.gmra.mxu3 %vm260_vm1, %v1421_v39 }
  0x72   :  { %1366 = vmatmul.msk.bf16.gmra.mxu0 %vm260_vm1, %v1398_v26  ;;  %1374 = vmatmul.msk.bf16.gmra.mxu1 %vm260_vm1, %v1406_v27 }
  0x73   :  { %1382 = vmatmul.msk.bf16.gmra.mxu2 %vm260_vm1, %v1414_v32  ;;  %1390 = vmatmul.msk.bf16.gmra.mxu3 %vm260_vm1, %v1422_v48 }
  0x82   :  { %1367 = vmatmul.msk.bf16.gmra.mxu0 %vm260_vm1, %v1399_v30  ;;  %1375 = vmatmul.msk.bf16.gmra.mxu1 %vm260_vm1, %v1407_v31 }
  0x83   :  { %1383 = vmatmul.msk.bf16.gmra.mxu2 %vm260_vm1, %v1415_v38  ;;  %1391 = vmatmul.msk.bf16.gmra.mxu3 %vm260_vm1, %v1423_v61 }
  0x8f   :  { %v1589_v34 = vpop.f32.mrf.mxu0  ;;  %v1591_v35 = vpop.f32.mrf.mxu1 }
  0x90   :  { %2856 = vst [vmem:[#allocation2_spill] sm:$0xff] %v1591_v35  ;;  %v530_v36 = vpack.c.bf16 %v1589_v34, %v1589_v34  ;;  %v546_v37 = vpack.c.bf16 %v1591_v35, %v1591_v35  ;;  %v664_v61 = vsel %vm663_vm3, %v1589_v34, 0.0 }
  0x92   :  { %595 = vst.msk [vmem:[%s2834_s2] sm:$0xf] %vm594_vm2, %v530_v36 }
  0x93   :  { %611 = vst.msk [vmem:[%s2834_s2 + $0x40] sm:$0xf] %vm594_vm2, %v546_v37 }
  0x96   :  { %v1657_v53 = vpop.f32.mrf.mxu2  ;;  %v1759_v15 = vpop.f32.mrf.mxu3 }
  0x97   :  { %v1613_v40 = vpop.f32.mrf.mxu0  ;;  %v1615_v41 = vpop.f32.mrf.mxu1  ;;  %v562_v54 = vpack.c.bf16 %v1657_v53, %v1657_v53  ;;  %v578_v17 = vpack.c.bf16 %v1759_v15, %v1759_v15 }
  0x98   :  { %v531_v42 = vpack.c.bf16 %v1613_v40, %v1613_v40  ;;  %v547_v43 = vpack.c.bf16 %v1615_v41, %v1615_v41 }
  0x99   :  { %627 = vst.msk [vmem:[%s2834_s2 + $0x80] sm:$0xf] %vm594_vm2, %v562_v54 }
  0x9a   :  { %596 = vst.msk [vmem:[%s2834_s2 + $0x4] sm:$0xf] %vm594_vm2, %v531_v42 }
  0x9b   :  { %612 = vst.msk [vmem:[%s2834_s2 + $0x44] sm:$0xf] %vm594_vm2, %v547_v43 }
  0x9c   :  { %643 = vst.msk [vmem:[%s2834_s2 + $0xc0] sm:$0xf] %vm594_vm2, %v578_v17 }
  0x9e   :  { %v1681_v59 = vpop.f32.mrf.mxu2  ;;  %v1791_v23 = vpop.f32.mrf.mxu3 }
  0x9f   :  { %v1629_v44 = vpop.f32.mrf.mxu0  ;;  %v1631_v45 = vpop.f32.mrf.mxu1  ;;  %v563_v60 = vpack.c.bf16 %v1681_v59, %v1681_v59  ;;  %v579_v25 = vpack.c.bf16 %v1791_v23, %v1791_v23 }
  0xa0   :  { %v532_v46 = vpack.c.bf16 %v1629_v44, %v1629_v44  ;;  %v548_v47 = vpack.c.bf16 %v1631_v45, %v1631_v45 }
  0xa1   :  { %628 = vst.msk [vmem:[%s2834_s2 + $0x84] sm:$0xf] %vm594_vm2, %v563_v60  ;;  %v665_v60 = vsel %vm663_vm3, %v1613_v40, 0.0 }
  0xa2   :  { %597 = vst.msk [vmem:[%s2834_s2 + $0x8] sm:$0xf] %vm594_vm2, %v532_v46 }
  0xa3   :  { %613 = vst.msk [vmem:[%s2834_s2 + $0x48] sm:$0xf] %vm594_vm2, %v548_v47 }
  0xa4   :  { %644 = vst.msk [vmem:[%s2834_s2 + $0xc4] sm:$0xf] %vm594_vm2, %v579_v25 }
  0xa6   :  { %v1709_v2 = vpop.f32.mrf.mxu2  ;;  %v1823_v31 = vpop.f32.mrf.mxu3 }
  0xa7   :  { %v1649_v49 = vpop.f32.mrf.mxu0  ;;  %v1651_v50 = vpop.f32.mrf.mxu1  ;;  %v564_v3 = vpack.c.bf16 %v1709_v2, %v1709_v2  ;;  %v580_v33 = vpack.c.bf16 %v1823_v31, %v1823_v31 }
  0xa8   :  { %v533_v51 = vpack.c.bf16 %v1649_v49, %v1649_v49  ;;  %v549_v52 = vpack.c.bf16 %v1651_v50, %v1651_v50 }
  0xa9   :  { %629 = vst.msk [vmem:[%s2834_s2 + $0x88] sm:$0xf] %vm594_vm2, %v564_v3  ;;  %v669_v3 = vsel %vm663_vm3, %v1649_v49, 0.0 }
  0xaa   :  { %598 = vst.msk [vmem:[%s2834_s2 + $0xc] sm:$0xf] %vm594_vm2, %v533_v51 }
  0xab   :  { %614 = vst.msk [vmem:[%s2834_s2 + $0x4c] sm:$0xf] %vm594_vm2, %v549_v52 }
  0xac   :  { %645 = vst.msk [vmem:[%s2834_s2 + $0xc8] sm:$0xf] %vm594_vm2, %v580_v33 }
  0xae   :  { %v1733_v8 = vpop.f32.mrf.mxu2  ;;  %v1855_v43 = vpop.f32.mrf.mxu3 }
  0xaf   :  { %v1673_v55 = vpop.f32.mrf.mxu0  ;;  %v1675_v56 = vpop.f32.mrf.mxu1  ;;  %v565_v9 = vpack.c.bf16 %v1733_v8, %v1733_v8  ;;  %v581_v47 = vpack.c.bf16 %v1855_v43, %v1855_v43 }
  0xb0   :  { %2857 = vst [vmem:[#allocation3_spill] sm:$0xff] %v1675_v56  ;;  %v534_v57 = vpack.c.bf16 %v1673_v55, %v1673_v55  ;;  %v550_v58 = vpack.c.bf16 %v1675_v56, %v1675_v56 }
  0xb1   :  { %630 = vst.msk [vmem:[%s2834_s2 + $0x8c] sm:$0xf] %vm594_vm2, %v565_v9 }
  0xb2   :  { %599 = vst.msk [vmem:[%s2834_s2 + $0x10] sm:$0xf] %vm594_vm2, %v534_v57 }
  0xb3   :  { %615 = vst.msk [vmem:[%s2834_s2 + $0x50] sm:$0xf] %vm594_vm2, %v550_v58 }
  0xb4   :  { %646 = vst.msk [vmem:[%s2834_s2 + $0xcc] sm:$0xf] %vm594_vm2, %v581_v47 }
  0xb6   :  { %v1757_v14 = vpop.f32.mrf.mxu2  ;;  %v1887_v58 = vpop.f32.mrf.mxu3 }
  0xb7   :  { %v1701_v62 = vpop.f32.mrf.mxu0  ;;  %v1703_v63 = vpop.f32.mrf.mxu1  ;;  %2861 = vst [vmem:[#allocation7_spill] sm:$0xff] %v1757_v14  ;;  %v566_v16 = vpack.c.bf16 %v1757_v14, %v1757_v14  ;;  %v582_v25 = vpack.c.bf16 %v1887_v58, %v1887_v58 }
  0xb8   :  { %2858 = vst [vmem:[#allocation4_spill] sm:$0xff] %v1703_v63  ;;  %v535_v0 = vpack.c.bf16 %v1701_v62, %v1701_v62  ;;  %v551_v1 = vpack.c.bf16 %v1703_v63, %v1703_v63 }
  0xb9   :  { %631 = vst.msk [vmem:[%s2834_s2 + $0x90] sm:$0xf] %vm594_vm2, %v566_v16 }
  0xba   :  { %600 = vst.msk [vmem:[%s2834_s2 + $0x14] sm:$0xf] %vm594_vm2, %v535_v0  ;;  %v667_v0 = vsel %vm663_vm3, %v1629_v44, 0.0 }
  0xbb   :  { %616 = vst.msk [vmem:[%s2834_s2 + $0x54] sm:$0xf] %vm594_vm2, %v551_v1  ;;  %v666_v1 = vadd.f32 %v665_v60, %v664_v61 }
  0xbc   :  { %647 = vst.msk [vmem:[%s2834_s2 + $0xd0] sm:$0xf] %vm594_vm2, %v582_v25 }
  0xbe   :  { %v1789_v22 = vpop.f32.mrf.mxu2 }
  0xbf   :  { %v1725_v4 = vpop.f32.mrf.mxu0  ;;  %v1727_v5 = vpop.f32.mrf.mxu1  ;;  %v567_v24 = vpack.c.bf16 %v1789_v22, %v1789_v22 }
  0xc0   :  { %2859 = vst [vmem:[#allocation5_spill] sm:$0xff] %v1727_v5  ;;  %v536_v6 = vpack.c.bf16 %v1725_v4, %v1725_v4  ;;  %v552_v7 = vpack.c.bf16 %v1727_v5, %v1727_v5 }
  0xc1   :  { %632 = vst.msk [vmem:[%s2834_s2 + $0x94] sm:$0xf] %vm594_vm2, %v567_v24 }
  0xc2   :  { %601 = vst.msk [vmem:[%s2834_s2 + $0x18] sm:$0xf] %vm594_vm2, %v536_v6  ;;  %v668_v6 = vadd.f32 %v667_v0, %v666_v1 }
  0xc3   :  { %617 = vst.msk [vmem:[%s2834_s2 + $0x58] sm:$0xf] %vm594_vm2, %v552_v7 }
  0xc6   :  { %v1821_v30 = vpop.f32.mrf.mxu2 }
  0xc7   :  { %v1749_v10 = vpop.f32.mrf.mxu0  ;;  %v1751_v11 = vpop.f32.mrf.mxu1  ;;  %v568_v32 = vpack.c.bf16 %v1821_v30, %v1821_v30 }
  0xc8   :  { %2860 = vst [vmem:[#allocation6_spill] sm:$0xff] %v1751_v11  ;;  %v537_v12 = vpack.c.bf16 %v1749_v10, %v1749_v10  ;;  %v553_v13 = vpack.c.bf16 %v1751_v11, %v1751_v11 }
  0xc9   :  { %633 = vst.msk [vmem:[%s2834_s2 + $0x98] sm:$0xf] %vm594_vm2, %v568_v32 }
  0xca   :  { %602 = vst.msk [vmem:[%s2834_s2 + $0x1c] sm:$0xf] %vm594_vm2, %v537_v12  ;;  %v671_v12 = vsel %vm663_vm3, %v1673_v55, 0.0 }
  0xcb   :  { %618 = vst.msk [vmem:[%s2834_s2 + $0x5c] sm:$0xf] %vm594_vm2, %v553_v13 }
  0xce   :  { %v1853_v42 = vpop.f32.mrf.mxu2 }
  0xcf   :  { %v1781_v18 = vpop.f32.mrf.mxu0  ;;  %v1783_v19 = vpop.f32.mrf.mxu1  ;;  %2862 = vst [vmem:[#allocation8_spill] sm:$0xff] %v1853_v42  ;;  %v569_v46 = vpack.c.bf16 %v1853_v42, %v1853_v42 }
  0xd0   :  { %v538_v20 = vpack.c.bf16 %v1781_v18, %v1781_v18  ;;  %v554_v21 = vpack.c.bf16 %v1783_v19, %v1783_v19  ;;  %v679_v60 = vsel %vm663_vm3, %v1781_v18, 0.0 }
  0xd1   :  { %634 = vst.msk [vmem:[%s2834_s2 + $0x9c] sm:$0xf] %vm594_vm2, %v569_v46  ;;  %v677_v46 = vsel %vm663_vm3, %v1749_v10, 0.0 }
  0xd2   :  { %603 = vst.msk [vmem:[%s2834_s2 + $0x20] sm:$0xf] %vm594_vm2, %v538_v20  ;;  %v1917_v20 = vpop.f32.mrf.mxu3 }
  0xd3   :  { %619 = vst.msk [vmem:[%s2834_s2 + $0x60] sm:$0xf] %vm594_vm2, %v554_v21  ;;  %v670_v21 = vadd.f32 %v669_v3, %v668_v6  ;;  %v583_v33 = vpack.c.bf16 %v1917_v20, %v1917_v20 }
  0xd5   :  { %v672_v32 = vadd.f32 %v671_v12, %v670_v21  ;;  %648 = vst.msk [vmem:[%s2834_s2 + $0xd4] sm:$0xf] %vm594_vm2, %v583_v33 }
  0xd6   :  { %v1885_v57 = vpop.f32.mrf.mxu2 }
  0xd7   :  { %v1813_v26 = vpop.f32.mrf.mxu0  ;;  %v1815_v27 = vpop.f32.mrf.mxu1  ;;  %v570_v24 = vpack.c.bf16 %v1885_v57, %v1885_v57 }
  0xd8   :  { %v539_v28 = vpack.c.bf16 %v1813_v26, %v1813_v26  ;;  %v555_v29 = vpack.c.bf16 %v1815_v27, %v1815_v27  ;;  %v681_v12 = vsel %vm663_vm3, %v1813_v26, 0.0 }
  0xd9   :  { %635 = vst.msk [vmem:[%s2834_s2 + $0xa0] sm:$0xf] %vm594_vm2, %v570_v24 }
  0xda   :  { %604 = vst.msk [vmem:[%s2834_s2 + $0x24] sm:$0xf] %vm594_vm2, %v539_v28  ;;  %v673_v28 = vsel %vm663_vm3, %v1701_v62, 0.0  ;;  %v1969_v3 = vpop.f32.mrf.mxu3 }
  0xdb   :  { %620 = vst.msk [vmem:[%s2834_s2 + $0x64] sm:$0xf] %vm594_vm2, %v555_v29 }
  0xde   :  { %v1915_v17 = vpop.f32.mrf.mxu2 }
  0xdf   :  { %v1845_v36 = vpop.f32.mrf.mxu0  ;;  %v1847_v37 = vpop.f32.mrf.mxu1  ;;  %v571_v29 = vpack.c.bf16 %v1915_v17, %v1915_v17 }
  0xe0   :  { %v540_v38 = vpack.c.bf16 %v1845_v36, %v1845_v36  ;;  %v556_v39 = vpack.c.bf16 %v1847_v37, %v1847_v37 }
  0xe1   :  { %636 = vst.msk [vmem:[%s2834_s2 + $0xa4] sm:$0xf] %vm594_vm2, %v571_v29 }
  0xe2   :  { %605 = vst.msk [vmem:[%s2834_s2 + $0x28] sm:$0xf] %vm594_vm2, %v540_v38  ;;  %v675_v38 = vsel %vm663_vm3, %v1725_v4, 0.0 }
  0xe3   :  { %621 = vst.msk [vmem:[%s2834_s2 + $0x68] sm:$0xf] %vm594_vm2, %v556_v39  ;;  %v674_v39 = vadd.f32 %v673_v28, %v672_v32 }
  0xe5   :  { %v676_v47 = vadd.f32 %v675_v38, %v674_v39 }
  0xe6   :  { %v1967_v1 = vpop.f32.mrf.mxu2 }
  0xe7   :  { %v1877_v48 = vpop.f32.mrf.mxu0  ;;  %v1879_v51 = vpop.f32.mrf.mxu1  ;;  %v678_v6 = vadd.f32 %v677_v46, %v676_v47 }
  0xe8   :  { %2863 = vst [vmem:[#allocation9_spill] sm:$0xff] %v1879_v51  ;;  %v541_v52 = vpack.c.bf16 %v1877_v48, %v1877_v48  ;;  %v557_v54 = vpack.c.bf16 %v1879_v51, %v1879_v51  ;;  %v685_v24 = vsel %vm663_vm3, %v1877_v48, 0.0  ;;  %v1997_v46 = vpop.f32.mrf.mxu3 }
  0xea   :  { %606 = vst.msk [vmem:[%s2834_s2 + $0x2c] sm:$0xf] %vm594_vm2, %v541_v52 }
  0xeb   :  { %622 = vst.msk [vmem:[%s2834_s2 + $0x6c] sm:$0xf] %vm594_vm2, %v557_v54 }
  0xee   :  { %v1995_v39 = vpop.f32.mrf.mxu2 }
  0xef   :  { %v1905_v7 = vpop.f32.mrf.mxu0  ;;  %v1907_v9 = vpop.f32.mrf.mxu1 }
  0xf0   :  { %2864 = vst [vmem:[#allocation10_spill] sm:$0xff] %v1907_v9  ;;  %v542_v13 = vpack.c.bf16 %v1905_v7, %v1905_v7  ;;  %v558_v16 = vpack.c.bf16 %v1907_v9, %v1907_v9  ;;  %v687_v32 = vsel %vm663_vm3, %v1905_v7, 0.0 }
  0xf2   :  { %607 = vst.msk [vmem:[%s2834_s2 + $0x30] sm:$0xf] %vm594_vm2, %v542_v13  ;;  %v680_v13 = vadd.f32 %v679_v60, %v678_v6  ;;  %v572_v60 = vpack.c.bf16 %v1967_v1, %v1967_v1  ;;  %v573_v6 = vpack.c.bf16 %v1995_v39, %v1995_v39 }
  0xf3   :  { %623 = vst.msk [vmem:[%s2834_s2 + $0x70] sm:$0xf] %vm594_vm2, %v558_v16  ;;  %v683_v16 = vsel %vm663_vm3, %v1845_v36, 0.0 }
  0xf4   :  { %v682_v21 = vadd.f32 %v681_v12, %v680_v13  ;;  %v585_v13 = vpack.c.bf16 %v1997_v46, %v1997_v46  ;;  %637 = vst.msk [vmem:[%s2834_s2 + $0xa8] sm:$0xf] %vm594_vm2, %v572_v60 }
  0xf5   :  { %638 = vst.msk [vmem:[%s2834_s2 + $0xac] sm:$0xf] %vm594_vm2, %v573_v6  ;;  %v695_v6 = vsel %vm663_vm3, %v1591_v35, 0.0 }
  0xf6   :  { %v684_v25 = vadd.f32 %v683_v16, %v682_v21  ;;  %650 = vst.msk [vmem:[%s2834_s2 + $0xdc] sm:$0xf] %vm594_vm2, %v585_v13  ;;  %v2045_v60 = vpop.f32.mrf.mxu2  ;;  %v697_v13 = vsel %vm663_vm3, %v1615_v41, 0.0 }
  0xf7   :  { %v1953_v52 = vpop.f32.mrf.mxu0  ;;  %v1955_v54 = vpop.f32.mrf.mxu1 }
  0xf8   :  { %2865 = vst [vmem:[#allocation11_spill] sm:$0xff] %v1955_v54  ;;  %v543_v61 = vpack.c.bf16 %v1953_v52, %v1953_v52  ;;  %v559_v0 = vpack.c.bf16 %v1955_v54, %v1955_v54  ;;  %v686_v47 = vadd.f32 %v685_v24, %v684_v25 }
  0xfa   :  { %608 = vst.msk [vmem:[%s2834_s2 + $0x34] sm:$0xf] %vm594_vm2, %v543_v61  ;;  %v584_v61 = vpack.c.bf16 %v1969_v3, %v1969_v3  ;;  %v688_v12 = vadd.f32 %v687_v32, %v686_v47 }
  0xfb   :  { %624 = vst.msk [vmem:[%s2834_s2 + $0x74] sm:$0xf] %vm594_vm2, %v559_v0  ;;  %v689_v0 = vsel %vm663_vm3, %v1953_v52, 0.0 }
  0xfc   :  { %v690_v21 = vadd.f32 %v689_v0, %v688_v12  ;;  %649 = vst.msk [vmem:[%s2834_s2 + $0xd8] sm:$0xf] %vm594_vm2, %v584_v61  ;;  %v2047_v61 = vpop.f32.mrf.mxu3 }
  0xff   :  { %v1985_v28 = vpop.f32.mrf.mxu0  ;;  %v1987_v29 = vpop.f32.mrf.mxu1 }
 0x100   :  { %v544_v33 = vpack.c.bf16 %v1985_v28, %v1985_v28  ;;  %v560_v38 = vpack.c.bf16 %v1987_v29, %v1987_v29  ;;  %v691_v16 = vsel %vm663_vm3, %v1985_v28, 0.0 }
 0x101   :  { %v692_v24 = vadd.f32 %v691_v16, %v690_v21  ;;  %v699_v21 = vsel %vm663_vm3, %v1631_v45, 0.0 }
 0x102   :  { %609 = vst.msk [vmem:[%s2834_s2 + $0x38] sm:$0xf] %vm594_vm2, %v544_v33 }
 0x103   :  { %625 = vst.msk [vmem:[%s2834_s2 + $0x78] sm:$0xf] %vm594_vm2, %v560_v38 }
 0x107   :  { %v2031_v25 = vpop.f32.mrf.mxu0  ;;  %v2033_v32 = vpop.f32.mrf.mxu1 }
 0x108   :  { %2866 = vst [vmem:[#allocation12_spill] sm:$0xff] %v2033_v32  ;;  %v545_v33 = vpack.c.bf16 %v2031_v25, %v2031_v25  ;;  %v693_v38 = vsel %vm663_vm3, %v2031_v25, 0.0  ;;  %v561_v47 = vpack.c.bf16 %v2033_v32, %v2033_v32 }
 0x109   :  { %v694_v0 = vadd.f32 %v693_v38, %v692_v24  ;;  %v701_v38 = vsel %vm663_vm3, %v1651_v50, 0.0 }
 0x10a   :  { %610 = vst.msk [vmem:[%s2834_s2 + $0x3c] sm:$0xf] %vm594_vm2, %v545_v33  ;;  %v574_v33 = vpack.c.bf16 %v2045_v60, %v2045_v60 }
 0x10b   :  { %v696_v12 = vadd.f32 %v695_v6, %v694_v0  ;;  %626 = vst.msk [vmem:[%s2834_s2 + $0x7c] sm:$0xf] %vm594_vm2, %v561_v47  ;;  %v586_v0 = vpack.c.bf16 %v2047_v61, %v2047_v61  ;;  %v2069_v6 = vpop.f32.mrf.mxu2  ;;  %v2071_v47 = vpop.f32.mrf.mxu3 }
 0x10c   :  { %2867 = vst [vmem:[#allocation13_spill] sm:$0xff] %v2069_v6 }
 0x10d   :  { %v698_v16 = vadd.f32 %v697_v13, %v696_v12  ;;  %2868 = vst [vmem:[#allocation14_spill] sm:$0xff] %v2071_v47  ;;  %v575_v12 = vpack.c.bf16 %v2069_v6, %v2069_v6  ;;  %v587_v13 = vpack.c.bf16 %v2071_v47, %v2071_v47 }
 0x10e   :  { %639 = vst.msk [vmem:[%s2834_s2 + $0xb0] sm:$0xf] %vm594_vm2, %v574_v33 }
 0x10f   :  { %v700_v24 = vadd.f32 %v699_v21, %v698_v16  ;;  %v703_v16 = vsel %vm663_vm3, %v1675_v56, 0.0  ;;  %651 = vst.msk [vmem:[%s2834_s2 + $0xe0] sm:$0xf] %vm594_vm2, %v586_v0  ;;  %v709_v0 = vsel %vm663_vm3, %v1751_v11, 0.0 }
 0x110   :  { %640 = vst.msk [vmem:[%s2834_s2 + $0xb4] sm:$0xf] %vm594_vm2, %v575_v12  ;;  %v711_v12 = vsel %vm663_vm3, %v1783_v19, 0.0 }
 0x111   :  { %v702_v35 = vadd.f32 %v701_v38, %v700_v24  ;;  %v705_v24 = vsel %vm663_vm3, %v1703_v63, 0.0  ;;  %652 = vst.msk [vmem:[%s2834_s2 + $0xe4] sm:$0xf] %vm594_vm2, %v587_v13 }
 0x113   :  { %v704_v21 = vadd.f32 %v703_v16, %v702_v35  ;;  %v707_v35 = vsel %vm663_vm3, %v1727_v5, 0.0  ;;  %v2101_v16 = vpop.f32.mrf.mxu2  ;;  %v2103_v63 = vpop.f32.mrf.mxu3  ;;  %v715_v5 = vsel %vm663_vm3, %v1847_v37, 0.0 }
 0x114   :  { %2869 = vst [vmem:[#allocation15_spill] sm:$0xff] %v2103_v63  ;;  %v576_v11 = vpack.c.bf16 %v2101_v16, %v2101_v16 }
 0x115   :  { %v706_v38 = vadd.f32 %v705_v24, %v704_v21  ;;  %v713_v24 = vsel %vm663_vm3, %v1815_v27, 0.0 }
 0x116   :  { %641 = vst.msk [vmem:[%s2834_s2 + $0xb8] sm:$0xf] %vm594_vm2, %v576_v11  ;;  %v723_v11 = vsel %vm663_vm3, %v1987_v29, 0.0 }
 0x117   :  { %v708_v33 = vadd.f32 %v707_v35, %v706_v38  ;;  %v717_v35 = vsel %vm663_vm3, %v1879_v51, 0.0 }
 0x119   :  { %v710_v56 = vadd.f32 %v709_v0, %v708_v33  ;;  %v588_v33 = vpack.c.bf16 %v2103_v63, %v2103_v63 }
 0x11b   :  { %v712_v21 = vadd.f32 %v711_v12, %v710_v56  ;;  %v2117_v0 = vpop.f32.mrf.mxu2  ;;  %v2119_v56 = vpop.f32.mrf.mxu3  ;;  %653 = vst.msk [vmem:[%s2834_s2 + $0xe8] sm:$0xf] %vm594_vm2, %v588_v33  ;;  %v725_v33 = vsel %vm663_vm3, %v2033_v32, 0.0 }
 0x11c   :  { %2870 = vst [vmem:[#allocation16_spill] sm:$0xff] %v2119_v56 }
 0x11d   :  { %v714_v13 = vadd.f32 %v713_v24, %v712_v21  ;;  %v577_v21 = vpack.c.bf16 %v2117_v0, %v2117_v0  ;;  %v719_v24 = vsel %vm663_vm3, %v1907_v9, 0.0  ;;  %v727_v9 = vsel %vm663_vm3, %v1657_v53, 0.0 }
 0x11f   :  { %v716_v38 = vadd.f32 %v715_v5, %v714_v13  ;;  %v589_v5 = vpack.c.bf16 %v2119_v56, %v2119_v56  ;;  %642 = vst.msk [vmem:[%s2834_s2 + $0xbc] sm:$0xf] %vm594_vm2, %v577_v21 }
 0x121   :  { %v718_v12 = vadd.f32 %v717_v35, %v716_v38  ;;  %v721_v38 = vsel %vm663_vm3, %v1955_v54, 0.0  ;;  %654 = vst.msk [vmem:[%s2834_s2 + $0xec] sm:$0xf] %vm594_vm2, %v589_v5  ;;  %v731_v5 = vsel %vm663_vm3, %v1709_v2, 0.0 }
 0x123   :  { %v720_v13 = vadd.f32 %v719_v24, %v718_v12  ;;  %v2149_v24 = vpop.f32.mrf.mxu3 }
 0x124   :  { %2871 = vst [vmem:[#allocation17_spill] sm:$0xff] %v2149_v24 }
 0x125   :  { %v722_v35 = vadd.f32 %v721_v38, %v720_v13  ;;  %v729_v13 = vsel %vm663_vm3, %v1681_v59, 0.0 }
 0x127   :  { %v724_v12 = vadd.f32 %v723_v11, %v722_v35  ;;  %v733_v35 = vsel %vm663_vm3, %v1733_v8, 0.0  ;;  %v590_v11 = vpack.c.bf16 %v2149_v24, %v2149_v24 }
 0x129   :  { %v726_v54 = vadd.f32 %v725_v33, %v724_v12  ;;  %655 = vst.msk [vmem:[%s2834_s2 + $0xf0] sm:$0xf] %vm594_vm2, %v590_v11 }
 0x12b   :  { %v728_v21 = vadd.f32 %v727_v9, %v726_v54  ;;  %v2161_v32 = vpop.f32.mrf.mxu3  ;;  %v735_v54 = vsel %vm663_vm3, %v1757_v14, 0.0 }
 0x12c   :  { %v591_v9 = vpack.c.bf16 %v2161_v32, %v2161_v32 }
 0x12d   :  { %v730_v38 = vadd.f32 %v729_v13, %v728_v21  ;;  %v739_v13 = vsel %vm663_vm3, %v1821_v30, 0.0 }
 0x12e   :  { %656 = vst.msk [vmem:[%s2834_s2 + $0xf4] sm:$0xf] %vm594_vm2, %v591_v9  ;;  %v745_v9 = vsel %vm663_vm3, %v1915_v17, 0.0 }
 0x12f   :  { %v732_v51 = vadd.f32 %v731_v5, %v730_v38  ;;  %v741_v5 = vsel %vm663_vm3, %v1853_v42, 0.0 }
 0x131   :  { %v734_v12 = vadd.f32 %v733_v35, %v732_v51  ;;  %v737_v51 = vsel %vm663_vm3, %v1789_v22, 0.0 }
 0x133   :  { %v736_v33 = vadd.f32 %v735_v54, %v734_v12  ;;  %v2181_v35 = vpop.f32.mrf.mxu3  ;;  %v743_v12 = vsel %vm663_vm3, %v1885_v57, 0.0 }
 0x134   :  { %2872 = vst [vmem:[#allocation18_spill] sm:$0xff] %v2181_v35 }
 0x135   :  { %v738_v21 = vadd.f32 %v737_v51, %v736_v33  ;;  %v747_v33 = vsel %vm663_vm3, %v1967_v1, 0.0 }
 0x137   :  { %v740_v38 = vadd.f32 %v739_v13, %v738_v21  ;;  %v749_v21 = vsel %vm663_vm3, %v1995_v39, 0.0  ;;  %v592_v13 = vpack.c.bf16 %v2181_v35, %v2181_v35 }
 0x139   :  { %v742_v11 = vadd.f32 %v741_v5, %v740_v38  ;;  %657 = vst.msk [vmem:[%s2834_s2 + $0xf8] sm:$0xf] %vm594_vm2, %v592_v13  ;;  %v759_v13 = vsel %vm663_vm3, %v1759_v15, 0.0 }
 0x13b   :  { %v744_v54 = vadd.f32 %v743_v12, %v742_v11  ;;  %v2193_v42 = vpop.f32.mrf.mxu3  ;;  %v751_v11 = vsel %vm663_vm3, %v2045_v60, 0.0  ;;  %v753_v12 = vsel %vm663_vm3, %v2069_v6, 0.0  ;;  %v763_v6 = vsel %vm663_vm3, %v1823_v31, 0.0 }
 0x13c   :  { %2873 = vst [vmem:[#allocation19_spill] sm:$0xff] %v2193_v42  ;;  %v593_v5 = vpack.c.bf16 %v2193_v42, %v2193_v42 }
 0x13d   :  { %v746_v14 = vadd.f32 %v745_v9, %v744_v54  ;;  %v755_v9 = vsel %vm663_vm3, %v2101_v16, 0.0 }
 0x13e   :  { %658 = vst.msk [vmem:[%s2834_s2 + $0xfc] sm:$0xf] %vm594_vm2, %v593_v5 }
 0x13f   :  { %v748_v51 = vadd.f32 %v747_v33, %v746_v14 }
 0x141   :  { %v750_v38 = vadd.f32 %v749_v21, %v748_v51  ;;  %v757_v51 = vsel %vm663_vm3, %v2117_v0, 0.0 }
 0x143   :  { %v752_v14 = vadd.f32 %v751_v11, %v750_v38  ;;  %v761_v11 = vsel %vm663_vm3, %v1791_v23, 0.0 }
 0x145   :  { %v754_v54 = vadd.f32 %v753_v12, %v752_v14  ;;  %v765_v12 = vsel %vm663_vm3, %v1855_v43, 0.0 }
 0x147   :  { %v756_v33 = vadd.f32 %v755_v9, %v754_v54  ;;  %v767_v9 = vsel %vm663_vm3, %v1887_v58, 0.0 }
 0x149   :  { %v758_v21 = vadd.f32 %v757_v51, %v756_v33  ;;  %v769_v51 = vsel %vm663_vm3, %v1917_v20, 0.0 }
 0x14b   :  { %v760_v38 = vadd.f32 %v759_v13, %v758_v21  ;;  %v771_v13 = vsel %vm663_vm3, %v1969_v3, 0.0 }
 0x14d   :  { %v762_v5 = vadd.f32 %v761_v11, %v760_v38  ;;  %v773_v11 = vsel %vm663_vm3, %v1997_v46, 0.0 }
 0x14f   :  { %v764_v14 = vadd.f32 %v763_v6, %v762_v5  ;;  %v775_v5 = vsel %vm663_vm3, %v2047_v61, 0.0 }
 0x151   :  { %v766_v54 = vadd.f32 %v765_v12, %v764_v14  ;;  %v1437_v14 = vmov 0.0  }
 0x152   :  { %800 = vst.msk [vmem:[%s2835_s3] sm:$0x1] %vm798_vm4, %v1437_v14 }
 0x153   :  { %v768_v33 = vadd.f32 %v767_v9, %v766_v54  ;;  %801 = vst.msk [vmem:[%s2836_s4] sm:$0x1] %vm798_vm4, %v1437_v14  ;;  %v777_v54 = vsel %vm663_vm3, %v2071_v47, 0.0  ;;  %v787_v14 = vsel %vm663_vm3, %v2181_v35, 0.0 }
 0x155   :  { %v770_v21 = vadd.f32 %v769_v51, %v768_v33  ;;  %v779_v33 = vsel %vm663_vm3, %v2103_v63, 0.0 }
 0x157   :  { %v772_v38 = vadd.f32 %v771_v13, %v770_v21  ;;  %v781_v21 = vsel %vm663_vm3, %v2119_v56, 0.0 }
 0x159   :  { %v774_v6 = vadd.f32 %v773_v11, %v772_v38  ;;  %v783_v38 = vsel %vm663_vm3, %v2149_v24, 0.0 }
 0x15b   :  { %v776_v12 = vadd.f32 %v775_v5, %v774_v6  ;;  %v785_v6 = vsel %vm663_vm3, %v2161_v32, 0.0 }
 0x15d   :  { %v778_v9 = vadd.f32 %v777_v54, %v776_v12  ;;  %v789_v54 = vsel %vm663_vm3, %v2193_v42, 0.0 }
 0x15f   :  { %v780_v51 = vadd.f32 %v779_v33, %v778_v9 }
 0x161   :  { %v782_v13 = vadd.f32 %v781_v21, %v780_v51 }
 0x163   :  { %v784_v11 = vadd.f32 %v783_v38, %v782_v13 }
 0x165   :  { %v786_v5 = vadd.f32 %v785_v6, %v784_v11 }
 0x167   :  { %v788_v12 = vadd.f32 %v787_v14, %v786_v5 }
 0x169   :  { %v790_v9 = vadd.f32 %v789_v54, %v788_v12 }
 0x16b   :  { %v791_v33 = vrot.slane %v790_v9, 4 }
 0x16d   :  { %v792_v63 = vadd.f32 %v791_v33, %v790_v9 }
 0x16f   :  { %v793_v56 = vrot.slane %v792_v63, 2 }
 0x171   :  { %v794_v51 = vadd.f32 %v793_v56, %v792_v63 }
 0x173   :  { %v795_v21 = vrot.slane %v794_v51, 1 }
 0x175   :  { %v796_v47 = vadd.f32 %v795_v21, %v794_v51 }
 0x177   :  { %v797_v24 = vmul.f32 0.001953125, %v796_v47 }
 0x179   :  { %799 = vst.msk [vmem:[%s2837_s5] sm:$0x1] %vm798_vm4, %v797_v24 }
 0x180   :  { %v2260_v13 = vld [vmem:[%s2837_s5] ss:$0 sm:$0xff] }
 0x181   :  { %v806_v38 = vsub.f32 %v1589_v34, %v2260_v13  ;;  %v807_v11 = vsub.f32 %v1613_v40, %v2260_v13  ;;  %v808_v63 = vsub.f32 %v1629_v44, %v2260_v13  ;;  %v809_v47 = vsub.f32 %v1649_v49, %v2260_v13 }
 0x182   :  { %v2274_v5 = vsub.f32 %v1673_v55, %v2260_v13  ;;  %v2279_v40 = vsub.f32 %v1701_v62, %v2260_v13  ;;  %v2284_v49 = vsub.f32 %v1725_v4, %v2260_v13  ;;  %v2290_v55 = vsub.f32 %v1749_v10, %v2260_v13 }
 0x183   :  { %v872_v56 = vsel %vm663_vm3, %v806_v38, 0.0  ;;  %v873_v24 = vsel %vm663_vm3, %v807_v11, 0.0  ;;  %v875_v34 = vsel %vm663_vm3, %v808_v63, 0.0  ;;  %v877_v44 = vsel %vm663_vm3, %v809_v47, 0.0 }
 0x184   :  { %v874_v6 = vadd.f32 %v873_v24, %v872_v56  ;;  %v879_v54 = vsel %vm663_vm3, %v2274_v5, 0.0  ;;  %v881_v33 = vsel %vm663_vm3, %v2279_v40, 0.0  ;;  %v2296_v51 = vsub.f32 %v1781_v18, %v2260_v13 }
 0x185   :  { %v883_v4 = vsel %vm663_vm3, %v2284_v49, 0.0  ;;  %v2302_v56 = vsub.f32 %v1813_v26, %v2260_v13  ;;  %v885_v10 = vsel %vm663_vm3, %v2290_v55, 0.0 }
 0x186   :  { %v876_v14 = vadd.f32 %v875_v34, %v874_v6  ;;  %v2308_v6 = vsub.f32 %v1845_v36, %v2260_v13  ;;  %v887_v18 = vsel %vm663_vm3, %v2296_v51, 0.0 }
 0x187   :  { %v889_v26 = vsel %vm663_vm3, %v2302_v56, 0.0 }
 0x188   :  { %v878_v12 = vadd.f32 %v877_v44, %v876_v14  ;;  %v2314_v14 = vsub.f32 %v1877_v48, %v2260_v13  ;;  %v891_v36 = vsel %vm663_vm3, %v2308_v6, 0.0 }
 0x18a   :  { %v880_v9 = vadd.f32 %v879_v54, %v878_v12  ;;  %v2320_v12 = vsub.f32 %v1905_v7, %v2260_v13  ;;  %v893_v48 = vsel %vm663_vm3, %v2314_v14, 0.0 }
 0x18c   :  { %v882_v62 = vadd.f32 %v881_v33, %v880_v9  ;;  %v2326_v9 = vsub.f32 %v1953_v52, %v2260_v13  ;;  %v895_v7 = vsel %vm663_vm3, %v2320_v12, 0.0 }
 0x18e   :  { %v884_v21 = vadd.f32 %v883_v4, %v882_v62  ;;  %v2332_v62 = vsub.f32 %v1985_v28, %v2260_v13  ;;  %v897_v52 = vsel %vm663_vm3, %v2326_v9, 0.0 }
 0x190   :  { %v886_v24 = vadd.f32 %v885_v10, %v884_v21  ;;  %v2338_v21 = vsub.f32 %v2031_v25, %v2260_v13  ;;  %v899_v28 = vsel %vm663_vm3, %v2332_v62, 0.0 }
 0x192   :  { %v888_v34 = vadd.f32 %v887_v18, %v886_v24  ;;  %v2874_v24 = vld [vmem:[#allocation2_spill] sm:$0xff]  ;;  %v901_v25 = vsel %vm663_vm3, %v2338_v21, 0.0 }
 0x193   :  { %v2344_v18 = vsub.f32 %v2874_v24, %v2260_v13 }
 0x194   :  { %v890_v44 = vadd.f32 %v889_v26, %v888_v34  ;;  %v2350_v26 = vsub.f32 %v1615_v41, %v2260_v13 }
 0x196   :  { %v892_v54 = vadd.f32 %v891_v36, %v890_v44  ;;  %v2356_v36 = vsub.f32 %v1631_v45, %v2260_v13  ;;  %v905_v41 = vsel %vm663_vm3, %v2350_v26, 0.0 }
 0x198   :  { %v894_v33 = vadd.f32 %v893_v48, %v892_v54  ;;  %v903_v54 = vsel %vm663_vm3, %v2344_v18, 0.0  ;;  %v907_v45 = vsel %vm663_vm3, %v2356_v36, 0.0 }
 0x19a   :  { %v896_v4 = vadd.f32 %v895_v7, %v894_v33  ;;  %v2362_v33 = vsub.f32 %v1651_v50, %v2260_v13  ;;  %v1009_v7 = vmul.f32 %v806_v38, %v806_v38 }
 0x19c   :  { %v898_v10 = vadd.f32 %v897_v52, %v896_v4  ;;  %v1010_v4 = vmul.f32 %v807_v11, %v807_v11  ;;  %v1073_v38 = vsel %vm663_vm3, %v1009_v7, 0.0  ;;  %v2878_v7 = vld [vmem:[#allocation6_spill] sm:$0xff] }
 0x19d   :  { %v2391_v35 = vsub.f32 %v2878_v7, %v2260_v13 }
 0x19e   :  { %v900_v34 = vadd.f32 %v899_v28, %v898_v10  ;;  %v2875_v10 = vld [vmem:[#allocation3_spill] sm:$0xff]  ;;  %v1011_v28 = vmul.f32 %v808_v63, %v808_v63  ;;  %v1074_v11 = vsel %vm663_vm3, %v1010_v4, 0.0 }
 0x19f   :  { %v2368_v24 = vsub.f32 %v2875_v10, %v2260_v13  ;;  %v2877_v10 = vld [vmem:[#allocation5_spill] sm:$0xff] }
 0x1a0   :  { %v902_v44 = vadd.f32 %v901_v25, %v900_v34  ;;  %v2876_v34 = vld [vmem:[#allocation4_spill] sm:$0xff]  ;;  %v2382_v42 = vsub.f32 %v2877_v10, %v2260_v13 }
 0x1a1   :  { %v2374_v25 = vsub.f32 %v2876_v34, %v2260_v13  ;;  %v911_v63 = vsel %vm663_vm3, %v2368_v24, 0.0 }
 0x1a2   :  { %v904_v48 = vadd.f32 %v903_v54, %v902_v44  ;;  %v909_v44 = vsel %vm663_vm3, %v2362_v33, 0.0  ;;  %v1012_v54 = vmul.f32 %v809_v47, %v809_v47 }
 0x1a3   :  { %v913_v4 = vsel %vm663_vm3, %v2374_v25, 0.0 }
 0x1a4   :  { %v906_v52 = vadd.f32 %v905_v41, %v904_v48  ;;  %v1075_v41 = vadd.f32 %v1074_v11, %v1073_v38 }
 0x1a6   :  { %v908_v50 = vadd.f32 %v907_v45, %v906_v52  ;;  %v1013_v52 = vmul.f32 %v2274_v5, %v2274_v5  ;;  %v1076_v45 = vsel %vm663_vm3, %v1011_v28, 0.0  ;;  %v2400_v5 = vsub.f32 %v1783_v19, %v2260_v13 }
 0x1a7   :  { %v1077_v47 = vadd.f32 %v1076_v45, %v1075_v41  ;;  %v915_v28 = vsel %vm663_vm3, %v2382_v42, 0.0  ;;  %v1016_v19 = vmul.f32 %v2290_v55, %v2290_v55  ;;  %v2879_v55 = vld [vmem:[#allocation9_spill] sm:$0xff] }
 0x1a8   :  { %v910_v48 = vadd.f32 %v909_v44, %v908_v50  ;;  %v1014_v50 = vmul.f32 %v2279_v40, %v2279_v40  ;;  %v1078_v44 = vsel %vm663_vm3, %v1012_v54, 0.0  ;;  %v1080_v41 = vsel %vm663_vm3, %v1013_v52, 0.0 }
 0x1a9   :  { %v1079_v11 = vadd.f32 %v1078_v44, %v1077_v47  ;;  %v2409_v40 = vsub.f32 %v1815_v27, %v2260_v13  ;;  %v917_v54 = vsel %vm663_vm3, %v2391_v35, 0.0  ;;  %v919_v52 = vsel %vm663_vm3, %v2400_v5, 0.0 }
 0x1aa   :  { %v912_v34 = vadd.f32 %v911_v63, %v910_v48  ;;  %v1015_v48 = vmul.f32 %v2284_v49, %v2284_v49  ;;  %v1082_v45 = vsel %vm663_vm3, %v1014_v50, 0.0  ;;  %v2418_v49 = vsub.f32 %v1847_v37, %v2260_v13 }
 0x1ab   :  { %v1081_v63 = vadd.f32 %v1080_v41, %v1079_v11  ;;  %v1017_v27 = vmul.f32 %v2296_v51, %v2296_v51  ;;  %v921_v50 = vsel %vm663_vm3, %v2409_v40, 0.0  ;;  %v1018_v37 = vmul.f32 %v2302_v56, %v2302_v56  ;;  %v2880_v51 = vld [vmem:[#allocation10_spill] sm:$0xff]  ;;  %v2881_v56 = vld [vmem:[#allocation11_spill] sm:$0xff] }
 0x1ac   :  { %v914_v38 = vadd.f32 %v913_v4, %v912_v34  ;;  %v1084_v7 = vsel %vm663_vm3, %v1015_v48, 0.0  ;;  %v1086_v11 = vsel %vm663_vm3, %v1016_v19, 0.0  ;;  %v923_v48 = vsel %vm663_vm3, %v2418_v49, 0.0 }
 0x1ad   :  { %v1083_v47 = vadd.f32 %v1082_v45, %v1081_v63  ;;  %v1019_v63 = vmul.f32 %v2308_v6, %v2308_v6  ;;  %v2454_v6 = vsub.f32 %v1987_v29, %v2260_v13  ;;  %v1022_v29 = vmul.f32 %v2326_v9, %v2326_v9 }
 0x1ae   :  { %v916_v10 = vadd.f32 %v915_v28, %v914_v38  ;;  %v2427_v38 = vsub.f32 %v2879_v55, %v2260_v13  ;;  %v1021_v55 = vmul.f32 %v2320_v12, %v2320_v12  ;;  %v2472_v12 = vsub.f32 %v1657_v53, %v2260_v13 }
 0x1af   :  { %v1085_v44 = vadd.f32 %v1084_v7, %v1083_v47  ;;  %v2445_v47 = vsub.f32 %v2881_v56, %v2260_v13  ;;  %v1090_v7 = vsel %vm663_vm3, %v1018_v37, 0.0  ;;  %v2481_v9 = vsub.f32 %v1681_v59, %v2260_v13 }
 0x1b0   :  { %v918_v34 = vadd.f32 %v917_v54, %v916_v10  ;;  %v2436_v10 = vsub.f32 %v2880_v51, %v2260_v13  ;;  %v1088_v54 = vsel %vm663_vm3, %v1017_v27, 0.0  ;;  %v925_v19 = vsel %vm663_vm3, %v2427_v38, 0.0 }
 0x1b1   :  { %v1087_v41 = vadd.f32 %v1086_v11, %v1085_v44  ;;  %v929_v37 = vsel %vm663_vm3, %v2445_v47, 0.0  ;;  %v1024_v53 = vmul.f32 %v2338_v21, %v2338_v21  ;;  %v1025_v59 = vmul.f32 %v2344_v18, %v2344_v18  ;;  %v2883_v18 = vld [vmem:[#allocation7_spill] sm:$0xff] }
 0x1b2   :  { %v920_v4 = vadd.f32 %v919_v52, %v918_v34  ;;  %v1020_v52 = vmul.f32 %v2314_v14, %v2314_v14  ;;  %v927_v27 = vsel %vm663_vm3, %v2436_v10, 0.0  ;;  %v2882_v14 = vld [vmem:[#allocation12_spill] sm:$0xff]  ;;  %v2499_v21 = vsub.f32 %v1733_v8, %v2260_v13 }
 0x1b3   :  { %v1089_v34 = vadd.f32 %v1088_v54, %v1087_v41  ;;  %v2463_v41 = vsub.f32 %v2882_v14, %v2260_v13  ;;  %v1102_v14 = vsel %vm663_vm3, %v1024_v53, 0.0  ;;  %v1027_v8 = vmul.f32 %v2356_v36, %v2356_v36 }
 0x1b4   :  { %v922_v28 = vadd.f32 %v921_v50, %v920_v4  ;;  %v1092_v50 = vsel %vm663_vm3, %v1019_v63, 0.0  ;;  %v1094_v51 = vsel %vm663_vm3, %v1020_v52, 0.0  ;;  %v931_v63 = vsel %vm663_vm3, %v2454_v6, 0.0 }
 0x1b5   :  { %v1091_v44 = vadd.f32 %v1090_v7, %v1089_v34  ;;  %v1096_v34 = vsel %vm663_vm3, %v1021_v55, 0.0  ;;  %v933_v52 = vsel %vm663_vm3, %v2463_v41, 0.0  ;;  %v1098_v7 = vsel %vm663_vm3, %v1022_v29, 0.0 }
 0x1b6   :  { %v924_v45 = vadd.f32 %v923_v48, %v922_v28  ;;  %v2526_v36 = vsub.f32 %v1821_v30, %v2260_v13  ;;  %v1030_v30 = vmul.f32 %v2374_v25, %v2374_v25  ;;  %v2553_v25 = vsub.f32 %v1915_v17, %v2260_v13 }
 0x1b7   :  { %v1093_v28 = vadd.f32 %v1092_v50, %v1091_v44  ;;  %v1033_v17 = vmul.f32 %v2400_v5, %v2400_v5  ;;  %v2580_v5 = vsub.f32 %v2045_v60, %v2260_v13  ;;  %v1036_v60 = vmul.f32 %v2427_v38, %v2427_v38 }
 0x1b8   :  { %v926_v4 = vadd.f32 %v925_v19, %v924_v45  ;;  %v1023_v45 = vmul.f32 %v2332_v62, %v2332_v62  ;;  %v2490_v62 = vsub.f32 %v1709_v2, %v2260_v13  ;;  %v1026_v2 = vmul.f32 %v2350_v26, %v2350_v26 }
 0x1b9   :  { %v1095_v54 = vadd.f32 %v1094_v51, %v1093_v28  ;;  %v937_v28 = vsel %vm663_vm3, %v2481_v9, 0.0  ;;  %v2508_v51 = vsub.f32 %v2883_v18, %v2260_v13  ;;  %v2517_v26 = vsub.f32 %v1789_v22, %v2260_v13 }
 0x1ba   :  { %v928_v11 = vadd.f32 %v927_v27, %v926_v4  ;;  %v935_v27 = vsel %vm663_vm3, %v2472_v12, 0.0  ;;  %v1100_v55 = vsel %vm663_vm3, %v1023_v45, 0.0  ;;  %v1029_v22 = vmul.f32 %v2368_v24, %v2368_v24 }
 0x1bb   :  { %v1097_v19 = vadd.f32 %v1096_v34, %v1095_v54  ;;  %v1104_v54 = vsel %vm663_vm3, %v1025_v59, 0.0  ;;  %v941_v34 = vsel %vm663_vm3, %v2499_v21, 0.0  ;;  %v2544_v24 = vsub.f32 %v1885_v57, %v2260_v13 }
 0x1bc   :  { %v930_v48 = vadd.f32 %v929_v37, %v928_v11  ;;  %v1032_v57 = vmul.f32 %v2391_v35, %v2391_v35  ;;  %v2571_v35 = vsub.f32 %v1995_v39, %v2260_v13  ;;  %v1035_v39 = vmul.f32 %v2418_v49, %v2418_v49 }
 0x1bd   :  { %v1099_v44 = vadd.f32 %v1098_v7, %v1097_v19  ;;  %v1106_v19 = vsel %vm663_vm3, %v1026_v2, 0.0  ;;  %v943_v7 = vsel %vm663_vm3, %v2508_v51, 0.0  ;;  %v947_v2 = vsel %vm663_vm3, %v2526_v36, 0.0 }
 0x1be   :  { %v932_v56 = vadd.f32 %v931_v63, %v930_v48  ;;  %v939_v48 = vsel %vm663_vm3, %v2490_v62, 0.0  ;;  %v2598_v49 = vsub.f32 %v2101_v16, %v2260_v13  ;;  %v2607_v38 = vsub.f32 %v2117_v0, %v2260_v13 }
 0x1bf   :  { %v1101_v11 = vadd.f32 %v1100_v55, %v1099_v44  ;;  %v945_v55 = vsel %vm663_vm3, %v2517_v26, 0.0  ;;  %v1038_v16 = vmul.f32 %v2445_v47, %v2445_v47  ;;  %v1039_v0 = vmul.f32 %v2454_v6, %v2454_v6 }
 0x1c0   :  { %v934_v4 = vadd.f32 %v933_v52, %v932_v56  ;;  %v1028_v56 = vmul.f32 %v2362_v33, %v2362_v33  ;;  %v2884_v33 = vld [vmem:[#allocation8_spill] sm:$0xff]  ;;  %v2625_v47 = vsub.f32 %v1791_v23, %v2260_v13  ;;  %v2634_v6 = vsub.f32 %v1823_v31, %v2260_v13 }
 0x1c1   :  { %v1103_v29 = vadd.f32 %v1102_v14, %v1101_v11  ;;  %v2535_v59 = vsub.f32 %v2884_v33, %v2260_v13  ;;  %v1031_v14 = vmul.f32 %v2382_v42, %v2382_v42  ;;  %v2562_v42 = vsub.f32 %v1967_v1, %v2260_v13 }
 0x1c2   :  { %v936_v50 = vadd.f32 %v935_v27, %v934_v4  ;;  %v1108_v4 = vsel %vm663_vm3, %v1027_v8, 0.0  ;;  %v1114_v8 = vsel %vm663_vm3, %v1030_v30, 0.0  ;;  %v1034_v1 = vmul.f32 %v2409_v40, %v2409_v40  ;;  %v2885_v40 = vld [vmem:[#allocation13_spill] sm:$0xff] }
 0x1c3   :  { %v1105_v45 = vadd.f32 %v1104_v54, %v1103_v29  ;;  %v957_v30 = vsel %vm663_vm3, %v2571_v35, 0.0  ;;  %v1041_v23 = vmul.f32 %v2472_v12, %v2472_v12  ;;  %v1042_v31 = vmul.f32 %v2481_v9, %v2481_v9 }
 0x1c4   :  { %v938_v37 = vadd.f32 %v937_v28, %v936_v50  ;;  %v1110_v50 = vsel %vm663_vm3, %v1028_v56, 0.0  ;;  %v2652_v12 = vsub.f32 %v1887_v58, %v2260_v13  ;;  %v2661_v9 = vsub.f32 %v1917_v20, %v2260_v13 }
 0x1c5   :  { %v1107_v53 = vadd.f32 %v1106_v19, %v1105_v45  ;;  %v951_v45 = vsel %vm663_vm3, %v2544_v24, 0.0  ;;  %v1044_v58 = vmul.f32 %v2499_v21, %v2499_v21  ;;  %v1045_v20 = vmul.f32 %v2508_v51, %v2508_v51 }
 0x1c6   :  { %v940_v63 = vadd.f32 %v939_v48, %v938_v37  ;;  %v1112_v37 = vsel %vm663_vm3, %v1029_v22, 0.0  ;;  %v949_v48 = vsel %vm663_vm3, %v2535_v59, 0.0  ;;  %v2679_v21 = vsub.f32 %v1997_v46, %v2260_v13 }
 0x1c7   :  { %v1109_v27 = vadd.f32 %v1108_v4, %v1107_v53  ;;  %v1118_v53 = vsel %vm663_vm3, %v1032_v57, 0.0  ;;  %v955_v4 = vsel %vm663_vm3, %v2562_v42, 0.0  ;;  %v1126_v57 = vsel %vm663_vm3, %v1036_v60, 0.0 }
 0x1c8   :  { %v942_v52 = vadd.f32 %v941_v34, %v940_v63  ;;  %v1116_v34 = vsel %vm663_vm3, %v1031_v14, 0.0  ;;  %v1037_v14 = vmul.f32 %v2436_v10, %v2436_v10  ;;  %v2616_v10 = vsub.f32 %v1759_v15, %v2260_v13 }
 0x1c9   :  { %v1111_v28 = vadd.f32 %v1110_v50, %v1109_v27  ;;  %v1122_v50 = vsel %vm663_vm3, %v1034_v1, 0.0  ;;  %v1040_v15 = vmul.f32 %v2463_v41, %v2463_v41  ;;  %v2643_v41 = vsub.f32 %v1855_v43, %v2260_v13 }
 0x1ca   :  { %v944_v44 = vadd.f32 %v943_v7, %v942_v52  ;;  %v953_v52 = vsel %vm663_vm3, %v2553_v25, 0.0  ;;  %v1043_v43 = vmul.f32 %v2490_v62, %v2490_v62  ;;  %v2670_v62 = vsub.f32 %v1969_v3, %v2260_v13 }
 0x1cb   :  { %v1113_v18 = vadd.f32 %v1112_v37, %v1111_v28  ;;  %v1124_v37 = vsel %vm663_vm3, %v1035_v39, 0.0  ;;  %v969_v39 = vsel %vm663_vm3, %v2625_v47, 0.0  ;;  %v1046_v3 = vmul.f32 %v2517_v26, %v2517_v26  ;;  %v2886_v26 = vld [vmem:[#allocation14_spill] sm:$0xff] }
 0x1cc   :  { %v946_v11 = vadd.f32 %v945_v55, %v944_v44  ;;  %v1120_v44 = vsel %vm663_vm3, %v1033_v17, 0.0  ;;  %v2589_v55 = vsub.f32 %v2885_v40, %v2260_v13  ;;  %v971_v40 = vsel %vm663_vm3, %v2634_v6, 0.0 }
 0x1cd   :  { %v1115_v63 = vadd.f32 %v1114_v8, %v1113_v18  ;;  %v2688_v51 = vsub.f32 %v2047_v61, %v2260_v13  ;;  %v1047_v46 = vmul.f32 %v2526_v36, %v2526_v36  ;;  %v1048_v61 = vmul.f32 %v2535_v59, %v2535_v59  ;;  %v2887_v36 = vld [vmem:[#allocation15_spill] sm:$0xff]  ;;  %v2888_v59 = vld [vmem:[#allocation16_spill] sm:$0xff] }
 0x1ce   :  { %v948_v29 = vadd.f32 %v947_v2, %v946_v11  ;;  %v959_v2 = vsel %vm663_vm3, %v2580_v5, 0.0 }
 0x1cf   :  { %v1117_v19 = vadd.f32 %v1116_v34, %v1115_v63  ;;  %v963_v63 = vsel %vm663_vm3, %v2598_v49, 0.0 }
 0x1d0   :  { %v950_v54 = vadd.f32 %v949_v48, %v948_v29  ;;  %v961_v48 = vsel %vm663_vm3, %v2589_v55, 0.0 }
 0x1d1   :  { %v1119_v22 = vadd.f32 %v1118_v53, %v1117_v19  ;;  %v1130_v19 = vsel %vm663_vm3, %v1038_v16, 0.0  ;;  %v967_v53 = vsel %vm663_vm3, %v2616_v10, 0.0  ;;  %v977_v16 = vsel %vm663_vm3, %v2661_v9, 0.0 }
 0x1d2   :  { %v952_v56 = vadd.f32 %v951_v45, %v950_v54  ;;  %v1128_v45 = vsel %vm663_vm3, %v1037_v14, 0.0 }
 0x1d3   :  { %v1121_v33 = vadd.f32 %v1120_v44, %v1119_v22  ;;  %v1134_v44 = vsel %vm663_vm3, %v1040_v15, 0.0  ;;  %v1146_v15 = vsel %vm663_vm3, %v1046_v3, 0.0 }
 0x1d4   :  { %v954_v7 = vadd.f32 %v953_v52, %v952_v56  ;;  %v965_v56 = vsel %vm663_vm3, %v2607_v38, 0.0 }
 0x1d5   :  { %v1123_v28 = vadd.f32 %v1122_v50, %v1121_v33 }
 0x1d6   :  { %v956_v27 = vadd.f32 %v955_v4, %v954_v7  ;;  %v1132_v7 = vsel %vm663_vm3, %v1039_v0, 0.0  ;;  %v1144_v0 = vsel %vm663_vm3, %v1045_v20, 0.0 }
 0x1d7   :  { %v1125_v18 = vadd.f32 %v1124_v37, %v1123_v28  ;;  %v1138_v28 = vsel %vm663_vm3, %v1042_v31, 0.0  ;;  %v975_v37 = vsel %vm663_vm3, %v2652_v12, 0.0 }
 0x1d8   :  { %v958_v11 = vadd.f32 %v957_v30, %v956_v27  ;;  %v1136_v30 = vsel %vm663_vm3, %v1041_v23, 0.0  ;;  %v1049_v23 = vmul.f32 %v2544_v24, %v2544_v24  ;;  %v2889_v24 = vld [vmem:[#allocation17_spill] sm:$0xff] }
 0x1d9   :  { %v1127_v54 = vadd.f32 %v1126_v57, %v1125_v18  ;;  %v1142_v57 = vsel %vm663_vm3, %v1044_v58, 0.0 }
 0x1da   :  { %v960_v29 = vadd.f32 %v959_v2, %v958_v11  ;;  %v973_v11 = vsel %vm663_vm3, %v2643_v41, 0.0 }
 0x1db   :  { %v1129_v34 = vadd.f32 %v1128_v45, %v1127_v54 }
 0x1dc   :  { %v962_v8 = vadd.f32 %v961_v48, %v960_v29  ;;  %v1140_v29 = vsel %vm663_vm3, %v1043_v43, 0.0  ;;  %v2724_v43 = vsub.f32 %v2889_v24, %v2260_v13 }
 0x1dd   :  { %v1131_v1 = vadd.f32 %v1130_v19, %v1129_v34  ;;  %v2697_v34 = vsub.f32 %v2886_v26, %v2260_v13 }
 0x1de   :  { %v964_v17 = vadd.f32 %v963_v63, %v962_v8  ;;  %v979_v63 = vsel %vm663_vm3, %v2670_v62, 0.0 }
 0x1df   :  { %v1133_v4 = vadd.f32 %v1132_v7, %v1131_v1  ;;  %v2706_v1 = vsub.f32 %v2887_v36, %v2260_v13  ;;  %v1148_v7 = vsel %vm663_vm3, %v1047_v46, 0.0  ;;  %v985_v31 = vsel %vm663_vm3, %v2697_v34, 0.0 }
 0x1e0   :  { %v966_v52 = vadd.f32 %v965_v56, %v964_v17  ;;  %v981_v56 = vsel %vm663_vm3, %v2679_v21, 0.0 }
 0x1e1   :  { %v1135_v33 = vadd.f32 %v1134_v44, %v1133_v4  ;;  %v1050_v44 = vmul.f32 %v2553_v25, %v2553_v25  ;;  %v2733_v25 = vsub.f32 %v2161_v32, %v2260_v13  ;;  %v1053_v32 = vmul.f32 %v2580_v5, %v2580_v5 }
 0x1e2   :  { %v968_v22 = vadd.f32 %v967_v53, %v966_v52  ;;  %v983_v53 = vsel %vm663_vm3, %v2688_v51, 0.0 }
 0x1e3   :  { %v1137_v50 = vadd.f32 %v1136_v30, %v1135_v33  ;;  %v987_v30 = vsel %vm663_vm3, %v2706_v1, 0.0 }
 0x1e4   :  { %v970_v27 = vadd.f32 %v969_v39, %v968_v22  ;;  %v2715_v39 = vsub.f32 %v2888_v59, %v2260_v13 }
 0x1e5   :  { %v1139_v14 = vadd.f32 %v1138_v28, %v1137_v50  ;;  %v1152_v50 = vsel %vm663_vm3, %v1049_v23, 0.0  ;;  %v1058_v23 = vmul.f32 %v2625_v47, %v2625_v47  ;;  %v1061_v47 = vmul.f32 %v2652_v12, %v2652_v12 }
 0x1e6   :  { %v972_v60 = vadd.f32 %v971_v40, %v970_v27  ;;  %v1150_v27 = vsel %vm663_vm3, %v1048_v61, 0.0  ;;  %v989_v28 = vsel %vm663_vm3, %v2715_v39, 0.0 }
 0x1e7   :  { %v1141_v48 = vadd.f32 %v1140_v29, %v1139_v14  ;;  %v1154_v14 = vsel %vm663_vm3, %v1050_v44, 0.0  ;;  %v1176_v12 = vsel %vm663_vm3, %v1061_v47, 0.0 }
 0x1e8   :  { %v974_v2 = vadd.f32 %v973_v11, %v972_v60  ;;  %v1051_v60 = vmul.f32 %v2562_v42, %v2562_v42  ;;  %v2890_v42 = vld [vmem:[#allocation18_spill] sm:$0xff] }
 0x1e9   :  { %v1143_v54 = vadd.f32 %v1142_v57, %v1141_v48  ;;  %v2742_v29 = vsub.f32 %v2890_v42, %v2260_v13  ;;  %v1065_v42 = vmul.f32 %v2688_v51, %v2688_v51 }
 0x1ea   :  { %v976_v18 = vadd.f32 %v975_v37, %v974_v2  ;;  %v1052_v2 = vmul.f32 %v2571_v35, %v2571_v35  ;;  %v1156_v48 = vsel %vm663_vm3, %v1051_v60, 0.0  ;;  %v2891_v35 = vld [vmem:[#allocation19_spill] sm:$0xff] }
 0x1eb   :  { %v1145_v17 = vadd.f32 %v1144_v0, %v1143_v54  ;;  %v2751_v57 = vsub.f32 %v2891_v35, %v2260_v13  ;;  %v1054_v54 = vmul.f32 %v2589_v55, %v2589_v55  ;;  %v995_v5 = vsel %vm663_vm3, %v2742_v29, 0.0 }
 0x1ec   :  { %v978_v8 = vadd.f32 %v977_v16, %v976_v18  ;;  %v991_v18 = vsel %vm663_vm3, %v2724_v43, 0.0  ;;  %v1056_v55 = vmul.f32 %v2607_v38, %v2607_v38  ;;  %v1059_v38 = vmul.f32 %v2634_v6, %v2634_v6  ;;  %v870_v6 = vld [vmem:[%s2835_s3] sm:$0x1] }
 0x1ed   :  { %v1147_v52 = vadd.f32 %v1146_v15, %v1145_v17  ;;  %v1160_v17 = vsel %vm663_vm3, %v1053_v32, 0.0  ;;  %v1162_v61 = vsel %vm663_vm3, %v1054_v54, 0.0  ;;  %v1066_v32 = vmul.f32 %v2697_v34, %v2697_v34 }
 0x1ee   :  { %v980_v45 = vadd.f32 %v979_v63, %v978_v8  ;;  %v993_v8 = vsel %vm663_vm3, %v2733_v25, 0.0  ;;  %v1158_v63 = vsel %vm663_vm3, %v1052_v2, 0.0  ;;  %v1172_v24 = vsel %vm663_vm3, %v1059_v38, 0.0 }
 0x1ef   :  { %v1149_v4 = vadd.f32 %v1148_v7, %v1147_v52  ;;  %v1057_v52 = vmul.f32 %v2616_v10, %v2616_v10  ;;  %v1166_v7 = vsel %vm663_vm3, %v1056_v55, 0.0  ;;  %v1060_v10 = vmul.f32 %v2643_v41, %v2643_v41 }
 0x1f0   :  { %v982_v19 = vadd.f32 %v981_v56, %v980_v45  ;;  %v1055_v45 = vmul.f32 %v2598_v49, %v2598_v49  ;;  %v997_v56 = vsel %vm663_vm3, %v2751_v57, 0.0  ;;  %v1186_v51 = vsel %vm663_vm3, %v1066_v32, 0.0 }
 0x1f1   :  { %v1151_v40 = vadd.f32 %v1150_v27, %v1149_v4  ;;  %v1168_v59 = vsel %vm663_vm3, %v1057_v52, 0.0  ;;  %v1170_v27 = vsel %vm663_vm3, %v1058_v23, 0.0  ;;  %v1174_v41 = vsel %vm663_vm3, %v1060_v10, 0.0 }
 0x1f2   :  { %v984_v22 = vadd.f32 %v983_v53, %v982_v19  ;;  %v1164_v36 = vsel %vm663_vm3, %v1055_v45, 0.0  ;;  %v1071_v45 = vmul.f32 %v2742_v29, %v2742_v29 }
 0x1f3   :  { %v1153_v58 = vadd.f32 %v1152_v50, %v1151_v40  ;;  %v1062_v50 = vmul.f32 %v2661_v9, %v2661_v9 }
 0x1f4   :  { %v986_v33 = vadd.f32 %v985_v31, %v984_v22 }
 0x1f5   :  { %v1155_v20 = vadd.f32 %v1154_v14, %v1153_v58 }
 0x1f6   :  { %v988_v11 = vadd.f32 %v987_v30, %v986_v33 }
 0x1f7   :  { %v1157_v3 = vadd.f32 %v1156_v48, %v1155_v20  ;;  %v1178_v20 = vsel %vm663_vm3, %v1062_v50, 0.0 }
 0x1f8   :  { %v990_v37 = vadd.f32 %v989_v28, %v988_v11  ;;  %v1063_v28 = vmul.f32 %v2670_v62, %v2670_v62 }
 0x1f9   :  { %v1159_v0 = vadd.f32 %v1158_v63, %v1157_v3  ;;  %v1184_v3 = vsel %vm663_vm3, %v1065_v42, 0.0  ;;  %v1069_v63 = vmul.f32 %v2724_v43, %v2724_v43 }
 0x1fa   :  { %v992_v16 = vadd.f32 %v991_v18, %v990_v37  ;;  %v1064_v37 = vmul.f32 %v2679_v21, %v2679_v21  ;;  %v1180_v62 = vsel %vm663_vm3, %v1063_v28, 0.0 }
 0x1fb   :  { %v1161_v26 = vadd.f32 %v1160_v17, %v1159_v0  ;;  %v1070_v0 = vmul.f32 %v2733_v25, %v2733_v25 }
 0x1fc   :  { %v994_v46 = vadd.f32 %v993_v8, %v992_v16  ;;  %v1182_v48 = vsel %vm663_vm3, %v1064_v37, 0.0  ;;  %v1067_v16 = vmul.f32 %v2706_v1, %v2706_v1  ;;  %v1068_v8 = vmul.f32 %v2715_v39, %v2715_v39 }
 0x1fd   :  { %v1163_v19 = vadd.f32 %v1162_v61, %v1161_v26  ;;  %v1192_v39 = vsel %vm663_vm3, %v1069_v63, 0.0  ;;  %v1194_v43 = vsel %vm663_vm3, %v1070_v0, 0.0 }
 0x1fe   :  { %v996_v13 = vadd.f32 %v995_v5, %v994_v46  ;;  %v1188_v34 = vsel %vm663_vm3, %v1067_v16, 0.0  ;;  %v1190_v1 = vsel %vm663_vm3, %v1068_v8, 0.0 }
 0x1ff   :  { %v1165_v53 = vadd.f32 %v1164_v36, %v1163_v19 }
 0x200   :  { %v998_v15 = vadd.f32 %v997_v56, %v996_v13  ;;  %v1072_v13 = vmul.f32 %v2751_v57, %v2751_v57  ;;  %v1196_v56 = vsel %vm663_vm3, %v1071_v45, 0.0 }
 0x201   :  { %v1167_v4 = vadd.f32 %v1166_v7, %v1165_v53 }
 0x202   :  { %v999_v49 = vrot.slane %v998_v15, 4  ;;  %v1198_v25 = vsel %vm663_vm3, %v1072_v13, 0.0 }
 0x203   :  { %v1169_v44 = vadd.f32 %v1168_v59, %v1167_v4 }
 0x204   :  { %v1000_v22 = vadd.f32 %v999_v49, %v998_v15  ;;  %v1008_v49 = vld [vmem:[%s2836_s4] sm:$0x1] }
 0x205   :  { %v1171_v40 = vadd.f32 %v1170_v27, %v1169_v44 }
 0x206   :  { %v1001_v31 = vrot.slane %v1000_v22, 2 }
 0x207   :  { %v1173_v60 = vadd.f32 %v1172_v24, %v1171_v40 }
 0x208   :  { %v1002_v33 = vadd.f32 %v1001_v31, %v1000_v22 }
 0x209   :  { %v1175_v58 = vadd.f32 %v1174_v41, %v1173_v60 }
 0x20a   :  { %v1003_v30 = vrot.slane %v1002_v33, 1 }
 0x20b   :  { %v1177_v14 = vadd.f32 %v1176_v12, %v1175_v58 }
 0x20c   :  { %v1004_v11 = vadd.f32 %v1003_v30, %v1002_v33 }
 0x20d   :  { %v1179_v9 = vadd.f32 %v1178_v20, %v1177_v14 }
 0x20e   :  { %v1005_v2 = vadd.f32 %v1004_v11, %v870_v6 }
 0x20f   :  { %v1181_v18 = vadd.f32 %v1180_v62, %v1179_v9 }
 0x210   :  { %1007 = vst.msk [vmem:[%s2835_s3] sm:$0x1] %vm798_vm4, %v1005_v2 }
 0x211   :  { %v1183_v21 = vadd.f32 %v1182_v48, %v1181_v18 }
 0x213   :  { %v1185_v35 = vadd.f32 %v1184_v3, %v1183_v21 }
 0x215   :  { %v1187_v54 = vadd.f32 %v1186_v51, %v1185_v35 }
 0x217   :  { %v1189_v46 = vadd.f32 %v1188_v34, %v1187_v54 }
 0x219   :  { %v1191_v5 = vadd.f32 %v1190_v1, %v1189_v46 }
 0x21b   :  { %v1193_v17 = vadd.f32 %v1192_v39, %v1191_v5 }
 0x21d   :  { %v1195_v26 = vadd.f32 %v1194_v43, %v1193_v17 }
 0x21f   :  { %v1197_v55 = vadd.f32 %v1196_v56, %v1195_v26 }
 0x221   :  { %v1199_v61 = vadd.f32 %v1198_v25, %v1197_v55 }
 0x223   :  { %v1200_v15 = vrot.slane %v1199_v61, 4 }
 0x225   :  { %v1201_v19 = vadd.f32 %v1200_v15, %v1199_v61 }
 0x227   :  { %v1202_v52 = vrot.slane %v1201_v19, 2 }
 0x229   :  { %v1203_v36 = vadd.f32 %v1202_v52, %v1201_v19 }
 0x22b   :  { %v1204_v29 = vrot.slane %v1203_v36, 1 }
 0x22d   :  { %v1205_v53 = vadd.f32 %v1204_v29, %v1203_v36 }
 0x22f   :  { %v1206_v57 = vadd.f32 %v1205_v53, %v1008_v49 }
 0x231   :  { %1207 = vst.msk [vmem:[%s2836_s4] sm:$0x1] %vm798_vm4, %v1206_v57 }

// kernel: _lambda_.17
= control target key start
LH: loop header
LB: loop body
LE: loop exit
PB: predicated region body
PF: predicated region fallthrough
CT: control target
= control target key end

     0   :  { %v160_v0 = vmov 0.0   ;;  %v161_v17 = vmov 0   ;;  %s243_s4 = inlined_call_operand.vmem [shape: f32[1,1,128], index: 4, kind: output, shape index: {1}]   ;;  %s244_s5 = inlined_call_operand.vmem [shape: f32[1,1,128], index: 5, kind: output, shape index: {2}]   ;;  %s245_s0 = inlined_call_operand.vmem [shape: bf16[1,32,128], index: 0, kind: input, shape index: {}]   ;;  %s246_s1 = inlined_call_operand.vmem [shape: bf16[1,32,128], index: 1, kind: input, shape index: {}]   ;;  %s247_s2 = inlined_call_operand.vmem [shape: f32[1,6,128], index: 2, kind: input, shape index: {}]   ;;  %s248_s3 = inlined_call_operand.vmem [shape: bf16[1,32,128], index: 3, kind: output, shape index: {0}]  }
   0x1   :  { %82 = vst [vmem:[%s243_s4] sm:$0x1] %v160_v0  ;;  %v17_v1 = vld [vmem:[%s247_s2] sm:$0x3f]  ;;  %v155_v8 = vld [vmem:[%s245_s0 + $0x8] sm:$0xff]  }
   0x2   :  { %v130_v2 = vld [vmem:[%s245_s0] sm:$0xff]   ;;  %83 = vst [vmem:[%s244_s5] sm:$0x1] %v160_v0  ;;  %v26_v6 = vperm.slane %v17_v1, 0  ;;  %v31_v7 = vperm.slane %v17_v1, 1  ;;  %v44_v11 = vperm.slane %v17_v1, 2  ;;  %vm58_vm0 = vcmp.gt.f32.partialorder %v17_v1, 0.0 }
   0x3   :  { %v138_v3 = vld [vmem:[%s246_s1] sm:$0xff]   ;;  %v131_v4 = vunpack.c.l.bf16 %v130_v2  ;;  %v132_v5 = vunpack.c.h.bf16 %v130_v2  ;;  %v156_v14 = vld [vmem:[%s246_s1 + $0x8] sm:$0xff]   ;;  %v63_v18 = vsel %vm58_vm0, 1, %v161_v17  ;;  %v135_v19 = vunpack.c.l.bf16 %v155_v8 }
   0x4   :  { %v139_v9 = vunpack.c.l.bf16 %v138_v3  ;;  %v140_v10 = vunpack.c.h.bf16 %v138_v3  ;;  %v53_v22 = vperm.slane %v17_v1, 3  ;;  %v136_v23 = vunpack.c.h.bf16 %v155_v8 }
   0x5   :  { %v27_v12 = vmul.f32 %v131_v4, %v26_v6  ;;  %v28_v13 = vmul.f32 %v132_v5, %v26_v6  ;;  %v64_v24 = vperm.slane %v63_v18, 4  ;;  %v29_v25 = vmul.f32 %v135_v19, %v26_v6 }
   0x6   :  { %v45_v15 = vmul.f32 %v139_v9, %v44_v11  ;;  %v46_v16 = vmul.f32 %v140_v10, %v44_v11  ;;  %v143_v26 = vunpack.c.l.bf16 %v156_v14  ;;  %v144_v27 = vunpack.c.h.bf16 %v156_v14 }
   0x7   :  { %v32_v20 = vadd.f32 %v31_v7, %v27_v12  ;;  %v33_v21 = vadd.f32 %v31_v7, %v28_v13  ;;  %v30_v30 = vmul.f32 %v136_v23, %v26_v6  ;;  %v34_v31 = vadd.f32 %v31_v7, %v29_v25 }
   0x8   :  { %v47_v32 = vmul.f32 %v143_v26, %v44_v11  ;;  %v48_v33 = vmul.f32 %v144_v27, %v44_v11  ;;  %vm213_vm1 = vcmp.eq.s32.totalorder %v64_v24, 1  ;;  %v84_v38 = vperm.slane %v17_v1, 5  ;;  %v89_v12 = vld [vmem:[%s243_s4] sm:$0x1] }
   0x9   :  { %v49_v28 = vadd.f32 %v45_v15, %v32_v20  ;;  %v50_v29 = vadd.f32 %v46_v16, %v33_v21  ;;  %v35_v36 = vadd.f32 %v31_v7, %v30_v30  ;;  %v101_v15 = vld [vmem:[%s244_s5] sm:$0x1] }
   0xa   :  { %v51_v39 = vadd.f32 %v47_v32, %v34_v31 }
   0xb   :  { %v54_v34 = vadd.f32 %v53_v22, %v49_v28  ;;  %v55_v35 = vadd.f32 %v53_v22, %v50_v29  ;;  %v52_v42 = vadd.f32 %v48_v33, %v35_v36 }
   0xc   :  { %v56_v43 = vadd.f32 %v53_v22, %v51_v39 }
   0xd   :  { %v59_v40 = vmax.f32 %v54_v34, 0.0  ;;  %v60_v41 = vmax.f32 %v55_v35, 0.0  ;;  %v57_v46 = vadd.f32 %v53_v22, %v52_v42 }
   0xe   :  { %v61_v50 = vmax.f32 %v56_v43, 0.0 }
   0xf   :  { %v66_v44 = vsel %vm213_vm1, %v59_v40, %v54_v34  ;;  %v67_v45 = vsel %vm213_vm1, %v60_v41, %v55_v35  ;;  %v62_v51 = vmax.f32 %v57_v46, 0.0 }
  0x10   :  { %v148_v47 = vpack.c.bf16 %v67_v45, %v66_v44  ;;  %v85_v48 = vsub.f32 %v66_v44, %v84_v38  ;;  %v86_v49 = vsub.f32 %v67_v45, %v84_v38  ;;  %v68_v55 = vsel %vm213_vm1, %v61_v50, %v56_v43 }
  0x11   :  { %v69_v56 = vsel %vm213_vm1, %v62_v51, %v57_v46  ;;  %v87_v57 = vsub.f32 %v68_v55, %v84_v38 }
  0x12   :  { %149 = vst [vmem:[%s248_s3] sm:$0xff] %v148_v47   ;;  %v90_v52 = vadd.f32 %v86_v49, %v85_v48  ;;  %v102_v53 = vmul.f32 %v85_v48, %v85_v48  ;;  %v103_v54 = vmul.f32 %v86_v49, %v86_v49  ;;  %v153_v59 = vpack.c.bf16 %v69_v56, %v68_v55 }
  0x13   :  { %v88_v60 = vsub.f32 %v69_v56, %v84_v38  ;;  %v104_v62 = vmul.f32 %v87_v57, %v87_v57 }
  0x14   :  { %v106_v58 = vadd.f32 %v103_v54, %v102_v53  ;;  %v91_v61 = vadd.f32 %v90_v52, %v87_v57  ;;  %157 = vst [vmem:[%s248_s3 + $0x8] sm:$0xff] %v153_v59  }
  0x15   :  { %v105_v63 = vmul.f32 %v88_v60, %v88_v60 }
  0x16   :  { %v92_v0 = vadd.f32 %v91_v61, %v88_v60  ;;  %v107_v1 = vadd.f32 %v106_v58, %v104_v62 }
  0x18   :  { %v93_v2 = vrot.slane %v92_v0, 4  ;;  %v108_v3 = vadd.f32 %v107_v1, %v105_v63 }
  0x1a   :  { %v94_v4 = vadd.f32 %v93_v2, %v92_v0  ;;  %v109_v5 = vrot.slane %v108_v3, 4 }
  0x1c   :  { %v95_v6 = vrot.slane %v94_v4, 2  ;;  %v110_v7 = vadd.f32 %v109_v5, %v108_v3 }
  0x1e   :  { %v96_v8 = vadd.f32 %v95_v6, %v94_v4  ;;  %v111_v9 = vrot.slane %v110_v7, 2 }
  0x20   :  { %v97_v10 = vrot.slane %v96_v8, 1  ;;  %v112_v11 = vadd.f32 %v111_v9, %v110_v7 }
  0x22   :  { %v98_v13 = vadd.f32 %v97_v10, %v96_v8  ;;  %v113_v14 = vrot.slane %v112_v11, 1 }
  0x24   :  { %v99_v16 = vadd.f32 %v98_v13, %v89_v12  ;;  %v114_v17 = vadd.f32 %v113_v14, %v112_v11 }
  0x26   :  { %100 = vst [vmem:[%s243_s4] sm:$0x1] %v99_v16  ;;  %v115_v18 = vadd.f32 %v114_v17, %v101_v15 }
  0x28   :  { %116 = vst [vmem:[%s244_s5] sm:$0x1] %v115_v18 }

// kernel: squeeze.44
= control target key start
LH: loop header
LB: loop body
LE: loop exit
PB: predicated region body
PF: predicated region fallthrough
CT: control target
= control target key end

     0   :  { %s130_s8 = smov 120   ;;  %s131_s9 = smov 88   ;;  %vm7_vm0 = vcmask 64512   ;;  %s221_s0 = inlined_call_operand.vmem [shape: f32[128], index: 0, kind: input, shape index: {}]   ;;  %s222_s1 = inlined_call_operand.vmem [shape: f32[16,8], index: 1, kind: output, shape index: {}]  }
   0x1   :  { %v4_v0 = vld [vmem:[%s221_s0] sm:$0x1]  ;;  %s129_s0 = smov 104   ;;  %s132_s10 = smov 96  }
   0x2   :  { %5 = vst [vmem:[#allocation0] sm:$0x1] %v4_v0  ;;  %s133_s11 = smov 112   ;;  %s134_s12 = smov 80  }
   0x3   :  { %s135_s13 = smov 64   ;;  %s136_s14 = smov 72  }
   0x4   :  { %s137_s15 = smov 56   ;;  %s138_s16 = smov 40  }
   0x5   :  { %s139_s17 = smov 48   ;;  %s140_s18 = smov 32  }
   0x6   :  { %s141_s19 = smov 16   ;;  %s142_s20 = smov 24  }
   0x7   :  { %s143_s21 = smov 8  }
   0x9   :  { %v21_v1 = vld [vmem:[#allocation0] sm:$0x1]  }
   0xa   :  { %v9_v2 = vld [vmem:[#allocation0] sm:$0x1]   ;;  %22 = vrot.lane.b32.xlu1 %v21_v1, %s129_s0 }
   0xb   :  { %10 = vrot.lane.b32.xlu0 %v9_v2, %s130_s8  ;;  %v33_v3 = vld [vmem:[#allocation0] sm:$0x1]  }
   0xc   :  { %34 = vrot.lane.b32.xlu2 %v33_v3, %s131_s9  ;;  %v27_v4 = vld [vmem:[#allocation0] sm:$0x1]  }
   0xd   :  { %v15_v5 = vld [vmem:[#allocation0] sm:$0x1]  }
   0xe   :  { %v39_v6 = vld [vmem:[#allocation0] sm:$0x1]  }
   0xf   :  { %v51_v7 = vld [vmem:[#allocation0] sm:$0x1]  }
  0x10   :  { %v45_v8 = vld [vmem:[#allocation0] sm:$0x1]  }
  0x11   :  { %v57_v9 = vld [vmem:[#allocation0] sm:$0x1]  }
  0x12   :  { %28 = vrot.lane.b32.xlu1 %v27_v4, %s132_s10  ;;  %v69_v10 = vld [vmem:[#allocation0] sm:$0x1]  }
  0x13   :  { %16 = vrot.lane.b32.xlu0 %v15_v5, %s133_s11  ;;  %v63_v11 = vld [vmem:[#allocation0] sm:$0x1]  }
  0x14   :  { %40 = vrot.lane.b32.xlu2 %v39_v6, %s134_s12  ;;  %v75_v12 = vld [vmem:[#allocation0] sm:$0x1]  }
  0x15   :  { %v87_v13 = vld [vmem:[#allocation0] sm:$0x1]  }
  0x16   :  { %v81_v14 = vld [vmem:[#allocation0] sm:$0x1]  }
  0x17   :  { %v93_v15 = vld [vmem:[#allocation0] sm:$0x1]  }
  0x18   :  { %v6_v21 = vld [vmem:[#allocation0] sm:$0x1]  }
  0x19   :  { %8 = vst.msk [vmem:[%s222_s1] sm:$0x1] %vm7_vm0, %v6_v21  }
  0x1a   :  { %52 = vrot.lane.b32.xlu1 %v51_v7, %s135_s13 }
  0x1b   :  { %46 = vrot.lane.b32.xlu0 %v45_v8, %s136_s14 }
  0x1c   :  { %58 = vrot.lane.b32.xlu2 %v57_v9, %s137_s15 }
  0x22   :  { %70 = vrot.lane.b32.xlu1 %v69_v10, %s138_s16 }
  0x23   :  { %64 = vrot.lane.b32.xlu0 %v63_v11, %s139_s17 }
  0x24   :  { %76 = vrot.lane.b32.xlu2 %v75_v12, %s140_s18 }
  0x2a   :  { %88 = vrot.lane.b32.xlu1 %v87_v13, %s141_s19 }
  0x2b   :  { %82 = vrot.lane.b32.xlu0 %v81_v14, %s142_s20 }
  0x2c   :  { %94 = vrot.lane.b32.xlu2 %v93_v15, %s143_s21 }
  0x66   :  { %v35_v16 = vpop.permute.xlu2 %34  }
  0x67   :  { %103 = vst.msk [vmem:[%s222_s1 + $0x5] sm:$0x1] %vm7_vm0, %v35_v16  }
  0x6e   :  { %v41_v17 = vpop.permute.xlu2 %40  }
  0x6f   :  { %104 = vst.msk [vmem:[%s222_s1 + $0x6] sm:$0x1] %vm7_vm0, %v41_v17  }
  0x76   :  { %v59_v18 = vpop.permute.xlu2 %58  }
  0x77   :  { %107 = vst.msk [vmem:[%s222_s1 + $0x9] sm:$0x1] %vm7_vm0, %v59_v18  }
  0x7c   :  { %v23_v19 = vpop.permute.xlu1 %22  }
  0x7d   :  { %v11_v20 = vpop.permute.xlu0 %10   ;;  %101 = vst.msk [vmem:[%s222_s1 + $0x3] sm:$0x1] %vm7_vm0, %v23_v19  }
  0x7e   :  { %99 = vst.msk [vmem:[%s222_s1 + $0x1] sm:$0x1] %vm7_vm0, %v11_v20   ;;  %v77_v22 = vpop.permute.xlu2 %76  }
  0x7f   :  { %110 = vst.msk [vmem:[%s222_s1 + $0xc] sm:$0x1] %vm7_vm0, %v77_v22  }
  0x84   :  { %v29_v23 = vpop.permute.xlu1 %28  }
  0x85   :  { %v17_v24 = vpop.permute.xlu0 %16   ;;  %102 = vst.msk [vmem:[%s222_s1 + $0x4] sm:$0x1] %vm7_vm0, %v29_v23  }
  0x86   :  { %100 = vst.msk [vmem:[%s222_s1 + $0x2] sm:$0x1] %vm7_vm0, %v17_v24   ;;  %v95_v25 = vpop.permute.xlu2 %94  }
  0x87   :  { %113 = vst.msk [vmem:[%s222_s1 + $0xf] sm:$0x1] %vm7_vm0, %v95_v25  }
  0x8c   :  { %v53_v26 = vpop.permute.xlu1 %52  }
  0x8d   :  { %v47_v27 = vpop.permute.xlu0 %46   ;;  %106 = vst.msk [vmem:[%s222_s1 + $0x8] sm:$0x1] %vm7_vm0, %v53_v26  }
  0x8e   :  { %105 = vst.msk [vmem:[%s222_s1 + $0x7] sm:$0x1] %vm7_vm0, %v47_v27  }
  0x94   :  { %v71_v28 = vpop.permute.xlu1 %70  }
  0x95   :  { %v65_v29 = vpop.permute.xlu0 %64   ;;  %109 = vst.msk [vmem:[%s222_s1 + $0xb] sm:$0x1] %vm7_vm0, %v71_v28  }
  0x96   :  { %108 = vst.msk [vmem:[%s222_s1 + $0xa] sm:$0x1] %vm7_vm0, %v65_v29  }
  0x9c   :  { %v89_v30 = vpop.permute.xlu1 %88  }
  0x9d   :  { %v83_v31 = vpop.permute.xlu0 %82   ;;  %112 = vst.msk [vmem:[%s222_s1 + $0xe] sm:$0x1] %vm7_vm0, %v89_v30  }
  0x9e   :  { %111 = vst.msk [vmem:[%s222_s1 + $0xd] sm:$0x1] %vm7_vm0, %v83_v31  }

// kernel: _lambda_.15
= control target key start
LH: loop header
LB: loop body
LE: loop exit
PB: predicated region body
PF: predicated region fallthrough
CT: control target
= control target key end

     0   :  { %vm507_vm0 = vcmask 1043456   ;;  %vm410_vm1 = vcmask 588800   ;;  %vm744_vm2 = vcmask 60416   ;;  %vm813_vm3 = vcmask 64512   ;;  %s3143_s2 = inlined_call_operand.vmem [shape: bf16[1,72,8], index: 2, kind: input, shape index: {}]   ;;  %s3144_s0 = inlined_call_operand.vmem [shape: bf16[1,512,72], index: 0, kind: input, shape index: {}]   ;;  %s3145_s1 = inlined_call_operand.vmem [shape: f32[1,2,72], index: 1, kind: input, shape index: {}]   ;;  %s3146_s3 = inlined_call_operand.vmem [shape: bf16[1,512,8], index: 3, kind: output, shape index: {0}]   ;;  %s3147_s4 = inlined_call_operand.vmem [shape: f32[1,1,8], index: 4, kind: output, shape index: {1}]   ;;  %s3148_s5 = inlined_call_operand.vmem [shape: f32[1,1,8], index: 5, kind: output, shape index: {2}]   ;;  %s3149_s6 = inlined_call_operand.vmem [shape: f32[1,1,8], index: 6, kind: output, shape index: {3}]  }
   0x1   :  { %v382_v0 = vld [vmem:[%s3143_s2 + $0x20] sm:$0xf]  ;;  %v1425_v9 = vld [vmem:[%s3143_s2 + $0x18] sm:$0xff]  ;;  %v1424_v17 = vld [vmem:[%s3143_s2 + $0x10] sm:$0xff]  ;;  %vm948_vm4 = vcmask 57344  }
   0x2   :  { %v400_v1 = vunpack.c.l.b16 %v382_v0  ;;  %v19_v2 = vld [vmem:[%s3145_s1] sm:$0x3]  ;;  %v1423_v23 = vld [vmem:[%s3143_s2 + $0x8] sm:$0xff]  ;;  %v1555_v48 = vld [vmem:[%s3144_s0 + $0x10] sm:$0xff]  }
   0x3   :  { %v1427_v3 = vld [vmem:[%s3144_s0] sm:$0xff]   ;;  %v1647_v8 = vperm.slane %v19_v2, 0  ;;  %v1657_v15 = vperm.slane %v19_v2, 1  ;;  %v1554_v26 = vld [vmem:[%s3144_s0 + $0x8] sm:$0xff]   ;;  %v1436_v55 = vunpack.c.l.bf16 %v1555_v48  ;;  %v1437_v56 = vunpack.c.h.bf16 %v1555_v48  ;;  %v1563_v61 = vld [vmem:[%s3144_s0 + $0x50] sm:$0xff]  }
   0x4   :  { %v405_v4 = vpack.c.b16 %v400_v1, %v400_v1  ;;  %v1428_v6 = vunpack.c.l.bf16 %v1427_v3  ;;  %v1429_v7 = vunpack.c.h.bf16 %v1427_v3  ;;  %v1561_v10 = vld [vmem:[%s3144_s0 + $0x40] sm:$0xff]   ;;  %v1432_v30 = vunpack.c.l.bf16 %v1554_v26  ;;  %v1562_v34 = vld [vmem:[%s3144_s0 + $0x48] sm:$0xff]  }
   0x5   :  { %v1460_v11 = vunpack.c.l.bf16 %v1561_v10  ;;  %v1461_v12 = vunpack.c.h.bf16 %v1561_v10  ;;  %v1422_v29 = vld [vmem:[%s3143_s2] sm:$0xff]  ;;  %v1433_v31 = vunpack.c.h.bf16 %v1554_v26  ;;  %v1464_v35 = vunpack.c.l.bf16 %v1562_v34 }
   0x6   :  { %v509_v5 = vsel %vm507_vm0, %v405_v4, 0  ;;  %v149_v13 = vmul.f32 %v1428_v6, %v1647_v8  ;;  %v150_v14 = vmul.f32 %v1429_v7, %v1647_v8  ;;  %v1465_v36 = vunpack.c.h.bf16 %v1562_v34  ;;  %v1569_v47 = vld [vmem:[%s3144_s0 + $0x80] sm:$0xff]  }
   0x7   :  { %514 = vmatpush.bf16.msra.mxu0 %v509_v5  ;;  %1585 = vmatpush.bf16.msra.mxu1 %v509_v5  ;;  %v165_v16 = vmul.f32 %v1460_v11, %v1647_v8  ;;  %v166_v18 = vmul.f32 %v1461_v12, %v1647_v8  ;;  %v151_v37 = vmul.f32 %v1432_v30, %v1647_v8  ;;  %v1492_v51 = vunpack.c.l.bf16 %v1569_v47  ;;  %v1577_v48 = vld [vmem:[%s3144_s0 + $0xc0] sm:$0xff]  }
   0x8   :  { %1586 = vmatpush.bf16.msra.mxu2 %v509_v5  ;;  %1587 = vmatpush.bf16.msra.mxu3 %v509_v5  ;;  %v214_v19 = vadd.f32 %v1657_v15, %v149_v13  ;;  %v215_v20 = vadd.f32 %v1657_v15, %v150_v14  ;;  %v152_v38 = vmul.f32 %v1433_v31, %v1647_v8  ;;  %v1493_v52 = vunpack.c.h.bf16 %v1569_v47  ;;  %v1570_v14 = vld [vmem:[%s3144_s0 + $0x88] sm:$0xff]   ;;  %v1571_v47 = vld [vmem:[%s3144_s0 + $0x90] sm:$0xff]  }
   0x9   :  { %v230_v21 = vadd.f32 %v1657_v15, %v165_v16  ;;  %v231_v22 = vadd.f32 %v1657_v15, %v166_v18  ;;  %v167_v39 = vmul.f32 %v1464_v35, %v1647_v8  ;;  %v168_v40 = vmul.f32 %v1465_v36, %v1647_v8  ;;  %v1556_v16 = vld [vmem:[%s3144_s0 + $0x18] sm:$0xff]  }
   0xa   :  { %v278_v24 = vmax.f32 %v214_v19, 0.0  ;;  %v279_v25 = vmax.f32 %v215_v20, 0.0  ;;  %v216_v41 = vadd.f32 %v1657_v15, %v151_v37  ;;  %v217_v42 = vadd.f32 %v1657_v15, %v152_v38 }
   0xb   :  { %515 = vmatpush.bf16.msra.mxu0 %v1425_v9  ;;  %1588 = vmatpush.bf16.msra.mxu1 %v1425_v9  ;;  %v294_v27 = vmax.f32 %v230_v21, 0.0  ;;  %v295_v28 = vmax.f32 %v231_v22, 0.0  ;;  %v232_v43 = vadd.f32 %v1657_v15, %v167_v39  ;;  %v233_v44 = vadd.f32 %v1657_v15, %v168_v40 }
   0xc   :  { %1589 = vmatpush.bf16.msra.mxu2 %v1425_v9  ;;  %1590 = vmatpush.bf16.msra.mxu3 %v1425_v9  ;;  %v342_v32 = vpack.c.bf16 %v279_v25, %v278_v24  ;;  %v280_v45 = vmax.f32 %v216_v41, 0.0  ;;  %v281_v46 = vmax.f32 %v217_v42, 0.0  ;;  %v181_v53 = vmul.f32 %v1492_v51, %v1647_v8 }
   0xd   :  { %v350_v33 = vpack.c.bf16 %v295_v28, %v294_v27  ;;  %v296_v49 = vmax.f32 %v232_v43, 0.0  ;;  %v297_v50 = vmax.f32 %v233_v44, 0.0  ;;  %v182_v54 = vmul.f32 %v1493_v52, %v1647_v8 }
   0xe   :  { %v343_v57 = vpack.c.bf16 %v281_v46, %v280_v45  ;;  %v246_v59 = vadd.f32 %v1657_v15, %v181_v53  ;;  %v1468_v0 = vunpack.c.l.bf16 %v1563_v61  ;;  %v1469_v1 = vunpack.c.h.bf16 %v1563_v61 }
   0xf   :  { %516 = vmatpush.bf16.msra.mxu0 %v1424_v17  ;;  %1591 = vmatpush.bf16.msra.mxu1 %v1424_v17  ;;  %v351_v58 = vpack.c.bf16 %v297_v50, %v296_v49  ;;  %v247_v60 = vadd.f32 %v1657_v15, %v182_v54  ;;  %v153_v2 = vmul.f32 %v1436_v55, %v1647_v8  ;;  %v1496_v19 = vunpack.c.l.bf16 %v1570_v14  ;;  %v1557_v49 = vld [vmem:[%s3144_s0 + $0x20] sm:$0xff]  }
  0x10   :  { %1592 = vmatpush.bf16.msra.mxu2 %v1424_v17  ;;  %1593 = vmatpush.bf16.msra.mxu3 %v1424_v17  ;;  %v310_v62 = vmax.f32 %v246_v59, 0.0  ;;  %v154_v3 = vmul.f32 %v1437_v56, %v1647_v8  ;;  %v169_v5 = vmul.f32 %v1468_v0, %v1647_v8  ;;  %v170_v6 = vmul.f32 %v1469_v1, %v1647_v8 }
  0x11   :  { %v311_v63 = vmax.f32 %v247_v60, 0.0  ;;  %v218_v7 = vadd.f32 %v1657_v15, %v153_v2  ;;  %v1497_v20 = vunpack.c.h.bf16 %v1570_v14  ;;  %v183_v21 = vmul.f32 %v1496_v19, %v1647_v8  ;;  %v1565_v2 = vld [vmem:[%s3144_s0 + $0x60] sm:$0xff]  }
  0x12   :  { %v219_v9 = vadd.f32 %v1657_v15, %v154_v3  ;;  %v234_v10 = vadd.f32 %v1657_v15, %v169_v5  ;;  %v235_v11 = vadd.f32 %v1657_v15, %v170_v6  ;;  %v1441_v24 = vunpack.c.h.bf16 %v1556_v16 }
  0x13   :  { %517 = vmatpush.bf16.msra.mxu0 %v1423_v23  ;;  %1594 = vmatpush.bf16.msra.mxu1 %v1423_v23  ;;  %v358_v4 = vpack.c.bf16 %v311_v63, %v310_v62  ;;  %v282_v12 = vmax.f32 %v218_v7, 0.0  ;;  %v184_v22 = vmul.f32 %v1497_v20, %v1647_v8  ;;  %v248_v27 = vadd.f32 %v1657_v15, %v183_v21 }
  0x14   :  { %1595 = vmatpush.bf16.msra.mxu2 %v1423_v23  ;;  %1596 = vmatpush.bf16.msra.mxu3 %v1423_v23  ;;  %v283_v13 = vmax.f32 %v219_v9, 0.0  ;;  %v298_v17 = vmax.f32 %v234_v10, 0.0  ;;  %v299_v18 = vmax.f32 %v235_v11, 0.0  ;;  %v1440_v23 = vunpack.c.l.bf16 %v1556_v16 }
  0x15   :  { %v249_v28 = vadd.f32 %v1657_v15, %v184_v22  ;;  %v312_v30 = vmax.f32 %v248_v27, 0.0  ;;  %v156_v35 = vmul.f32 %v1441_v24, %v1647_v8  ;;  %v1500_v50 = vunpack.c.l.bf16 %v1571_v47  ;;  %v1558_v27 = vld [vmem:[%s3144_s0 + $0x28] sm:$0xff]  }
  0x16   :  { %v344_v25 = vpack.c.bf16 %v283_v13, %v282_v12  ;;  %v352_v26 = vpack.c.bf16 %v299_v18, %v298_v17  ;;  %v155_v34 = vmul.f32 %v1440_v23, %v1647_v8  ;;  %v1501_v51 = vunpack.c.h.bf16 %v1571_v47 }
  0x17   :  { %518 = vmatpush.bf16.msra.mxu0 %v1422_v29  ;;  %1597 = vmatpush.bf16.msra.mxu1 %v1422_v29  ;;  %v313_v31 = vmax.f32 %v249_v28, 0.0  ;;  %v221_v40 = vadd.f32 %v1657_v15, %v156_v35  ;;  %v1524_v52 = vunpack.c.l.bf16 %v1577_v48  ;;  %v1525_v53 = vunpack.c.h.bf16 %v1577_v48 }
  0x18   :  { %1598 = vmatpush.bf16.msra.mxu2 %v1422_v29  ;;  %1599 = vmatpush.bf16.msra.mxu3 %v1422_v29  ;;  %v1564_v29 = vld [vmem:[%s3144_s0 + $0x58] sm:$0xff]   ;;  %v220_v39 = vadd.f32 %v1657_v15, %v155_v34  ;;  %v185_v54 = vmul.f32 %v1500_v50, %v1647_v8  ;;  %v186_v55 = vmul.f32 %v1501_v51, %v1647_v8  ;;  %v1444_v59 = vunpack.c.l.bf16 %v1557_v49 }
  0x19   :  { %v359_v36 = vpack.c.bf16 %v313_v31, %v312_v30  ;;  %v285_v44 = vmax.f32 %v221_v40, 0.0  ;;  %v197_v56 = vmul.f32 %v1524_v52, %v1647_v8  ;;  %v1445_v60 = vunpack.c.h.bf16 %v1557_v49 }
  0x1a   :  { %1390 = vmatmul.msk.bf16.vlgmr.msra.gmra.mxu0 %vm410_vm1, %v342_v32  ;;  %1398 = vmatmul.msk.bf16.vlgmr.msra.gmra.mxu1 %vm410_vm1, %v350_v33  ;;  %v1472_v32 = vunpack.c.l.bf16 %v1564_v29  ;;  %v1473_v33 = vunpack.c.h.bf16 %v1564_v29  ;;  %v284_v43 = vmax.f32 %v220_v39, 0.0  ;;  %v250_v62 = vadd.f32 %v1657_v15, %v185_v54 }
  0x1b   :  { %1406 = vmatmul.msk.bf16.vlgmr.msra.gmra.mxu2 %vm410_vm1, %v358_v4  ;;  %v251_v63 = vadd.f32 %v1657_v15, %v186_v55  ;;  %v262_v0 = vadd.f32 %v1657_v15, %v197_v56  ;;  %v157_v7 = vmul.f32 %v1444_v59, %v1647_v8  ;;  %v158_v9 = vmul.f32 %v1445_v60, %v1647_v8 }
  0x1c   :  { %v171_v37 = vmul.f32 %v1472_v32, %v1647_v8  ;;  %v172_v38 = vmul.f32 %v1473_v33, %v1647_v8  ;;  %v314_v3 = vmax.f32 %v250_v62, 0.0  ;;  %v1476_v10 = vunpack.c.l.bf16 %v1565_v2 }
  0x1d   :  { %v315_v4 = vmax.f32 %v251_v63, 0.0  ;;  %v326_v5 = vmax.f32 %v262_v0, 0.0  ;;  %v1477_v11 = vunpack.c.h.bf16 %v1565_v2  ;;  %v222_v17 = vadd.f32 %v1657_v15, %v157_v7  ;;  %v1579_v2 = vld [vmem:[%s3144_s0 + $0xd0] sm:$0xff]  }
  0x1e   :  { %v236_v41 = vadd.f32 %v1657_v15, %v171_v37  ;;  %v237_v42 = vadd.f32 %v1657_v15, %v172_v38  ;;  %v173_v14 = vmul.f32 %v1476_v10, %v1647_v8  ;;  %v223_v18 = vadd.f32 %v1657_v15, %v158_v9 }
  0x1f   :  { %v360_v12 = vpack.c.bf16 %v315_v4, %v314_v3  ;;  %v174_v16 = vmul.f32 %v1477_v11, %v1647_v8  ;;  %v286_v21 = vmax.f32 %v222_v17, 0.0  ;;  %v1448_v37 = vunpack.c.l.bf16 %v1558_v27  ;;  %v1559_v3 = vld [vmem:[%s3144_s0 + $0x30] sm:$0xff]  }
  0x20   :  { %v300_v45 = vmax.f32 %v236_v41, 0.0  ;;  %v301_v46 = vmax.f32 %v237_v42, 0.0  ;;  %v238_v19 = vadd.f32 %v1657_v15, %v173_v14  ;;  %v287_v22 = vmax.f32 %v223_v18, 0.0 }
  0x21   :  { %v239_v20 = vadd.f32 %v1657_v15, %v174_v16  ;;  %v1449_v38 = vunpack.c.h.bf16 %v1558_v27  ;;  %v159_v49 = vmul.f32 %v1448_v37, %v1647_v8  ;;  %v1533_v7 = vunpack.c.h.bf16 %v1579_v2 }
  0x22   :  { %v353_v61 = vpack.c.bf16 %v301_v46, %v300_v45  ;;  %v302_v23 = vmax.f32 %v238_v19, 0.0  ;;  %v1452_v14 = vunpack.c.l.bf16 %v1559_v3  ;;  %v1453_v16 = vunpack.c.h.bf16 %v1559_v3 }
  0x23   :  { %v303_v24 = vmax.f32 %v239_v20, 0.0  ;;  %v160_v50 = vmul.f32 %v1449_v38, %v1647_v8 }
  0x24   :  { %v161_v27 = vmul.f32 %v1452_v14, %v1647_v8 }
  0x25   :  { %v354_v39 = vpack.c.bf16 %v303_v24, %v302_v23 }
  0x2a   :  { %1391 = vmatmul.msk.bf16.gmra.mxu0 %vm410_vm1, %v343_v57  ;;  %1399 = vmatmul.msk.bf16.gmra.mxu1 %vm410_vm1, %v351_v58  ;;  %v198_v57 = vmul.f32 %v1525_v53, %v1647_v8  ;;  %v345_v58 = vpack.c.bf16 %v285_v44, %v284_v43  ;;  %v1566_v44 = vld [vmem:[%s3144_s0 + $0x68] sm:$0xff]  }
  0x2b   :  { %1407 = vmatmul.msk.bf16.gmra.mxu2 %vm410_vm1, %v359_v36  ;;  %v346_v36 = vpack.c.bf16 %v287_v22, %v286_v21  ;;  %v1480_v51 = vunpack.c.l.bf16 %v1566_v44  ;;  %v1481_v52 = vunpack.c.h.bf16 %v1566_v44  ;;  %v1567_v22 = vld [vmem:[%s3144_s0 + $0x70] sm:$0xff]   ;;  %v1574_v44 = vld [vmem:[%s3144_s0 + $0xa8] sm:$0xff]  }
  0x2c   :  { %v263_v1 = vadd.f32 %v1657_v15, %v198_v57  ;;  %v224_v57 = vadd.f32 %v1657_v15, %v159_v49 }
  0x2d   :  { %v175_v55 = vmul.f32 %v1480_v51, %v1647_v8  ;;  %v176_v56 = vmul.f32 %v1481_v52, %v1647_v8 }
  0x2e   :  { %v327_v6 = vmax.f32 %v263_v1, 0.0  ;;  %v1573_v1 = vld [vmem:[%s3144_s0 + $0xa0] sm:$0xff]  }
  0x2f   :  { %v240_v59 = vadd.f32 %v1657_v15, %v175_v55  ;;  %v241_v60 = vadd.f32 %v1657_v15, %v176_v56  ;;  %v1508_v4 = vunpack.c.l.bf16 %v1573_v1 }
  0x30   :  { %v366_v13 = vpack.c.bf16 %v327_v6, %v326_v5  ;;  %v1509_v5 = vunpack.c.h.bf16 %v1573_v1  ;;  %v1532_v6 = vunpack.c.l.bf16 %v1579_v2 }
  0x31   :  { %v304_v63 = vmax.f32 %v240_v59, 0.0  ;;  %v305_v0 = vmax.f32 %v241_v60, 0.0  ;;  %v189_v9 = vmul.f32 %v1508_v4, %v1647_v8 }
  0x32   :  { %1414 = vmatmul.msk.bf16.vlgmr.msra.gmra.mxu3 %vm410_vm1, %v366_v13  ;;  %v190_v10 = vmul.f32 %v1509_v5, %v1647_v8  ;;  %v201_v11 = vmul.f32 %v1532_v6, %v1647_v8 }
  0x33   :  { %v355_v17 = vpack.c.bf16 %v305_v0, %v304_v63  ;;  %v254_v18 = vadd.f32 %v1657_v15, %v189_v9 }
  0x34   :  { %v255_v19 = vadd.f32 %v1657_v15, %v190_v10  ;;  %v266_v20 = vadd.f32 %v1657_v15, %v201_v11 }
  0x35   :  { %v318_v23 = vmax.f32 %v254_v18, 0.0 }
  0x36   :  { %v319_v24 = vmax.f32 %v255_v19, 0.0 }
  0x3a   :  { %1392 = vmatmul.msk.bf16.gmra.mxu0 %vm410_vm1, %v344_v25  ;;  %1400 = vmatmul.msk.bf16.gmra.mxu1 %vm410_vm1, %v352_v26  ;;  %v1572_v25 = vld [vmem:[%s3144_s0 + $0x98] sm:$0xff]   ;;  %v1578_v26 = vld [vmem:[%s3144_s0 + $0xc8] sm:$0xff]  }
  0x3b   :  { %1408 = vmatmul.msk.bf16.gmra.mxu2 %vm410_vm1, %v360_v12  ;;  %v1504_v28 = vunpack.c.l.bf16 %v1572_v25  ;;  %v1505_v29 = vunpack.c.h.bf16 %v1572_v25  ;;  %v1528_v30 = vunpack.c.l.bf16 %v1578_v26  ;;  %v1529_v31 = vunpack.c.h.bf16 %v1578_v26 }
  0x3c   :  { %v202_v12 = vmul.f32 %v1533_v7, %v1647_v8  ;;  %v330_v25 = vmax.f32 %v266_v20, 0.0 }
  0x3d   :  { %v187_v32 = vmul.f32 %v1504_v28, %v1647_v8  ;;  %v188_v33 = vmul.f32 %v1505_v29, %v1647_v8  ;;  %v199_v34 = vmul.f32 %v1528_v30, %v1647_v8  ;;  %v200_v35 = vmul.f32 %v1529_v31, %v1647_v8 }
  0x3e   :  { %v267_v21 = vadd.f32 %v1657_v15, %v202_v12  ;;  %v162_v28 = vmul.f32 %v1453_v16, %v1647_v8  ;;  %v1484_v29 = vunpack.c.l.bf16 %v1567_v22  ;;  %v1485_v30 = vunpack.c.h.bf16 %v1567_v22  ;;  %v1581_v22 = vld [vmem:[%s3144_s0 + $0xe0] sm:$0xff]  }
  0x3f   :  { %v252_v40 = vadd.f32 %v1657_v15, %v187_v32  ;;  %v253_v41 = vadd.f32 %v1657_v15, %v188_v33  ;;  %v264_v42 = vadd.f32 %v1657_v15, %v199_v34  ;;  %v265_v43 = vadd.f32 %v1657_v15, %v200_v35 }
  0x40   :  { %v331_v26 = vmax.f32 %v267_v21, 0.0  ;;  %v362_v31 = vpack.c.bf16 %v319_v24, %v318_v23  ;;  %v177_v33 = vmul.f32 %v1484_v29, %v1647_v8  ;;  %v178_v34 = vmul.f32 %v1485_v30, %v1647_v8  ;;  %v1575_v21 = vld [vmem:[%s3144_s0 + $0xb0] sm:$0xff]  }
  0x41   :  { %v316_v45 = vmax.f32 %v252_v40, 0.0  ;;  %v317_v46 = vmax.f32 %v253_v41, 0.0  ;;  %v328_v47 = vmax.f32 %v264_v42, 0.0  ;;  %v329_v48 = vmax.f32 %v265_v43, 0.0 }
  0x42   :  { %v368_v32 = vpack.c.bf16 %v331_v26, %v330_v25  ;;  %v226_v35 = vadd.f32 %v1657_v15, %v161_v27  ;;  %v242_v37 = vadd.f32 %v1657_v15, %v177_v33  ;;  %v243_v38 = vadd.f32 %v1657_v15, %v178_v34 }
  0x43   :  { %v361_v53 = vpack.c.bf16 %v317_v46, %v316_v45  ;;  %v367_v54 = vpack.c.bf16 %v329_v48, %v328_v47  ;;  %v1580_v45 = vld [vmem:[%s3144_s0 + $0xd8] sm:$0xff]   ;;  %v1512_v46 = vunpack.c.l.bf16 %v1574_v44  ;;  %v1513_v47 = vunpack.c.h.bf16 %v1574_v44  ;;  %v1582_v44 = vld [vmem:[%s3144_s0 + $0xe8] sm:$0xff]  }
  0x44   :  { %v290_v40 = vmax.f32 %v226_v35, 0.0  ;;  %v306_v42 = vmax.f32 %v242_v37, 0.0  ;;  %v307_v43 = vmax.f32 %v243_v38, 0.0  ;;  %v1536_v48 = vunpack.c.l.bf16 %v1580_v45 }
  0x45   :  { %1415 = vmatmul.msk.bf16.gmra.mxu3 %vm410_vm1, %v367_v54  ;;  %v1537_v49 = vunpack.c.h.bf16 %v1580_v45  ;;  %v191_v51 = vmul.f32 %v1512_v46, %v1647_v8  ;;  %v192_v52 = vmul.f32 %v1513_v47, %v1647_v8  ;;  %v1516_v23 = vunpack.c.l.bf16 %v1575_v21 }
  0x46   :  { %v1517_v24 = vunpack.c.h.bf16 %v1575_v21  ;;  %v1540_v25 = vunpack.c.l.bf16 %v1581_v22  ;;  %v1541_v26 = vunpack.c.h.bf16 %v1581_v22  ;;  %v1544_v47 = vunpack.c.l.bf16 %v1582_v44 }
  0x47   :  { %v204_v54 = vmul.f32 %v1537_v49, %v1647_v8  ;;  %v257_v59 = vadd.f32 %v1657_v15, %v192_v52  ;;  %v193_v27 = vmul.f32 %v1516_v23, %v1647_v8 }
  0x48   :  { %v205_v29 = vmul.f32 %v1540_v25, %v1647_v8  ;;  %v206_v30 = vmul.f32 %v1541_v26, %v1647_v8 }
  0x49   :  { %v321_v1 = vmax.f32 %v257_v59, 0.0  ;;  %v258_v33 = vadd.f32 %v1657_v15, %v193_v27 }
  0x4a   :  { %1393 = vmatmul.msk.bf16.gmra.mxu0 %vm410_vm1, %v345_v58  ;;  %1401 = vmatmul.msk.bf16.gmra.mxu1 %vm410_vm1, %v353_v61  ;;  %v225_v58 = vadd.f32 %v1657_v15, %v160_v50  ;;  %v288_v61 = vmax.f32 %v224_v57, 0.0  ;;  %v356_v57 = vpack.c.bf16 %v307_v43, %v306_v42  ;;  %v270_v35 = vadd.f32 %v1657_v15, %v205_v29  ;;  %v1576_v43 = vld [vmem:[%s3144_s0 + $0xb8] sm:$0xff]  }
  0x4b   :  { %1409 = vmatmul.msk.bf16.gmra.mxu2 %vm410_vm1, %v361_v53  ;;  %v203_v53 = vmul.f32 %v1536_v48, %v1647_v8  ;;  %v322_v37 = vmax.f32 %v258_v33, 0.0  ;;  %v1520_v45 = vunpack.c.l.bf16 %v1576_v43  ;;  %v1521_v46 = vunpack.c.h.bf16 %v1576_v43 }
  0x4c   :  { %v289_v62 = vmax.f32 %v225_v58, 0.0  ;;  %v256_v58 = vadd.f32 %v1657_v15, %v191_v51  ;;  %v1545_v48 = vunpack.c.h.bf16 %v1582_v44  ;;  %v207_v51 = vmul.f32 %v1544_v47, %v1647_v8 }
  0x4d   :  { %v268_v60 = vadd.f32 %v1657_v15, %v203_v53  ;;  %v195_v49 = vmul.f32 %v1520_v45, %v1647_v8 }
  0x4e   :  { %v347_v13 = vpack.c.bf16 %v289_v62, %v288_v61  ;;  %v269_v61 = vadd.f32 %v1657_v15, %v204_v54  ;;  %v1568_v62 = vld [vmem:[%s3144_s0 + $0x78] sm:$0xff]   ;;  %v320_v0 = vmax.f32 %v256_v58, 0.0  ;;  %v208_v52 = vmul.f32 %v1545_v48, %v1647_v8 }
  0x4f   :  { %v332_v2 = vmax.f32 %v268_v60, 0.0  ;;  %v1488_v5 = vunpack.c.l.bf16 %v1568_v62  ;;  %v1489_v6 = vunpack.c.h.bf16 %v1568_v62  ;;  %v260_v53 = vadd.f32 %v1657_v15, %v195_v49 }
  0x50   :  { %v333_v4 = vmax.f32 %v269_v61, 0.0  ;;  %v363_v7 = vpack.c.bf16 %v321_v1, %v320_v0 }
  0x51   :  { %v179_v10 = vmul.f32 %v1488_v5, %v1647_v8  ;;  %v180_v11 = vmul.f32 %v1489_v6, %v1647_v8  ;;  %v324_v61 = vmax.f32 %v260_v53, 0.0 }
  0x52   :  { %v369_v9 = vpack.c.bf16 %v333_v4, %v332_v2 }
  0x53   :  { %v244_v14 = vadd.f32 %v1657_v15, %v179_v10  ;;  %v245_v16 = vadd.f32 %v1657_v15, %v180_v11 }
  0x55   :  { %1416 = vmatmul.msk.bf16.gmra.mxu3 %vm410_vm1, %v368_v32  ;;  %v308_v19 = vmax.f32 %v244_v14, 0.0  ;;  %v309_v20 = vmax.f32 %v245_v16, 0.0 }
  0x57   :  { %v357_v32 = vpack.c.bf16 %v309_v20, %v308_v19 }
  0x5a   :  { %1394 = vmatmul.msk.bf16.gmra.mxu0 %vm410_vm1, %v346_v36  ;;  %1402 = vmatmul.msk.bf16.gmra.mxu1 %vm410_vm1, %v354_v39  ;;  %v227_v36 = vadd.f32 %v1657_v15, %v162_v28  ;;  %v1560_v39 = vld [vmem:[%s3144_s0 + $0x38] sm:$0xff]   ;;  %v194_v28 = vmul.f32 %v1517_v24, %v1647_v8 }
  0x5b   :  { %1410 = vmatmul.msk.bf16.gmra.mxu2 %vm410_vm1, %v362_v31  ;;  %v1456_v50 = vunpack.c.l.bf16 %v1560_v39  ;;  %v1457_v56 = vunpack.c.h.bf16 %v1560_v39  ;;  %v334_v39 = vmax.f32 %v270_v35, 0.0 }
  0x5c   :  { %v291_v41 = vmax.f32 %v227_v36, 0.0  ;;  %v259_v34 = vadd.f32 %v1657_v15, %v194_v28  ;;  %v271_v36 = vadd.f32 %v1657_v15, %v206_v30  ;;  %v1584_v28 = vld [vmem:[%s3144_s0 + $0xf8] sm:$0xff]  }
  0x5d   :  { %v163_v63 = vmul.f32 %v1456_v50, %v1647_v8  ;;  %v164_v3 = vmul.f32 %v1457_v56, %v1647_v8  ;;  %v196_v50 = vmul.f32 %v1521_v46, %v1647_v8  ;;  %v273_v56 = vadd.f32 %v1657_v15, %v208_v52 }
  0x5e   :  { %v348_v55 = vpack.c.bf16 %v291_v41, %v290_v40  ;;  %v323_v38 = vmax.f32 %v259_v34, 0.0  ;;  %v335_v40 = vmax.f32 %v271_v36, 0.0  ;;  %v1552_v30 = vunpack.c.l.bf16 %v1584_v28 }
  0x5f   :  { %v228_v12 = vadd.f32 %v1657_v15, %v163_v63  ;;  %v261_v54 = vadd.f32 %v1657_v15, %v196_v50  ;;  %v337_v0 = vmax.f32 %v273_v56, 0.0 }
  0x60   :  { %v364_v41 = vpack.c.bf16 %v323_v38, %v322_v37  ;;  %v370_v42 = vpack.c.bf16 %v335_v40, %v334_v39 }
  0x61   :  { %v325_v62 = vmax.f32 %v261_v54, 0.0 }
  0x63   :  { %v365_v1 = vpack.c.bf16 %v325_v62, %v324_v61 }
  0x65   :  { %1417 = vmatmul.msk.bf16.gmra.mxu3 %vm410_vm1, %v369_v9 }
  0x6a   :  { %1395 = vmatmul.msk.bf16.gmra.mxu0 %vm410_vm1, %v347_v13  ;;  %1403 = vmatmul.msk.bf16.gmra.mxu1 %vm410_vm1, %v355_v17  ;;  %v229_v13 = vadd.f32 %v1657_v15, %v164_v3  ;;  %v292_v17 = vmax.f32 %v228_v12, 0.0 }
  0x6b   :  { %1411 = vmatmul.msk.bf16.gmra.mxu2 %vm410_vm1, %v363_v7  ;;  %v1583_v7 = vld [vmem:[%s3144_s0 + $0xf0] sm:$0xff]  }
  0x6c   :  { %v293_v18 = vmax.f32 %v229_v13, 0.0  ;;  %v1548_v9 = vunpack.c.l.bf16 %v1583_v7  ;;  %v1549_v10 = vunpack.c.h.bf16 %v1583_v7 }
  0x6e   :  { %v349_v31 = vpack.c.bf16 %v293_v18, %v292_v17  ;;  %v209_v11 = vmul.f32 %v1548_v9, %v1647_v8  ;;  %v210_v12 = vmul.f32 %v1549_v10, %v1647_v8 }
  0x70   :  { %v274_v13 = vadd.f32 %v1657_v15, %v209_v11  ;;  %v275_v14 = vadd.f32 %v1657_v15, %v210_v12 }
  0x72   :  { %v338_v20 = vmax.f32 %v274_v13, 0.0  ;;  %v339_v21 = vmax.f32 %v275_v14, 0.0 }
  0x74   :  { %v372_v22 = vpack.c.bf16 %v339_v21, %v338_v20 }
  0x75   :  { %1418 = vmatmul.msk.bf16.gmra.mxu3 %vm410_vm1, %v370_v42 }
  0x7a   :  { %1396 = vmatmul.msk.bf16.gmra.mxu0 %vm410_vm1, %v348_v55  ;;  %1404 = vmatmul.msk.bf16.gmra.mxu1 %vm410_vm1, %v356_v57  ;;  %v272_v55 = vadd.f32 %v1657_v15, %v207_v51 }
  0x7b   :  { %1412 = vmatmul.msk.bf16.gmra.mxu2 %vm410_vm1, %v364_v41 }
  0x7c   :  { %v336_v63 = vmax.f32 %v272_v55, 0.0 }
  0x7e   :  { %v371_v2 = vpack.c.bf16 %v337_v0, %v336_v63 }
  0x85   :  { %1419 = vmatmul.msk.bf16.gmra.mxu3 %vm410_vm1, %v371_v2 }
  0x8a   :  { %1397 = vmatmul.msk.bf16.gmra.mxu0 %vm410_vm1, %v349_v31  ;;  %1405 = vmatmul.msk.bf16.gmra.mxu1 %vm410_vm1, %v357_v32  ;;  %v1553_v31 = vunpack.c.h.bf16 %v1584_v28  ;;  %v211_v32 = vmul.f32 %v1552_v30, %v1647_v8 }
  0x8b   :  { %1413 = vmatmul.msk.bf16.gmra.mxu2 %vm410_vm1, %v365_v1 }
  0x8c   :  { %v212_v33 = vmul.f32 %v1553_v31, %v1647_v8  ;;  %v276_v34 = vadd.f32 %v1657_v15, %v211_v32 }
  0x8e   :  { %v277_v35 = vadd.f32 %v1657_v15, %v212_v33  ;;  %v340_v8 = vmax.f32 %v276_v34, 0.0 }
  0x90   :  { %v341_v15 = vmax.f32 %v277_v35, 0.0 }
  0x92   :  { %v373_v42 = vpack.c.bf16 %v341_v15, %v340_v8 }
  0x95   :  { %1420 = vmatmul.msk.bf16.gmra.mxu3 %vm410_vm1, %v372_v22 }
  0x97   :  { %v1898_v57 = vpop.f32.mrf.mxu0  ;;  %v1900_v58 = vpop.f32.mrf.mxu1 }
  0x98   :  { %3168 = vst [vmem:[#allocation2_spill] sm:$0xff] %v1900_v58  ;;  %v680_v59 = vpack.c.bf16 %v1898_v57, %v1898_v57  ;;  %v696_v60 = vpack.c.bf16 %v1900_v58, %v1900_v58 }
  0x9a   :  { %745 = vst.msk [vmem:[%s3146_s3] sm:$0xf] %vm744_vm2, %v680_v59 }
  0x9b   :  { %761 = vst.msk [vmem:[%s3146_s3 + $0x40] sm:$0xf] %vm744_vm2, %v696_v60 }
  0x9e   :  { %v1964_v27 = vpop.f32.mrf.mxu2 }
  0x9f   :  { %v1916_v3 = vpop.f32.mrf.mxu0  ;;  %v1918_v4 = vpop.f32.mrf.mxu1  ;;  %v712_v29 = vpack.c.bf16 %v1964_v27, %v1964_v27 }
  0xa0   :  { %v681_v5 = vpack.c.bf16 %v1916_v3, %v1916_v3  ;;  %v697_v6 = vpack.c.bf16 %v1918_v4, %v1918_v4  ;;  %v815_v15 = vsel %vm813_vm3, %v1916_v3, 0.0 }
  0xa1   :  { %777 = vst.msk [vmem:[%s3146_s3 + $0x80] sm:$0xf] %vm744_vm2, %v712_v29 }
  0xa2   :  { %746 = vst.msk [vmem:[%s3146_s3 + $0x4] sm:$0xf] %vm744_vm2, %v681_v5 }
  0xa3   :  { %762 = vst.msk [vmem:[%s3146_s3 + $0x44] sm:$0xf] %vm744_vm2, %v697_v6 }
  0xa5   :  { %1421 = vmatmul.msk.bf16.gmra.mxu3 %vm410_vm1, %v373_v42  ;;  %v814_v42 = vsel %vm813_vm3, %v1898_v57, 0.0 }
  0xa6   :  { %v1995_v40 = vpop.f32.mrf.mxu2 }
  0xa7   :  { %v1939_v16 = vpop.f32.mrf.mxu0  ;;  %v1941_v17 = vpop.f32.mrf.mxu1  ;;  %v713_v41 = vpack.c.bf16 %v1995_v40, %v1995_v40 }
  0xa8   :  { %v682_v18 = vpack.c.bf16 %v1939_v16, %v1939_v16  ;;  %v698_v19 = vpack.c.bf16 %v1941_v17, %v1941_v17 }
  0xa9   :  { %778 = vst.msk [vmem:[%s3146_s3 + $0x84] sm:$0xf] %vm744_vm2, %v713_v41 }
  0xaa   :  { %747 = vst.msk [vmem:[%s3146_s3 + $0x8] sm:$0xf] %vm744_vm2, %v682_v18 }
  0xab   :  { %763 = vst.msk [vmem:[%s3146_s3 + $0x48] sm:$0xf] %vm744_vm2, %v698_v19 }
  0xae   :  { %v2020_v47 = vpop.f32.mrf.mxu2 }
  0xaf   :  { %v1956_v23 = vpop.f32.mrf.mxu0  ;;  %v1958_v24 = vpop.f32.mrf.mxu1  ;;  %v714_v48 = vpack.c.bf16 %v2020_v47, %v2020_v47 }
  0xb0   :  { %v683_v25 = vpack.c.bf16 %v1956_v23, %v1956_v23  ;;  %v699_v26 = vpack.c.bf16 %v1958_v24, %v1958_v24 }
  0xb1   :  { %779 = vst.msk [vmem:[%s3146_s3 + $0x88] sm:$0xf] %vm744_vm2, %v714_v48  ;;  %v819_v48 = vsel %vm813_vm3, %v1956_v23, 0.0 }
  0xb2   :  { %748 = vst.msk [vmem:[%s3146_s3 + $0xc] sm:$0xf] %vm744_vm2, %v683_v25 }
  0xb3   :  { %764 = vst.msk [vmem:[%s3146_s3 + $0x4c] sm:$0xf] %vm744_vm2, %v699_v26 }
  0xb5   :  { %v2070_v62 = vpop.f32.mrf.mxu3 }
  0xb6   :  { %v2044_v53 = vpop.f32.mrf.mxu2  ;;  %v728_v0 = vpack.c.bf16 %v2070_v62, %v2070_v62 }
  0xb7   :  { %v1987_v36 = vpop.f32.mrf.mxu0  ;;  %v1989_v37 = vpop.f32.mrf.mxu1  ;;  %v715_v54 = vpack.c.bf16 %v2044_v53, %v2044_v53 }
  0xb8   :  { %3169 = vst [vmem:[#allocation3_spill] sm:$0xff] %v1989_v37  ;;  %v684_v38 = vpack.c.bf16 %v1987_v36, %v1987_v36  ;;  %v700_v39 = vpack.c.bf16 %v1989_v37, %v1989_v37 }
  0xb9   :  { %780 = vst.msk [vmem:[%s3146_s3 + $0x8c] sm:$0xf] %vm744_vm2, %v715_v54 }
  0xba   :  { %749 = vst.msk [vmem:[%s3146_s3 + $0x10] sm:$0xf] %vm744_vm2, %v684_v38 }
  0xbb   :  { %765 = vst.msk [vmem:[%s3146_s3 + $0x50] sm:$0xf] %vm744_vm2, %v700_v39 }
  0xbc   :  { %793 = vst.msk [vmem:[%s3146_s3 + $0xc0] sm:$0xf] %vm744_vm2, %v728_v0 }
  0xbd   :  { %v2102_v9 = vpop.f32.mrf.mxu3 }
  0xbe   :  { %v2068_v61 = vpop.f32.mrf.mxu2  ;;  %v729_v11 = vpack.c.bf16 %v2102_v9, %v2102_v9 }
  0xbf   :  { %v2012_v43 = vpop.f32.mrf.mxu0  ;;  %v2014_v44 = vpop.f32.mrf.mxu1  ;;  %3173 = vst [vmem:[#allocation7_spill] sm:$0xff] %v2068_v61  ;;  %v716_v63 = vpack.c.bf16 %v2068_v61, %v2068_v61 }
  0xc0   :  { %3170 = vst [vmem:[#allocation4_spill] sm:$0xff] %v2014_v44  ;;  %v685_v45 = vpack.c.bf16 %v2012_v43, %v2012_v43  ;;  %v701_v46 = vpack.c.bf16 %v2014_v44, %v2014_v44 }
  0xc1   :  { %781 = vst.msk [vmem:[%s3146_s3 + $0x90] sm:$0xf] %vm744_vm2, %v716_v63 }
  0xc2   :  { %750 = vst.msk [vmem:[%s3146_s3 + $0x14] sm:$0xf] %vm744_vm2, %v685_v45  ;;  %v817_v45 = vsel %vm813_vm3, %v1939_v16, 0.0 }
  0xc3   :  { %766 = vst.msk [vmem:[%s3146_s3 + $0x54] sm:$0xf] %vm744_vm2, %v701_v46  ;;  %v816_v46 = vadd.f32 %v815_v15, %v814_v42 }
  0xc4   :  { %794 = vst.msk [vmem:[%s3146_s3 + $0xc4] sm:$0xf] %vm744_vm2, %v729_v11 }
  0xc6   :  { %v2100_v7 = vpop.f32.mrf.mxu2 }
  0xc7   :  { %v2036_v49 = vpop.f32.mrf.mxu0  ;;  %v2038_v50 = vpop.f32.mrf.mxu1  ;;  %v717_v10 = vpack.c.bf16 %v2100_v7, %v2100_v7 }
  0xc8   :  { %3171 = vst [vmem:[#allocation5_spill] sm:$0xff] %v2038_v50  ;;  %v686_v51 = vpack.c.bf16 %v2036_v49, %v2036_v49  ;;  %v702_v52 = vpack.c.bf16 %v2038_v50, %v2038_v50  ;;  %v2134_v20 = vpop.f32.mrf.mxu3 }
  0xc9   :  { %782 = vst.msk [vmem:[%s3146_s3 + $0x94] sm:$0xf] %vm744_vm2, %v717_v10  ;;  %v730_v22 = vpack.c.bf16 %v2134_v20, %v2134_v20 }
  0xca   :  { %751 = vst.msk [vmem:[%s3146_s3 + $0x18] sm:$0xf] %vm744_vm2, %v686_v51  ;;  %v818_v51 = vadd.f32 %v817_v45, %v816_v46 }
  0xcb   :  { %767 = vst.msk [vmem:[%s3146_s3 + $0x58] sm:$0xf] %vm744_vm2, %v702_v52 }
  0xcc   :  { %795 = vst.msk [vmem:[%s3146_s3 + $0xc8] sm:$0xf] %vm744_vm2, %v730_v22 }
  0xce   :  { %v2132_v19 = vpop.f32.mrf.mxu2 }
  0xcf   :  { %v2060_v55 = vpop.f32.mrf.mxu0  ;;  %v2062_v56 = vpop.f32.mrf.mxu1  ;;  %v718_v21 = vpack.c.bf16 %v2132_v19, %v2132_v19 }
  0xd0   :  { %3172 = vst [vmem:[#allocation6_spill] sm:$0xff] %v2062_v56  ;;  %v687_v59 = vpack.c.bf16 %v2060_v55, %v2060_v55  ;;  %v703_v60 = vpack.c.bf16 %v2062_v56, %v2062_v56  ;;  %v2166_v31 = vpop.f32.mrf.mxu3 }
  0xd1   :  { %783 = vst.msk [vmem:[%s3146_s3 + $0x98] sm:$0xf] %vm744_vm2, %v718_v21  ;;  %v731_v33 = vpack.c.bf16 %v2166_v31, %v2166_v31 }
  0xd2   :  { %752 = vst.msk [vmem:[%s3146_s3 + $0x1c] sm:$0xf] %vm744_vm2, %v687_v59  ;;  %v821_v59 = vsel %vm813_vm3, %v1987_v36, 0.0 }
  0xd3   :  { %768 = vst.msk [vmem:[%s3146_s3 + $0x5c] sm:$0xf] %vm744_vm2, %v703_v60 }
  0xd4   :  { %796 = vst.msk [vmem:[%s3146_s3 + $0xcc] sm:$0xf] %vm744_vm2, %v731_v33 }
  0xd6   :  { %v2164_v30 = vpop.f32.mrf.mxu2 }
  0xd7   :  { %v2092_v1 = vpop.f32.mrf.mxu0  ;;  %v2094_v2 = vpop.f32.mrf.mxu1  ;;  %v719_v32 = vpack.c.bf16 %v2164_v30, %v2164_v30 }
  0xd8   :  { %v688_v5 = vpack.c.bf16 %v2092_v1, %v2092_v1  ;;  %v704_v6 = vpack.c.bf16 %v2094_v2, %v2094_v2  ;;  %v2198_v8 = vpop.f32.mrf.mxu3  ;;  %v829_v15 = vsel %vm813_vm3, %v2092_v1, 0.0 }
  0xd9   :  { %784 = vst.msk [vmem:[%s3146_s3 + $0x9c] sm:$0xf] %vm744_vm2, %v719_v32  ;;  %v732_v11 = vpack.c.bf16 %v2198_v8, %v2198_v8  ;;  %v827_v32 = vsel %vm813_vm3, %v2060_v55, 0.0 }
  0xda   :  { %753 = vst.msk [vmem:[%s3146_s3 + $0x20] sm:$0xf] %vm744_vm2, %v688_v5 }
  0xdb   :  { %769 = vst.msk [vmem:[%s3146_s3 + $0x60] sm:$0xf] %vm744_vm2, %v704_v6  ;;  %v820_v6 = vadd.f32 %v819_v48, %v818_v51 }
  0xdc   :  { %797 = vst.msk [vmem:[%s3146_s3 + $0xd0] sm:$0xf] %vm744_vm2, %v732_v11 }
  0xdd   :  { %v822_v21 = vadd.f32 %v821_v59, %v820_v6 }
  0xde   :  { %v2196_v41 = vpop.f32.mrf.mxu2 }
  0xdf   :  { %v2124_v12 = vpop.f32.mrf.mxu0  ;;  %v2126_v13 = vpop.f32.mrf.mxu1  ;;  %v720_v10 = vpack.c.bf16 %v2196_v41, %v2196_v41 }
  0xe0   :  { %v689_v14 = vpack.c.bf16 %v2124_v12, %v2124_v12  ;;  %v705_v18 = vpack.c.bf16 %v2126_v13, %v2126_v13  ;;  %v2228_v5 = vpop.f32.mrf.mxu3  ;;  %v831_v59 = vsel %vm813_vm3, %v2124_v12, 0.0 }
  0xe1   :  { %v733_v22 = vpack.c.bf16 %v2228_v5, %v2228_v5  ;;  %785 = vst.msk [vmem:[%s3146_s3 + $0xa0] sm:$0xf] %vm744_vm2, %v720_v10 }
  0xe2   :  { %754 = vst.msk [vmem:[%s3146_s3 + $0x24] sm:$0xf] %vm744_vm2, %v689_v14  ;;  %v823_v14 = vsel %vm813_vm3, %v2012_v43, 0.0 }
  0xe3   :  { %770 = vst.msk [vmem:[%s3146_s3 + $0x64] sm:$0xf] %vm744_vm2, %v705_v18 }
  0xe4   :  { %798 = vst.msk [vmem:[%s3146_s3 + $0xd4] sm:$0xf] %vm744_vm2, %v733_v22 }
  0xe6   :  { %v2226_v0 = vpop.f32.mrf.mxu2 }
  0xe7   :  { %v2156_v25 = vpop.f32.mrf.mxu0  ;;  %v2158_v26 = vpop.f32.mrf.mxu1  ;;  %v721_v18 = vpack.c.bf16 %v2226_v0, %v2226_v0 }
  0xe8   :  { %v690_v28 = vpack.c.bf16 %v2156_v25, %v2156_v25  ;;  %v706_v29 = vpack.c.bf16 %v2158_v26, %v2158_v26  ;;  %v2280_v48 = vpop.f32.mrf.mxu3 }
  0xe9   :  { %786 = vst.msk [vmem:[%s3146_s3 + $0xa4] sm:$0xf] %vm744_vm2, %v721_v18 }
  0xea   :  { %755 = vst.msk [vmem:[%s3146_s3 + $0x28] sm:$0xf] %vm744_vm2, %v690_v28  ;;  %v825_v28 = vsel %vm813_vm3, %v2036_v49, 0.0 }
  0xeb   :  { %771 = vst.msk [vmem:[%s3146_s3 + $0x68] sm:$0xf] %vm744_vm2, %v706_v29  ;;  %v824_v29 = vadd.f32 %v823_v14, %v822_v21 }
  0xed   :  { %v826_v33 = vadd.f32 %v825_v28, %v824_v29 }
  0xee   :  { %v2278_v46 = vpop.f32.mrf.mxu2 }
  0xef   :  { %v2188_v34 = vpop.f32.mrf.mxu0  ;;  %v2190_v35 = vpop.f32.mrf.mxu1  ;;  %v828_v51 = vadd.f32 %v827_v32, %v826_v33 }
  0xf0   :  { %3174 = vst [vmem:[#allocation8_spill] sm:$0xff] %v2190_v35  ;;  %v691_v38 = vpack.c.bf16 %v2188_v34, %v2188_v34  ;;  %v707_v39 = vpack.c.bf16 %v2190_v35, %v2190_v35  ;;  %v835_v10 = vsel %vm813_vm3, %v2188_v34, 0.0  ;;  %v2308_v32 = vpop.f32.mrf.mxu3 }
  0xf2   :  { %756 = vst.msk [vmem:[%s3146_s3 + $0x2c] sm:$0xf] %vm744_vm2, %v691_v38 }
  0xf3   :  { %772 = vst.msk [vmem:[%s3146_s3 + $0x6c] sm:$0xf] %vm744_vm2, %v707_v39 }
  0xf6   :  { %v2306_v29 = vpop.f32.mrf.mxu2 }
  0xf7   :  { %v2216_v52 = vpop.f32.mrf.mxu0  ;;  %v2218_v54 = vpop.f32.mrf.mxu1 }
  0xf8   :  { %3175 = vst [vmem:[#allocation9_spill] sm:$0xff] %v2218_v54  ;;  %v692_v60 = vpack.c.bf16 %v2216_v52, %v2216_v52  ;;  %v708_v63 = vpack.c.bf16 %v2218_v54, %v2218_v54  ;;  %v837_v21 = vsel %vm813_vm3, %v2216_v52, 0.0 }
  0xfa   :  { %757 = vst.msk [vmem:[%s3146_s3 + $0x30] sm:$0xf] %vm744_vm2, %v692_v60  ;;  %v830_v60 = vadd.f32 %v829_v15, %v828_v51  ;;  %v722_v15 = vpack.c.bf16 %v2278_v46, %v2278_v46  ;;  %v723_v51 = vpack.c.bf16 %v2306_v29, %v2306_v29 }
  0xfb   :  { %773 = vst.msk [vmem:[%s3146_s3 + $0x70] sm:$0xf] %vm744_vm2, %v708_v63  ;;  %v833_v63 = vsel %vm813_vm3, %v2156_v25, 0.0 }
  0xfc   :  { %v832_v6 = vadd.f32 %v831_v59, %v830_v60  ;;  %v735_v60 = vpack.c.bf16 %v2308_v32, %v2308_v32  ;;  %787 = vst.msk [vmem:[%s3146_s3 + $0xa8] sm:$0xf] %vm744_vm2, %v722_v15 }
  0xfd   :  { %788 = vst.msk [vmem:[%s3146_s3 + $0xac] sm:$0xf] %vm744_vm2, %v723_v51  ;;  %v845_v51 = vsel %vm813_vm3, %v1900_v58, 0.0 }
  0xfe   :  { %v834_v11 = vadd.f32 %v833_v63, %v832_v6  ;;  %800 = vst.msk [vmem:[%s3146_s3 + $0xdc] sm:$0xf] %vm744_vm2, %v735_v60  ;;  %v2356_v15 = vpop.f32.mrf.mxu2  ;;  %v847_v60 = vsel %vm813_vm3, %v1918_v4, 0.0 }
  0xff   :  { %v2264_v38 = vpop.f32.mrf.mxu0  ;;  %v2266_v39 = vpop.f32.mrf.mxu1  ;;  %3178 = vst [vmem:[#allocation12_spill] sm:$0xff] %v2356_v15 }
 0x100   :  { %3176 = vst [vmem:[#allocation10_spill] sm:$0xff] %v2266_v39  ;;  %v693_v42 = vpack.c.bf16 %v2264_v38, %v2264_v38  ;;  %v709_v45 = vpack.c.bf16 %v2266_v39, %v2266_v39  ;;  %v836_v33 = vadd.f32 %v835_v10, %v834_v11 }
 0x102   :  { %758 = vst.msk [vmem:[%s3146_s3 + $0x34] sm:$0xf] %vm744_vm2, %v693_v42  ;;  %v734_v42 = vpack.c.bf16 %v2280_v48, %v2280_v48  ;;  %v838_v59 = vadd.f32 %v837_v21, %v836_v33 }
 0x103   :  { %774 = vst.msk [vmem:[%s3146_s3 + $0x74] sm:$0xf] %vm744_vm2, %v709_v45  ;;  %v839_v45 = vsel %vm813_vm3, %v2264_v38, 0.0 }
 0x104   :  { %v840_v6 = vadd.f32 %v839_v45, %v838_v59  ;;  %799 = vst.msk [vmem:[%s3146_s3 + $0xd8] sm:$0xf] %vm744_vm2, %v734_v42  ;;  %v2358_v42 = vpop.f32.mrf.mxu3 }
 0x107   :  { %v2296_v14 = vpop.f32.mrf.mxu0  ;;  %v2298_v18 = vpop.f32.mrf.mxu1 }
 0x108   :  { %v694_v22 = vpack.c.bf16 %v2296_v14, %v2296_v14  ;;  %v710_v28 = vpack.c.bf16 %v2298_v18, %v2298_v18  ;;  %v841_v63 = vsel %vm813_vm3, %v2296_v14, 0.0 }
 0x109   :  { %v842_v10 = vadd.f32 %v841_v63, %v840_v6  ;;  %v849_v6 = vsel %vm813_vm3, %v1941_v17, 0.0 }
 0x10a   :  { %759 = vst.msk [vmem:[%s3146_s3 + $0x38] sm:$0xf] %vm744_vm2, %v694_v22 }
 0x10b   :  { %775 = vst.msk [vmem:[%s3146_s3 + $0x78] sm:$0xf] %vm744_vm2, %v710_v28 }
 0x10f   :  { %v2342_v11 = vpop.f32.mrf.mxu0  ;;  %v2344_v21 = vpop.f32.mrf.mxu1 }
 0x110   :  { %3177 = vst [vmem:[#allocation11_spill] sm:$0xff] %v2344_v21  ;;  %v695_v22 = vpack.c.bf16 %v2342_v11, %v2342_v11  ;;  %v843_v28 = vsel %vm813_vm3, %v2342_v11, 0.0  ;;  %v711_v33 = vpack.c.bf16 %v2344_v21, %v2344_v21 }
 0x111   :  { %v844_v45 = vadd.f32 %v843_v28, %v842_v10  ;;  %v851_v28 = vsel %vm813_vm3, %v1958_v24, 0.0 }
 0x112   :  { %760 = vst.msk [vmem:[%s3146_s3 + $0x3c] sm:$0xf] %vm744_vm2, %v695_v22  ;;  %v724_v22 = vpack.c.bf16 %v2356_v15, %v2356_v15 }
 0x113   :  { %v846_v59 = vadd.f32 %v845_v51, %v844_v45  ;;  %776 = vst.msk [vmem:[%s3146_s3 + $0x7c] sm:$0xf] %vm744_vm2, %v711_v33  ;;  %v736_v45 = vpack.c.bf16 %v2358_v42, %v2358_v42  ;;  %v2380_v51 = vpop.f32.mrf.mxu2  ;;  %v2382_v33 = vpop.f32.mrf.mxu3 }
 0x114   :  { %3179 = vst [vmem:[#allocation13_spill] sm:$0xff] %v2380_v51 }
 0x115   :  { %v848_v63 = vadd.f32 %v847_v60, %v846_v59  ;;  %3180 = vst [vmem:[#allocation14_spill] sm:$0xff] %v2382_v33  ;;  %v725_v59 = vpack.c.bf16 %v2380_v51, %v2380_v51  ;;  %v737_v60 = vpack.c.bf16 %v2382_v33, %v2382_v33 }
 0x116   :  { %789 = vst.msk [vmem:[%s3146_s3 + $0xb0] sm:$0xf] %vm744_vm2, %v724_v22 }
 0x117   :  { %v850_v10 = vadd.f32 %v849_v6, %v848_v63  ;;  %v853_v63 = vsel %vm813_vm3, %v1989_v37, 0.0  ;;  %801 = vst.msk [vmem:[%s3146_s3 + $0xe0] sm:$0xf] %vm744_vm2, %v736_v45  ;;  %v859_v45 = vsel %vm813_vm3, %v2062_v56, 0.0 }
 0x118   :  { %790 = vst.msk [vmem:[%s3146_s3 + $0xb4] sm:$0xf] %vm744_vm2, %v725_v59  ;;  %v861_v59 = vsel %vm813_vm3, %v2094_v2, 0.0 }
 0x119   :  { %v852_v58 = vadd.f32 %v851_v28, %v850_v10  ;;  %v855_v10 = vsel %vm813_vm3, %v2014_v44, 0.0  ;;  %802 = vst.msk [vmem:[%s3146_s3 + $0xe4] sm:$0xf] %vm744_vm2, %v737_v60 }
 0x11b   :  { %v854_v6 = vadd.f32 %v853_v63, %v852_v58  ;;  %v857_v58 = vsel %vm813_vm3, %v2038_v50, 0.0  ;;  %v2412_v63 = vpop.f32.mrf.mxu2  ;;  %v2414_v44 = vpop.f32.mrf.mxu3  ;;  %v865_v50 = vsel %vm813_vm3, %v2158_v26, 0.0 }
 0x11c   :  { %3181 = vst [vmem:[#allocation15_spill] sm:$0xff] %v2414_v44  ;;  %v726_v56 = vpack.c.bf16 %v2412_v63, %v2412_v63 }
 0x11d   :  { %v856_v28 = vadd.f32 %v855_v10, %v854_v6  ;;  %v863_v10 = vsel %vm813_vm3, %v2126_v13, 0.0 }
 0x11e   :  { %791 = vst.msk [vmem:[%s3146_s3 + $0xb8] sm:$0xf] %vm744_vm2, %v726_v56  ;;  %v873_v56 = vsel %vm813_vm3, %v2298_v18, 0.0 }
 0x11f   :  { %v858_v22 = vadd.f32 %v857_v58, %v856_v28  ;;  %v867_v58 = vsel %vm813_vm3, %v2190_v35, 0.0 }
 0x121   :  { %v860_v37 = vadd.f32 %v859_v45, %v858_v22  ;;  %v738_v22 = vpack.c.bf16 %v2414_v44, %v2414_v44 }
 0x123   :  { %v862_v6 = vadd.f32 %v861_v59, %v860_v37  ;;  %v2428_v45 = vpop.f32.mrf.mxu2  ;;  %v2430_v37 = vpop.f32.mrf.mxu3  ;;  %803 = vst.msk [vmem:[%s3146_s3 + $0xe8] sm:$0xf] %vm744_vm2, %v738_v22  ;;  %v875_v22 = vsel %vm813_vm3, %v2344_v21, 0.0 }
 0x124   :  { %3182 = vst [vmem:[#allocation16_spill] sm:$0xff] %v2430_v37 }
 0x125   :  { %v864_v60 = vadd.f32 %v863_v10, %v862_v6  ;;  %v727_v6 = vpack.c.bf16 %v2428_v45, %v2428_v45  ;;  %v869_v10 = vsel %vm813_vm3, %v2218_v54, 0.0  ;;  %v877_v54 = vsel %vm813_vm3, %v1964_v27, 0.0 }
 0x127   :  { %v866_v28 = vadd.f32 %v865_v50, %v864_v60  ;;  %v739_v50 = vpack.c.bf16 %v2430_v37, %v2430_v37  ;;  %792 = vst.msk [vmem:[%s3146_s3 + $0xbc] sm:$0xf] %vm744_vm2, %v727_v6 }
 0x129   :  { %v868_v59 = vadd.f32 %v867_v58, %v866_v28  ;;  %v871_v28 = vsel %vm813_vm3, %v2266_v39, 0.0  ;;  %804 = vst.msk [vmem:[%s3146_s3 + $0xec] sm:$0xf] %vm744_vm2, %v739_v50  ;;  %v881_v50 = vsel %vm813_vm3, %v2020_v47, 0.0 }
 0x12b   :  { %v870_v60 = vadd.f32 %v869_v10, %v868_v59  ;;  %v2460_v10 = vpop.f32.mrf.mxu3 }
 0x12c   :  { %3183 = vst [vmem:[#allocation17_spill] sm:$0xff] %v2460_v10 }
 0x12d   :  { %v872_v58 = vadd.f32 %v871_v28, %v870_v60  ;;  %v879_v60 = vsel %vm813_vm3, %v1995_v40, 0.0 }
 0x12f   :  { %v874_v59 = vadd.f32 %v873_v56, %v872_v58  ;;  %v883_v58 = vsel %vm813_vm3, %v2044_v53, 0.0  ;;  %v740_v56 = vpack.c.bf16 %v2460_v10, %v2460_v10 }
 0x131   :  { %v876_v39 = vadd.f32 %v875_v22, %v874_v59  ;;  %805 = vst.msk [vmem:[%s3146_s3 + $0xf0] sm:$0xf] %vm744_vm2, %v740_v56  ;;  %v893_v56 = vsel %vm813_vm3, %v2196_v41, 0.0 }
 0x133   :  { %v878_v6 = vadd.f32 %v877_v54, %v876_v39  ;;  %v2472_v21 = vpop.f32.mrf.mxu3  ;;  %v885_v39 = vsel %vm813_vm3, %v2068_v61, 0.0 }
 0x134   :  { %v741_v54 = vpack.c.bf16 %v2472_v21, %v2472_v21 }
 0x135   :  { %v880_v28 = vadd.f32 %v879_v60, %v878_v6  ;;  %v889_v60 = vsel %vm813_vm3, %v2132_v19, 0.0 }
 0x136   :  { %806 = vst.msk [vmem:[%s3146_s3 + $0xf4] sm:$0xf] %vm744_vm2, %v741_v54  ;;  %v895_v54 = vsel %vm813_vm3, %v2226_v0, 0.0 }
 0x137   :  { %v882_v35 = vadd.f32 %v881_v50, %v880_v28  ;;  %v891_v50 = vsel %vm813_vm3, %v2164_v30, 0.0 }
 0x139   :  { %v884_v59 = vadd.f32 %v883_v58, %v882_v35  ;;  %v887_v35 = vsel %vm813_vm3, %v2100_v7, 0.0 }
 0x13b   :  { %v886_v22 = vadd.f32 %v885_v39, %v884_v59  ;;  %v2492_v61 = vpop.f32.mrf.mxu3 }
 0x13c   :  { %3184 = vst [vmem:[#allocation18_spill] sm:$0xff] %v2492_v61 }
 0x13d   :  { %v888_v6 = vadd.f32 %v887_v35, %v886_v22  ;;  %v897_v22 = vsel %vm813_vm3, %v2278_v46, 0.0 }
 0x13f   :  { %v890_v28 = vadd.f32 %v889_v60, %v888_v6  ;;  %v899_v6 = vsel %vm813_vm3, %v2306_v29, 0.0  ;;  %v742_v60 = vpack.c.bf16 %v2492_v61, %v2492_v61 }
 0x141   :  { %v892_v58 = vadd.f32 %v891_v50, %v890_v28  ;;  %807 = vst.msk [vmem:[%s3146_s3 + $0xf8] sm:$0xf] %vm744_vm2, %v742_v60 }
 0x143   :  { %v894_v59 = vadd.f32 %v893_v56, %v892_v58  ;;  %v2504_v50 = vpop.f32.mrf.mxu3  ;;  %v901_v58 = vsel %vm813_vm3, %v2356_v15, 0.0 }
 0x144   :  { %3185 = vst [vmem:[#allocation19_spill] sm:$0xff] %v2504_v50  ;;  %v743_v56 = vpack.c.bf16 %v2504_v50, %v2504_v50 }
 0x145   :  { %v896_v39 = vadd.f32 %v895_v54, %v894_v59  ;;  %v903_v54 = vsel %vm813_vm3, %v2380_v51, 0.0  ;;  %v911_v51 = vsel %vm813_vm3, %v2102_v9, 0.0 }
 0x146   :  { %808 = vst.msk [vmem:[%s3146_s3 + $0xfc] sm:$0xf] %vm744_vm2, %v743_v56  ;;  %v913_v56 = vsel %vm813_vm3, %v2134_v20, 0.0 }
 0x147   :  { %v898_v35 = vadd.f32 %v897_v22, %v896_v39  ;;  %v905_v22 = vsel %vm813_vm3, %v2412_v63, 0.0 }
 0x149   :  { %v900_v28 = vadd.f32 %v899_v6, %v898_v35  ;;  %v907_v6 = vsel %vm813_vm3, %v2428_v45, 0.0 }
 0x14b   :  { %v902_v59 = vadd.f32 %v901_v58, %v900_v28  ;;  %v909_v28 = vsel %vm813_vm3, %v2070_v62, 0.0 }
 0x14d   :  { %v904_v39 = vadd.f32 %v903_v54, %v902_v59  ;;  %v915_v54 = vsel %vm813_vm3, %v2166_v31, 0.0 }
 0x14f   :  { %v906_v35 = vadd.f32 %v905_v22, %v904_v39  ;;  %v917_v22 = vsel %vm813_vm3, %v2198_v8, 0.0 }
 0x151   :  { %v908_v60 = vadd.f32 %v907_v6, %v906_v35  ;;  %v919_v6 = vsel %vm813_vm3, %v2228_v5, 0.0 }
 0x153   :  { %v910_v58 = vadd.f32 %v909_v28, %v908_v60  ;;  %v921_v28 = vsel %vm813_vm3, %v2280_v48, 0.0 }
 0x155   :  { %v912_v15 = vadd.f32 %v911_v51, %v910_v58  ;;  %v923_v58 = vsel %vm813_vm3, %v2308_v32, 0.0 }
 0x157   :  { %v914_v59 = vadd.f32 %v913_v56, %v912_v15  ;;  %v925_v56 = vsel %vm813_vm3, %v2358_v42, 0.0 }
 0x159   :  { %v916_v39 = vadd.f32 %v915_v54, %v914_v59  ;;  %v1602_v59 = vmov 0.0  }
 0x15a   :  { %950 = vst.msk [vmem:[%s3147_s4] sm:$0x1] %vm948_vm4, %v1602_v59 }
 0x15b   :  { %v918_v35 = vadd.f32 %v917_v22, %v916_v39  ;;  %951 = vst.msk [vmem:[%s3148_s5] sm:$0x1] %vm948_vm4, %v1602_v59  ;;  %v927_v39 = vsel %vm813_vm3, %v2382_v33, 0.0  ;;  %v937_v59 = vsel %vm813_vm3, %v2492_v61, 0.0 }
 0x15d   :  { %v920_v60 = vadd.f32 %v919_v6, %v918_v35  ;;  %v929_v35 = vsel %vm813_vm3, %v2414_v44, 0.0 }
 0x15f   :  { %v922_v51 = vadd.f32 %v921_v28, %v920_v60  ;;  %v931_v60 = vsel %vm813_vm3, %v2430_v37, 0.0 }
 0x161   :  { %v924_v15 = vadd.f32 %v923_v58, %v922_v51  ;;  %v933_v51 = vsel %vm813_vm3, %v2460_v10, 0.0 }
 0x163   :  { %v926_v54 = vadd.f32 %v925_v56, %v924_v15  ;;  %v935_v15 = vsel %vm813_vm3, %v2472_v21, 0.0 }
 0x165   :  { %v928_v22 = vadd.f32 %v927_v39, %v926_v54  ;;  %v939_v39 = vsel %vm813_vm3, %v2504_v50, 0.0 }
 0x167   :  { %v930_v6 = vadd.f32 %v929_v35, %v928_v22 }
 0x169   :  { %v932_v28 = vadd.f32 %v931_v60, %v930_v6 }
 0x16b   :  { %v934_v58 = vadd.f32 %v933_v51, %v932_v28 }
 0x16d   :  { %v936_v56 = vadd.f32 %v935_v15, %v934_v58 }
 0x16f   :  { %v938_v54 = vadd.f32 %v937_v59, %v936_v56 }
 0x171   :  { %v940_v22 = vadd.f32 %v939_v39, %v938_v54 }
 0x173   :  { %v941_v35 = vrot.slane %v940_v22, 4 }
 0x175   :  { %v942_v44 = vadd.f32 %v941_v35, %v940_v22 }
 0x177   :  { %v943_v37 = vrot.slane %v942_v44, 2 }
 0x179   :  { %v944_v6 = vadd.f32 %v943_v37, %v942_v44 }
 0x17b   :  { %v945_v60 = vrot.slane %v944_v6, 1 }
 0x17d   :  { %v946_v33 = vadd.f32 %v945_v60, %v944_v6 }
 0x17f   :  { %v947_v10 = vmul.f32 0.001953125, %v946_v33 }
 0x181   :  { %949 = vst.msk [vmem:[%s3149_s6] sm:$0x1] %vm948_vm4, %v947_v10 }
 0x188   :  { %v2571_v28 = vld [vmem:[%s3149_s6] ss:$0 sm:$0xff] }
 0x189   :  { %v956_v51 = vsub.f32 %v1898_v57, %v2571_v28  ;;  %v957_v58 = vsub.f32 %v1916_v3, %v2571_v28  ;;  %v958_v44 = vsub.f32 %v1939_v16, %v2571_v28  ;;  %v959_v33 = vsub.f32 %v1956_v23, %v2571_v28 }
 0x18a   :  { %v2585_v56 = vsub.f32 %v1987_v36, %v2571_v28  ;;  %v2590_v3 = vsub.f32 %v2012_v43, %v2571_v28  ;;  %v2595_v23 = vsub.f32 %v2036_v49, %v2571_v28  ;;  %v2601_v36 = vsub.f32 %v2060_v55, %v2571_v28 }
 0x18b   :  { %v1022_v37 = vsel %vm813_vm3, %v956_v51, 0.0  ;;  %v1023_v10 = vsel %vm813_vm3, %v957_v58, 0.0  ;;  %v1025_v57 = vsel %vm813_vm3, %v958_v44, 0.0  ;;  %v1027_v16 = vsel %vm813_vm3, %v959_v33, 0.0 }
 0x18c   :  { %v1024_v15 = vadd.f32 %v1023_v10, %v1022_v37  ;;  %v1029_v39 = vsel %vm813_vm3, %v2585_v56, 0.0  ;;  %v1031_v35 = vsel %vm813_vm3, %v2590_v3, 0.0  ;;  %v2607_v6 = vsub.f32 %v2092_v1, %v2571_v28 }
 0x18d   :  { %v1033_v49 = vsel %vm813_vm3, %v2595_v23, 0.0  ;;  %v2613_v37 = vsub.f32 %v2124_v12, %v2571_v28  ;;  %v1035_v55 = vsel %vm813_vm3, %v2601_v36, 0.0 }
 0x18e   :  { %v1026_v59 = vadd.f32 %v1025_v57, %v1024_v15  ;;  %v2619_v15 = vsub.f32 %v2156_v25, %v2571_v28  ;;  %v1037_v1 = vsel %vm813_vm3, %v2607_v6, 0.0 }
 0x18f   :  { %v1039_v12 = vsel %vm813_vm3, %v2613_v37, 0.0 }
 0x190   :  { %v1028_v54 = vadd.f32 %v1027_v16, %v1026_v59  ;;  %v2625_v59 = vsub.f32 %v2188_v34, %v2571_v28  ;;  %v1041_v25 = vsel %vm813_vm3, %v2619_v15, 0.0 }
 0x192   :  { %v1030_v22 = vadd.f32 %v1029_v39, %v1028_v54  ;;  %v2631_v54 = vsub.f32 %v2216_v52, %v2571_v28  ;;  %v1043_v34 = vsel %vm813_vm3, %v2625_v59, 0.0 }
 0x194   :  { %v1032_v43 = vadd.f32 %v1031_v35, %v1030_v22  ;;  %v2637_v22 = vsub.f32 %v2264_v38, %v2571_v28  ;;  %v1045_v52 = vsel %vm813_vm3, %v2631_v54, 0.0 }
 0x196   :  { %v1034_v60 = vadd.f32 %v1033_v49, %v1032_v43  ;;  %v2643_v43 = vsub.f32 %v2296_v14, %v2571_v28  ;;  %v1047_v38 = vsel %vm813_vm3, %v2637_v22, 0.0 }
 0x198   :  { %v1036_v10 = vadd.f32 %v1035_v55, %v1034_v60  ;;  %v2649_v60 = vsub.f32 %v2342_v11, %v2571_v28  ;;  %v1049_v14 = vsel %vm813_vm3, %v2643_v43, 0.0 }
 0x19a   :  { %v1038_v57 = vadd.f32 %v1037_v1, %v1036_v10  ;;  %v3186_v10 = vld [vmem:[#allocation2_spill] sm:$0xff]  ;;  %v1051_v11 = vsel %vm813_vm3, %v2649_v60, 0.0 }
 0x19b   :  { %v2655_v1 = vsub.f32 %v3186_v10, %v2571_v28 }
 0x19c   :  { %v1040_v16 = vadd.f32 %v1039_v12, %v1038_v57  ;;  %v2661_v12 = vsub.f32 %v1918_v4, %v2571_v28 }
 0x19e   :  { %v1042_v39 = vadd.f32 %v1041_v25, %v1040_v16  ;;  %v2667_v25 = vsub.f32 %v1941_v17, %v2571_v28  ;;  %v1055_v4 = vsel %vm813_vm3, %v2661_v12, 0.0 }
 0x1a0   :  { %v1044_v35 = vadd.f32 %v1043_v34, %v1042_v39  ;;  %v1053_v39 = vsel %vm813_vm3, %v2655_v1, 0.0  ;;  %v1057_v17 = vsel %vm813_vm3, %v2667_v25, 0.0 }
 0x1a2   :  { %v1046_v49 = vadd.f32 %v1045_v52, %v1044_v35  ;;  %v2673_v35 = vsub.f32 %v1958_v24, %v2571_v28  ;;  %v1159_v52 = vmul.f32 %v956_v51, %v956_v51 }
 0x1a4   :  { %v1048_v55 = vadd.f32 %v1047_v38, %v1046_v49  ;;  %v1160_v49 = vmul.f32 %v957_v58, %v957_v58  ;;  %v1223_v51 = vsel %vm813_vm3, %v1159_v52, 0.0  ;;  %v3190_v52 = vld [vmem:[#allocation6_spill] sm:$0xff] }
 0x1a5   :  { %v2702_v61 = vsub.f32 %v3190_v52, %v2571_v28 }
 0x1a6   :  { %v1050_v57 = vadd.f32 %v1049_v14, %v1048_v55  ;;  %v3187_v55 = vld [vmem:[#allocation3_spill] sm:$0xff]  ;;  %v1161_v14 = vmul.f32 %v958_v44, %v958_v44  ;;  %v1224_v58 = vsel %vm813_vm3, %v1160_v49, 0.0 }
 0x1a7   :  { %v2679_v10 = vsub.f32 %v3187_v55, %v2571_v28  ;;  %v3189_v55 = vld [vmem:[#allocation5_spill] sm:$0xff] }
 0x1a8   :  { %v1052_v16 = vadd.f32 %v1051_v11, %v1050_v57  ;;  %v3188_v57 = vld [vmem:[#allocation4_spill] sm:$0xff]  ;;  %v2693_v50 = vsub.f32 %v3189_v55, %v2571_v28 }
 0x1a9   :  { %v2685_v11 = vsub.f32 %v3188_v57, %v2571_v28  ;;  %v1061_v44 = vsel %vm813_vm3, %v2679_v10, 0.0 }
 0x1aa   :  { %v1054_v34 = vadd.f32 %v1053_v39, %v1052_v16  ;;  %v1059_v16 = vsel %vm813_vm3, %v2673_v35, 0.0  ;;  %v1162_v39 = vmul.f32 %v959_v33, %v959_v33 }
 0x1ab   :  { %v1063_v49 = vsel %vm813_vm3, %v2685_v11, 0.0 }
 0x1ac   :  { %v1056_v38 = vadd.f32 %v1055_v4, %v1054_v34  ;;  %v1225_v4 = vadd.f32 %v1224_v58, %v1223_v51 }
 0x1ae   :  { %v1058_v24 = vadd.f32 %v1057_v17, %v1056_v38  ;;  %v1163_v38 = vmul.f32 %v2585_v56, %v2585_v56  ;;  %v1226_v17 = vsel %vm813_vm3, %v1161_v14, 0.0  ;;  %v2711_v56 = vsub.f32 %v2094_v2, %v2571_v28 }
 0x1af   :  { %v1227_v33 = vadd.f32 %v1226_v17, %v1225_v4  ;;  %v1065_v14 = vsel %vm813_vm3, %v2693_v50, 0.0  ;;  %v1166_v2 = vmul.f32 %v2601_v36, %v2601_v36  ;;  %v3191_v36 = vld [vmem:[#allocation8_spill] sm:$0xff] }
 0x1b0   :  { %v1060_v34 = vadd.f32 %v1059_v16, %v1058_v24  ;;  %v1164_v24 = vmul.f32 %v2590_v3, %v2590_v3  ;;  %v1228_v16 = vsel %vm813_vm3, %v1162_v39, 0.0  ;;  %v1230_v4 = vsel %vm813_vm3, %v1163_v38, 0.0 }
 0x1b1   :  { %v1229_v58 = vadd.f32 %v1228_v16, %v1227_v33  ;;  %v2720_v3 = vsub.f32 %v2126_v13, %v2571_v28  ;;  %v1067_v39 = vsel %vm813_vm3, %v2702_v61, 0.0  ;;  %v1069_v38 = vsel %vm813_vm3, %v2711_v56, 0.0 }
 0x1b2   :  { %v1062_v57 = vadd.f32 %v1061_v44, %v1060_v34  ;;  %v1165_v34 = vmul.f32 %v2595_v23, %v2595_v23  ;;  %v1232_v17 = vsel %vm813_vm3, %v1164_v24, 0.0  ;;  %v2729_v23 = vsub.f32 %v2158_v26, %v2571_v28 }
 0x1b3   :  { %v1231_v44 = vadd.f32 %v1230_v4, %v1229_v58  ;;  %v1167_v13 = vmul.f32 %v2607_v6, %v2607_v6  ;;  %v1071_v24 = vsel %vm813_vm3, %v2720_v3, 0.0  ;;  %v1168_v26 = vmul.f32 %v2613_v37, %v2613_v37  ;;  %v3192_v6 = vld [vmem:[#allocation9_spill] sm:$0xff]  ;;  %v3193_v37 = vld [vmem:[#allocation10_spill] sm:$0xff] }
 0x1b4   :  { %v1064_v51 = vadd.f32 %v1063_v49, %v1062_v57  ;;  %v1234_v52 = vsel %vm813_vm3, %v1165_v34, 0.0  ;;  %v1236_v58 = vsel %vm813_vm3, %v1166_v2, 0.0  ;;  %v1073_v34 = vsel %vm813_vm3, %v2729_v23, 0.0 }
 0x1b5   :  { %v1233_v33 = vadd.f32 %v1232_v17, %v1231_v44  ;;  %v1169_v44 = vmul.f32 %v2619_v15, %v2619_v15  ;;  %v2765_v15 = vsub.f32 %v2298_v18, %v2571_v28  ;;  %v1172_v18 = vmul.f32 %v2637_v22, %v2637_v22 }
 0x1b6   :  { %v1066_v55 = vadd.f32 %v1065_v14, %v1064_v51  ;;  %v2738_v51 = vsub.f32 %v3191_v36, %v2571_v28  ;;  %v1171_v36 = vmul.f32 %v2631_v54, %v2631_v54  ;;  %v2783_v54 = vsub.f32 %v1964_v27, %v2571_v28 }
 0x1b7   :  { %v1235_v16 = vadd.f32 %v1234_v52, %v1233_v33  ;;  %v2756_v33 = vsub.f32 %v3193_v37, %v2571_v28  ;;  %v1240_v52 = vsel %vm813_vm3, %v1168_v26, 0.0  ;;  %v2792_v22 = vsub.f32 %v1995_v40, %v2571_v28 }
 0x1b8   :  { %v1068_v57 = vadd.f32 %v1067_v39, %v1066_v55  ;;  %v2747_v55 = vsub.f32 %v3192_v6, %v2571_v28  ;;  %v1238_v39 = vsel %vm813_vm3, %v1167_v13, 0.0  ;;  %v1075_v2 = vsel %vm813_vm3, %v2738_v51, 0.0 }
 0x1b9   :  { %v1237_v4 = vadd.f32 %v1236_v58, %v1235_v16  ;;  %v1079_v26 = vsel %vm813_vm3, %v2756_v33, 0.0  ;;  %v1174_v27 = vmul.f32 %v2649_v60, %v2649_v60  ;;  %v1175_v40 = vmul.f32 %v2655_v1, %v2655_v1  ;;  %v3195_v1 = vld [vmem:[#allocation7_spill] sm:$0xff] }
 0x1ba   :  { %v1070_v49 = vadd.f32 %v1069_v38, %v1068_v57  ;;  %v1170_v38 = vmul.f32 %v2625_v59, %v2625_v59  ;;  %v1077_v13 = vsel %vm813_vm3, %v2747_v55, 0.0  ;;  %v3194_v59 = vld [vmem:[#allocation11_spill] sm:$0xff]  ;;  %v2810_v60 = vsub.f32 %v2044_v53, %v2571_v28 }
 0x1bb   :  { %v1239_v57 = vadd.f32 %v1238_v39, %v1237_v4  ;;  %v2774_v4 = vsub.f32 %v3194_v59, %v2571_v28  ;;  %v1252_v59 = vsel %vm813_vm3, %v1174_v27, 0.0  ;;  %v1177_v53 = vmul.f32 %v2667_v25, %v2667_v25 }
 0x1bc   :  { %v1072_v14 = vadd.f32 %v1071_v24, %v1070_v49  ;;  %v1242_v24 = vsel %vm813_vm3, %v1169_v44, 0.0  ;;  %v1244_v6 = vsel %vm813_vm3, %v1170_v38, 0.0  ;;  %v1081_v44 = vsel %vm813_vm3, %v2765_v15, 0.0 }
 0x1bd   :  { %v1241_v16 = vadd.f32 %v1240_v52, %v1239_v57  ;;  %v1246_v57 = vsel %vm813_vm3, %v1171_v36, 0.0  ;;  %v1083_v38 = vsel %vm813_vm3, %v2774_v4, 0.0  ;;  %v1248_v52 = vsel %vm813_vm3, %v1172_v18, 0.0 }
 0x1be   :  { %v1074_v17 = vadd.f32 %v1073_v34, %v1072_v14  ;;  %v2837_v25 = vsub.f32 %v2132_v19, %v2571_v28  ;;  %v1180_v19 = vmul.f32 %v2685_v11, %v2685_v11  ;;  %v2864_v11 = vsub.f32 %v2226_v0, %v2571_v28 }
 0x1bf   :  { %v1243_v14 = vadd.f32 %v1242_v24, %v1241_v16  ;;  %v1183_v0 = vmul.f32 %v2711_v56, %v2711_v56  ;;  %v3196_v56 = vld [vmem:[#allocation12_spill] sm:$0xff] }
 0x1c0   :  { %v1076_v49 = vadd.f32 %v1075_v2, %v1074_v17  ;;  %v1173_v17 = vmul.f32 %v2643_v43, %v2643_v43  ;;  %v2801_v43 = vsub.f32 %v2020_v47, %v2571_v28  ;;  %v1176_v47 = vmul.f32 %v2661_v12, %v2661_v12 }
 0x1c1   :  { %v1245_v39 = vadd.f32 %v1244_v6, %v1243_v14  ;;  %v1087_v14 = vsel %vm813_vm3, %v2792_v22, 0.0  ;;  %v2819_v6 = vsub.f32 %v3195_v1, %v2571_v28  ;;  %v2828_v12 = vsub.f32 %v2100_v7, %v2571_v28 }
 0x1c2   :  { %v1078_v58 = vadd.f32 %v1077_v13, %v1076_v49  ;;  %v1085_v13 = vsel %vm813_vm3, %v2783_v54, 0.0  ;;  %v1250_v36 = vsel %vm813_vm3, %v1173_v17, 0.0  ;;  %v1179_v7 = vmul.f32 %v2679_v10, %v2679_v10 }
 0x1c3   :  { %v1247_v2 = vadd.f32 %v1246_v57, %v1245_v39  ;;  %v1254_v39 = vsel %vm813_vm3, %v1175_v40, 0.0  ;;  %v1091_v57 = vsel %vm813_vm3, %v2810_v60, 0.0  ;;  %v1095_v40 = vsel %vm813_vm3, %v2828_v12, 0.0 }
 0x1c4   :  { %v1080_v34 = vadd.f32 %v1079_v26, %v1078_v58  ;;  %v2855_v10 = vsub.f32 %v2196_v41, %v2571_v28  ;;  %v1182_v41 = vmul.f32 %v2702_v61, %v2702_v61  ;;  %v1264_v1 = vsel %vm813_vm3, %v1180_v19, 0.0 }
 0x1c5   :  { %v1249_v16 = vadd.f32 %v1248_v52, %v1247_v2  ;;  %v1256_v2 = vsel %vm813_vm3, %v1176_v47, 0.0  ;;  %v1093_v52 = vsel %vm813_vm3, %v2819_v6, 0.0  ;;  %v1262_v47 = vsel %vm813_vm3, %v1179_v7, 0.0 }
 0x1c6   :  { %v1082_v37 = vadd.f32 %v1081_v44, %v1080_v34  ;;  %v1089_v34 = vsel %vm813_vm3, %v2801_v43, 0.0  ;;  %v2882_v61 = vsub.f32 %v2306_v29, %v2571_v28  ;;  %v1185_v29 = vmul.f32 %v2729_v23, %v2729_v23 }
 0x1c7   :  { %v1251_v58 = vadd.f32 %v1250_v36, %v1249_v16  ;;  %v2909_v23 = vsub.f32 %v2412_v63, %v2571_v28  ;;  %v1188_v63 = vmul.f32 %v2756_v33, %v2756_v33  ;;  %v2936_v33 = vsub.f32 %v2102_v9, %v2571_v28 }
 0x1c8   :  { %v1084_v49 = vadd.f32 %v1083_v38, %v1082_v37  ;;  %v1178_v37 = vmul.f32 %v2673_v35, %v2673_v35  ;;  %v2846_v35 = vsub.f32 %v2164_v30, %v2571_v28  ;;  %v1181_v30 = vmul.f32 %v2693_v50, %v2693_v50 }
 0x1c9   :  { %v1253_v18 = vadd.f32 %v1252_v59, %v1251_v58  ;;  %v2873_v50 = vsub.f32 %v2278_v46, %v2571_v28  ;;  %v1184_v46 = vmul.f32 %v2720_v3, %v2720_v3  ;;  %v3197_v3 = vld [vmem:[#allocation13_spill] sm:$0xff]  ;;  %v1107_v19 = vsel %vm813_vm3, %v2882_v61, 0.0 }
 0x1ca   :  { %v1086_v24 = vadd.f32 %v1085_v13, %v1084_v49  ;;  %v1258_v49 = vsel %vm813_vm3, %v1177_v53, 0.0  ;;  %v1260_v36 = vsel %vm813_vm3, %v1178_v37, 0.0  ;;  %v1103_v37 = vsel %vm813_vm3, %v2864_v11, 0.0 }
 0x1cb   :  { %v1255_v17 = vadd.f32 %v1254_v39, %v1253_v18  ;;  %v1099_v18 = vsel %vm813_vm3, %v2846_v35, 0.0  ;;  %v1101_v39 = vsel %vm813_vm3, %v2855_v10, 0.0  ;;  %v1105_v7 = vsel %vm813_vm3, %v2873_v50, 0.0 }
 0x1cc   :  { %v1088_v26 = vadd.f32 %v1087_v14, %v1086_v24  ;;  %v1097_v14 = vsel %vm813_vm3, %v2837_v25, 0.0  ;;  %v1191_v9 = vmul.f32 %v2783_v54, %v2783_v54  ;;  %v2963_v54 = vsub.f32 %v2198_v8, %v2571_v28 }
 0x1cd   :  { %v1257_v27 = vadd.f32 %v1256_v2, %v1255_v17  ;;  %v1268_v2 = vsel %vm813_vm3, %v1182_v41, 0.0  ;;  %v1194_v8 = vmul.f32 %v2810_v60, %v2810_v60  ;;  %v2990_v60 = vsub.f32 %v2308_v32, %v2571_v28 }
 0x1ce   :  { %v1090_v44 = vadd.f32 %v1089_v34, %v1088_v26  ;;  %v1197_v32 = vmul.f32 %v2837_v25, %v2837_v25  ;;  %v3199_v25 = vld [vmem:[#allocation15_spill] sm:$0xff] }
 0x1cf   :  { %v1259_v13 = vadd.f32 %v1258_v49, %v1257_v27  ;;  %v1270_v49 = vsel %vm813_vm3, %v1183_v0, 0.0 }
 0x1d0   :  { %v1092_v38 = vadd.f32 %v1091_v57, %v1090_v44  ;;  %v1266_v44 = vsel %vm813_vm3, %v1181_v30, 0.0 }
 0x1d1   :  { %v1261_v58 = vadd.f32 %v1260_v36, %v1259_v13  ;;  %v1186_v36 = vmul.f32 %v2738_v51, %v2738_v51  ;;  %v2918_v51 = vsub.f32 %v2428_v45, %v2571_v28  ;;  %v1189_v45 = vmul.f32 %v2765_v15, %v2765_v15 }
 0x1d2   :  { %v1094_v16 = vadd.f32 %v1093_v52, %v1092_v38  ;;  %v2891_v52 = vsub.f32 %v3196_v56, %v2571_v28  ;;  %v2945_v15 = vsub.f32 %v2134_v20, %v2571_v28  ;;  %v1192_v20 = vmul.f32 %v2792_v22, %v2792_v22 }
 0x1d3   :  { %v1263_v26 = vadd.f32 %v1262_v47, %v1261_v58  ;;  %v1187_v47 = vmul.f32 %v2747_v55, %v2747_v55  ;;  %v2927_v55 = vsub.f32 %v2070_v62, %v2571_v28  ;;  %v1190_v62 = vmul.f32 %v2774_v4, %v2774_v4 }
 0x1d4   :  { %v1096_v24 = vadd.f32 %v1095_v40, %v1094_v16  ;;  %v2900_v40 = vsub.f32 %v3197_v3, %v2571_v28  ;;  %v1109_v30 = vsel %vm813_vm3, %v2891_v52, 0.0  ;;  %v2954_v4 = vsub.f32 %v2166_v31, %v2571_v28 }
 0x1d5   :  { %v1265_v53 = vadd.f32 %v1264_v1, %v1263_v26  ;;  %v1276_v1 = vsel %vm813_vm3, %v1186_v36, 0.0  ;;  %v1278_v0 = vsel %vm813_vm3, %v1187_v47, 0.0  ;;  %v1121_v3 = vsel %vm813_vm3, %v2945_v15, 0.0 }
 0x1d6   :  { %v1098_v59 = vadd.f32 %v1097_v14, %v1096_v24  ;;  %v1272_v24 = vsel %vm813_vm3, %v1184_v46, 0.0  ;;  %v1111_v41 = vsel %vm813_vm3, %v2900_v40, 0.0  ;;  %v1193_v31 = vmul.f32 %v2801_v43, %v2801_v43 }
 0x1d7   :  { %v1267_v57 = vadd.f32 %v1266_v44, %v1265_v53  ;;  %v2972_v22 = vsub.f32 %v2228_v5, %v2571_v28  ;;  %v2981_v43 = vsub.f32 %v2280_v48, %v2571_v28  ;;  %v1195_v5 = vmul.f32 %v2819_v6, %v2819_v6 }
 0x1d8   :  { %v1100_v34 = vadd.f32 %v1099_v18, %v1098_v59  ;;  %v1274_v59 = vsel %vm813_vm3, %v1185_v29, 0.0  ;;  %v1119_v29 = vsel %vm813_vm3, %v2936_v33, 0.0  ;;  %v1196_v48 = vmul.f32 %v2828_v12, %v2828_v12  ;;  %v3198_v12 = vld [vmem:[#allocation14_spill] sm:$0xff] }
 0x1d9   :  { %v1269_v27 = vadd.f32 %v1268_v2, %v1267_v57  ;;  %v1115_v57 = vsel %vm813_vm3, %v2918_v51, 0.0  ;;  %v2999_v6 = vsub.f32 %v2358_v42, %v2571_v28  ;;  %v1198_v42 = vmul.f32 %v2846_v35, %v2846_v35  ;;  %v3200_v35 = vld [vmem:[#allocation16_spill] sm:$0xff] }
 0x1da   :  { %v1102_v17 = vadd.f32 %v1101_v39, %v1100_v34  ;;  %v1113_v39 = vsel %vm813_vm3, %v2909_v23, 0.0 }
 0x1db   :  { %v1271_v13 = vadd.f32 %v1270_v49, %v1269_v27  ;;  %v1282_v27 = vsel %vm813_vm3, %v1189_v45, 0.0  ;;  %v1284_v49 = vsel %vm813_vm3, %v1190_v62, 0.0  ;;  %v1294_v45 = vsel %vm813_vm3, %v1195_v5, 0.0 }
 0x1dc   :  { %v1104_v38 = vadd.f32 %v1103_v37, %v1102_v17  ;;  %v1280_v37 = vsel %vm813_vm3, %v1188_v63, 0.0  ;;  %v1127_v63 = vsel %vm813_vm3, %v2972_v22, 0.0  ;;  %v1296_v62 = vsel %vm813_vm3, %v1196_v48, 0.0 }
 0x1dd   :  { %v1273_v14 = vadd.f32 %v1272_v24, %v1271_v13 }
 0x1de   :  { %v1106_v16 = vadd.f32 %v1105_v7, %v1104_v38  ;;  %v1117_v38 = vsel %vm813_vm3, %v2927_v55, 0.0 }
 0x1df   :  { %v1275_v18 = vadd.f32 %v1274_v59, %v1273_v14  ;;  %v1288_v14 = vsel %vm813_vm3, %v1192_v20, 0.0  ;;  %v1125_v59 = vsel %vm813_vm3, %v2963_v54, 0.0 }
 0x1e0   :  { %v1108_v58 = vadd.f32 %v1107_v19, %v1106_v16  ;;  %v1286_v19 = vsel %vm813_vm3, %v1191_v9, 0.0  ;;  %v1199_v9 = vmul.f32 %v2855_v10, %v2855_v10  ;;  %v3201_v10 = vld [vmem:[#allocation17_spill] sm:$0xff] }
 0x1e1   :  { %v1277_v53 = vadd.f32 %v1276_v1, %v1275_v18  ;;  %v1292_v1 = vsel %vm813_vm3, %v1194_v8, 0.0 }
 0x1e2   :  { %v1110_v26 = vadd.f32 %v1109_v30, %v1108_v58  ;;  %v1123_v58 = vsel %vm813_vm3, %v2954_v4, 0.0 }
 0x1e3   :  { %v1279_v17 = vadd.f32 %v1278_v0, %v1277_v53 }
 0x1e4   :  { %v1112_v34 = vadd.f32 %v1111_v41, %v1110_v26  ;;  %v1290_v26 = vsel %vm813_vm3, %v1193_v31, 0.0  ;;  %v3035_v31 = vsub.f32 %v3201_v10, %v2571_v28 }
 0x1e5   :  { %v1281_v2 = vadd.f32 %v1280_v37, %v1279_v17  ;;  %v3008_v17 = vsub.f32 %v3198_v12, %v2571_v28 }
 0x1e6   :  { %v1114_v44 = vadd.f32 %v1113_v39, %v1112_v34  ;;  %v1129_v39 = vsel %vm813_vm3, %v2981_v43, 0.0 }
 0x1e7   :  { %v1283_v7 = vadd.f32 %v1282_v27, %v1281_v2  ;;  %v3017_v2 = vsub.f32 %v3199_v25, %v2571_v28  ;;  %v1298_v27 = vsel %vm813_vm3, %v1197_v32, 0.0  ;;  %v1135_v20 = vsel %vm813_vm3, %v3008_v17, 0.0 }
 0x1e8   :  { %v1116_v46 = vadd.f32 %v1115_v57, %v1114_v44  ;;  %v1131_v57 = vsel %vm813_vm3, %v2990_v60, 0.0 }
 0x1e9   :  { %v1285_v13 = vadd.f32 %v1284_v49, %v1283_v7  ;;  %v1200_v49 = vmul.f32 %v2864_v11, %v2864_v11  ;;  %v3044_v11 = vsub.f32 %v2472_v21, %v2571_v28  ;;  %v1203_v21 = vmul.f32 %v2891_v52, %v2891_v52 }
 0x1ea   :  { %v1118_v56 = vadd.f32 %v1117_v38, %v1116_v46  ;;  %v1133_v38 = vsel %vm813_vm3, %v2999_v6, 0.0 }
 0x1eb   :  { %v1287_v24 = vadd.f32 %v1286_v19, %v1285_v13  ;;  %v1137_v19 = vsel %vm813_vm3, %v3017_v2, 0.0 }
 0x1ec   :  { %v1120_v16 = vadd.f32 %v1119_v29, %v1118_v56  ;;  %v3026_v29 = vsub.f32 %v3200_v35, %v2571_v28 }
 0x1ed   :  { %v1289_v47 = vadd.f32 %v1288_v14, %v1287_v24  ;;  %v1302_v24 = vsel %vm813_vm3, %v1199_v9, 0.0  ;;  %v1208_v9 = vmul.f32 %v2936_v33, %v2936_v33  ;;  %v1211_v33 = vmul.f32 %v2963_v54, %v2963_v54 }
 0x1ee   :  { %v1122_v36 = vadd.f32 %v1121_v3, %v1120_v16  ;;  %v1300_v16 = vsel %vm813_vm3, %v1198_v42, 0.0  ;;  %v1139_v14 = vsel %vm813_vm3, %v3026_v29, 0.0 }
 0x1ef   :  { %v1291_v41 = vadd.f32 %v1290_v26, %v1289_v47  ;;  %v1304_v47 = vsel %vm813_vm3, %v1200_v49, 0.0  ;;  %v1326_v54 = vsel %vm813_vm3, %v1211_v33, 0.0 }
 0x1f0   :  { %v1124_v30 = vadd.f32 %v1123_v58, %v1122_v36  ;;  %v1201_v36 = vmul.f32 %v2873_v50, %v2873_v50  ;;  %v3202_v50 = vld [vmem:[#allocation18_spill] sm:$0xff] }
 0x1f1   :  { %v1293_v53 = vadd.f32 %v1292_v1, %v1291_v41  ;;  %v3053_v26 = vsub.f32 %v3202_v50, %v2571_v28  ;;  %v1215_v50 = vmul.f32 %v2999_v6, %v2999_v6 }
 0x1f2   :  { %v1126_v18 = vadd.f32 %v1125_v59, %v1124_v30  ;;  %v1202_v30 = vmul.f32 %v2882_v61, %v2882_v61  ;;  %v1306_v41 = vsel %vm813_vm3, %v1201_v36, 0.0  ;;  %v3203_v61 = vld [vmem:[#allocation19_spill] sm:$0xff] }
 0x1f3   :  { %v1295_v44 = vadd.f32 %v1294_v45, %v1293_v53  ;;  %v3062_v1 = vsub.f32 %v3203_v61, %v2571_v28  ;;  %v1204_v53 = vmul.f32 %v2900_v40, %v2900_v40  ;;  %v1145_v52 = vsel %vm813_vm3, %v3053_v26, 0.0 }
 0x1f4   :  { %v1128_v34 = vadd.f32 %v1127_v63, %v1126_v18  ;;  %v1141_v18 = vsel %vm813_vm3, %v3035_v31, 0.0  ;;  %v1206_v40 = vmul.f32 %v2918_v51, %v2918_v51  ;;  %v1209_v51 = vmul.f32 %v2945_v15, %v2945_v15  ;;  %v1020_v15 = vld [vmem:[%s3147_s4] sm:$0x1] }
 0x1f5   :  { %v1297_v46 = vadd.f32 %v1296_v62, %v1295_v44  ;;  %v1310_v44 = vsel %vm813_vm3, %v1203_v21, 0.0  ;;  %v1312_v42 = vsel %vm813_vm3, %v1204_v53, 0.0  ;;  %v1216_v21 = vmul.f32 %v3008_v17, %v3008_v17 }
 0x1f6   :  { %v1130_v0 = vadd.f32 %v1129_v39, %v1128_v34  ;;  %v1143_v34 = vsel %vm813_vm3, %v3044_v11, 0.0  ;;  %v1308_v39 = vsel %vm813_vm3, %v1202_v30, 0.0  ;;  %v1322_v10 = vsel %vm813_vm3, %v1209_v51, 0.0 }
 0x1f7   :  { %v1299_v7 = vadd.f32 %v1298_v27, %v1297_v46  ;;  %v1207_v46 = vmul.f32 %v2927_v55, %v2927_v55  ;;  %v1316_v27 = vsel %vm813_vm3, %v1206_v40, 0.0  ;;  %v1210_v55 = vmul.f32 %v2954_v4, %v2954_v4 }
 0x1f8   :  { %v1132_v37 = vadd.f32 %v1131_v57, %v1130_v0  ;;  %v1205_v0 = vmul.f32 %v2909_v23, %v2909_v23  ;;  %v1147_v57 = vsel %vm813_vm3, %v3062_v1, 0.0  ;;  %v1336_v6 = vsel %vm813_vm3, %v1216_v21, 0.0 }
 0x1f9   :  { %v1301_v3 = vadd.f32 %v1300_v16, %v1299_v7  ;;  %v1318_v35 = vsel %vm813_vm3, %v1207_v46, 0.0  ;;  %v1320_v16 = vsel %vm813_vm3, %v1208_v9, 0.0  ;;  %v1324_v4 = vsel %vm813_vm3, %v1210_v55, 0.0 }
 0x1fa   :  { %v1134_v56 = vadd.f32 %v1133_v38, %v1132_v37  ;;  %v1314_v25 = vsel %vm813_vm3, %v1205_v0, 0.0  ;;  %v1221_v0 = vmul.f32 %v3053_v26, %v3053_v26 }
 0x1fb   :  { %v1303_v8 = vadd.f32 %v1302_v24, %v1301_v3  ;;  %v1212_v24 = vmul.f32 %v2972_v22, %v2972_v22 }
 0x1fc   :  { %v1136_v13 = vadd.f32 %v1135_v20, %v1134_v56 }
 0x1fd   :  { %v1305_v5 = vadd.f32 %v1304_v47, %v1303_v8 }
 0x1fe   :  { %v1138_v58 = vadd.f32 %v1137_v19, %v1136_v13 }
 0x1ff   :  { %v1307_v48 = vadd.f32 %v1306_v41, %v1305_v5  ;;  %v1328_v5 = vsel %vm813_vm3, %v1212_v24, 0.0 }
 0x200   :  { %v1140_v59 = vadd.f32 %v1139_v14, %v1138_v58  ;;  %v1213_v14 = vmul.f32 %v2981_v43, %v2981_v43 }
 0x201   :  { %v1309_v45 = vadd.f32 %v1308_v39, %v1307_v48  ;;  %v1334_v48 = vsel %vm813_vm3, %v1215_v50, 0.0  ;;  %v1219_v39 = vmul.f32 %v3035_v31, %v3035_v31 }
 0x202   :  { %v1142_v63 = vadd.f32 %v1141_v18, %v1140_v59  ;;  %v1214_v59 = vmul.f32 %v2990_v60, %v2990_v60  ;;  %v1330_v43 = vsel %vm813_vm3, %v1213_v14, 0.0 }
 0x203   :  { %v1311_v12 = vadd.f32 %v1310_v44, %v1309_v45  ;;  %v1220_v45 = vmul.f32 %v3044_v11, %v3044_v11 }
 0x204   :  { %v1144_v32 = vadd.f32 %v1143_v34, %v1142_v63  ;;  %v1332_v41 = vsel %vm813_vm3, %v1214_v59, 0.0  ;;  %v1217_v63 = vmul.f32 %v3017_v2, %v3017_v2  ;;  %v1218_v34 = vmul.f32 %v3026_v29, %v3026_v29 }
 0x205   :  { %v1313_v37 = vadd.f32 %v1312_v42, %v1311_v12  ;;  %v1342_v29 = vsel %vm813_vm3, %v1219_v39, 0.0  ;;  %v1344_v31 = vsel %vm813_vm3, %v1220_v45, 0.0 }
 0x206   :  { %v1146_v28 = vadd.f32 %v1145_v52, %v1144_v32  ;;  %v1338_v17 = vsel %vm813_vm3, %v1217_v63, 0.0  ;;  %v1340_v2 = vsel %vm813_vm3, %v1218_v34, 0.0 }
 0x207   :  { %v1315_v38 = vadd.f32 %v1314_v25, %v1313_v37 }
 0x208   :  { %v1148_v62 = vadd.f32 %v1147_v57, %v1146_v28  ;;  %v1222_v28 = vmul.f32 %v3062_v1, %v3062_v1  ;;  %v1346_v57 = vsel %vm813_vm3, %v1221_v0, 0.0 }
 0x209   :  { %v1317_v7 = vadd.f32 %v1316_v27, %v1315_v38 }
 0x20a   :  { %v1149_v23 = vrot.slane %v1148_v62, 4  ;;  %v1348_v11 = vsel %vm813_vm3, %v1222_v28, 0.0 }
 0x20b   :  { %v1319_v49 = vadd.f32 %v1318_v35, %v1317_v7 }
 0x20c   :  { %v1150_v56 = vadd.f32 %v1149_v23, %v1148_v62  ;;  %v1158_v23 = vld [vmem:[%s3148_s5] sm:$0x1] }
 0x20d   :  { %v1321_v3 = vadd.f32 %v1320_v16, %v1319_v49 }
 0x20e   :  { %v1151_v20 = vrot.slane %v1150_v56, 2 }
 0x20f   :  { %v1323_v36 = vadd.f32 %v1322_v10, %v1321_v3 }
 0x210   :  { %v1152_v13 = vadd.f32 %v1151_v20, %v1150_v56 }
 0x211   :  { %v1325_v8 = vadd.f32 %v1324_v4, %v1323_v36 }
 0x212   :  { %v1153_v19 = vrot.slane %v1152_v13, 1 }
 0x213   :  { %v1327_v47 = vadd.f32 %v1326_v54, %v1325_v8 }
 0x214   :  { %v1154_v58 = vadd.f32 %v1153_v19, %v1152_v13 }
 0x215   :  { %v1329_v22 = vadd.f32 %v1328_v5, %v1327_v47 }
 0x216   :  { %v1155_v30 = vadd.f32 %v1154_v58, %v1020_v15 }
 0x217   :  { %v1331_v18 = vadd.f32 %v1330_v43, %v1329_v22 }
 0x218   :  { %1157 = vst.msk [vmem:[%s3147_s4] sm:$0x1] %vm948_vm4, %v1155_v30 }
 0x219   :  { %v1333_v60 = vadd.f32 %v1332_v41, %v1331_v18 }
 0x21b   :  { %v1335_v61 = vadd.f32 %v1334_v48, %v1333_v60 }
 0x21d   :  { %v1337_v53 = vadd.f32 %v1336_v6, %v1335_v61 }
 0x21f   :  { %v1339_v32 = vadd.f32 %v1338_v17, %v1337_v53 }
 0x221   :  { %v1341_v52 = vadd.f32 %v1340_v2, %v1339_v32 }
 0x223   :  { %v1343_v44 = vadd.f32 %v1342_v29, %v1341_v52 }
 0x225   :  { %v1345_v12 = vadd.f32 %v1344_v31, %v1343_v44 }
 0x227   :  { %v1347_v40 = vadd.f32 %v1346_v57, %v1345_v12 }
 0x229   :  { %v1349_v42 = vadd.f32 %v1348_v11, %v1347_v40 }
 0x22b   :  { %v1350_v62 = vrot.slane %v1349_v42, 4 }
 0x22d   :  { %v1351_v37 = vadd.f32 %v1350_v62, %v1349_v42 }
 0x22f   :  { %v1352_v46 = vrot.slane %v1351_v37, 2 }
 0x231   :  { %v1353_v25 = vadd.f32 %v1352_v46, %v1351_v37 }
 0x233   :  { %v1354_v26 = vrot.slane %v1353_v25, 1 }
 0x235   :  { %v1355_v38 = vadd.f32 %v1354_v26, %v1353_v25 }
 0x237   :  { %v1356_v1 = vadd.f32 %v1355_v38, %v1158_v23 }
 0x239   :  { %1357 = vst.msk [vmem:[%s3148_s5] sm:$0x1] %vm948_vm4, %v1356_v1 }

// kernel: _lambda_.18
= control target key start
LH: loop header
LB: loop body
LE: loop exit
PB: predicated region body
PF: predicated region fallthrough
CT: control target
= control target key end

     0   :  { %vm373_vm0 = vcmask 1043456   ;;  %vm276_vm1 = vcmask 588800   ;;  %vm610_vm2 = vcmask 60416   ;;  %vm679_vm3 = vcmask 64512   ;;  %s2870_s1 = inlined_call_operand.vmem [shape: bf16[1,72,8], index: 1, kind: input, shape index: {}]   ;;  %s2871_s0 = inlined_call_operand.vmem [shape: bf16[1,512,72], index: 0, kind: input, shape index: {}]   ;;  %s2872_s2 = inlined_call_operand.vmem [shape: bf16[1,512,8], index: 2, kind: output, shape index: {0}]   ;;  %s2873_s3 = inlined_call_operand.vmem [shape: f32[1,1,8], index: 3, kind: output, shape index: {1}]   ;;  %s2874_s4 = inlined_call_operand.vmem [shape: f32[1,1,8], index: 4, kind: output, shape index: {2}]   ;;  %s2875_s5 = inlined_call_operand.vmem [shape: f32[1,1,8], index: 5, kind: output, shape index: {3}]  }
   0x1   :  { %v88_v0 = vld [vmem:[%s2870_s1 + $0x20] sm:$0xf]  ;;  %v1451_v4 = vld [vmem:[%s2870_s1 + $0x18] sm:$0xff]  ;;  %v1450_v5 = vld [vmem:[%s2870_s1 + $0x10] sm:$0xff]  ;;  %vm814_vm4 = vcmask 57344  }
   0x2   :  { %v266_v1 = vunpack.c.l.b16 %v88_v0  ;;  %v1449_v6 = vld [vmem:[%s2870_s1 + $0x8] sm:$0xff]  ;;  %v1448_v7 = vld [vmem:[%s2870_s1] sm:$0xff]  ;;  %v1418_v13 = vld [vmem:[%s2871_s0 + $0x10] sm:$0xff] }
   0x3   :  { %v1416_v8 = vld [vmem:[%s2871_s0] sm:$0xff]  ;;  %v1417_v10 = vld [vmem:[%s2871_s0 + $0x8] sm:$0xff]  ;;  %v1426_v14 = vld [vmem:[%s2871_s0 + $0x50] sm:$0xff] }
   0x4   :  { %v271_v2 = vpack.c.b16 %v266_v1, %v266_v1  ;;  %v1424_v9 = vld [vmem:[%s2871_s0 + $0x40] sm:$0xff]  ;;  %v1425_v11 = vld [vmem:[%s2871_s0 + $0x48] sm:$0xff]  ;;  %v1419_v16 = vld [vmem:[%s2871_s0 + $0x18] sm:$0xff] }
   0x5   :  { %v1432_v12 = vld [vmem:[%s2871_s0 + $0x80] sm:$0xff]  ;;  %v1433_v15 = vld [vmem:[%s2871_s0 + $0x88] sm:$0xff]  ;;  %v1427_v17 = vld [vmem:[%s2871_s0 + $0x58] sm:$0xff] }
   0x6   :  { %v375_v3 = vsel %vm373_vm0, %v271_v2, 0  ;;  %v1434_v18 = vld [vmem:[%s2871_s0 + $0x90] sm:$0xff]  ;;  %v1440_v19 = vld [vmem:[%s2871_s0 + $0xc0] sm:$0xff]  ;;  %v1435_v22 = vld [vmem:[%s2871_s0 + $0x98] sm:$0xff] }
   0x7   :  { %380 = vmatpush.bf16.msra.mxu0 %v375_v3  ;;  %1452 = vmatpush.bf16.msra.mxu1 %v375_v3  ;;  %v1420_v20 = vld [vmem:[%s2871_s0 + $0x20] sm:$0xff]  ;;  %v1441_v23 = vld [vmem:[%s2871_s0 + $0xc8] sm:$0xff]  ;;  %v1442_v27 = vld [vmem:[%s2871_s0 + $0xd0] sm:$0xff] }
   0x8   :  { %1453 = vmatpush.bf16.msra.mxu2 %v375_v3  ;;  %1454 = vmatpush.bf16.msra.mxu3 %v375_v3  ;;  %v1428_v21 = vld [vmem:[%s2871_s0 + $0x60] sm:$0xff]  ;;  %v1421_v24 = vld [vmem:[%s2871_s0 + $0x28] sm:$0xff]  ;;  %v1422_v28 = vld [vmem:[%s2871_s0 + $0x30] sm:$0xff] }
   0x9   :  { %v1429_v25 = vld [vmem:[%s2871_s0 + $0x68] sm:$0xff]  ;;  %v1436_v26 = vld [vmem:[%s2871_s0 + $0xa0] sm:$0xff]  ;;  %v1430_v29 = vld [vmem:[%s2871_s0 + $0x70] sm:$0xff] }
   0xa   :  { %v1437_v30 = vld [vmem:[%s2871_s0 + $0xa8] sm:$0xff]  ;;  %v1443_v31 = vld [vmem:[%s2871_s0 + $0xd8] sm:$0xff]  ;;  %v1438_v34 = vld [vmem:[%s2871_s0 + $0xb0] sm:$0xff] }
   0xb   :  { %381 = vmatpush.bf16.msra.mxu0 %v1451_v4  ;;  %1455 = vmatpush.bf16.msra.mxu1 %v1451_v4  ;;  %v1423_v32 = vld [vmem:[%s2871_s0 + $0x38] sm:$0xff]  ;;  %v1444_v35 = vld [vmem:[%s2871_s0 + $0xe0] sm:$0xff]  ;;  %v1445_v41 = vld [vmem:[%s2871_s0 + $0xe8] sm:$0xff] }
   0xc   :  { %1456 = vmatpush.bf16.msra.mxu2 %v1451_v4  ;;  %1457 = vmatpush.bf16.msra.mxu3 %v1451_v4  ;;  %v1431_v33 = vld [vmem:[%s2871_s0 + $0x78] sm:$0xff]  ;;  %v1446_v50 = vld [vmem:[%s2871_s0 + $0xf0] sm:$0xff] }
   0xd   :  { %v1439_v40 = vld [vmem:[%s2871_s0 + $0xb8] sm:$0xff] }
   0xe   :  { %v1447_v63 = vld [vmem:[%s2871_s0 + $0xf8] sm:$0xff] }
   0xf   :  { %382 = vmatpush.bf16.msra.mxu0 %v1450_v5  ;;  %1458 = vmatpush.bf16.msra.mxu1 %v1450_v5 }
  0x10   :  { %1459 = vmatpush.bf16.msra.mxu2 %v1450_v5  ;;  %1460 = vmatpush.bf16.msra.mxu3 %v1450_v5 }
  0x13   :  { %383 = vmatpush.bf16.msra.mxu0 %v1449_v6  ;;  %1461 = vmatpush.bf16.msra.mxu1 %v1449_v6 }
  0x14   :  { %1462 = vmatpush.bf16.msra.mxu2 %v1449_v6  ;;  %1463 = vmatpush.bf16.msra.mxu3 %v1449_v6 }
  0x17   :  { %384 = vmatpush.bf16.msra.mxu0 %v1448_v7  ;;  %1464 = vmatpush.bf16.msra.mxu1 %v1448_v7 }
  0x18   :  { %1465 = vmatpush.bf16.msra.mxu2 %v1448_v7  ;;  %1466 = vmatpush.bf16.msra.mxu3 %v1448_v7 }
  0x1a   :  { %1384 = vmatmul.msk.bf16.vlgmr.msra.gmra.mxu0 %vm276_vm1, %v1416_v8  ;;  %1392 = vmatmul.msk.bf16.vlgmr.msra.gmra.mxu1 %vm276_vm1, %v1424_v9 }
  0x1b   :  { %1400 = vmatmul.msk.bf16.vlgmr.msra.gmra.mxu2 %vm276_vm1, %v1432_v12  ;;  %1408 = vmatmul.msk.bf16.vlgmr.msra.gmra.mxu3 %vm276_vm1, %v1440_v19 }
  0x2a   :  { %1385 = vmatmul.msk.bf16.gmra.mxu0 %vm276_vm1, %v1417_v10  ;;  %1393 = vmatmul.msk.bf16.gmra.mxu1 %vm276_vm1, %v1425_v11 }
  0x2b   :  { %1401 = vmatmul.msk.bf16.gmra.mxu2 %vm276_vm1, %v1433_v15  ;;  %1409 = vmatmul.msk.bf16.gmra.mxu3 %vm276_vm1, %v1441_v23 }
  0x3a   :  { %1386 = vmatmul.msk.bf16.gmra.mxu0 %vm276_vm1, %v1418_v13  ;;  %1394 = vmatmul.msk.bf16.gmra.mxu1 %vm276_vm1, %v1426_v14 }
  0x3b   :  { %1402 = vmatmul.msk.bf16.gmra.mxu2 %vm276_vm1, %v1434_v18  ;;  %1410 = vmatmul.msk.bf16.gmra.mxu3 %vm276_vm1, %v1442_v27 }
  0x4a   :  { %1387 = vmatmul.msk.bf16.gmra.mxu0 %vm276_vm1, %v1419_v16  ;;  %1395 = vmatmul.msk.bf16.gmra.mxu1 %vm276_vm1, %v1427_v17 }
  0x4b   :  { %1403 = vmatmul.msk.bf16.gmra.mxu2 %vm276_vm1, %v1435_v22  ;;  %1411 = vmatmul.msk.bf16.gmra.mxu3 %vm276_vm1, %v1443_v31 }
  0x5a   :  { %1388 = vmatmul.msk.bf16.gmra.mxu0 %vm276_vm1, %v1420_v20  ;;  %1396 = vmatmul.msk.bf16.gmra.mxu1 %vm276_vm1, %v1428_v21 }
  0x5b   :  { %1404 = vmatmul.msk.bf16.gmra.mxu2 %vm276_vm1, %v1436_v26  ;;  %1412 = vmatmul.msk.bf16.gmra.mxu3 %vm276_vm1, %v1444_v35 }
  0x6a   :  { %1389 = vmatmul.msk.bf16.gmra.mxu0 %vm276_vm1, %v1421_v24  ;;  %1397 = vmatmul.msk.bf16.gmra.mxu1 %vm276_vm1, %v1429_v25 }
  0x6b   :  { %1405 = vmatmul.msk.bf16.gmra.mxu2 %vm276_vm1, %v1437_v30  ;;  %1413 = vmatmul.msk.bf16.gmra.mxu3 %vm276_vm1, %v1445_v41 }
  0x7a   :  { %1390 = vmatmul.msk.bf16.gmra.mxu0 %vm276_vm1, %v1422_v28  ;;  %1398 = vmatmul.msk.bf16.gmra.mxu1 %vm276_vm1, %v1430_v29 }
  0x7b   :  { %1406 = vmatmul.msk.bf16.gmra.mxu2 %vm276_vm1, %v1438_v34  ;;  %1414 = vmatmul.msk.bf16.gmra.mxu3 %vm276_vm1, %v1446_v50 }
  0x8a   :  { %1391 = vmatmul.msk.bf16.gmra.mxu0 %vm276_vm1, %v1423_v32  ;;  %1399 = vmatmul.msk.bf16.gmra.mxu1 %vm276_vm1, %v1431_v33 }
  0x8b   :  { %1407 = vmatmul.msk.bf16.gmra.mxu2 %vm276_vm1, %v1439_v40  ;;  %1415 = vmatmul.msk.bf16.gmra.mxu3 %vm276_vm1, %v1447_v63 }
  0x97   :  { %v1627_v36 = vpop.f32.mrf.mxu0  ;;  %v1629_v37 = vpop.f32.mrf.mxu1 }
  0x98   :  { %2894 = vst [vmem:[#allocation2_spill] sm:$0xff] %v1629_v37  ;;  %v546_v38 = vpack.c.bf16 %v1627_v36, %v1627_v36  ;;  %v562_v39 = vpack.c.bf16 %v1629_v37, %v1629_v37  ;;  %v680_v63 = vsel %vm679_vm3, %v1627_v36, 0.0 }
  0x9a   :  { %611 = vst.msk [vmem:[%s2872_s2] sm:$0xf] %vm610_vm2, %v546_v38 }
  0x9b   :  { %627 = vst.msk [vmem:[%s2872_s2 + $0x40] sm:$0xf] %vm610_vm2, %v562_v39 }
  0x9e   :  { %v1695_v55 = vpop.f32.mrf.mxu2  ;;  %v1797_v17 = vpop.f32.mrf.mxu3 }
  0x9f   :  { %v1651_v42 = vpop.f32.mrf.mxu0  ;;  %v1653_v43 = vpop.f32.mrf.mxu1  ;;  %v578_v56 = vpack.c.bf16 %v1695_v55, %v1695_v55  ;;  %v594_v19 = vpack.c.bf16 %v1797_v17, %v1797_v17 }
  0xa0   :  { %v547_v44 = vpack.c.bf16 %v1651_v42, %v1651_v42  ;;  %v563_v45 = vpack.c.bf16 %v1653_v43, %v1653_v43 }
  0xa1   :  { %643 = vst.msk [vmem:[%s2872_s2 + $0x80] sm:$0xf] %vm610_vm2, %v578_v56 }
  0xa2   :  { %612 = vst.msk [vmem:[%s2872_s2 + $0x4] sm:$0xf] %vm610_vm2, %v547_v44 }
  0xa3   :  { %628 = vst.msk [vmem:[%s2872_s2 + $0x44] sm:$0xf] %vm610_vm2, %v563_v45 }
  0xa4   :  { %659 = vst.msk [vmem:[%s2872_s2 + $0xc0] sm:$0xf] %vm610_vm2, %v594_v19 }
  0xa6   :  { %v1719_v61 = vpop.f32.mrf.mxu2  ;;  %v1829_v25 = vpop.f32.mrf.mxu3 }
  0xa7   :  { %v1667_v46 = vpop.f32.mrf.mxu0  ;;  %v1669_v47 = vpop.f32.mrf.mxu1  ;;  %v579_v62 = vpack.c.bf16 %v1719_v61, %v1719_v61  ;;  %v595_v27 = vpack.c.bf16 %v1829_v25, %v1829_v25 }
  0xa8   :  { %v548_v48 = vpack.c.bf16 %v1667_v46, %v1667_v46  ;;  %v564_v49 = vpack.c.bf16 %v1669_v47, %v1669_v47 }
  0xa9   :  { %644 = vst.msk [vmem:[%s2872_s2 + $0x84] sm:$0xf] %vm610_vm2, %v579_v62  ;;  %v681_v62 = vsel %vm679_vm3, %v1651_v42, 0.0 }
  0xaa   :  { %613 = vst.msk [vmem:[%s2872_s2 + $0x8] sm:$0xf] %vm610_vm2, %v548_v48 }
  0xab   :  { %629 = vst.msk [vmem:[%s2872_s2 + $0x48] sm:$0xf] %vm610_vm2, %v564_v49 }
  0xac   :  { %660 = vst.msk [vmem:[%s2872_s2 + $0xc4] sm:$0xf] %vm610_vm2, %v595_v27 }
  0xae   :  { %v1747_v4 = vpop.f32.mrf.mxu2  ;;  %v1861_v33 = vpop.f32.mrf.mxu3 }
  0xaf   :  { %v1687_v51 = vpop.f32.mrf.mxu0  ;;  %v1689_v52 = vpop.f32.mrf.mxu1  ;;  %v580_v5 = vpack.c.bf16 %v1747_v4, %v1747_v4  ;;  %v596_v35 = vpack.c.bf16 %v1861_v33, %v1861_v33 }
  0xb0   :  { %v549_v53 = vpack.c.bf16 %v1687_v51, %v1687_v51  ;;  %v565_v54 = vpack.c.bf16 %v1689_v52, %v1689_v52 }
  0xb1   :  { %645 = vst.msk [vmem:[%s2872_s2 + $0x88] sm:$0xf] %vm610_vm2, %v580_v5  ;;  %v685_v5 = vsel %vm679_vm3, %v1687_v51, 0.0 }
  0xb2   :  { %614 = vst.msk [vmem:[%s2872_s2 + $0xc] sm:$0xf] %vm610_vm2, %v549_v53 }
  0xb3   :  { %630 = vst.msk [vmem:[%s2872_s2 + $0x4c] sm:$0xf] %vm610_vm2, %v565_v54 }
  0xb4   :  { %661 = vst.msk [vmem:[%s2872_s2 + $0xc8] sm:$0xf] %vm610_vm2, %v596_v35 }
  0xb6   :  { %v1771_v10 = vpop.f32.mrf.mxu2  ;;  %v1893_v45 = vpop.f32.mrf.mxu3 }
  0xb7   :  { %v1711_v57 = vpop.f32.mrf.mxu0  ;;  %v1713_v58 = vpop.f32.mrf.mxu1  ;;  %v581_v11 = vpack.c.bf16 %v1771_v10, %v1771_v10  ;;  %v597_v49 = vpack.c.bf16 %v1893_v45, %v1893_v45 }
  0xb8   :  { %2895 = vst [vmem:[#allocation3_spill] sm:$0xff] %v1713_v58  ;;  %v550_v59 = vpack.c.bf16 %v1711_v57, %v1711_v57  ;;  %v566_v60 = vpack.c.bf16 %v1713_v58, %v1713_v58 }
  0xb9   :  { %646 = vst.msk [vmem:[%s2872_s2 + $0x8c] sm:$0xf] %vm610_vm2, %v581_v11 }
  0xba   :  { %615 = vst.msk [vmem:[%s2872_s2 + $0x10] sm:$0xf] %vm610_vm2, %v550_v59 }
  0xbb   :  { %631 = vst.msk [vmem:[%s2872_s2 + $0x50] sm:$0xf] %vm610_vm2, %v566_v60 }
  0xbc   :  { %662 = vst.msk [vmem:[%s2872_s2 + $0xcc] sm:$0xf] %vm610_vm2, %v597_v49 }
  0xbe   :  { %v1795_v16 = vpop.f32.mrf.mxu2  ;;  %v1925_v60 = vpop.f32.mrf.mxu3 }
  0xbf   :  { %v1739_v0 = vpop.f32.mrf.mxu0  ;;  %v1741_v1 = vpop.f32.mrf.mxu1  ;;  %2899 = vst [vmem:[#allocation7_spill] sm:$0xff] %v1795_v16  ;;  %v582_v18 = vpack.c.bf16 %v1795_v16, %v1795_v16  ;;  %v598_v27 = vpack.c.bf16 %v1925_v60, %v1925_v60 }
  0xc0   :  { %2896 = vst [vmem:[#allocation4_spill] sm:$0xff] %v1741_v1  ;;  %v551_v2 = vpack.c.bf16 %v1739_v0, %v1739_v0  ;;  %v567_v3 = vpack.c.bf16 %v1741_v1, %v1741_v1 }
  0xc1   :  { %647 = vst.msk [vmem:[%s2872_s2 + $0x90] sm:$0xf] %vm610_vm2, %v582_v18 }
  0xc2   :  { %616 = vst.msk [vmem:[%s2872_s2 + $0x14] sm:$0xf] %vm610_vm2, %v551_v2  ;;  %v683_v2 = vsel %vm679_vm3, %v1667_v46, 0.0 }
  0xc3   :  { %632 = vst.msk [vmem:[%s2872_s2 + $0x54] sm:$0xf] %vm610_vm2, %v567_v3  ;;  %v682_v3 = vadd.f32 %v681_v62, %v680_v63 }
  0xc4   :  { %663 = vst.msk [vmem:[%s2872_s2 + $0xd0] sm:$0xf] %vm610_vm2, %v598_v27 }
  0xc6   :  { %v1827_v24 = vpop.f32.mrf.mxu2 }
  0xc7   :  { %v1763_v6 = vpop.f32.mrf.mxu0  ;;  %v1765_v7 = vpop.f32.mrf.mxu1  ;;  %v583_v26 = vpack.c.bf16 %v1827_v24, %v1827_v24 }
  0xc8   :  { %2897 = vst [vmem:[#allocation5_spill] sm:$0xff] %v1765_v7  ;;  %v552_v8 = vpack.c.bf16 %v1763_v6, %v1763_v6  ;;  %v568_v9 = vpack.c.bf16 %v1765_v7, %v1765_v7 }
  0xc9   :  { %648 = vst.msk [vmem:[%s2872_s2 + $0x94] sm:$0xf] %vm610_vm2, %v583_v26 }
  0xca   :  { %617 = vst.msk [vmem:[%s2872_s2 + $0x18] sm:$0xf] %vm610_vm2, %v552_v8  ;;  %v684_v8 = vadd.f32 %v683_v2, %v682_v3 }
  0xcb   :  { %633 = vst.msk [vmem:[%s2872_s2 + $0x58] sm:$0xf] %vm610_vm2, %v568_v9 }
  0xce   :  { %v1859_v32 = vpop.f32.mrf.mxu2 }
  0xcf   :  { %v1787_v12 = vpop.f32.mrf.mxu0  ;;  %v1789_v13 = vpop.f32.mrf.mxu1  ;;  %v584_v34 = vpack.c.bf16 %v1859_v32, %v1859_v32 }
  0xd0   :  { %2898 = vst [vmem:[#allocation6_spill] sm:$0xff] %v1789_v13  ;;  %v553_v14 = vpack.c.bf16 %v1787_v12, %v1787_v12  ;;  %v569_v15 = vpack.c.bf16 %v1789_v13, %v1789_v13 }
  0xd1   :  { %649 = vst.msk [vmem:[%s2872_s2 + $0x98] sm:$0xf] %vm610_vm2, %v584_v34 }
  0xd2   :  { %618 = vst.msk [vmem:[%s2872_s2 + $0x1c] sm:$0xf] %vm610_vm2, %v553_v14  ;;  %v687_v14 = vsel %vm679_vm3, %v1711_v57, 0.0 }
  0xd3   :  { %634 = vst.msk [vmem:[%s2872_s2 + $0x5c] sm:$0xf] %vm610_vm2, %v569_v15 }
  0xd6   :  { %v1891_v44 = vpop.f32.mrf.mxu2 }
  0xd7   :  { %v1819_v20 = vpop.f32.mrf.mxu0  ;;  %v1821_v21 = vpop.f32.mrf.mxu1  ;;  %2900 = vst [vmem:[#allocation8_spill] sm:$0xff] %v1891_v44  ;;  %v585_v48 = vpack.c.bf16 %v1891_v44, %v1891_v44 }
  0xd8   :  { %v554_v22 = vpack.c.bf16 %v1819_v20, %v1819_v20  ;;  %v570_v23 = vpack.c.bf16 %v1821_v21, %v1821_v21  ;;  %v695_v62 = vsel %vm679_vm3, %v1819_v20, 0.0 }
  0xd9   :  { %650 = vst.msk [vmem:[%s2872_s2 + $0x9c] sm:$0xf] %vm610_vm2, %v585_v48  ;;  %v693_v48 = vsel %vm679_vm3, %v1787_v12, 0.0 }
  0xda   :  { %619 = vst.msk [vmem:[%s2872_s2 + $0x20] sm:$0xf] %vm610_vm2, %v554_v22  ;;  %v1955_v22 = vpop.f32.mrf.mxu3 }
  0xdb   :  { %635 = vst.msk [vmem:[%s2872_s2 + $0x60] sm:$0xf] %vm610_vm2, %v570_v23  ;;  %v686_v23 = vadd.f32 %v685_v5, %v684_v8  ;;  %v599_v35 = vpack.c.bf16 %v1955_v22, %v1955_v22 }
  0xdd   :  { %v688_v34 = vadd.f32 %v687_v14, %v686_v23  ;;  %664 = vst.msk [vmem:[%s2872_s2 + $0xd4] sm:$0xf] %vm610_vm2, %v599_v35 }
  0xde   :  { %v1923_v59 = vpop.f32.mrf.mxu2 }
  0xdf   :  { %v1851_v28 = vpop.f32.mrf.mxu0  ;;  %v1853_v29 = vpop.f32.mrf.mxu1  ;;  %v586_v26 = vpack.c.bf16 %v1923_v59, %v1923_v59 }
  0xe0   :  { %v555_v30 = vpack.c.bf16 %v1851_v28, %v1851_v28  ;;  %v571_v31 = vpack.c.bf16 %v1853_v29, %v1853_v29  ;;  %v697_v14 = vsel %vm679_vm3, %v1851_v28, 0.0 }
  0xe1   :  { %651 = vst.msk [vmem:[%s2872_s2 + $0xa0] sm:$0xf] %vm610_vm2, %v586_v26 }
  0xe2   :  { %620 = vst.msk [vmem:[%s2872_s2 + $0x24] sm:$0xf] %vm610_vm2, %v555_v30  ;;  %v689_v30 = vsel %vm679_vm3, %v1739_v0, 0.0  ;;  %v2007_v5 = vpop.f32.mrf.mxu3 }
  0xe3   :  { %636 = vst.msk [vmem:[%s2872_s2 + $0x64] sm:$0xf] %vm610_vm2, %v571_v31 }
  0xe6   :  { %v1953_v19 = vpop.f32.mrf.mxu2 }
  0xe7   :  { %v1883_v38 = vpop.f32.mrf.mxu0  ;;  %v1885_v39 = vpop.f32.mrf.mxu1  ;;  %v587_v31 = vpack.c.bf16 %v1953_v19, %v1953_v19 }
  0xe8   :  { %v556_v40 = vpack.c.bf16 %v1883_v38, %v1883_v38  ;;  %v572_v41 = vpack.c.bf16 %v1885_v39, %v1885_v39 }
  0xe9   :  { %652 = vst.msk [vmem:[%s2872_s2 + $0xa4] sm:$0xf] %vm610_vm2, %v587_v31 }
  0xea   :  { %621 = vst.msk [vmem:[%s2872_s2 + $0x28] sm:$0xf] %vm610_vm2, %v556_v40  ;;  %v691_v40 = vsel %vm679_vm3, %v1763_v6, 0.0 }
  0xeb   :  { %637 = vst.msk [vmem:[%s2872_s2 + $0x68] sm:$0xf] %vm610_vm2, %v572_v41  ;;  %v690_v41 = vadd.f32 %v689_v30, %v688_v34 }
  0xed   :  { %v692_v49 = vadd.f32 %v691_v40, %v690_v41 }
  0xee   :  { %v2005_v3 = vpop.f32.mrf.mxu2 }
  0xef   :  { %v1915_v50 = vpop.f32.mrf.mxu0  ;;  %v1917_v53 = vpop.f32.mrf.mxu1  ;;  %v694_v8 = vadd.f32 %v693_v48, %v692_v49 }
  0xf0   :  { %2901 = vst [vmem:[#allocation9_spill] sm:$0xff] %v1917_v53  ;;  %v557_v54 = vpack.c.bf16 %v1915_v50, %v1915_v50  ;;  %v573_v56 = vpack.c.bf16 %v1917_v53, %v1917_v53  ;;  %v701_v26 = vsel %vm679_vm3, %v1915_v50, 0.0  ;;  %v2035_v48 = vpop.f32.mrf.mxu3 }
  0xf2   :  { %622 = vst.msk [vmem:[%s2872_s2 + $0x2c] sm:$0xf] %vm610_vm2, %v557_v54 }
  0xf3   :  { %638 = vst.msk [vmem:[%s2872_s2 + $0x6c] sm:$0xf] %vm610_vm2, %v573_v56 }
  0xf6   :  { %v2033_v41 = vpop.f32.mrf.mxu2 }
  0xf7   :  { %v1943_v9 = vpop.f32.mrf.mxu0  ;;  %v1945_v11 = vpop.f32.mrf.mxu1 }
  0xf8   :  { %2902 = vst [vmem:[#allocation10_spill] sm:$0xff] %v1945_v11  ;;  %v558_v15 = vpack.c.bf16 %v1943_v9, %v1943_v9  ;;  %v574_v18 = vpack.c.bf16 %v1945_v11, %v1945_v11  ;;  %v703_v34 = vsel %vm679_vm3, %v1943_v9, 0.0 }
  0xfa   :  { %623 = vst.msk [vmem:[%s2872_s2 + $0x30] sm:$0xf] %vm610_vm2, %v558_v15  ;;  %v696_v15 = vadd.f32 %v695_v62, %v694_v8  ;;  %v588_v62 = vpack.c.bf16 %v2005_v3, %v2005_v3  ;;  %v589_v8 = vpack.c.bf16 %v2033_v41, %v2033_v41 }
  0xfb   :  { %639 = vst.msk [vmem:[%s2872_s2 + $0x70] sm:$0xf] %vm610_vm2, %v574_v18  ;;  %v699_v18 = vsel %vm679_vm3, %v1883_v38, 0.0 }
  0xfc   :  { %v698_v23 = vadd.f32 %v697_v14, %v696_v15  ;;  %v601_v15 = vpack.c.bf16 %v2035_v48, %v2035_v48  ;;  %653 = vst.msk [vmem:[%s2872_s2 + $0xa8] sm:$0xf] %vm610_vm2, %v588_v62 }
  0xfd   :  { %654 = vst.msk [vmem:[%s2872_s2 + $0xac] sm:$0xf] %vm610_vm2, %v589_v8  ;;  %v711_v8 = vsel %vm679_vm3, %v1629_v37, 0.0 }
  0xfe   :  { %v700_v27 = vadd.f32 %v699_v18, %v698_v23  ;;  %666 = vst.msk [vmem:[%s2872_s2 + $0xdc] sm:$0xf] %vm610_vm2, %v601_v15  ;;  %v2083_v62 = vpop.f32.mrf.mxu2  ;;  %v713_v15 = vsel %vm679_vm3, %v1653_v43, 0.0 }
  0xff   :  { %v1991_v54 = vpop.f32.mrf.mxu0  ;;  %v1993_v56 = vpop.f32.mrf.mxu1 }
 0x100   :  { %2903 = vst [vmem:[#allocation11_spill] sm:$0xff] %v1993_v56  ;;  %v559_v63 = vpack.c.bf16 %v1991_v54, %v1991_v54  ;;  %v575_v2 = vpack.c.bf16 %v1993_v56, %v1993_v56  ;;  %v702_v49 = vadd.f32 %v701_v26, %v700_v27 }
 0x102   :  { %624 = vst.msk [vmem:[%s2872_s2 + $0x34] sm:$0xf] %vm610_vm2, %v559_v63  ;;  %v600_v63 = vpack.c.bf16 %v2007_v5, %v2007_v5  ;;  %v704_v14 = vadd.f32 %v703_v34, %v702_v49 }
 0x103   :  { %640 = vst.msk [vmem:[%s2872_s2 + $0x74] sm:$0xf] %vm610_vm2, %v575_v2  ;;  %v705_v2 = vsel %vm679_vm3, %v1991_v54, 0.0 }
 0x104   :  { %v706_v23 = vadd.f32 %v705_v2, %v704_v14  ;;  %665 = vst.msk [vmem:[%s2872_s2 + $0xd8] sm:$0xf] %vm610_vm2, %v600_v63  ;;  %v2085_v63 = vpop.f32.mrf.mxu3 }
 0x107   :  { %v2023_v30 = vpop.f32.mrf.mxu0  ;;  %v2025_v31 = vpop.f32.mrf.mxu1 }
 0x108   :  { %v560_v35 = vpack.c.bf16 %v2023_v30, %v2023_v30  ;;  %v576_v40 = vpack.c.bf16 %v2025_v31, %v2025_v31  ;;  %v707_v18 = vsel %vm679_vm3, %v2023_v30, 0.0 }
 0x109   :  { %v708_v26 = vadd.f32 %v707_v18, %v706_v23  ;;  %v715_v23 = vsel %vm679_vm3, %v1669_v47, 0.0 }
 0x10a   :  { %625 = vst.msk [vmem:[%s2872_s2 + $0x38] sm:$0xf] %vm610_vm2, %v560_v35 }
 0x10b   :  { %641 = vst.msk [vmem:[%s2872_s2 + $0x78] sm:$0xf] %vm610_vm2, %v576_v40 }
 0x10f   :  { %v2069_v27 = vpop.f32.mrf.mxu0  ;;  %v2071_v34 = vpop.f32.mrf.mxu1 }
 0x110   :  { %2904 = vst [vmem:[#allocation12_spill] sm:$0xff] %v2071_v34  ;;  %v561_v35 = vpack.c.bf16 %v2069_v27, %v2069_v27  ;;  %v709_v40 = vsel %vm679_vm3, %v2069_v27, 0.0  ;;  %v577_v49 = vpack.c.bf16 %v2071_v34, %v2071_v34 }
 0x111   :  { %v710_v2 = vadd.f32 %v709_v40, %v708_v26  ;;  %v717_v40 = vsel %vm679_vm3, %v1689_v52, 0.0 }
 0x112   :  { %626 = vst.msk [vmem:[%s2872_s2 + $0x3c] sm:$0xf] %vm610_vm2, %v561_v35  ;;  %v590_v35 = vpack.c.bf16 %v2083_v62, %v2083_v62 }
 0x113   :  { %v712_v14 = vadd.f32 %v711_v8, %v710_v2  ;;  %642 = vst.msk [vmem:[%s2872_s2 + $0x7c] sm:$0xf] %vm610_vm2, %v577_v49  ;;  %v602_v2 = vpack.c.bf16 %v2085_v63, %v2085_v63  ;;  %v2107_v8 = vpop.f32.mrf.mxu2  ;;  %v2109_v49 = vpop.f32.mrf.mxu3 }
 0x114   :  { %2905 = vst [vmem:[#allocation13_spill] sm:$0xff] %v2107_v8 }
 0x115   :  { %v714_v18 = vadd.f32 %v713_v15, %v712_v14  ;;  %2906 = vst [vmem:[#allocation14_spill] sm:$0xff] %v2109_v49  ;;  %v591_v14 = vpack.c.bf16 %v2107_v8, %v2107_v8  ;;  %v603_v15 = vpack.c.bf16 %v2109_v49, %v2109_v49 }
 0x116   :  { %655 = vst.msk [vmem:[%s2872_s2 + $0xb0] sm:$0xf] %vm610_vm2, %v590_v35 }
 0x117   :  { %v716_v26 = vadd.f32 %v715_v23, %v714_v18  ;;  %v719_v18 = vsel %vm679_vm3, %v1713_v58, 0.0  ;;  %667 = vst.msk [vmem:[%s2872_s2 + $0xe0] sm:$0xf] %vm610_vm2, %v602_v2  ;;  %v725_v2 = vsel %vm679_vm3, %v1789_v13, 0.0 }
 0x118   :  { %656 = vst.msk [vmem:[%s2872_s2 + $0xb4] sm:$0xf] %vm610_vm2, %v591_v14  ;;  %v727_v14 = vsel %vm679_vm3, %v1821_v21, 0.0 }
 0x119   :  { %v718_v37 = vadd.f32 %v717_v40, %v716_v26  ;;  %v721_v26 = vsel %vm679_vm3, %v1741_v1, 0.0  ;;  %668 = vst.msk [vmem:[%s2872_s2 + $0xe4] sm:$0xf] %vm610_vm2, %v603_v15 }
 0x11b   :  { %v720_v23 = vadd.f32 %v719_v18, %v718_v37  ;;  %v723_v37 = vsel %vm679_vm3, %v1765_v7, 0.0  ;;  %v2139_v18 = vpop.f32.mrf.mxu2  ;;  %v2141_v1 = vpop.f32.mrf.mxu3  ;;  %v731_v7 = vsel %vm679_vm3, %v1885_v39, 0.0 }
 0x11c   :  { %2907 = vst [vmem:[#allocation15_spill] sm:$0xff] %v2141_v1  ;;  %v592_v13 = vpack.c.bf16 %v2139_v18, %v2139_v18 }
 0x11d   :  { %v722_v40 = vadd.f32 %v721_v26, %v720_v23  ;;  %v729_v26 = vsel %vm679_vm3, %v1853_v29, 0.0 }
 0x11e   :  { %657 = vst.msk [vmem:[%s2872_s2 + $0xb8] sm:$0xf] %vm610_vm2, %v592_v13  ;;  %v739_v13 = vsel %vm679_vm3, %v2025_v31, 0.0 }
 0x11f   :  { %v724_v35 = vadd.f32 %v723_v37, %v722_v40  ;;  %v733_v37 = vsel %vm679_vm3, %v1917_v53, 0.0 }
 0x121   :  { %v726_v58 = vadd.f32 %v725_v2, %v724_v35  ;;  %v604_v35 = vpack.c.bf16 %v2141_v1, %v2141_v1 }
 0x123   :  { %v728_v23 = vadd.f32 %v727_v14, %v726_v58  ;;  %v2155_v2 = vpop.f32.mrf.mxu2  ;;  %v2157_v58 = vpop.f32.mrf.mxu3  ;;  %669 = vst.msk [vmem:[%s2872_s2 + $0xe8] sm:$0xf] %vm610_vm2, %v604_v35  ;;  %v741_v35 = vsel %vm679_vm3, %v2071_v34, 0.0 }
 0x124   :  { %2908 = vst [vmem:[#allocation16_spill] sm:$0xff] %v2157_v58 }
 0x125   :  { %v730_v15 = vadd.f32 %v729_v26, %v728_v23  ;;  %v593_v23 = vpack.c.bf16 %v2155_v2, %v2155_v2  ;;  %v735_v26 = vsel %vm679_vm3, %v1945_v11, 0.0  ;;  %v743_v11 = vsel %vm679_vm3, %v1695_v55, 0.0 }
 0x127   :  { %v732_v40 = vadd.f32 %v731_v7, %v730_v15  ;;  %v605_v7 = vpack.c.bf16 %v2157_v58, %v2157_v58  ;;  %658 = vst.msk [vmem:[%s2872_s2 + $0xbc] sm:$0xf] %vm610_vm2, %v593_v23 }
 0x129   :  { %v734_v14 = vadd.f32 %v733_v37, %v732_v40  ;;  %v737_v40 = vsel %vm679_vm3, %v1993_v56, 0.0  ;;  %670 = vst.msk [vmem:[%s2872_s2 + $0xec] sm:$0xf] %vm610_vm2, %v605_v7  ;;  %v747_v7 = vsel %vm679_vm3, %v1747_v4, 0.0 }
 0x12b   :  { %v736_v15 = vadd.f32 %v735_v26, %v734_v14  ;;  %v2187_v26 = vpop.f32.mrf.mxu3 }
 0x12c   :  { %2909 = vst [vmem:[#allocation17_spill] sm:$0xff] %v2187_v26 }
 0x12d   :  { %v738_v37 = vadd.f32 %v737_v40, %v736_v15  ;;  %v745_v15 = vsel %vm679_vm3, %v1719_v61, 0.0 }
 0x12f   :  { %v740_v14 = vadd.f32 %v739_v13, %v738_v37  ;;  %v749_v37 = vsel %vm679_vm3, %v1771_v10, 0.0  ;;  %v606_v13 = vpack.c.bf16 %v2187_v26, %v2187_v26 }
 0x131   :  { %v742_v56 = vadd.f32 %v741_v35, %v740_v14  ;;  %671 = vst.msk [vmem:[%s2872_s2 + $0xf0] sm:$0xf] %vm610_vm2, %v606_v13 }
 0x133   :  { %v744_v23 = vadd.f32 %v743_v11, %v742_v56  ;;  %v2199_v34 = vpop.f32.mrf.mxu3  ;;  %v751_v56 = vsel %vm679_vm3, %v1795_v16, 0.0 }
 0x134   :  { %v607_v11 = vpack.c.bf16 %v2199_v34, %v2199_v34 }
 0x135   :  { %v746_v40 = vadd.f32 %v745_v15, %v744_v23  ;;  %v755_v15 = vsel %vm679_vm3, %v1859_v32, 0.0 }
 0x136   :  { %672 = vst.msk [vmem:[%s2872_s2 + $0xf4] sm:$0xf] %vm610_vm2, %v607_v11  ;;  %v761_v11 = vsel %vm679_vm3, %v1953_v19, 0.0 }
 0x137   :  { %v748_v53 = vadd.f32 %v747_v7, %v746_v40  ;;  %v757_v7 = vsel %vm679_vm3, %v1891_v44, 0.0 }
 0x139   :  { %v750_v14 = vadd.f32 %v749_v37, %v748_v53  ;;  %v753_v53 = vsel %vm679_vm3, %v1827_v24, 0.0 }
 0x13b   :  { %v752_v35 = vadd.f32 %v751_v56, %v750_v14  ;;  %v2219_v37 = vpop.f32.mrf.mxu3  ;;  %v759_v14 = vsel %vm679_vm3, %v1923_v59, 0.0 }
 0x13c   :  { %2910 = vst [vmem:[#allocation18_spill] sm:$0xff] %v2219_v37 }
 0x13d   :  { %v754_v23 = vadd.f32 %v753_v53, %v752_v35  ;;  %v763_v35 = vsel %vm679_vm3, %v2005_v3, 0.0 }
 0x13f   :  { %v756_v40 = vadd.f32 %v755_v15, %v754_v23  ;;  %v765_v23 = vsel %vm679_vm3, %v2033_v41, 0.0  ;;  %v608_v15 = vpack.c.bf16 %v2219_v37, %v2219_v37 }
 0x141   :  { %v758_v13 = vadd.f32 %v757_v7, %v756_v40  ;;  %673 = vst.msk [vmem:[%s2872_s2 + $0xf8] sm:$0xf] %vm610_vm2, %v608_v15  ;;  %v775_v15 = vsel %vm679_vm3, %v1797_v17, 0.0 }
 0x143   :  { %v760_v56 = vadd.f32 %v759_v14, %v758_v13  ;;  %v2231_v44 = vpop.f32.mrf.mxu3  ;;  %v767_v13 = vsel %vm679_vm3, %v2083_v62, 0.0  ;;  %v769_v14 = vsel %vm679_vm3, %v2107_v8, 0.0  ;;  %v779_v8 = vsel %vm679_vm3, %v1861_v33, 0.0 }
 0x144   :  { %2911 = vst [vmem:[#allocation19_spill] sm:$0xff] %v2231_v44  ;;  %v609_v7 = vpack.c.bf16 %v2231_v44, %v2231_v44 }
 0x145   :  { %v762_v16 = vadd.f32 %v761_v11, %v760_v56  ;;  %v771_v11 = vsel %vm679_vm3, %v2139_v18, 0.0 }
 0x146   :  { %674 = vst.msk [vmem:[%s2872_s2 + $0xfc] sm:$0xf] %vm610_vm2, %v609_v7 }
 0x147   :  { %v764_v53 = vadd.f32 %v763_v35, %v762_v16 }
 0x149   :  { %v766_v40 = vadd.f32 %v765_v23, %v764_v53  ;;  %v773_v53 = vsel %vm679_vm3, %v2155_v2, 0.0 }
 0x14b   :  { %v768_v16 = vadd.f32 %v767_v13, %v766_v40  ;;  %v777_v13 = vsel %vm679_vm3, %v1829_v25, 0.0 }
 0x14d   :  { %v770_v56 = vadd.f32 %v769_v14, %v768_v16  ;;  %v781_v14 = vsel %vm679_vm3, %v1893_v45, 0.0 }
 0x14f   :  { %v772_v35 = vadd.f32 %v771_v11, %v770_v56  ;;  %v783_v11 = vsel %vm679_vm3, %v1925_v60, 0.0 }
 0x151   :  { %v774_v23 = vadd.f32 %v773_v53, %v772_v35  ;;  %v785_v53 = vsel %vm679_vm3, %v1955_v22, 0.0 }
 0x153   :  { %v776_v40 = vadd.f32 %v775_v15, %v774_v23  ;;  %v787_v15 = vsel %vm679_vm3, %v2007_v5, 0.0 }
 0x155   :  { %v778_v7 = vadd.f32 %v777_v13, %v776_v40  ;;  %v789_v13 = vsel %vm679_vm3, %v2035_v48, 0.0 }
 0x157   :  { %v780_v16 = vadd.f32 %v779_v8, %v778_v7  ;;  %v791_v7 = vsel %vm679_vm3, %v2085_v63, 0.0 }
 0x159   :  { %v782_v56 = vadd.f32 %v781_v14, %v780_v16  ;;  %v1469_v16 = vmov 0.0  }
 0x15a   :  { %816 = vst.msk [vmem:[%s2873_s3] sm:$0x1] %vm814_vm4, %v1469_v16 }
 0x15b   :  { %v784_v35 = vadd.f32 %v783_v11, %v782_v56  ;;  %817 = vst.msk [vmem:[%s2874_s4] sm:$0x1] %vm814_vm4, %v1469_v16  ;;  %v793_v56 = vsel %vm679_vm3, %v2109_v49, 0.0  ;;  %v803_v16 = vsel %vm679_vm3, %v2219_v37, 0.0 }
 0x15d   :  { %v786_v23 = vadd.f32 %v785_v53, %v784_v35  ;;  %v795_v35 = vsel %vm679_vm3, %v2141_v1, 0.0 }
 0x15f   :  { %v788_v40 = vadd.f32 %v787_v15, %v786_v23  ;;  %v797_v23 = vsel %vm679_vm3, %v2157_v58, 0.0 }
 0x161   :  { %v790_v8 = vadd.f32 %v789_v13, %v788_v40  ;;  %v799_v40 = vsel %vm679_vm3, %v2187_v26, 0.0 }
 0x163   :  { %v792_v14 = vadd.f32 %v791_v7, %v790_v8  ;;  %v801_v8 = vsel %vm679_vm3, %v2199_v34, 0.0 }
 0x165   :  { %v794_v11 = vadd.f32 %v793_v56, %v792_v14  ;;  %v805_v56 = vsel %vm679_vm3, %v2231_v44, 0.0 }
 0x167   :  { %v796_v53 = vadd.f32 %v795_v35, %v794_v11 }
 0x169   :  { %v798_v15 = vadd.f32 %v797_v23, %v796_v53 }
 0x16b   :  { %v800_v13 = vadd.f32 %v799_v40, %v798_v15 }
 0x16d   :  { %v802_v7 = vadd.f32 %v801_v8, %v800_v13 }
 0x16f   :  { %v804_v14 = vadd.f32 %v803_v16, %v802_v7 }
 0x171   :  { %v806_v11 = vadd.f32 %v805_v56, %v804_v14 }
 0x173   :  { %v807_v35 = vrot.slane %v806_v11, 4 }
 0x175   :  { %v808_v1 = vadd.f32 %v807_v35, %v806_v11 }
 0x177   :  { %v809_v58 = vrot.slane %v808_v1, 2 }
 0x179   :  { %v810_v53 = vadd.f32 %v809_v58, %v808_v1 }
 0x17b   :  { %v811_v23 = vrot.slane %v810_v53, 1 }
 0x17d   :  { %v812_v49 = vadd.f32 %v811_v23, %v810_v53 }
 0x17f   :  { %v813_v26 = vmul.f32 0.001953125, %v812_v49 }
 0x181   :  { %815 = vst.msk [vmem:[%s2875_s5] sm:$0x1] %vm814_vm4, %v813_v26 }
 0x188   :  { %v2298_v15 = vld [vmem:[%s2875_s5] ss:$0 sm:$0xff] }
 0x189   :  { %v822_v40 = vsub.f32 %v1627_v36, %v2298_v15  ;;  %v823_v13 = vsub.f32 %v1651_v42, %v2298_v15  ;;  %v824_v1 = vsub.f32 %v1667_v46, %v2298_v15  ;;  %v825_v49 = vsub.f32 %v1687_v51, %v2298_v15 }
 0x18a   :  { %v2312_v7 = vsub.f32 %v1711_v57, %v2298_v15  ;;  %v2317_v42 = vsub.f32 %v1739_v0, %v2298_v15  ;;  %v2322_v51 = vsub.f32 %v1763_v6, %v2298_v15  ;;  %v2328_v57 = vsub.f32 %v1787_v12, %v2298_v15 }
 0x18b   :  { %v888_v58 = vsel %vm679_vm3, %v822_v40, 0.0  ;;  %v889_v26 = vsel %vm679_vm3, %v823_v13, 0.0  ;;  %v891_v36 = vsel %vm679_vm3, %v824_v1, 0.0  ;;  %v893_v46 = vsel %vm679_vm3, %v825_v49, 0.0 }
 0x18c   :  { %v890_v8 = vadd.f32 %v889_v26, %v888_v58  ;;  %v895_v56 = vsel %vm679_vm3, %v2312_v7, 0.0  ;;  %v897_v35 = vsel %vm679_vm3, %v2317_v42, 0.0  ;;  %v2334_v53 = vsub.f32 %v1819_v20, %v2298_v15 }
 0x18d   :  { %v899_v6 = vsel %vm679_vm3, %v2322_v51, 0.0  ;;  %v2340_v58 = vsub.f32 %v1851_v28, %v2298_v15  ;;  %v901_v12 = vsel %vm679_vm3, %v2328_v57, 0.0 }
 0x18e   :  { %v892_v16 = vadd.f32 %v891_v36, %v890_v8  ;;  %v2346_v8 = vsub.f32 %v1883_v38, %v2298_v15  ;;  %v903_v20 = vsel %vm679_vm3, %v2334_v53, 0.0 }
 0x18f   :  { %v905_v28 = vsel %vm679_vm3, %v2340_v58, 0.0 }
 0x190   :  { %v894_v14 = vadd.f32 %v893_v46, %v892_v16  ;;  %v2352_v16 = vsub.f32 %v1915_v50, %v2298_v15  ;;  %v907_v38 = vsel %vm679_vm3, %v2346_v8, 0.0 }
 0x192   :  { %v896_v11 = vadd.f32 %v895_v56, %v894_v14  ;;  %v2358_v14 = vsub.f32 %v1943_v9, %v2298_v15  ;;  %v909_v50 = vsel %vm679_vm3, %v2352_v16, 0.0 }
 0x194   :  { %v898_v0 = vadd.f32 %v897_v35, %v896_v11  ;;  %v2364_v11 = vsub.f32 %v1991_v54, %v2298_v15  ;;  %v911_v9 = vsel %vm679_vm3, %v2358_v14, 0.0 }
 0x196   :  { %v900_v23 = vadd.f32 %v899_v6, %v898_v0  ;;  %v2370_v0 = vsub.f32 %v2023_v30, %v2298_v15  ;;  %v913_v54 = vsel %vm679_vm3, %v2364_v11, 0.0 }
 0x198   :  { %v902_v26 = vadd.f32 %v901_v12, %v900_v23  ;;  %v2376_v23 = vsub.f32 %v2069_v27, %v2298_v15  ;;  %v915_v30 = vsel %vm679_vm3, %v2370_v0, 0.0 }
 0x19a   :  { %v904_v36 = vadd.f32 %v903_v20, %v902_v26  ;;  %v2912_v26 = vld [vmem:[#allocation2_spill] sm:$0xff]  ;;  %v917_v27 = vsel %vm679_vm3, %v2376_v23, 0.0 }
 0x19b   :  { %v2382_v20 = vsub.f32 %v2912_v26, %v2298_v15 }
 0x19c   :  { %v906_v46 = vadd.f32 %v905_v28, %v904_v36  ;;  %v2388_v28 = vsub.f32 %v1653_v43, %v2298_v15 }
 0x19e   :  { %v908_v56 = vadd.f32 %v907_v38, %v906_v46  ;;  %v2394_v38 = vsub.f32 %v1669_v47, %v2298_v15  ;;  %v921_v43 = vsel %vm679_vm3, %v2388_v28, 0.0 }
 0x1a0   :  { %v910_v35 = vadd.f32 %v909_v50, %v908_v56  ;;  %v919_v56 = vsel %vm679_vm3, %v2382_v20, 0.0  ;;  %v923_v47 = vsel %vm679_vm3, %v2394_v38, 0.0 }
 0x1a2   :  { %v912_v6 = vadd.f32 %v911_v9, %v910_v35  ;;  %v2400_v35 = vsub.f32 %v1689_v52, %v2298_v15  ;;  %v1025_v9 = vmul.f32 %v822_v40, %v822_v40 }
 0x1a4   :  { %v914_v12 = vadd.f32 %v913_v54, %v912_v6  ;;  %v1026_v6 = vmul.f32 %v823_v13, %v823_v13  ;;  %v1089_v40 = vsel %vm679_vm3, %v1025_v9, 0.0  ;;  %v2916_v9 = vld [vmem:[#allocation6_spill] sm:$0xff] }
 0x1a5   :  { %v2429_v37 = vsub.f32 %v2916_v9, %v2298_v15 }
 0x1a6   :  { %v916_v36 = vadd.f32 %v915_v30, %v914_v12  ;;  %v2913_v12 = vld [vmem:[#allocation3_spill] sm:$0xff]  ;;  %v1027_v30 = vmul.f32 %v824_v1, %v824_v1  ;;  %v1090_v13 = vsel %vm679_vm3, %v1026_v6, 0.0 }
 0x1a7   :  { %v2406_v26 = vsub.f32 %v2913_v12, %v2298_v15  ;;  %v2915_v12 = vld [vmem:[#allocation5_spill] sm:$0xff] }
 0x1a8   :  { %v918_v46 = vadd.f32 %v917_v27, %v916_v36  ;;  %v2914_v36 = vld [vmem:[#allocation4_spill] sm:$0xff]  ;;  %v2420_v44 = vsub.f32 %v2915_v12, %v2298_v15 }
 0x1a9   :  { %v2412_v27 = vsub.f32 %v2914_v36, %v2298_v15  ;;  %v927_v1 = vsel %vm679_vm3, %v2406_v26, 0.0 }
 0x1aa   :  { %v920_v50 = vadd.f32 %v919_v56, %v918_v46  ;;  %v925_v46 = vsel %vm679_vm3, %v2400_v35, 0.0  ;;  %v1028_v56 = vmul.f32 %v825_v49, %v825_v49 }
 0x1ab   :  { %v929_v6 = vsel %vm679_vm3, %v2412_v27, 0.0 }
 0x1ac   :  { %v922_v54 = vadd.f32 %v921_v43, %v920_v50  ;;  %v1091_v43 = vadd.f32 %v1090_v13, %v1089_v40 }
 0x1ae   :  { %v924_v52 = vadd.f32 %v923_v47, %v922_v54  ;;  %v1029_v54 = vmul.f32 %v2312_v7, %v2312_v7  ;;  %v1092_v47 = vsel %vm679_vm3, %v1027_v30, 0.0  ;;  %v2438_v7 = vsub.f32 %v1821_v21, %v2298_v15 }
 0x1af   :  { %v1093_v49 = vadd.f32 %v1092_v47, %v1091_v43  ;;  %v931_v30 = vsel %vm679_vm3, %v2420_v44, 0.0  ;;  %v1032_v21 = vmul.f32 %v2328_v57, %v2328_v57  ;;  %v2917_v57 = vld [vmem:[#allocation9_spill] sm:$0xff] }
 0x1b0   :  { %v926_v50 = vadd.f32 %v925_v46, %v924_v52  ;;  %v1030_v52 = vmul.f32 %v2317_v42, %v2317_v42  ;;  %v1094_v46 = vsel %vm679_vm3, %v1028_v56, 0.0  ;;  %v1096_v43 = vsel %vm679_vm3, %v1029_v54, 0.0 }
 0x1b1   :  { %v1095_v13 = vadd.f32 %v1094_v46, %v1093_v49  ;;  %v2447_v42 = vsub.f32 %v1853_v29, %v2298_v15  ;;  %v933_v56 = vsel %vm679_vm3, %v2429_v37, 0.0  ;;  %v935_v54 = vsel %vm679_vm3, %v2438_v7, 0.0 }
 0x1b2   :  { %v928_v36 = vadd.f32 %v927_v1, %v926_v50  ;;  %v1031_v50 = vmul.f32 %v2322_v51, %v2322_v51  ;;  %v1098_v47 = vsel %vm679_vm3, %v1030_v52, 0.0  ;;  %v2456_v51 = vsub.f32 %v1885_v39, %v2298_v15 }
 0x1b3   :  { %v1097_v1 = vadd.f32 %v1096_v43, %v1095_v13  ;;  %v1033_v29 = vmul.f32 %v2334_v53, %v2334_v53  ;;  %v937_v52 = vsel %vm679_vm3, %v2447_v42, 0.0  ;;  %v1034_v39 = vmul.f32 %v2340_v58, %v2340_v58  ;;  %v2918_v53 = vld [vmem:[#allocation10_spill] sm:$0xff]  ;;  %v2919_v58 = vld [vmem:[#allocation11_spill] sm:$0xff] }
 0x1b4   :  { %v930_v40 = vadd.f32 %v929_v6, %v928_v36  ;;  %v1100_v9 = vsel %vm679_vm3, %v1031_v50, 0.0  ;;  %v1102_v13 = vsel %vm679_vm3, %v1032_v21, 0.0  ;;  %v939_v50 = vsel %vm679_vm3, %v2456_v51, 0.0 }
 0x1b5   :  { %v1099_v49 = vadd.f32 %v1098_v47, %v1097_v1  ;;  %v1035_v1 = vmul.f32 %v2346_v8, %v2346_v8  ;;  %v2492_v8 = vsub.f32 %v2025_v31, %v2298_v15  ;;  %v1038_v31 = vmul.f32 %v2364_v11, %v2364_v11 }
 0x1b6   :  { %v932_v12 = vadd.f32 %v931_v30, %v930_v40  ;;  %v2465_v40 = vsub.f32 %v2917_v57, %v2298_v15  ;;  %v1037_v57 = vmul.f32 %v2358_v14, %v2358_v14  ;;  %v2510_v14 = vsub.f32 %v1695_v55, %v2298_v15 }
 0x1b7   :  { %v1101_v46 = vadd.f32 %v1100_v9, %v1099_v49  ;;  %v2483_v49 = vsub.f32 %v2919_v58, %v2298_v15  ;;  %v1106_v9 = vsel %vm679_vm3, %v1034_v39, 0.0  ;;  %v2519_v11 = vsub.f32 %v1719_v61, %v2298_v15 }
 0x1b8   :  { %v934_v36 = vadd.f32 %v933_v56, %v932_v12  ;;  %v2474_v12 = vsub.f32 %v2918_v53, %v2298_v15  ;;  %v1104_v56 = vsel %vm679_vm3, %v1033_v29, 0.0  ;;  %v941_v21 = vsel %vm679_vm3, %v2465_v40, 0.0 }
 0x1b9   :  { %v1103_v43 = vadd.f32 %v1102_v13, %v1101_v46  ;;  %v945_v39 = vsel %vm679_vm3, %v2483_v49, 0.0  ;;  %v1040_v55 = vmul.f32 %v2376_v23, %v2376_v23  ;;  %v1041_v61 = vmul.f32 %v2382_v20, %v2382_v20  ;;  %v2921_v20 = vld [vmem:[#allocation7_spill] sm:$0xff] }
 0x1ba   :  { %v936_v6 = vadd.f32 %v935_v54, %v934_v36  ;;  %v1036_v54 = vmul.f32 %v2352_v16, %v2352_v16  ;;  %v943_v29 = vsel %vm679_vm3, %v2474_v12, 0.0  ;;  %v2920_v16 = vld [vmem:[#allocation12_spill] sm:$0xff]  ;;  %v2537_v23 = vsub.f32 %v1771_v10, %v2298_v15 }
 0x1bb   :  { %v1105_v36 = vadd.f32 %v1104_v56, %v1103_v43  ;;  %v2501_v43 = vsub.f32 %v2920_v16, %v2298_v15  ;;  %v1118_v16 = vsel %vm679_vm3, %v1040_v55, 0.0  ;;  %v1043_v10 = vmul.f32 %v2394_v38, %v2394_v38 }
 0x1bc   :  { %v938_v30 = vadd.f32 %v937_v52, %v936_v6  ;;  %v1108_v52 = vsel %vm679_vm3, %v1035_v1, 0.0  ;;  %v1110_v53 = vsel %vm679_vm3, %v1036_v54, 0.0  ;;  %v947_v1 = vsel %vm679_vm3, %v2492_v8, 0.0 }
 0x1bd   :  { %v1107_v46 = vadd.f32 %v1106_v9, %v1105_v36  ;;  %v1112_v36 = vsel %vm679_vm3, %v1037_v57, 0.0  ;;  %v949_v54 = vsel %vm679_vm3, %v2501_v43, 0.0  ;;  %v1114_v9 = vsel %vm679_vm3, %v1038_v31, 0.0 }
 0x1be   :  { %v940_v47 = vadd.f32 %v939_v50, %v938_v30  ;;  %v2564_v38 = vsub.f32 %v1859_v32, %v2298_v15  ;;  %v1046_v32 = vmul.f32 %v2412_v27, %v2412_v27  ;;  %v2591_v27 = vsub.f32 %v1953_v19, %v2298_v15 }
 0x1bf   :  { %v1109_v30 = vadd.f32 %v1108_v52, %v1107_v46  ;;  %v1049_v19 = vmul.f32 %v2438_v7, %v2438_v7  ;;  %v2618_v7 = vsub.f32 %v2083_v62, %v2298_v15  ;;  %v1052_v62 = vmul.f32 %v2465_v40, %v2465_v40 }
 0x1c0   :  { %v942_v6 = vadd.f32 %v941_v21, %v940_v47  ;;  %v1039_v47 = vmul.f32 %v2370_v0, %v2370_v0  ;;  %v2528_v0 = vsub.f32 %v1747_v4, %v2298_v15  ;;  %v1042_v4 = vmul.f32 %v2388_v28, %v2388_v28 }
 0x1c1   :  { %v1111_v56 = vadd.f32 %v1110_v53, %v1109_v30  ;;  %v953_v30 = vsel %vm679_vm3, %v2519_v11, 0.0  ;;  %v2546_v53 = vsub.f32 %v2921_v20, %v2298_v15  ;;  %v2555_v28 = vsub.f32 %v1827_v24, %v2298_v15 }
 0x1c2   :  { %v944_v13 = vadd.f32 %v943_v29, %v942_v6  ;;  %v951_v29 = vsel %vm679_vm3, %v2510_v14, 0.0  ;;  %v1116_v57 = vsel %vm679_vm3, %v1039_v47, 0.0  ;;  %v1045_v24 = vmul.f32 %v2406_v26, %v2406_v26 }
 0x1c3   :  { %v1113_v21 = vadd.f32 %v1112_v36, %v1111_v56  ;;  %v1120_v56 = vsel %vm679_vm3, %v1041_v61, 0.0  ;;  %v957_v36 = vsel %vm679_vm3, %v2537_v23, 0.0  ;;  %v2582_v26 = vsub.f32 %v1923_v59, %v2298_v15 }
 0x1c4   :  { %v946_v50 = vadd.f32 %v945_v39, %v944_v13  ;;  %v1048_v59 = vmul.f32 %v2429_v37, %v2429_v37  ;;  %v2609_v37 = vsub.f32 %v2033_v41, %v2298_v15  ;;  %v1051_v41 = vmul.f32 %v2456_v51, %v2456_v51 }
 0x1c5   :  { %v1115_v46 = vadd.f32 %v1114_v9, %v1113_v21  ;;  %v1122_v21 = vsel %vm679_vm3, %v1042_v4, 0.0  ;;  %v959_v9 = vsel %vm679_vm3, %v2546_v53, 0.0  ;;  %v963_v4 = vsel %vm679_vm3, %v2564_v38, 0.0 }
 0x1c6   :  { %v948_v58 = vadd.f32 %v947_v1, %v946_v50  ;;  %v955_v50 = vsel %vm679_vm3, %v2528_v0, 0.0  ;;  %v2636_v51 = vsub.f32 %v2139_v18, %v2298_v15  ;;  %v2645_v40 = vsub.f32 %v2155_v2, %v2298_v15 }
 0x1c7   :  { %v1117_v13 = vadd.f32 %v1116_v57, %v1115_v46  ;;  %v961_v57 = vsel %vm679_vm3, %v2555_v28, 0.0  ;;  %v1054_v18 = vmul.f32 %v2483_v49, %v2483_v49  ;;  %v1055_v2 = vmul.f32 %v2492_v8, %v2492_v8 }
 0x1c8   :  { %v950_v6 = vadd.f32 %v949_v54, %v948_v58  ;;  %v1044_v58 = vmul.f32 %v2400_v35, %v2400_v35  ;;  %v2922_v35 = vld [vmem:[#allocation8_spill] sm:$0xff]  ;;  %v2663_v49 = vsub.f32 %v1829_v25, %v2298_v15  ;;  %v2672_v8 = vsub.f32 %v1861_v33, %v2298_v15 }
 0x1c9   :  { %v1119_v31 = vadd.f32 %v1118_v16, %v1117_v13  ;;  %v2573_v61 = vsub.f32 %v2922_v35, %v2298_v15  ;;  %v1047_v16 = vmul.f32 %v2420_v44, %v2420_v44  ;;  %v2600_v44 = vsub.f32 %v2005_v3, %v2298_v15 }
 0x1ca   :  { %v952_v52 = vadd.f32 %v951_v29, %v950_v6  ;;  %v1124_v6 = vsel %vm679_vm3, %v1043_v10, 0.0  ;;  %v1130_v10 = vsel %vm679_vm3, %v1046_v32, 0.0  ;;  %v1050_v3 = vmul.f32 %v2447_v42, %v2447_v42  ;;  %v2923_v42 = vld [vmem:[#allocation13_spill] sm:$0xff] }
 0x1cb   :  { %v1121_v47 = vadd.f32 %v1120_v56, %v1119_v31  ;;  %v973_v32 = vsel %vm679_vm3, %v2609_v37, 0.0  ;;  %v1057_v25 = vmul.f32 %v2510_v14, %v2510_v14  ;;  %v1058_v33 = vmul.f32 %v2519_v11, %v2519_v11 }
 0x1cc   :  { %v954_v39 = vadd.f32 %v953_v30, %v952_v52  ;;  %v1126_v52 = vsel %vm679_vm3, %v1044_v58, 0.0  ;;  %v2690_v14 = vsub.f32 %v1925_v60, %v2298_v15  ;;  %v2699_v11 = vsub.f32 %v1955_v22, %v2298_v15 }
 0x1cd   :  { %v1123_v55 = vadd.f32 %v1122_v21, %v1121_v47  ;;  %v967_v47 = vsel %vm679_vm3, %v2582_v26, 0.0  ;;  %v1060_v60 = vmul.f32 %v2537_v23, %v2537_v23  ;;  %v1061_v22 = vmul.f32 %v2546_v53, %v2546_v53 }
 0x1ce   :  { %v956_v1 = vadd.f32 %v955_v50, %v954_v39  ;;  %v1128_v39 = vsel %vm679_vm3, %v1045_v24, 0.0  ;;  %v965_v50 = vsel %vm679_vm3, %v2573_v61, 0.0  ;;  %v2717_v23 = vsub.f32 %v2035_v48, %v2298_v15 }
 0x1cf   :  { %v1125_v29 = vadd.f32 %v1124_v6, %v1123_v55  ;;  %v1134_v55 = vsel %vm679_vm3, %v1048_v59, 0.0  ;;  %v971_v6 = vsel %vm679_vm3, %v2600_v44, 0.0  ;;  %v1142_v59 = vsel %vm679_vm3, %v1052_v62, 0.0 }
 0x1d0   :  { %v958_v54 = vadd.f32 %v957_v36, %v956_v1  ;;  %v1132_v36 = vsel %vm679_vm3, %v1047_v16, 0.0  ;;  %v1053_v16 = vmul.f32 %v2474_v12, %v2474_v12  ;;  %v2654_v12 = vsub.f32 %v1797_v17, %v2298_v15 }
 0x1d1   :  { %v1127_v30 = vadd.f32 %v1126_v52, %v1125_v29  ;;  %v1138_v52 = vsel %vm679_vm3, %v1050_v3, 0.0  ;;  %v1056_v17 = vmul.f32 %v2501_v43, %v2501_v43  ;;  %v2681_v43 = vsub.f32 %v1893_v45, %v2298_v15 }
 0x1d2   :  { %v960_v46 = vadd.f32 %v959_v9, %v958_v54  ;;  %v969_v54 = vsel %vm679_vm3, %v2591_v27, 0.0  ;;  %v1059_v45 = vmul.f32 %v2528_v0, %v2528_v0  ;;  %v2708_v0 = vsub.f32 %v2007_v5, %v2298_v15 }
 0x1d3   :  { %v1129_v20 = vadd.f32 %v1128_v39, %v1127_v30  ;;  %v1140_v39 = vsel %vm679_vm3, %v1051_v41, 0.0  ;;  %v985_v41 = vsel %vm679_vm3, %v2663_v49, 0.0  ;;  %v1062_v5 = vmul.f32 %v2555_v28, %v2555_v28  ;;  %v2924_v28 = vld [vmem:[#allocation14_spill] sm:$0xff] }
 0x1d4   :  { %v962_v13 = vadd.f32 %v961_v57, %v960_v46  ;;  %v1136_v46 = vsel %vm679_vm3, %v1049_v19, 0.0  ;;  %v2627_v57 = vsub.f32 %v2923_v42, %v2298_v15  ;;  %v987_v42 = vsel %vm679_vm3, %v2672_v8, 0.0 }
 0x1d5   :  { %v1131_v1 = vadd.f32 %v1130_v10, %v1129_v20  ;;  %v2726_v53 = vsub.f32 %v2085_v63, %v2298_v15  ;;  %v1063_v48 = vmul.f32 %v2564_v38, %v2564_v38  ;;  %v1064_v63 = vmul.f32 %v2573_v61, %v2573_v61  ;;  %v2925_v38 = vld [vmem:[#allocation15_spill] sm:$0xff]  ;;  %v2926_v61 = vld [vmem:[#allocation16_spill] sm:$0xff] }
 0x1d6   :  { %v964_v31 = vadd.f32 %v963_v4, %v962_v13  ;;  %v975_v4 = vsel %vm679_vm3, %v2618_v7, 0.0 }
 0x1d7   :  { %v1133_v21 = vadd.f32 %v1132_v36, %v1131_v1  ;;  %v979_v1 = vsel %vm679_vm3, %v2636_v51, 0.0 }
 0x1d8   :  { %v966_v56 = vadd.f32 %v965_v50, %v964_v31  ;;  %v977_v50 = vsel %vm679_vm3, %v2627_v57, 0.0 }
 0x1d9   :  { %v1135_v24 = vadd.f32 %v1134_v55, %v1133_v21  ;;  %v1146_v21 = vsel %vm679_vm3, %v1054_v18, 0.0  ;;  %v983_v55 = vsel %vm679_vm3, %v2654_v12, 0.0  ;;  %v993_v18 = vsel %vm679_vm3, %v2699_v11, 0.0 }
 0x1da   :  { %v968_v58 = vadd.f32 %v967_v47, %v966_v56  ;;  %v1144_v47 = vsel %vm679_vm3, %v1053_v16, 0.0 }
 0x1db   :  { %v1137_v35 = vadd.f32 %v1136_v46, %v1135_v24  ;;  %v1150_v46 = vsel %vm679_vm3, %v1056_v17, 0.0  ;;  %v1162_v17 = vsel %vm679_vm3, %v1062_v5, 0.0 }
 0x1dc   :  { %v970_v9 = vadd.f32 %v969_v54, %v968_v58  ;;  %v981_v58 = vsel %vm679_vm3, %v2645_v40, 0.0 }
 0x1dd   :  { %v1139_v30 = vadd.f32 %v1138_v52, %v1137_v35 }
 0x1de   :  { %v972_v29 = vadd.f32 %v971_v6, %v970_v9  ;;  %v1148_v9 = vsel %vm679_vm3, %v1055_v2, 0.0  ;;  %v1160_v2 = vsel %vm679_vm3, %v1061_v22, 0.0 }
 0x1df   :  { %v1141_v20 = vadd.f32 %v1140_v39, %v1139_v30  ;;  %v1154_v30 = vsel %vm679_vm3, %v1058_v33, 0.0  ;;  %v991_v39 = vsel %vm679_vm3, %v2690_v14, 0.0 }
 0x1e0   :  { %v974_v13 = vadd.f32 %v973_v32, %v972_v29  ;;  %v1152_v32 = vsel %vm679_vm3, %v1057_v25, 0.0  ;;  %v1065_v25 = vmul.f32 %v2582_v26, %v2582_v26  ;;  %v2927_v26 = vld [vmem:[#allocation17_spill] sm:$0xff] }
 0x1e1   :  { %v1143_v56 = vadd.f32 %v1142_v59, %v1141_v20  ;;  %v1158_v59 = vsel %vm679_vm3, %v1060_v60, 0.0 }
 0x1e2   :  { %v976_v31 = vadd.f32 %v975_v4, %v974_v13  ;;  %v989_v13 = vsel %vm679_vm3, %v2681_v43, 0.0 }
 0x1e3   :  { %v1145_v36 = vadd.f32 %v1144_v47, %v1143_v56 }
 0x1e4   :  { %v978_v10 = vadd.f32 %v977_v50, %v976_v31  ;;  %v1156_v31 = vsel %vm679_vm3, %v1059_v45, 0.0  ;;  %v2762_v45 = vsub.f32 %v2927_v26, %v2298_v15 }
 0x1e5   :  { %v1147_v3 = vadd.f32 %v1146_v21, %v1145_v36  ;;  %v2735_v36 = vsub.f32 %v2924_v28, %v2298_v15 }
 0x1e6   :  { %v980_v19 = vadd.f32 %v979_v1, %v978_v10  ;;  %v995_v1 = vsel %vm679_vm3, %v2708_v0, 0.0 }
 0x1e7   :  { %v1149_v6 = vadd.f32 %v1148_v9, %v1147_v3  ;;  %v2744_v3 = vsub.f32 %v2925_v38, %v2298_v15  ;;  %v1164_v9 = vsel %vm679_vm3, %v1063_v48, 0.0  ;;  %v1001_v33 = vsel %vm679_vm3, %v2735_v36, 0.0 }
 0x1e8   :  { %v982_v54 = vadd.f32 %v981_v58, %v980_v19  ;;  %v997_v58 = vsel %vm679_vm3, %v2717_v23, 0.0 }
 0x1e9   :  { %v1151_v35 = vadd.f32 %v1150_v46, %v1149_v6  ;;  %v1066_v46 = vmul.f32 %v2591_v27, %v2591_v27  ;;  %v2771_v27 = vsub.f32 %v2199_v34, %v2298_v15  ;;  %v1069_v34 = vmul.f32 %v2618_v7, %v2618_v7 }
 0x1ea   :  { %v984_v24 = vadd.f32 %v983_v55, %v982_v54  ;;  %v999_v55 = vsel %vm679_vm3, %v2726_v53, 0.0 }
 0x1eb   :  { %v1153_v52 = vadd.f32 %v1152_v32, %v1151_v35  ;;  %v1003_v32 = vsel %vm679_vm3, %v2744_v3, 0.0 }
 0x1ec   :  { %v986_v29 = vadd.f32 %v985_v41, %v984_v24  ;;  %v2753_v41 = vsub.f32 %v2926_v61, %v2298_v15 }
 0x1ed   :  { %v1155_v16 = vadd.f32 %v1154_v30, %v1153_v52  ;;  %v1168_v52 = vsel %vm679_vm3, %v1065_v25, 0.0  ;;  %v1074_v25 = vmul.f32 %v2663_v49, %v2663_v49  ;;  %v1077_v49 = vmul.f32 %v2690_v14, %v2690_v14 }
 0x1ee   :  { %v988_v62 = vadd.f32 %v987_v42, %v986_v29  ;;  %v1166_v29 = vsel %vm679_vm3, %v1064_v63, 0.0  ;;  %v1005_v30 = vsel %vm679_vm3, %v2753_v41, 0.0 }
 0x1ef   :  { %v1157_v50 = vadd.f32 %v1156_v31, %v1155_v16  ;;  %v1170_v16 = vsel %vm679_vm3, %v1066_v46, 0.0  ;;  %v1192_v14 = vsel %vm679_vm3, %v1077_v49, 0.0 }
 0x1f0   :  { %v990_v4 = vadd.f32 %v989_v13, %v988_v62  ;;  %v1067_v62 = vmul.f32 %v2600_v44, %v2600_v44  ;;  %v2928_v44 = vld [vmem:[#allocation18_spill] sm:$0xff] }
 0x1f1   :  { %v1159_v56 = vadd.f32 %v1158_v59, %v1157_v50  ;;  %v2780_v31 = vsub.f32 %v2928_v44, %v2298_v15  ;;  %v1081_v44 = vmul.f32 %v2726_v53, %v2726_v53 }
 0x1f2   :  { %v992_v20 = vadd.f32 %v991_v39, %v990_v4  ;;  %v1068_v4 = vmul.f32 %v2609_v37, %v2609_v37  ;;  %v1172_v50 = vsel %vm679_vm3, %v1067_v62, 0.0  ;;  %v2929_v37 = vld [vmem:[#allocation19_spill] sm:$0xff] }
 0x1f3   :  { %v1161_v19 = vadd.f32 %v1160_v2, %v1159_v56  ;;  %v2789_v59 = vsub.f32 %v2929_v37, %v2298_v15  ;;  %v1070_v56 = vmul.f32 %v2627_v57, %v2627_v57  ;;  %v1011_v7 = vsel %vm679_vm3, %v2780_v31, 0.0 }
 0x1f4   :  { %v994_v10 = vadd.f32 %v993_v18, %v992_v20  ;;  %v1007_v20 = vsel %vm679_vm3, %v2762_v45, 0.0  ;;  %v1072_v57 = vmul.f32 %v2645_v40, %v2645_v40  ;;  %v1075_v40 = vmul.f32 %v2672_v8, %v2672_v8  ;;  %v886_v8 = vld [vmem:[%s2873_s3] sm:$0x1] }
 0x1f5   :  { %v1163_v54 = vadd.f32 %v1162_v17, %v1161_v19  ;;  %v1176_v19 = vsel %vm679_vm3, %v1069_v34, 0.0  ;;  %v1178_v63 = vsel %vm679_vm3, %v1070_v56, 0.0  ;;  %v1082_v34 = vmul.f32 %v2735_v36, %v2735_v36 }
 0x1f6   :  { %v996_v47 = vadd.f32 %v995_v1, %v994_v10  ;;  %v1009_v10 = vsel %vm679_vm3, %v2771_v27, 0.0  ;;  %v1174_v1 = vsel %vm679_vm3, %v1068_v4, 0.0  ;;  %v1188_v26 = vsel %vm679_vm3, %v1075_v40, 0.0 }
 0x1f7   :  { %v1165_v6 = vadd.f32 %v1164_v9, %v1163_v54  ;;  %v1073_v54 = vmul.f32 %v2654_v12, %v2654_v12  ;;  %v1182_v9 = vsel %vm679_vm3, %v1072_v57, 0.0  ;;  %v1076_v12 = vmul.f32 %v2681_v43, %v2681_v43 }
 0x1f8   :  { %v998_v21 = vadd.f32 %v997_v58, %v996_v47  ;;  %v1071_v47 = vmul.f32 %v2636_v51, %v2636_v51  ;;  %v1013_v58 = vsel %vm679_vm3, %v2789_v59, 0.0  ;;  %v1202_v53 = vsel %vm679_vm3, %v1082_v34, 0.0 }
 0x1f9   :  { %v1167_v42 = vadd.f32 %v1166_v29, %v1165_v6  ;;  %v1184_v61 = vsel %vm679_vm3, %v1073_v54, 0.0  ;;  %v1186_v29 = vsel %vm679_vm3, %v1074_v25, 0.0  ;;  %v1190_v43 = vsel %vm679_vm3, %v1076_v12, 0.0 }
 0x1fa   :  { %v1000_v24 = vadd.f32 %v999_v55, %v998_v21  ;;  %v1180_v38 = vsel %vm679_vm3, %v1071_v47, 0.0  ;;  %v1087_v47 = vmul.f32 %v2780_v31, %v2780_v31 }
 0x1fb   :  { %v1169_v60 = vadd.f32 %v1168_v52, %v1167_v42  ;;  %v1078_v52 = vmul.f32 %v2699_v11, %v2699_v11 }
 0x1fc   :  { %v1002_v35 = vadd.f32 %v1001_v33, %v1000_v24 }
 0x1fd   :  { %v1171_v22 = vadd.f32 %v1170_v16, %v1169_v60 }
 0x1fe   :  { %v1004_v13 = vadd.f32 %v1003_v32, %v1002_v35 }
 0x1ff   :  { %v1173_v5 = vadd.f32 %v1172_v50, %v1171_v22  ;;  %v1194_v22 = vsel %vm679_vm3, %v1078_v52, 0.0 }
 0x200   :  { %v1006_v39 = vadd.f32 %v1005_v30, %v1004_v13  ;;  %v1079_v30 = vmul.f32 %v2708_v0, %v2708_v0 }
 0x201   :  { %v1175_v2 = vadd.f32 %v1174_v1, %v1173_v5  ;;  %v1200_v5 = vsel %vm679_vm3, %v1081_v44, 0.0  ;;  %v1085_v1 = vmul.f32 %v2762_v45, %v2762_v45 }
 0x202   :  { %v1008_v18 = vadd.f32 %v1007_v20, %v1006_v39  ;;  %v1080_v39 = vmul.f32 %v2717_v23, %v2717_v23  ;;  %v1196_v0 = vsel %vm679_vm3, %v1079_v30, 0.0 }
 0x203   :  { %v1177_v28 = vadd.f32 %v1176_v19, %v1175_v2  ;;  %v1086_v2 = vmul.f32 %v2771_v27, %v2771_v27 }
 0x204   :  { %v1010_v48 = vadd.f32 %v1009_v10, %v1008_v18  ;;  %v1198_v50 = vsel %vm679_vm3, %v1080_v39, 0.0  ;;  %v1083_v18 = vmul.f32 %v2744_v3, %v2744_v3  ;;  %v1084_v10 = vmul.f32 %v2753_v41, %v2753_v41 }
 0x205   :  { %v1179_v21 = vadd.f32 %v1178_v63, %v1177_v28  ;;  %v1208_v41 = vsel %vm679_vm3, %v1085_v1, 0.0  ;;  %v1210_v45 = vsel %vm679_vm3, %v1086_v2, 0.0 }
 0x206   :  { %v1012_v15 = vadd.f32 %v1011_v7, %v1010_v48  ;;  %v1204_v36 = vsel %vm679_vm3, %v1083_v18, 0.0  ;;  %v1206_v3 = vsel %vm679_vm3, %v1084_v10, 0.0 }
 0x207   :  { %v1181_v55 = vadd.f32 %v1180_v38, %v1179_v21 }
 0x208   :  { %v1014_v17 = vadd.f32 %v1013_v58, %v1012_v15  ;;  %v1088_v15 = vmul.f32 %v2789_v59, %v2789_v59  ;;  %v1212_v58 = vsel %vm679_vm3, %v1087_v47, 0.0 }
 0x209   :  { %v1183_v6 = vadd.f32 %v1182_v9, %v1181_v55 }
 0x20a   :  { %v1015_v51 = vrot.slane %v1014_v17, 4  ;;  %v1214_v27 = vsel %vm679_vm3, %v1088_v15, 0.0 }
 0x20b   :  { %v1185_v46 = vadd.f32 %v1184_v61, %v1183_v6 }
 0x20c   :  { %v1016_v24 = vadd.f32 %v1015_v51, %v1014_v17  ;;  %v1024_v51 = vld [vmem:[%s2874_s4] sm:$0x1] }
 0x20d   :  { %v1187_v42 = vadd.f32 %v1186_v29, %v1185_v46 }
 0x20e   :  { %v1017_v33 = vrot.slane %v1016_v24, 2 }
 0x20f   :  { %v1189_v62 = vadd.f32 %v1188_v26, %v1187_v42 }
 0x210   :  { %v1018_v35 = vadd.f32 %v1017_v33, %v1016_v24 }
 0x211   :  { %v1191_v60 = vadd.f32 %v1190_v43, %v1189_v62 }
 0x212   :  { %v1019_v32 = vrot.slane %v1018_v35, 1 }
 0x213   :  { %v1193_v16 = vadd.f32 %v1192_v14, %v1191_v60 }
 0x214   :  { %v1020_v13 = vadd.f32 %v1019_v32, %v1018_v35 }
 0x215   :  { %v1195_v11 = vadd.f32 %v1194_v22, %v1193_v16 }
 0x216   :  { %v1021_v4 = vadd.f32 %v1020_v13, %v886_v8 }
 0x217   :  { %v1197_v20 = vadd.f32 %v1196_v0, %v1195_v11 }
 0x218   :  { %1023 = vst.msk [vmem:[%s2873_s3] sm:$0x1] %vm814_vm4, %v1021_v4 }
 0x219   :  { %v1199_v23 = vadd.f32 %v1198_v50, %v1197_v20 }
 0x21b   :  { %v1201_v37 = vadd.f32 %v1200_v5, %v1199_v23 }
 0x21d   :  { %v1203_v56 = vadd.f32 %v1202_v53, %v1201_v37 }
 0x21f   :  { %v1205_v48 = vadd.f32 %v1204_v36, %v1203_v56 }
 0x221   :  { %v1207_v7 = vadd.f32 %v1206_v3, %v1205_v48 }
 0x223   :  { %v1209_v19 = vadd.f32 %v1208_v41, %v1207_v7 }
 0x225   :  { %v1211_v28 = vadd.f32 %v1210_v45, %v1209_v19 }
 0x227   :  { %v1213_v57 = vadd.f32 %v1212_v58, %v1211_v28 }
 0x229   :  { %v1215_v63 = vadd.f32 %v1214_v27, %v1213_v57 }
 0x22b   :  { %v1216_v17 = vrot.slane %v1215_v63, 4 }
 0x22d   :  { %v1217_v21 = vadd.f32 %v1216_v17, %v1215_v63 }
 0x22f   :  { %v1218_v54 = vrot.slane %v1217_v21, 2 }
 0x231   :  { %v1219_v38 = vadd.f32 %v1218_v54, %v1217_v21 }
 0x233   :  { %v1220_v31 = vrot.slane %v1219_v38, 1 }
 0x235   :  { %v1221_v55 = vadd.f32 %v1220_v31, %v1219_v38 }
 0x237   :  { %v1222_v59 = vadd.f32 %v1221_v55, %v1024_v51 }
 0x239   :  { %1223 = vst.msk [vmem:[%s2874_s4] sm:$0x1] %vm814_vm4, %v1222_v59 }

// kernel: _lambda_.23
= control target key start
LH: loop header
LB: loop body
LE: loop exit
PB: predicated region body
PF: predicated region fallthrough
CT: control target
= control target key end

     0   :  { %v200_v3 = vmov 0.0   ;;  %s266_s0 = inlined_call_operand.vmem [shape: bf16[1,32,128], index: 0, kind: input, shape index: {}]   ;;  %s267_s1 = inlined_call_operand.vmem [shape: bf16[1,32,128], index: 1, kind: input, shape index: {}]   ;;  %s268_s2 = inlined_call_operand.vmem [shape: f32[1,6,128], index: 2, kind: input, shape index: {}]   ;;  %s269_s3 = inlined_call_operand.vmem [shape: bf16[1,32,128], index: 3, kind: output, shape index: {0}]   ;;  %s270_s4 = inlined_call_operand.vmem [shape: f32[1,1,128], index: 4, kind: output, shape index: {1}]   ;;  %s271_s5 = inlined_call_operand.hbm [shape: f32[1,1,128], index: 5, kind: output, shape index: {2}]  }
   0x1   :  { %v18_v0 = vld [vmem:[%s268_s2] sm:$0x3f]  ;;  %v168_v2 = vld [vmem:[%s266_s0 + $0x8] sm:$0xff]   ;;  %84 = vst [vmem:[#allocation2] sm:$0x1] %v200_v3 }
   0x2   :  { %v143_v1 = vld [vmem:[%s266_s0] sm:$0xff]   ;;  %v148_v6 = vunpack.c.l.bf16 %v168_v2  ;;  %v149_v7 = vunpack.c.h.bf16 %v168_v2  ;;  %v169_v9 = vld [vmem:[%s267_s1 + $0x8] sm:$0xff]  }
   0x3   :  { %v144_v4 = vunpack.c.l.bf16 %v143_v1  ;;  %v145_v5 = vunpack.c.h.bf16 %v143_v1  ;;  %v151_v8 = vld [vmem:[%s267_s1] sm:$0xff]  }
   0x4   :  { %11 = vsyncpa [#allocation3], 0  ;;  %83 = vst [vmem:[%s270_s4] sm:$0x1] %v200_v3  ;;  %v27_v10 = vperm.slane %v18_v0, 0  ;;  %v32_v11 = vperm.slane %v18_v0, 1  ;;  %v152_v12 = vunpack.c.l.bf16 %v151_v8  ;;  %v153_v13 = vunpack.c.h.bf16 %v151_v8  ;;  %s129_s11 = sshll.u32 %s271_s5, 4  ;;  %s130_s11 = int_to_ptr.hbm [resolvable:$true] %s129_s11 }
   0x5   :  { %v156_v14 = vunpack.c.l.bf16 %v169_v9  ;;  %v157_v15 = vunpack.c.h.bf16 %v169_v9  ;;  %v45_v16 = vperm.slane %v18_v0, 2  ;;  %v54_v17 = vperm.slane %v18_v0, 3 }
   0x6   :  { %v28_v18 = vmul.f32 %v144_v4, %v27_v10  ;;  %v29_v19 = vmul.f32 %v145_v5, %v27_v10  ;;  %v30_v20 = vmul.f32 %v148_v6, %v27_v10  ;;  %v31_v21 = vmul.f32 %v149_v7, %v27_v10 }
   0x7   :  { %v46_v22 = vmul.f32 %v152_v12, %v45_v16  ;;  %v47_v23 = vmul.f32 %v153_v13, %v45_v16  ;;  %v48_v24 = vmul.f32 %v156_v14, %v45_v16  ;;  %v49_v25 = vmul.f32 %v157_v15, %v45_v16 }
   0x8   :  { %v33_v26 = vadd.f32 %v32_v11, %v28_v18  ;;  %v34_v27 = vadd.f32 %v32_v11, %v29_v19  ;;  %v35_v28 = vadd.f32 %v32_v11, %v30_v20  ;;  %v36_v29 = vadd.f32 %v32_v11, %v31_v21  ;;  %v102_v13 = vld [vmem:[#allocation2] sm:$0x1] }
   0x9   :  { %vm59_vm0 = vcmp.gt.f32.partialorder %v18_v0, 0.0  ;;  %v201_v34 = vmov 0   ;;  %v85_v41 = vperm.slane %v18_v0, 5 }
   0xa   :  { %v50_v30 = vadd.f32 %v46_v22, %v33_v26  ;;  %v51_v31 = vadd.f32 %v47_v23, %v34_v27  ;;  %v52_v32 = vadd.f32 %v48_v24, %v35_v28  ;;  %v53_v33 = vadd.f32 %v49_v25, %v36_v29 }
   0xb   :  { %v64_v35 = vsel %vm59_vm0, 1, %v201_v34  ;;  %v90_v12 = vld [vmem:[%s270_s4] sm:$0x1] }
   0xc   :  { %v55_v36 = vadd.f32 %v54_v17, %v50_v30  ;;  %v56_v37 = vadd.f32 %v54_v17, %v51_v31  ;;  %v57_v38 = vadd.f32 %v54_v17, %v52_v32  ;;  %v58_v39 = vadd.f32 %v54_v17, %v53_v33 }
   0xd   :  { %v65_v40 = vperm.slane %v64_v35, 4 }
   0xe   :  { %v60_v42 = vmax.f32 %v55_v36, 0.0  ;;  %v61_v43 = vmax.f32 %v56_v37, 0.0  ;;  %v62_v44 = vmax.f32 %v57_v38, 0.0  ;;  %v63_v45 = vmax.f32 %v58_v39, 0.0 }
   0xf   :  { %vm66_vm1 = vcmp.eq.s32.totalorder %v65_v40, 1 }
  0x10   :  { %v67_v46 = vsel %vm66_vm1, %v60_v42, %v55_v36  ;;  %v68_v47 = vsel %vm66_vm1, %v61_v43, %v56_v37  ;;  %v69_v48 = vsel %vm66_vm1, %v62_v44, %v57_v38  ;;  %v70_v49 = vsel %vm66_vm1, %v63_v45, %v58_v39 }
  0x11   :  { %v86_v50 = vsub.f32 %v67_v46, %v85_v41  ;;  %v87_v51 = vsub.f32 %v68_v47, %v85_v41  ;;  %v88_v52 = vsub.f32 %v69_v48, %v85_v41  ;;  %v89_v53 = vsub.f32 %v70_v49, %v85_v41 }
  0x12   :  { %v161_v54 = vpack.c.bf16 %v68_v47, %v67_v46  ;;  %v166_v55 = vpack.c.bf16 %v70_v49, %v69_v48 }
  0x13   :  { %v103_v56 = vmul.f32 %v86_v50, %v86_v50  ;;  %v104_v57 = vmul.f32 %v87_v51, %v87_v51  ;;  %v105_v58 = vmul.f32 %v88_v52, %v88_v52  ;;  %v91_v59 = vadd.f32 %v87_v51, %v86_v50 }
  0x14   :  { %162 = vst [vmem:[%s269_s3] sm:$0xff] %v161_v54   ;;  %v106_v60 = vmul.f32 %v89_v53, %v89_v53 }
  0x15   :  { %v107_v61 = vadd.f32 %v104_v57, %v103_v56  ;;  %170 = vst [vmem:[%s269_s3 + $0x8] sm:$0xff] %v166_v55   ;;  %v92_v62 = vadd.f32 %v91_v59, %v88_v52  ;;  %s202_s3 = smov [#allocation2]  }
  0x16   :  { %s127_s8 = sshll.u32 %s202_s3, 4  ;;  %s128_s8 = int_to_ptr.vmem [resolvable:$true] %s127_s8 }
  0x17   :  { %v108_v63 = vadd.f32 %v107_v61, %v105_v58  ;;  %v93_v0 = vadd.f32 %v92_v62, %v89_v53 }
  0x19   :  { %v109_v1 = vadd.f32 %v108_v63, %v106_v60  ;;  %v94_v2 = vrot.slane %v93_v0, 4 }
  0x1b   :  { %v110_v3 = vrot.slane %v109_v1, 4  ;;  %v95_v4 = vadd.f32 %v94_v2, %v93_v0 }
  0x1d   :  { %v111_v5 = vadd.f32 %v110_v3, %v109_v1  ;;  %v96_v6 = vrot.slane %v95_v4, 2 }
  0x1f   :  { %v112_v7 = vrot.slane %v111_v5, 2  ;;  %v97_v8 = vadd.f32 %v96_v6, %v95_v4 }
  0x21   :  { %v113_v9 = vadd.f32 %v112_v7, %v111_v5  ;;  %v98_v10 = vrot.slane %v97_v8, 1 }
  0x23   :  { %v114_v11 = vrot.slane %v113_v9, 1  ;;  %v99_v14 = vadd.f32 %v98_v10, %v97_v8 }
  0x25   :  { %v115_v15 = vadd.f32 %v114_v11, %v113_v9  ;;  %v100_v16 = vadd.f32 %v99_v14, %v90_v12 }
  0x27   :  { %v116_v17 = vadd.f32 %v115_v15, %v102_v13  ;;  %101 = vst [vmem:[%s270_s4] sm:$0x1] %v100_v16 }
  0x29   :  { %117 = vst [vmem:[#allocation2] sm:$0x1] %v116_v17 }
  0x2a   :  { %132 = dma.vmem_to_hbm [thread:$0]  %s128_s8, 16, %s130_s11, [#allocation3]  }
  0x2b   :  { %198 = dma.done.wait [#allocation3], 16  }
  0x2c   :  { %199 = vsyncadd [#allocation3], 4294967280 }
  0x2d   :  { %141 = vsyncpa [#allocation3], 1 }

// kernel: tile.129
= control target key start
LH: loop header
LB: loop body
LE: loop exit
PB: predicated region body
PF: predicated region fallthrough
CT: control target
= control target key end

     0   :  { %vm6_vm0 = vcmask 1043458   ;;  %vm10_vm1 = vcmask 1045508   ;;  %s15_s6 = smov 3  ;;  %s18_s7 = smov 12  ;;  %vm12_vm2 = vcmask 64512   ;;  %vm29_vm3 = vcmask 1048512   ;;  %s578_s0 = inlined_call_operand.vmem [shape: f32[6,16,8], index: 0, kind: input, shape index: {}]   ;;  %s579_s1 = inlined_call_operand.vmem [shape: f32[6,128], index: 1, kind: output, shape index: {}]  }
   0x1   :  { %v269_v0 = vld [vmem:[%s578_s0 + $0xf] ss:$16 sm:%s15_s6]   ;;  %s23_s12 = smov 48  ;;  %s49_s15 = smov 3  ;;  %vm46_vm4 = vcmask 982912   ;;  %vm63_vm5 = vcmask 917312  }
   0x2   :  { %v270_v1 = vld [vmem:[%s578_s0 + $0xf] ss:$16 sm:%s18_s7]   ;;  %s52_s16 = smov 12  ;;  %v275_v5 = vld [vmem:[%s578_s0 + $0xd] ss:$16 sm:%s49_s15]   ;;  %s57_s21 = smov 48 }
   0x3   :  { %v21_v2 = vsel %vm6_vm0, %v270_v1, %v269_v0  ;;  %v271_v3 = vld [vmem:[%s578_s0 + $0xf] ss:$16 sm:%s23_s12]   ;;  %v276_v6 = vld [vmem:[%s578_s0 + $0xd] ss:$16 sm:%s52_s16]   ;;  %s329_s22 = smov 120   ;;  %s32_s25 = smov 3 }
   0x4   :  { %v26_v4 = vsel %vm10_vm1, %v271_v3, %v21_v2  ;;  %v55_v7 = vsel %vm6_vm0, %v276_v6, %v275_v5  ;;  %v277_v8 = vld [vmem:[%s578_s0 + $0xd] ss:$16 sm:%s57_s21]   ;;  %s35_s26 = smov 12  ;;  %v272_v10 = vld [vmem:[%s578_s0 + $0xe] ss:$16 sm:%s32_s25]   ;;  %s40_s2 = smov 48 }
   0x5   :  { %27 = vrot.lane.b32.xlu0 %v26_v4, %s329_s22  ;;  %v60_v9 = vsel %vm10_vm1, %v277_v8, %v55_v7  ;;  %v273_v11 = vld [vmem:[%s578_s0 + $0xe] ss:$16 sm:%s35_s26]   ;;  %s330_s3 = smov 104   ;;  %s66_s6 = smov 3  ;;  %vm80_vm6 = vcmask 851712   ;;  %vm97_vm7 = vcmask 786112  }
   0x6   :  { %61 = vrot.lane.b32.xlu1 %v60_v9, %s330_s3  ;;  %v38_v12 = vsel %vm6_vm0, %v273_v11, %v272_v10  ;;  %v274_v13 = vld [vmem:[%s578_s0 + $0xe] ss:$16 sm:%s40_s2]   ;;  %s69_s7 = smov 12  ;;  %s74_s12 = smov 48  ;;  %vm114_vm8 = vcmask 720512   ;;  %vm131_vm9 = vcmask 654912  }
   0x7   :  { %v278_v14 = vld [vmem:[%s578_s0 + $0xc] ss:$16 sm:%s66_s6]   ;;  %s117_s15 = smov 3  ;;  %s120_s16 = smov 12  ;;  %v43_v18 = vsel %vm10_vm1, %v274_v13, %v38_v12  ;;  %vm148_vm10 = vcmask 589312   ;;  %vm165_vm11 = vcmask 523712  }
   0x8   :  { %v279_v15 = vld [vmem:[%s578_s0 + $0xc] ss:$16 sm:%s69_s7]   ;;  %s134_s17 = smov 3  ;;  %s137_s18 = smov 12  ;;  %v287_v20 = vld [vmem:[%s578_s0 + $0x9] ss:$16 sm:%s117_s15]  }
   0x9   :  { %v72_v16 = vsel %vm6_vm0, %v279_v15, %v278_v14  ;;  %v280_v17 = vld [vmem:[%s578_s0 + $0xc] ss:$16 sm:%s74_s12]   ;;  %v288_v21 = vld [vmem:[%s578_s0 + $0x9] ss:$16 sm:%s120_s16]   ;;  %s125_s23 = smov 48  ;;  %s331_s24 = smov 112  }
   0xa   :  { %v77_v19 = vsel %vm10_vm1, %v280_v17, %v72_v16  ;;  %v290_v22 = vld [vmem:[%s578_s0 + $0x8] ss:$16 sm:%s134_s17]   ;;  %s142_s29 = smov 48  ;;  %s332_s30 = smov 96   ;;  %v123_v24 = vsel %vm6_vm0, %v288_v21, %v287_v20  ;;  %v289_v25 = vld [vmem:[%s578_s0 + $0x9] ss:$16 sm:%s125_s23]  }
   0xb   :  { %v291_v23 = vld [vmem:[%s578_s0 + $0x8] ss:$16 sm:%s137_s18]   ;;  %s168_s4 = smov 3  ;;  %s171_s5 = smov 12  ;;  %v128_v28 = vsel %vm10_vm1, %v289_v25, %v123_v24  ;;  %vm182_vm12 = vcmask 458112   ;;  %vm199_vm13 = vcmask 392512  }
   0xc   :  { %v140_v26 = vsel %vm6_vm0, %v291_v23, %v290_v22  ;;  %v292_v27 = vld [vmem:[%s578_s0 + $0x8] ss:$16 sm:%s142_s29]   ;;  %s83_s8 = smov 3  ;;  %s86_s9 = smov 12  ;;  %v296_v34 = vld [vmem:[%s578_s0 + $0x6] ss:$16 sm:%s168_s4]  }
   0xd   :  { %44 = vrot.lane.b32.xlu0 %v43_v18, %s331_s24  ;;  %v281_v29 = vld [vmem:[%s578_s0 + $0xb] ss:$16 sm:%s83_s8]   ;;  %s91_s14 = smov 48  ;;  %s185_s15 = smov 3  ;;  %v145_v33 = vsel %vm10_vm1, %v292_v27, %v140_v26  ;;  %vm216_vm14 = vcmask 326912   ;;  %vm233_vm15 = vcmask 261312  }
   0xe   :  { %78 = vrot.lane.b32.xlu1 %v77_v19, %s332_s30  ;;  %v282_v30 = vld [vmem:[%s578_s0 + $0xb] ss:$16 sm:%s86_s9]   ;;  %s188_s16 = smov 12  ;;  %s176_s23 = smov 48 }
   0xf   :  { %v89_v31 = vsel %vm6_vm0, %v282_v30, %v281_v29  ;;  %v283_v32 = vld [vmem:[%s578_s0 + $0xb] ss:$16 sm:%s91_s14]   ;;  %v297_v35 = vld [vmem:[%s578_s0 + $0x6] ss:$16 sm:%s171_s5]   ;;  %s333_s24 = smov 72   ;;  %s334_s25 = smov 88  }
  0x10   :  { %v94_v36 = vsel %vm10_vm1, %v283_v32, %v89_v31  ;;  %v299_v37 = vld [vmem:[%s578_s0 + $0x5] ss:$16 sm:%s185_s15]   ;;  %s193_s30 = smov 48  ;;  %s219_s2 = smov 3  ;;  %v174_v39 = vsel %vm6_vm0, %v297_v35, %v296_v34  ;;  %v298_v40 = vld [vmem:[%s578_s0 + $0x6] ss:$16 sm:%s176_s23]  }
  0x11   :  { %95 = vrot.lane.b32.xlu2 %v94_v36, %s334_s25  ;;  %v300_v38 = vld [vmem:[%s578_s0 + $0x5] ss:$16 sm:%s188_s16]   ;;  %s335_s3 = smov 64   ;;  %s100_s6 = smov 3  ;;  %v179_v47 = vsel %vm10_vm1, %v298_v40, %v174_v39 }
  0x12   :  { %s103_s7 = smov 12  ;;  %s222_s8 = smov 12  ;;  %v284_v41 = vld [vmem:[%s578_s0 + $0xa] ss:$16 sm:%s100_s6]   ;;  %v191_v43 = vsel %vm6_vm0, %v300_v38, %v299_v37  ;;  %v301_v44 = vld [vmem:[%s578_s0 + $0x5] ss:$16 sm:%s193_s30]  }
  0x13   :  { %v285_v42 = vld [vmem:[%s578_s0 + $0xa] ss:$16 sm:%s103_s7]   ;;  %s108_s13 = smov 48  ;;  %s151_s18 = smov 3  ;;  %v305_v49 = vld [vmem:[%s578_s0 + $0x3] ss:$16 sm:%s219_s2]   ;;  %v196_v51 = vsel %vm10_vm1, %v301_v44, %v191_v43 }
  0x14   :  { %v106_v45 = vsel %vm6_vm0, %v285_v42, %v284_v41  ;;  %v286_v46 = vld [vmem:[%s578_s0 + $0xa] ss:$16 sm:%s108_s13]   ;;  %s154_s19 = smov 12  ;;  %s227_s20 = smov 48  ;;  %v306_v50 = vld [vmem:[%s578_s0 + $0x3] ss:$16 sm:%s222_s8]  }
  0x15   :  { %129 = vrot.lane.b32.xlu0 %v128_v28, %s333_s24  ;;  %v111_v48 = vsel %vm10_vm1, %v286_v46, %v106_v45  ;;  %s236_s25 = smov 3  ;;  %s239_s26 = smov 12  ;;  %v293_v52 = vld [vmem:[%s578_s0 + $0x7] ss:$16 sm:%s151_s18]   ;;  %v225_v57 = vsel %vm6_vm0, %v306_v50, %v305_v49 }
  0x16   :  { %146 = vrot.lane.b32.xlu1 %v145_v33, %s335_s3  ;;  %v294_v53 = vld [vmem:[%s578_s0 + $0x7] ss:$16 sm:%s154_s19]   ;;  %s159_s2 = smov 48  ;;  %s336_s3 = smov 48  }
  0x17   :  { %v307_v54 = vld [vmem:[%s578_s0 + $0x3] ss:$16 sm:%s227_s20]   ;;  %s337_s6 = smov 80   ;;  %v308_v55 = vld [vmem:[%s578_s0 + $0x2] ss:$16 sm:%s236_s25]   ;;  %s244_s11 = smov 48  ;;  %v157_v58 = vsel %vm6_vm0, %v294_v53, %v293_v52 }
  0x18   :  { %v309_v56 = vld [vmem:[%s578_s0 + $0x2] ss:$16 sm:%s239_s26]   ;;  %s338_s12 = smov 40   ;;  %v295_v59 = vld [vmem:[%s578_s0 + $0x7] ss:$16 sm:%s159_s2]   ;;  %s202_s17 = smov 3  ;;  %v230_v62 = vsel %vm10_vm1, %v307_v54, %v225_v57 }
  0x19   :  { %112 = vrot.lane.b32.xlu2 %v111_v48, %s337_s6  ;;  %v242_v60 = vsel %vm6_vm0, %v309_v56, %v308_v55  ;;  %v310_v61 = vld [vmem:[%s578_s0 + $0x2] ss:$16 sm:%s244_s11]   ;;  %s205_s18 = smov 12  ;;  %v162_v63 = vsel %vm10_vm1, %v295_v59, %v157_v58  ;;  %s210_s23 = smov 48 }
  0x1a   :  { %v247_v0 = vsel %vm10_vm1, %v310_v61, %v242_v60  ;;  %v302_v1 = vld [vmem:[%s578_s0 + $0x4] ss:$16 sm:%s202_s17]   ;;  %s339_s24 = smov 24   ;;  %s340_s25 = smov 56  }
  0x1b   :  { %v303_v2 = vld [vmem:[%s578_s0 + $0x4] ss:$16 sm:%s205_s18]   ;;  %s341_s26 = smov 16   ;;  %s253_s29 = smov 3 }
  0x1c   :  { %v208_v3 = vsel %vm6_vm0, %v303_v2, %v302_v1  ;;  %v304_v4 = vld [vmem:[%s578_s0 + $0x4] ss:$16 sm:%s210_s23]   ;;  %s256_s30 = smov 12  ;;  %v311_v6 = vld [vmem:[%s578_s0 + $0x1] ss:$16 sm:%s253_s29]   ;;  %s261_s6 = smov 48 }
  0x1d   :  { %180 = vrot.lane.b32.xlu0 %v179_v47, %s336_s3  ;;  %v213_v5 = vsel %vm10_vm1, %v304_v4, %v208_v3  ;;  %v312_v7 = vld [vmem:[%s578_s0 + $0x1] ss:$16 sm:%s256_s30]   ;;  %s342_s7 = smov 32   ;;  %s343_s10 = smov 8  }
  0x1e   :  { %197 = vrot.lane.b32.xlu1 %v196_v51, %s338_s12  ;;  %v259_v8 = vsel %vm6_vm0, %v312_v7, %v311_v6  ;;  %v313_v9 = vld [vmem:[%s578_s0 + $0x1] ss:$16 sm:%s261_s6]   ;;  %s2_s11 = smov 3  ;;  %s4_s12 = smov 12 }
  0x1f   :  { %v264_v10 = vsel %vm10_vm1, %v313_v9, %v259_v8  ;;  %s8_s13 = smov 48  ;;  %v3_v11 = vld [vmem:[%s578_s0] ss:$16 sm:%s2_s11]  }
  0x20   :  { %v5_v12 = vld [vmem:[%s578_s0] ss:$16 sm:%s4_s12]  }
  0x21   :  { %163 = vrot.lane.b32.xlu2 %v162_v63, %s340_s25  ;;  %v7_v13 = vsel %vm6_vm0, %v5_v12, %v3_v11  ;;  %v9_v14 = vld [vmem:[%s578_s0] ss:$16 sm:%s8_s13]   ;;  %vm250_vm0 = vcmask 195712  }
  0x22   :  { %v11_v15 = vsel %vm10_vm1, %v9_v14, %v7_v13  ;;  %vm267_vm1 = vcmask 130112  }
  0x23   :  { %13 = vst.msk [vmem:[%s579_s1] sm:$0x3f] %vm12_vm2, %v11_v15  }
  0x25   :  { %231 = vrot.lane.b32.xlu0 %v230_v62, %s339_s24 }
  0x26   :  { %248 = vrot.lane.b32.xlu1 %v247_v0, %s341_s26 }
  0x29   :  { %214 = vrot.lane.b32.xlu2 %v213_v5, %s342_s7 }
  0x31   :  { %265 = vrot.lane.b32.xlu2 %v264_v10, %s343_s10 }
  0x6b   :  { %v96_v16 = vpop.permute.xlu2 %95  }
  0x73   :  { %v113_v18 = vpop.permute.xlu2 %112  }
  0x77   :  { %v28_v17 = vpop.permute.xlu0 %27  }
  0x78   :  { %30 = vst.msk [vmem:[%s579_s1] sm:$0x3f] %vm29_vm3, %v28_v17   ;;  %v62_v19 = vpop.permute.xlu1 %61  }
  0x7b   :  { %v164_v21 = vpop.permute.xlu2 %163  }
  0x7f   :  { %v45_v20 = vpop.permute.xlu0 %44  }
  0x80   :  { %47 = vst.msk [vmem:[%s579_s1] sm:$0x3f] %vm46_vm4, %v45_v20   ;;  %v79_v22 = vpop.permute.xlu1 %78  }
  0x81   :  { %64 = vst.msk [vmem:[%s579_s1] sm:$0x3f] %vm63_vm5, %v62_v19  }
  0x82   :  { %81 = vst.msk [vmem:[%s579_s1] sm:$0x3f] %vm80_vm6, %v79_v22  }
  0x83   :  { %98 = vst.msk [vmem:[%s579_s1] sm:$0x3f] %vm97_vm7, %v96_v16   ;;  %v215_v24 = vpop.permute.xlu2 %214  }
  0x84   :  { %115 = vst.msk [vmem:[%s579_s1] sm:$0x3f] %vm114_vm8, %v113_v18  }
  0x87   :  { %v130_v23 = vpop.permute.xlu0 %129  }
  0x88   :  { %132 = vst.msk [vmem:[%s579_s1] sm:$0x3f] %vm131_vm9, %v130_v23   ;;  %v147_v25 = vpop.permute.xlu1 %146  }
  0x89   :  { %149 = vst.msk [vmem:[%s579_s1] sm:$0x3f] %vm148_vm10, %v147_v25  }
  0x8a   :  { %166 = vst.msk [vmem:[%s579_s1] sm:$0x3f] %vm165_vm11, %v164_v21  }
  0x8b   :  { %v266_v27 = vpop.permute.xlu2 %265  }
  0x8f   :  { %v181_v26 = vpop.permute.xlu0 %180  }
  0x90   :  { %183 = vst.msk [vmem:[%s579_s1] sm:$0x3f] %vm182_vm12, %v181_v26   ;;  %v198_v28 = vpop.permute.xlu1 %197  }
  0x91   :  { %200 = vst.msk [vmem:[%s579_s1] sm:$0x3f] %vm199_vm13, %v198_v28  }
  0x92   :  { %217 = vst.msk [vmem:[%s579_s1] sm:$0x3f] %vm216_vm14, %v215_v24  }
  0x97   :  { %v232_v29 = vpop.permute.xlu0 %231  }
  0x98   :  { %234 = vst.msk [vmem:[%s579_s1] sm:$0x3f] %vm233_vm15, %v232_v29   ;;  %v249_v30 = vpop.permute.xlu1 %248  }
  0x99   :  { %251 = vst.msk [vmem:[%s579_s1] sm:$0x3f] %vm250_vm0, %v249_v30  }
  0x9a   :  { %268 = vst.msk [vmem:[%s579_s1] sm:$0x3f] %vm267_vm1, %v266_v27  }

// kernel: _lambda_.27
= control target key start
LH: loop header
LB: loop body
LE: loop exit
PB: predicated region body
PF: predicated region fallthrough
CT: control target
= control target key end

     0   :  { %s173_s0 = inlined_call_operand.vmem [shape: bf16[32,128], index: 0, kind: input, shape index: {}]   ;;  %s174_s1 = inlined_call_operand.vmem [shape: bf16[32,128], index: 1, kind: input, shape index: {}]   ;;  %s175_s2 = inlined_call_operand.vmem [shape: bf16[32,128], index: 2, kind: input, shape index: {}]   ;;  %s176_s3 = inlined_call_operand.vmem [shape: f32[6,128], index: 3, kind: input, shape index: {}]   ;;  %s177_s4 = inlined_call_operand.vmem [shape: f32[32,128], index: 4, kind: output, shape index: {}]  }
   0x1   :  { %v17_v0 = vld [vmem:[%s176_s3] sm:$0x3f]  ;;  %v112_v8 = vld [vmem:[%s173_s0 + $0x8] sm:$0xff]  }
   0x2   :  { %v89_v1 = vld [vmem:[%s173_s0] sm:$0xff]   ;;  %v26_v4 = vperm.slane %v17_v0, 0  ;;  %v31_v5 = vperm.slane %v17_v0, 1  ;;  %v44_v9 = vperm.slane %v17_v0, 2  ;;  %v66_v11 = vperm.slane %v17_v0, 4  ;;  %v113_v12 = vld [vmem:[%s174_s1 + $0x8] sm:$0xff]  }
   0x3   :  { %v97_v2 = vld [vmem:[%s174_s1] sm:$0xff]   ;;  %v90_v3 = vunpack.c.l.bf16 %v89_v1  ;;  %v91_v14 = vunpack.c.h.bf16 %v89_v1  ;;  %v114_v16 = vld [vmem:[%s175_s2 + $0x8] sm:$0xff]   ;;  %v53_v18 = vperm.slane %v17_v0, 3  ;;  %v94_v20 = vunpack.c.l.bf16 %v112_v8 }
   0x4   :  { %v98_v6 = vunpack.c.l.bf16 %v97_v2  ;;  %v105_v7 = vld [vmem:[%s175_s2] sm:$0xff]   ;;  %v99_v15 = vunpack.c.h.bf16 %v97_v2  ;;  %v102_v24 = vunpack.c.l.bf16 %v113_v12  ;;  %v110_v27 = vunpack.c.l.bf16 %v114_v16 }
   0x5   :  { %v106_v10 = vunpack.c.l.bf16 %v105_v7  ;;  %v27_v13 = vmul.f32 %v90_v3, %v26_v4  ;;  %v107_v19 = vunpack.c.h.bf16 %v105_v7  ;;  %v28_v22 = vmul.f32 %v91_v14, %v26_v4 }
   0x6   :  { %v45_v17 = vmul.f32 %v98_v6, %v44_v9  ;;  %v46_v23 = vmul.f32 %v99_v15, %v44_v9  ;;  %v29_v26 = vmul.f32 %v94_v20, %v26_v4  ;;  %v95_v28 = vunpack.c.h.bf16 %v112_v8 }
   0x7   :  { %v32_v21 = vadd.f32 %v31_v5, %v27_v13  ;;  %v67_v25 = vmul.f32 %v106_v10, %v66_v11  ;;  %v33_v30 = vadd.f32 %v31_v5, %v28_v22  ;;  %v47_v31 = vmul.f32 %v102_v24, %v44_v9 }
   0x8   :  { %v103_v32 = vunpack.c.h.bf16 %v113_v12  ;;  %v75_v33 = vperm.slane %v17_v0, 5  ;;  %v34_v34 = vadd.f32 %v31_v5, %v29_v26  ;;  %v30_v35 = vmul.f32 %v95_v28, %v26_v4 }
   0x9   :  { %v49_v29 = vadd.f32 %v45_v17, %v32_v21  ;;  %v111_v36 = vunpack.c.h.bf16 %v114_v16  ;;  %v50_v38 = vadd.f32 %v46_v23, %v33_v30  ;;  %v68_v39 = vmul.f32 %v107_v19, %v66_v11 }
   0xa   :  { %v48_v40 = vmul.f32 %v103_v32, %v44_v9  ;;  %v51_v41 = vadd.f32 %v47_v31, %v34_v34  ;;  %v69_v42 = vmul.f32 %v110_v27, %v66_v11  ;;  %v35_v43 = vadd.f32 %v31_v5, %v30_v35 }
   0xb   :  { %v54_v37 = vadd.f32 %v53_v18, %v49_v29  ;;  %v55_v45 = vadd.f32 %v53_v18, %v50_v38  ;;  %v70_v48 = vmul.f32 %v111_v36, %v66_v11 }
   0xc   :  { %v56_v46 = vadd.f32 %v53_v18, %v51_v41  ;;  %v52_v47 = vadd.f32 %v48_v40, %v35_v43 }
   0xd   :  { %v71_v44 = vadd.f32 %v67_v25, %v54_v37  ;;  %v72_v50 = vadd.f32 %v68_v39, %v55_v45 }
   0xe   :  { %v73_v51 = vadd.f32 %v69_v42, %v56_v46  ;;  %v57_v52 = vadd.f32 %v53_v18, %v52_v47 }
   0xf   :  { %v76_v49 = vadd.f32 %v75_v33, %v71_v44  ;;  %v77_v53 = vadd.f32 %v75_v33, %v72_v50 }
  0x10   :  { %v78_v54 = vadd.f32 %v75_v33, %v73_v51  ;;  %v74_v55 = vadd.f32 %v70_v48, %v57_v52 }
  0x11   :  { %80 = vst [vmem:[%s177_s4] sm:$0xff] %v76_v49 }
  0x12   :  { %81 = vst [vmem:[%s177_s4 + $0x8] sm:$0xff] %v77_v53  ;;  %v79_v56 = vadd.f32 %v75_v33, %v74_v55 }
  0x13   :  { %82 = vst [vmem:[%s177_s4 + $0x10] sm:$0xff] %v78_v54 }
  0x14   :  { %83 = vst [vmem:[%s177_s4 + $0x18] sm:$0xff] %v79_v56 }

</bundles_post_ra>
